<compile_context>
chip_gen: v7x
topology: tpu7x:2x2x1
jax: 0.10.0
libtpu: 0.0.40
codegen_flags: <defaults>
</compile_context>

<pallas_src>
import math

import jax
import jax.numpy as jnp
from jax.experimental import pallas as pl
from jax.experimental.pallas import tpu as pltpu

H_DIM = 32            # model_config['h_dim']
N_HEADS = 8
D_HEAD = H_DIM // N_HEADS
VIEW2_DIM = 1024
C1_DIM = 2048
C2_DIM = 1024
OUT_DIM = 2
PAD_OUT = 128         # lane-padded output width (sliced to OUT_DIM outside the kernel)
BN_EPS = 1e-5


def _round_up(x, m):
    return ((x + m - 1) // m) * m


def _fusion_kernel(
    xv1_ref, xa_ref, xb_ref,
    wa1_ref, ba1_ref, wa2_ref, ba2_ref,
    wqkv_ref, bqkv_ref, wo_ref, bo_ref,
    hmbd_ref, hmtbd_ref,
    w1_ref, b1_ref, w2_ref, b2_ref, w3_ref, b3_ref,
    out_ref,
):
    f32 = jnp.float32
    bf16 = jnp.bfloat16
    H = H_DIM
    NH = N_HEADS

    # linear_adjust_view1 / linear_adjust_view2 (view-2 path: bf16 operands, f32 accumulation)
    h1 = jnp.dot(xv1_ref[...], wa1_ref[...], preferred_element_type=f32) + ba1_ref[...]
    hA = jnp.dot(xa_ref[...], wa2_ref[...], preferred_element_type=f32) + ba2_ref[...]
    hB = jnp.dot(xb_ref[...], wa2_ref[...], preferred_element_type=f32) + ba2_ref[...]
    tokens = (h1, hA, hB)                     # the 3 fused tokens, each (N, 32) f32

    # Packed Q|K|V projection: one (N,32)x(32,96) matmul per token (3 instead of 9).
    wqkv = wqkv_ref[...]
    bqkv = bqkv_ref[...]
    qkv = [jnp.dot(t, wqkv, preferred_element_type=f32) + bqkv for t in tokens]
    qs = [x[:, :H] for x in qkv]
    ks = [x[:, H:2 * H] for x in qkv]
    vs = [x[:, 2 * H:] for x in qkv]

    k_cat = jnp.concatenate(ks, axis=1)       # (N, 96)  [k0 | k1 | k2]
    v_cat = jnp.concatenate(vs, axis=1)       # (N, 96)  [v0 | v1 | v2]
    hm_bd = hmbd_ref[...]                     # (96, 24) block-diag head selector
    hmt_bd = hmtbd_ref[...]                   # (24, 96) its transpose
    wo = wo_ref[...]
    bo = bo_ref[...]
    inv_sqrt_dh = 1.0 / math.sqrt(D_HEAD)

    att = []
    for i in range(3):
        # per-head scores of query token i against all 3 key tokens in ONE matmul -> (N, 24)
        q_rep = jnp.concatenate([qs[i]] * 3, axis=1)                    # (N, 96)
        s = jnp.dot(q_rep * k_cat, hm_bd, preferred_element_type=f32) * inv_sqrt_dh
        s0, s1, s2 = s[:, :NH], s[:, NH:2 * NH], s[:, 2 * NH:]
        m = jnp.maximum(jnp.maximum(s0, s1), s2)
        e0, e1, e2 = jnp.exp(s0 - m), jnp.exp(s1 - m), jnp.exp(s2 - m)
        inv_den = pl.reciprocal(e0 + e1 + e2, approx=True)              # EUP slot
        a_cat = jnp.concatenate([e0 * inv_den, e1 * inv_den, e2 * inv_den], axis=1)  # (N, 24)
        # broadcast per-head weights to per-dim weights for all 3 value tokens in ONE matmul
        w_full = jnp.dot(a_cat, hmt_bd, preferred_element_type=f32)     # (N, 96)
        wv_ = w_full * v_cat
        ctx = wv_[:, :H] + wv_[:, H:2 * H] + wv_[:, 2 * H:]             # (N, 32)
        att.append(jnp.dot(ctx, wo, preferred_element_type=f32) + bo)   # output projection

    total = jnp.concatenate(att, axis=1)                                 # (N, 96) = total_1

    # classifier1 + folded BN1 + ReLU : single K=96 bf16 matmul (dropout = identity, eval)
    z = jnp.dot(total.astype(bf16), w1_ref[...], preferred_element_type=f32) + b1_ref[...]
    z = jnp.maximum(z, 0.0)
    # classifier2 + folded BN2 + ReLU
    z = jnp.dot(z.astype(bf16), w2_ref[...], preferred_element_type=f32) + b2_ref[...]
    z = jnp.maximum(z, 0.0)
    # classifier3, lane-padded to 128 output columns (sliced to 2 outside the kernel)
    out_ref[...] = jnp.dot(z.astype(bf16), w3_ref[...], preferred_element_type=f32) + b3_ref[...]


_WEIGHT_ORDER = [
    "wa1", "ba1", "wa2", "ba2",
    "wqkv", "bqkv", "wo", "bo",
    "hm_bd", "hmt_bd",
    "w1", "b1f", "w2", "b2f",
    "w3p", "b3p",
]


def synergy_fusion_forward(x_view1, xa, xb, params, *, tile_n=None):
    n = x_view1.shape[0]
    if tile_n is None:
        # <=512 rows/tile keeps VMEM usage far below v7x's 64 MiB; for n >= 1024 the
        # parallel grid has >=2 steps so both v7x TensorCores get work.
        tile_n = min(512, _round_up(n, 16))
    n_pad = _round_up(n, tile_n)

    def pad_rows(x):
        return x if x.shape[0] == n_pad else jnp.pad(x, ((0, n_pad - x.shape[0]), (0, 0)))

    x_view1 = pad_rows(x_view1.astype(jnp.float32))
    xa = pad_rows(xa).astype(jnp.bfloat16)   # halves the dominant (N,1024) input DMA
    xb = pad_rows(xb).astype(jnp.bfloat16)

    grid = (n_pad // tile_n,)

    def row_spec(d):
        return pl.BlockSpec((tile_n, d), lambda i: (i, 0))

    def full_spec(a):
        return pl.BlockSpec(a.shape, lambda i: (0, 0))

    weights = [params[k] for k in _WEIGHT_ORDER]
    in_specs = [row_spec(2 * H_DIM), row_spec(VIEW2_DIM), row_spec(VIEW2_DIM)]
    in_specs += [full_spec(w) for w in weights]
    out_spec = pl.BlockSpec((tile_n, PAD_OUT), lambda i: (i, 0))

    out = pl.pallas_call(
        _fusion_kernel,
        out_shape=jax.ShapeDtypeStruct((n_pad, PAD_OUT), jnp.float32),
        grid_spec=pltpu.PrefetchScalarGridSpec(
            num_scalar_prefetch=0,
            grid=grid,
            in_specs=in_specs,
            out_specs=out_spec,
        ),
        compiler_params=pltpu.CompilerParams(
            dimension_semantics=("parallel",),
            # 48 MiB fits every generation, including v7x's 64 MiB physical VMEM.
            vmem_limit_bytes=48 << 20,
        ),
    )(x_view1, xa, xb, *weights)
    return out[:n, :OUT_DIM]


def init_params(key):
    keys = iter(jax.random.split(key, 12))
    bf16 = jnp.bfloat16

    def lin(k, fan_in, fan_out):
        bound = 1.0 / math.sqrt(fan_in)
        kw, kb = jax.random.split(k)
        w = jax.random.uniform(kw, (fan_in, fan_out), jnp.float32, -bound, bound)
        b = jax.random.uniform(kb, (1, fan_out), jnp.float32, -bound, bound)
        return w, b

    p = {}
    p["wa1"], p["ba1"] = lin(next(keys), 2 * H_DIM, H_DIM)        # linear_adjust_view1
    wa2, ba2 = lin(next(keys), VIEW2_DIM, H_DIM)                  # linear_adjust_view2 (shared)
    p["wa2"], p["ba2"] = wa2.astype(bf16), ba2

    wq, bq = lin(next(keys), H_DIM, H_DIM)                        # attention projections
    wk, bk = lin(next(keys), H_DIM, H_DIM)
    wv, bv = lin(next(keys), H_DIM, H_DIM)
    p["wqkv"] = jnp.concatenate([wq, wk, wv], axis=1)             # (32, 96) packed Q|K|V
    p["bqkv"] = jnp.concatenate([bq, bk, bv], axis=1)             # (1, 96)
    p["wo"], p["bo"] = lin(next(keys), H_DIM, H_DIM)

    # BatchNorm1d eval: gamma=1, beta=0, running_mean=0, running_var=1 -> scale/shift,
    # folded directly into the classifier weights/biases (bit-identical affine folding).
    def bn(dim):
        gamma = jnp.ones((dim,), jnp.float32)
        beta = jnp.zeros((dim,), jnp.float32)
        mean = jnp.zeros((dim,), jnp.float32)
        var = jnp.ones((dim,), jnp.float32)
        scale = gamma / jnp.sqrt(var + BN_EPS)
        shift = beta - mean * scale
        return scale, shift

    w1, b1 = lin(next(keys), 3 * H_DIM, C1_DIM)                   # classifier1 (single K=96)
    s1, t1 = bn(C1_DIM)
    p["w1"] = (w1 * s1[None, :]).astype(bf16)
    p["b1f"] = b1 * s1[None, :] + t1[None, :]

    w2, b2 = lin(next(keys), C1_DIM, C2_DIM)                      # classifier2
    s2, t2 = bn(C2_DIM)
    p["w2"] = (w2 * s2[None, :]).astype(bf16)
    p["b2f"] = b2 * s2[None, :] + t2[None, :]

    w3, b3 = lin(next(keys), C2_DIM, OUT_DIM)                     # classifier3 (lane-padded)
    p["w3p"] = jnp.pad(w3, ((0, 0), (0, PAD_OUT - OUT_DIM))).astype(bf16)
    p["b3p"] = jnp.pad(b3, ((0, 0), (0, PAD_OUT - OUT_DIM)))

    # head selector: hm[d, h] = 1 if feature d belongs to head h (contiguous head split)
    d_idx = jnp.arange(H_DIM)[:, None] // D_HEAD
    h_idx = jnp.arange(N_HEADS)[None, :]
    hm = (d_idx == h_idx).astype(jnp.float32)                     # (32, 8)
    hm_bd = jnp.zeros((3 * H_DIM, 3 * N_HEADS), jnp.float32)      # block-diag over the 3 tokens
    for j in range(3):
        hm_bd = hm_bd.at[j * H_DIM:(j + 1) * H_DIM, j * N_HEADS:(j + 1) * N_HEADS].set(hm)
    p["hm_bd"] = hm_bd
    p["hmt_bd"] = hm_bd.T
    return p


def reference_forward(x_view1, xa, xb, p):
    """Pure-JAX reference (einsum multi-head attention), mirroring the kernel dtype policy."""
    f32 = jnp.float32
    bf16 = jnp.bfloat16
    n = x_view1.shape[0]

    h1 = jnp.dot(x_view1, p["wa1"], preferred_element_type=f32) + p["ba1"]
    hA = jnp.dot(xa.astype(bf16), p["wa2"], preferred_element_type=f32) + p["ba2"]
    hB = jnp.dot(xb.astype(bf16), p["wa2"], preferred_element_type=f32) + p["ba2"]
    x = jnp.stack([h1, hA, hB], axis=1)                           # (N, 3, 32)

    wqkv, bqkv = p["wqkv"], p["bqkv"]
    wq, wk, wv = wqkv[:, :H_DIM], wqkv[:, H_DIM:2 * H_DIM], wqkv[:, 2 * H_DIM:]
    bq, bk, bv = bqkv[:, :H_DIM], bqkv[:, H_DIM:2 * H_DIM], bqkv[:, 2 * H_DIM:]

    def proj(w, b):
        return (x.reshape(-1, H_DIM) @ w + b).reshape(n, 3, N_HEADS, D_HEAD)

    q, k, v = proj(wq, bq), proj(wk, bk), proj(wv, bv)
    s = jnp.einsum("nihd,njhd->nhij", q, k) / math.sqrt(D_HEAD)
    a = jax.nn.softmax(s, axis=-1)
    ctx = jnp.einsum("nhij,njhd->nihd", a, v).reshape(n, 3, H_DIM)
    attended = ctx.reshape(-1, H_DIM) @ p["wo"] + p["bo"]
    total = attended.reshape(n, 3 * H_DIM)

    z = jnp.maximum(jnp.dot(total.astype(bf16), p["w1"], preferred_element_type=f32) + p["b1f"], 0.0)
    z = jnp.maximum(jnp.dot(z.astype(bf16), p["w2"], preferred_element_type=f32) + p["b2f"], 0.0)
    out = jnp.dot(z.astype(bf16), p["w3p"], preferred_element_type=f32) + p["b3p"]
    return out[:, :OUT_DIM]


if __name__ == "__main__":
    N = 8  # number of (drugA, drugB, cell) triplets

    key = jax.random.PRNGKey(0)
    k_params, k1, k2, k3 = jax.random.split(key, 4)
    params = init_params(k_params)

    # Stand-ins for the outputs of the injected encoders:
    #   x_view1_raw ~ model_View1(triplets, cell[triplets[:,2]], edge_index)  -> (N, 2*h_dim)
    #   xa_raw      ~ model_View2_A(triplets[:, [0, 2]])                      -> (N, 1024)
    #   xb_raw      ~ model_View2_B(triplets[:, [1, 2]])                      -> (N, 1024)
    x_view1_raw = jax.random.normal(k1, (N, 2 * H_DIM), jnp.float32)
    xa_raw = jax.random.normal(k2, (N, VIEW2_DIM), jnp.float32)
    xb_raw = jax.random.normal(k3, (N, VIEW2_DIM), jnp.float32)

    out = synergy_fusion_forward(x_view1_raw, xa_raw, xb_raw, params)
    out = jax.block_until_ready(out)

    ref = reference_forward(x_view1_raw, xa_raw, xb_raw, params)
    assert out.shape == (N, OUT_DIM)
    max_err = float(jnp.max(jnp.abs(out - ref)))
    assert jnp.allclose(out, ref, atol=5e-3, rtol=5e-2), (
        f"Pallas kernel mismatch vs JAX reference (max abs err={max_err})")

    print("KERNEL_OK")
</pallas_src>

<mosaic_0001>
module attributes {stable_mosaic.version = 11 : i64} {
  func.func @_fusion_kernel(%arg0: i32, %arg1: memref<16x64xf32, #tpu.memory_space<vmem>>, %arg2: memref<16x1024xbf16, #tpu.memory_space<vmem>>, %arg3: memref<16x1024xbf16, #tpu.memory_space<vmem>>, %arg4: memref<64x32xf32, #tpu.memory_space<vmem>>, %arg5: memref<1x32xf32, #tpu.memory_space<vmem>>, %arg6: memref<1024x32xbf16, #tpu.memory_space<vmem>>, %arg7: memref<1x32xf32, #tpu.memory_space<vmem>>, %arg8: memref<32x96xf32, #tpu.memory_space<vmem>>, %arg9: memref<1x96xf32, #tpu.memory_space<vmem>>, %arg10: memref<32x32xf32, #tpu.memory_space<vmem>>, %arg11: memref<1x32xf32, #tpu.memory_space<vmem>>, %arg12: memref<96x24xf32, #tpu.memory_space<vmem>>, %arg13: memref<24x96xf32, #tpu.memory_space<vmem>>, %arg14: memref<96x2048xbf16, #tpu.memory_space<vmem>>, %arg15: memref<1x2048xf32, #tpu.memory_space<vmem>>, %arg16: memref<2048x1024xbf16, #tpu.memory_space<vmem>>, %arg17: memref<1x1024xf32, #tpu.memory_space<vmem>>, %arg18: memref<1024x128xbf16, #tpu.memory_space<vmem>>, %arg19: memref<1x128xf32, #tpu.memory_space<vmem>>, %arg20: memref<16x128xf32, #tpu.memory_space<vmem>>) attributes {dimension_semantics = [#tpu.dimension_semantics<parallel>], iteration_bounds = array<i64: 1>, scalar_prefetch = 0 : i64, scratch_operands = 0 : i64, tpu.core_type = #tpu.core_type<tc>, window_params = [{transform_indices = @transform_0, window_bounds = array<i64: 16, 64>}, {transform_indices = @transform_1, window_bounds = array<i64: 16, 1024>}, {transform_indices = @transform_2, window_bounds = array<i64: 16, 1024>}, {pipeline_mode = #tpu.pipeline_mode<synchronous>, transform_indices = @transform_3, window_bounds = array<i64: 64, 32>}, {pipeline_mode = #tpu.pipeline_mode<synchronous>, transform_indices = @transform_4, window_bounds = array<i64: 1, 32>}, {pipeline_mode = #tpu.pipeline_mode<synchronous>, transform_indices = @transform_5, window_bounds = array<i64: 1024, 32>}, {pipeline_mode = #tpu.pipeline_mode<synchronous>, transform_indices = @transform_6, window_bounds = array<i64: 1, 32>}, {pipeline_mode = #tpu.pipeline_mode<synchronous>, transform_indices = @transform_7, window_bounds = array<i64: 32, 96>}, {pipeline_mode = #tpu.pipeline_mode<synchronous>, transform_indices = @transform_8, window_bounds = array<i64: 1, 96>}, {pipeline_mode = #tpu.pipeline_mode<synchronous>, transform_indices = @transform_9, window_bounds = array<i64: 32, 32>}, {pipeline_mode = #tpu.pipeline_mode<synchronous>, transform_indices = @transform_10, window_bounds = array<i64: 1, 32>}, {pipeline_mode = #tpu.pipeline_mode<synchronous>, transform_indices = @transform_11, window_bounds = array<i64: 96, 24>}, {pipeline_mode = #tpu.pipeline_mode<synchronous>, transform_indices = @transform_12, window_bounds = array<i64: 24, 96>}, {pipeline_mode = #tpu.pipeline_mode<synchronous>, transform_indices = @transform_13, window_bounds = array<i64: 96, 2048>}, {pipeline_mode = #tpu.pipeline_mode<synchronous>, transform_indices = @transform_14, window_bounds = array<i64: 1, 2048>}, {pipeline_mode = #tpu.pipeline_mode<synchronous>, transform_indices = @transform_15, window_bounds = array<i64: 2048, 1024>}, {pipeline_mode = #tpu.pipeline_mode<synchronous>, transform_indices = @transform_16, window_bounds = array<i64: 1, 1024>}, {pipeline_mode = #tpu.pipeline_mode<synchronous>, transform_indices = @transform_17, window_bounds = array<i64: 1024, 128>}, {pipeline_mode = #tpu.pipeline_mode<synchronous>, transform_indices = @transform_18, window_bounds = array<i64: 1, 128>}, {transform_indices = @transform_19, window_bounds = array<i64: 16, 128>}]} {
    %c0 = arith.constant 0 : index
    %c0_0 = arith.constant 0 : index
    %0 = vector.load %arg1[%c0, %c0_0] : memref<16x64xf32, #tpu.memory_space<vmem>>, vector<16x64xf32>
    %c0_1 = arith.constant 0 : index
    %c0_2 = arith.constant 0 : index
    %1 = vector.load %arg4[%c0_1, %c0_2] : memref<64x32xf32, #tpu.memory_space<vmem>>, vector<64x32xf32>
    %cst = arith.constant dense<0.000000e+00> : vector<16x32xf32>
    %2 = tpu.matmul %0, %1, %cst {dimension_numbers = #tpu.dot_dimension_numbers<[1], [0], [0], [1], [0, 0, 1, 1], [], []>} : vector<16x64xf32>, vector<64x32xf32>, vector<16x32xf32> -> vector<16x32xf32>
    %c0_3 = arith.constant 0 : index
    %c0_4 = arith.constant 0 : index
    %3 = vector.load %arg5[%c0_3, %c0_4] : memref<1x32xf32, #tpu.memory_space<vmem>>, vector<1x32xf32>
    %4 = vector.broadcast %3 : vector<1x32xf32> to vector<16x32xf32>
    %5 = arith.addf %2, %4 : vector<16x32xf32>
    %c0_5 = arith.constant 0 : index
    %c0_6 = arith.constant 0 : index
    %6 = vector.load %arg2[%c0_5, %c0_6] : memref<16x1024xbf16, #tpu.memory_space<vmem>>, vector<16x1024xbf16>
    %c0_7 = arith.constant 0 : index
    %c0_8 = arith.constant 0 : index
    %7 = vector.load %arg6[%c0_7, %c0_8] : memref<1024x32xbf16, #tpu.memory_space<vmem>>, vector<1024x32xbf16>
    %cst_9 = arith.constant dense<0.000000e+00> : vector<16x32xf32>
    %8 = tpu.matmul %6, %7, %cst_9 {dimension_numbers = #tpu.dot_dimension_numbers<[1], [0], [0], [1], [0, 0, 1, 1], [], []>} : vector<16x1024xbf16>, vector<1024x32xbf16>, vector<16x32xf32> -> vector<16x32xf32>
    %c0_10 = arith.constant 0 : index
    %c0_11 = arith.constant 0 : index
    %9 = vector.load %arg7[%c0_10, %c0_11] : memref<1x32xf32, #tpu.memory_space<vmem>>, vector<1x32xf32>
    %10 = vector.broadcast %9 : vector<1x32xf32> to vector<16x32xf32>
    %11 = arith.addf %8, %10 : vector<16x32xf32>
    %c0_12 = arith.constant 0 : index
    %c0_13 = arith.constant 0 : index
    %12 = vector.load %arg3[%c0_12, %c0_13] : memref<16x1024xbf16, #tpu.memory_space<vmem>>, vector<16x1024xbf16>
    %c0_14 = arith.constant 0 : index
    %c0_15 = arith.constant 0 : index
    %13 = vector.load %arg6[%c0_14, %c0_15] : memref<1024x32xbf16, #tpu.memory_space<vmem>>, vector<1024x32xbf16>
    %cst_16 = arith.constant dense<0.000000e+00> : vector<16x32xf32>
    %14 = tpu.matmul %12, %13, %cst_16 {dimension_numbers = #tpu.dot_dimension_numbers<[1], [0], [0], [1], [0, 0, 1, 1], [], []>} : vector<16x1024xbf16>, vector<1024x32xbf16>, vector<16x32xf32> -> vector<16x32xf32>
    %c0_17 = arith.constant 0 : index
    %c0_18 = arith.constant 0 : index
    %15 = vector.load %arg7[%c0_17, %c0_18] : memref<1x32xf32, #tpu.memory_space<vmem>>, vector<1x32xf32>
    %16 = vector.broadcast %15 : vector<1x32xf32> to vector<16x32xf32>
    %17 = arith.addf %14, %16 : vector<16x32xf32>
    %c0_19 = arith.constant 0 : index
    %c0_20 = arith.constant 0 : index
    %18 = vector.load %arg8[%c0_19, %c0_20] : memref<32x96xf32, #tpu.memory_space<vmem>>, vector<32x96xf32>
    %c0_21 = arith.constant 0 : index
    %c0_22 = arith.constant 0 : index
    %19 = vector.load %arg9[%c0_21, %c0_22] : memref<1x96xf32, #tpu.memory_space<vmem>>, vector<1x96xf32>
    %cst_23 = arith.constant dense<0.000000e+00> : vector<16x96xf32>
    %20 = tpu.matmul %5, %18, %cst_23 {dimension_numbers = #tpu.dot_dimension_numbers<[1], [0], [0], [1], [0, 0, 1, 1], [], []>} : vector<16x32xf32>, vector<32x96xf32>, vector<16x96xf32> -> vector<16x96xf32>
    %21 = vector.broadcast %19 : vector<1x96xf32> to vector<16x96xf32>
    %22 = arith.addf %20, %21 : vector<16x96xf32>
    %cst_24 = arith.constant dense<0.000000e+00> : vector<16x96xf32>
    %23 = tpu.matmul %11, %18, %cst_24 {dimension_numbers = #tpu.dot_dimension_numbers<[1], [0], [0], [1], [0, 0, 1, 1], [], []>} : vector<16x32xf32>, vector<32x96xf32>, vector<16x96xf32> -> vector<16x96xf32>
    %24 = vector.broadcast %19 : vector<1x96xf32> to vector<16x96xf32>
    %25 = arith.addf %23, %24 : vector<16x96xf32>
    %cst_25 = arith.constant dense<0.000000e+00> : vector<16x96xf32>
    %26 = tpu.matmul %17, %18, %cst_25 {dimension_numbers = #tpu.dot_dimension_numbers<[1], [0], [0], [1], [0, 0, 1, 1], [], []>} : vector<16x32xf32>, vector<32x96xf32>, vector<16x96xf32> -> vector<16x96xf32>
    %27 = vector.broadcast %19 : vector<1x96xf32> to vector<16x96xf32>
    %28 = arith.addf %26, %27 : vector<16x96xf32>
    %29 = vector.extract_strided_slice %22 {offsets = [0, 0], sizes = [16, 32], strides = [1, 1]} : vector<16x96xf32> to vector<16x32xf32>
    %30 = vector.extract_strided_slice %25 {offsets = [0, 0], sizes = [16, 32], strides = [1, 1]} : vector<16x96xf32> to vector<16x32xf32>
    %31 = vector.extract_strided_slice %28 {offsets = [0, 0], sizes = [16, 32], strides = [1, 1]} : vector<16x96xf32> to vector<16x32xf32>
    %32 = vector.extract_strided_slice %22 {offsets = [0, 32], sizes = [16, 32], strides = [1, 1]} : vector<16x96xf32> to vector<16x32xf32>
    %33 = vector.extract_strided_slice %25 {offsets = [0, 32], sizes = [16, 32], strides = [1, 1]} : vector<16x96xf32> to vector<16x32xf32>
    %34 = vector.extract_strided_slice %28 {offsets = [0, 32], sizes = [16, 32], strides = [1, 1]} : vector<16x96xf32> to vector<16x32xf32>
    %35 = vector.extract_strided_slice %22 {offsets = [0, 64], sizes = [16, 32], strides = [1, 1]} : vector<16x96xf32> to vector<16x32xf32>
    %36 = vector.extract_strided_slice %25 {offsets = [0, 64], sizes = [16, 32], strides = [1, 1]} : vector<16x96xf32> to vector<16x32xf32>
    %37 = vector.extract_strided_slice %28 {offsets = [0, 64], sizes = [16, 32], strides = [1, 1]} : vector<16x96xf32> to vector<16x32xf32>
    %38 = tpu.concatenate %32, %33, %34 in 1 : vector<16x32xf32>, vector<16x32xf32>, vector<16x32xf32> -> vector<16x96xf32>
    %39 = tpu.concatenate %35, %36, %37 in 1 : vector<16x32xf32>, vector<16x32xf32>, vector<16x32xf32> -> vector<16x96xf32>
    %c0_26 = arith.constant 0 : index
    %c0_27 = arith.constant 0 : index
    %40 = vector.load %arg12[%c0_26, %c0_27] : memref<96x24xf32, #tpu.memory_space<vmem>>, vector<96x24xf32>
    %c0_28 = arith.constant 0 : index
    %c0_29 = arith.constant 0 : index
    %41 = vector.load %arg13[%c0_28, %c0_29] : memref<24x96xf32, #tpu.memory_space<vmem>>, vector<24x96xf32>
    %c0_30 = arith.constant 0 : index
    %c0_31 = arith.constant 0 : index
    %42 = vector.load %arg10[%c0_30, %c0_31] : memref<32x32xf32, #tpu.memory_space<vmem>>, vector<32x32xf32>
    %c0_32 = arith.constant 0 : index
    %c0_33 = arith.constant 0 : index
    %43 = vector.load %arg11[%c0_32, %c0_33] : memref<1x32xf32, #tpu.memory_space<vmem>>, vector<1x32xf32>
    %44 = tpu.concatenate %29, %29, %29 in 1 : vector<16x32xf32>, vector<16x32xf32>, vector<16x32xf32> -> vector<16x96xf32>
    %45 = arith.mulf %44, %38 : vector<16x96xf32>
    %cst_34 = arith.constant dense<0.000000e+00> : vector<16x24xf32>
    %46 = tpu.matmul %45, %40, %cst_34 {dimension_numbers = #tpu.dot_dimension_numbers<[1], [0], [0], [1], [0, 0, 1, 1], [], []>} : vector<16x96xf32>, vector<96x24xf32>, vector<16x24xf32> -> vector<16x24xf32>
    %cst_35 = arith.constant 5.000000e-01 : f32
    %47 = vector.broadcast %cst_35 : f32 to vector<16x24xf32>
    %48 = arith.mulf %46, %47 : vector<16x24xf32>
    %49 = vector.extract_strided_slice %48 {offsets = [0, 0], sizes = [16, 8], strides = [1, 1]} : vector<16x24xf32> to vector<16x8xf32>
    %50 = vector.extract_strided_slice %48 {offsets = [0, 8], sizes = [16, 8], strides = [1, 1]} : vector<16x24xf32> to vector<16x8xf32>
    %51 = vector.extract_strided_slice %48 {offsets = [0, 16], sizes = [16, 8], strides = [1, 1]} : vector<16x24xf32> to vector<16x8xf32>
    %52 = arith.maximumf %49, %50 : vector<16x8xf32>
    %53 = arith.maximumf %52, %51 : vector<16x8xf32>
    %54 = arith.subf %49, %53 : vector<16x8xf32>
    %55 = math.exp %54 : vector<16x8xf32>
    %56 = arith.subf %50, %53 : vector<16x8xf32>
    %57 = math.exp %56 : vector<16x8xf32>
    %58 = arith.subf %51, %53 : vector<16x8xf32>
    %59 = math.exp %58 : vector<16x8xf32>
    %60 = arith.addf %55, %57 : vector<16x8xf32>
    %61 = arith.addf %60, %59 : vector<16x8xf32>
    %62 = tpu.reciprocal %61 {approx = true} : vector<16x8xf32> -> vector<16x8xf32>
    %63 = arith.mulf %55, %62 : vector<16x8xf32>
    %64 = arith.mulf %57, %62 : vector<16x8xf32>
    %65 = arith.mulf %59, %62 : vector<16x8xf32>
    %66 = tpu.concatenate %63, %64, %65 in 1 : vector<16x8xf32>, vector<16x8xf32>, vector<16x8xf32> -> vector<16x24xf32>
    %cst_36 = arith.constant dense<0.000000e+00> : vector<16x96xf32>
    %67 = tpu.matmul %66, %41, %cst_36 {dimension_numbers = #tpu.dot_dimension_numbers<[1], [0], [0], [1], [0, 0, 1, 1], [], []>} : vector<16x24xf32>, vector<24x96xf32>, vector<16x96xf32> -> vector<16x96xf32>
    %68 = arith.mulf %67, %39 : vector<16x96xf32>
    %69 = vector.extract_strided_slice %68 {offsets = [0, 0], sizes = [16, 32], strides = [1, 1]} : vector<16x96xf32> to vector<16x32xf32>
    %70 = vector.extract_strided_slice %68 {offsets = [0, 32], sizes = [16, 32], strides = [1, 1]} : vector<16x96xf32> to vector<16x32xf32>
    %71 = arith.addf %69, %70 : vector<16x32xf32>
    %72 = vector.extract_strided_slice %68 {offsets = [0, 64], sizes = [16, 32], strides = [1, 1]} : vector<16x96xf32> to vector<16x32xf32>
    %73 = arith.addf %71, %72 : vector<16x32xf32>
    %cst_37 = arith.constant dense<0.000000e+00> : vector<16x32xf32>
    %74 = tpu.matmul %73, %42, %cst_37 {dimension_numbers = #tpu.dot_dimension_numbers<[1], [0], [0], [1], [0, 0, 1, 1], [], []>} : vector<16x32xf32>, vector<32x32xf32>, vector<16x32xf32> -> vector<16x32xf32>
    %75 = vector.broadcast %43 : vector<1x32xf32> to vector<16x32xf32>
    %76 = arith.addf %74, %75 : vector<16x32xf32>
    %77 = tpu.concatenate %30, %30, %30 in 1 : vector<16x32xf32>, vector<16x32xf32>, vector<16x32xf32> -> vector<16x96xf32>
    %78 = arith.mulf %77, %38 : vector<16x96xf32>
    %cst_38 = arith.constant dense<0.000000e+00> : vector<16x24xf32>
    %79 = tpu.matmul %78, %40, %cst_38 {dimension_numbers = #tpu.dot_dimension_numbers<[1], [0], [0], [1], [0, 0, 1, 1], [], []>} : vector<16x96xf32>, vector<96x24xf32>, vector<16x24xf32> -> vector<16x24xf32>
    %cst_39 = arith.constant 5.000000e-01 : f32
    %80 = vector.broadcast %cst_39 : f32 to vector<16x24xf32>
    %81 = arith.mulf %79, %80 : vector<16x24xf32>
    %82 = vector.extract_strided_slice %81 {offsets = [0, 0], sizes = [16, 8], strides = [1, 1]} : vector<16x24xf32> to vector<16x8xf32>
    %83 = vector.extract_strided_slice %81 {offsets = [0, 8], sizes = [16, 8], strides = [1, 1]} : vector<16x24xf32> to vector<16x8xf32>
    %84 = vector.extract_strided_slice %81 {offsets = [0, 16], sizes = [16, 8], strides = [1, 1]} : vector<16x24xf32> to vector<16x8xf32>
    %85 = arith.maximumf %82, %83 : vector<16x8xf32>
    %86 = arith.maximumf %85, %84 : vector<16x8xf32>
    %87 = arith.subf %82, %86 : vector<16x8xf32>
    %88 = math.exp %87 : vector<16x8xf32>
    %89 = arith.subf %83, %86 : vector<16x8xf32>
    %90 = math.exp %89 : vector<16x8xf32>
    %91 = arith.subf %84, %86 : vector<16x8xf32>
    %92 = math.exp %91 : vector<16x8xf32>
    %93 = arith.addf %88, %90 : vector<16x8xf32>
    %94 = arith.addf %93, %92 : vector<16x8xf32>
    %95 = tpu.reciprocal %94 {approx = true} : vector<16x8xf32> -> vector<16x8xf32>
    %96 = arith.mulf %88, %95 : vector<16x8xf32>
    %97 = arith.mulf %90, %95 : vector<16x8xf32>
    %98 = arith.mulf %92, %95 : vector<16x8xf32>
    %99 = tpu.concatenate %96, %97, %98 in 1 : vector<16x8xf32>, vector<16x8xf32>, vector<16x8xf32> -> vector<16x24xf32>
    %cst_40 = arith.constant dense<0.000000e+00> : vector<16x96xf32>
    %100 = tpu.matmul %99, %41, %cst_40 {dimension_numbers = #tpu.dot_dimension_numbers<[1], [0], [0], [1], [0, 0, 1, 1], [], []>} : vector<16x24xf32>, vector<24x96xf32>, vector<16x96xf32> -> vector<16x96xf32>
    %101 = arith.mulf %100, %39 : vector<16x96xf32>
    %102 = vector.extract_strided_slice %101 {offsets = [0, 0], sizes = [16, 32], strides = [1, 1]} : vector<16x96xf32> to vector<16x32xf32>
    %103 = vector.extract_strided_slice %101 {offsets = [0, 32], sizes = [16, 32], strides = [1, 1]} : vector<16x96xf32> to vector<16x32xf32>
    %104 = arith.addf %102, %103 : vector<16x32xf32>
    %105 = vector.extract_strided_slice %101 {offsets = [0, 64], sizes = [16, 32], strides = [1, 1]} : vector<16x96xf32> to vector<16x32xf32>
    %106 = arith.addf %104, %105 : vector<16x32xf32>
    %cst_41 = arith.constant dense<0.000000e+00> : vector<16x32xf32>
    %107 = tpu.matmul %106, %42, %cst_41 {dimension_numbers = #tpu.dot_dimension_numbers<[1], [0], [0], [1], [0, 0, 1, 1], [], []>} : vector<16x32xf32>, vector<32x32xf32>, vector<16x32xf32> -> vector<16x32xf32>
    %108 = vector.broadcast %43 : vector<1x32xf32> to vector<16x32xf32>
    %109 = arith.addf %107, %108 : vector<16x32xf32>
    %110 = tpu.concatenate %31, %31, %31 in 1 : vector<16x32xf32>, vector<16x32xf32>, vector<16x32xf32> -> vector<16x96xf32>
    %111 = arith.mulf %110, %38 : vector<16x96xf32>
    %cst_42 = arith.constant dense<0.000000e+00> : vector<16x24xf32>
    %112 = tpu.matmul %111, %40, %cst_42 {dimension_numbers = #tpu.dot_dimension_numbers<[1], [0], [0], [1], [0, 0, 1, 1], [], []>} : vector<16x96xf32>, vector<96x24xf32>, vector<16x24xf32> -> vector<16x24xf32>
    %cst_43 = arith.constant 5.000000e-01 : f32
    %113 = vector.broadcast %cst_43 : f32 to vector<16x24xf32>
    %114 = arith.mulf %112, %113 : vector<16x24xf32>
    %115 = vector.extract_strided_slice %114 {offsets = [0, 0], sizes = [16, 8], strides = [1, 1]} : vector<16x24xf32> to vector<16x8xf32>
    %116 = vector.extract_strided_slice %114 {offsets = [0, 8], sizes = [16, 8], strides = [1, 1]} : vector<16x24xf32> to vector<16x8xf32>
    %117 = vector.extract_strided_slice %114 {offsets = [0, 16], sizes = [16, 8], strides = [1, 1]} : vector<16x24xf32> to vector<16x8xf32>
    %118 = arith.maximumf %115, %116 : vector<16x8xf32>
    %119 = arith.maximumf %118, %117 : vector<16x8xf32>
    %120 = arith.subf %115, %119 : vector<16x8xf32>
    %121 = math.exp %120 : vector<16x8xf32>
    %122 = arith.subf %116, %119 : vector<16x8xf32>
    %123 = math.exp %122 : vector<16x8xf32>
    %124 = arith.subf %117, %119 : vector<16x8xf32>
    %125 = math.exp %124 : vector<16x8xf32>
    %126 = arith.addf %121, %123 : vector<16x8xf32>
    %127 = arith.addf %126, %125 : vector<16x8xf32>
    %128 = tpu.reciprocal %127 {approx = true} : vector<16x8xf32> -> vector<16x8xf32>
    %129 = arith.mulf %121, %128 : vector<16x8xf32>
    %130 = arith.mulf %123, %128 : vector<16x8xf32>
    %131 = arith.mulf %125, %128 : vector<16x8xf32>
    %132 = tpu.concatenate %129, %130, %131 in 1 : vector<16x8xf32>, vector<16x8xf32>, vector<16x8xf32> -> vector<16x24xf32>
    %cst_44 = arith.constant dense<0.000000e+00> : vector<16x96xf32>
    %133 = tpu.matmul %132, %41, %cst_44 {dimension_numbers = #tpu.dot_dimension_numbers<[1], [0], [0], [1], [0, 0, 1, 1], [], []>} : vector<16x24xf32>, vector<24x96xf32>, vector<16x96xf32> -> vector<16x96xf32>
    %134 = arith.mulf %133, %39 : vector<16x96xf32>
    %135 = vector.extract_strided_slice %134 {offsets = [0, 0], sizes = [16, 32], strides = [1, 1]} : vector<16x96xf32> to vector<16x32xf32>
    %136 = vector.extract_strided_slice %134 {offsets = [0, 32], sizes = [16, 32], strides = [1, 1]} : vector<16x96xf32> to vector<16x32xf32>
    %137 = arith.addf %135, %136 : vector<16x32xf32>
    %138 = vector.extract_strided_slice %134 {offsets = [0, 64], sizes = [16, 32], strides = [1, 1]} : vector<16x96xf32> to vector<16x32xf32>
    %139 = arith.addf %137, %138 : vector<16x32xf32>
    %cst_45 = arith.constant dense<0.000000e+00> : vector<16x32xf32>
    %140 = tpu.matmul %139, %42, %cst_45 {dimension_numbers = #tpu.dot_dimension_numbers<[1], [0], [0], [1], [0, 0, 1, 1], [], []>} : vector<16x32xf32>, vector<32x32xf32>, vector<16x32xf32> -> vector<16x32xf32>
    %141 = vector.broadcast %43 : vector<1x32xf32> to vector<16x32xf32>
    %142 = arith.addf %140, %141 : vector<16x32xf32>
    %143 = tpu.concatenate %76, %109, %142 in 1 : vector<16x32xf32>, vector<16x32xf32>, vector<16x32xf32> -> vector<16x96xf32>
    %144 = arith.truncf %143 : vector<16x96xf32> to vector<16x96xbf16>
    %c0_46 = arith.constant 0 : index
    %c0_47 = arith.constant 0 : index
    %145 = vector.load %arg14[%c0_46, %c0_47] : memref<96x2048xbf16, #tpu.memory_space<vmem>>, vector<96x2048xbf16>
    %cst_48 = arith.constant dense<0.000000e+00> : vector<16x2048xf32>
    %146 = tpu.matmul %144, %145, %cst_48 {dimension_numbers = #tpu.dot_dimension_numbers<[1], [0], [0], [1], [0, 0, 1, 1], [], []>} : vector<16x96xbf16>, vector<96x2048xbf16>, vector<16x2048xf32> -> vector<16x2048xf32>
    %c0_49 = arith.constant 0 : index
    %c0_50 = arith.constant 0 : index
    %147 = vector.load %arg15[%c0_49, %c0_50] : memref<1x2048xf32, #tpu.memory_space<vmem>>, vector<1x2048xf32>
    %148 = vector.broadcast %147 : vector<1x2048xf32> to vector<16x2048xf32>
    %149 = arith.addf %146, %148 : vector<16x2048xf32>
    %cst_51 = arith.constant 0.000000e+00 : f32
    %150 = vector.broadcast %cst_51 : f32 to vector<16x2048xf32>
    %151 = arith.maximumf %149, %150 : vector<16x2048xf32>
    %152 = arith.truncf %151 : vector<16x2048xf32> to vector<16x2048xbf16>
    %c0_52 = arith.constant 0 : index
    %c0_53 = arith.constant 0 : index
    %153 = vector.load %arg16[%c0_52, %c0_53] : memref<2048x1024xbf16, #tpu.memory_space<vmem>>, vector<2048x1024xbf16>
    %cst_54 = arith.constant dense<0.000000e+00> : vector<16x1024xf32>
    %154 = tpu.matmul %152, %153, %cst_54 {dimension_numbers = #tpu.dot_dimension_numbers<[1], [0], [0], [1], [0, 0, 1, 1], [], []>} : vector<16x2048xbf16>, vector<2048x1024xbf16>, vector<16x1024xf32> -> vector<16x1024xf32>
    %c0_55 = arith.constant 0 : index
    %c0_56 = arith.constant 0 : index
    %155 = vector.load %arg17[%c0_55, %c0_56] : memref<1x1024xf32, #tpu.memory_space<vmem>>, vector<1x1024xf32>
    %156 = vector.broadcast %155 : vector<1x1024xf32> to vector<16x1024xf32>
    %157 = arith.addf %154, %156 : vector<16x1024xf32>
    %cst_57 = arith.constant 0.000000e+00 : f32
    %158 = vector.broadcast %cst_57 : f32 to vector<16x1024xf32>
    %159 = arith.maximumf %157, %158 : vector<16x1024xf32>
    %160 = arith.truncf %159 : vector<16x1024xf32> to vector<16x1024xbf16>
    %c0_58 = arith.constant 0 : index
    %c0_59 = arith.constant 0 : index
    %161 = vector.load %arg18[%c0_58, %c0_59] : memref<1024x128xbf16, #tpu.memory_space<vmem>>, vector<1024x128xbf16>
    %cst_60 = arith.constant dense<0.000000e+00> : vector<16x128xf32>
    %162 = tpu.matmul %160, %161, %cst_60 {dimension_numbers = #tpu.dot_dimension_numbers<[1], [0], [0], [1], [0, 0, 1, 1], [], []>} : vector<16x1024xbf16>, vector<1024x128xbf16>, vector<16x128xf32> -> vector<16x128xf32>
    %c0_61 = arith.constant 0 : index
    %c0_62 = arith.constant 0 : index
    %163 = vector.load %arg19[%c0_61, %c0_62] : memref<1x128xf32, #tpu.memory_space<vmem>>, vector<1x128xf32>
    %164 = vector.broadcast %163 : vector<1x128xf32> to vector<16x128xf32>
    %165 = arith.addf %162, %164 : vector<16x128xf32>
    %c0_63 = arith.constant 0 : index
    %c0_64 = arith.constant 0 : index
    %166 = vector.load %arg20[%c0_63, %c0_64] : memref<16x128xf32, #tpu.memory_space<vmem>>, vector<16x128xf32>
    tpu.vector_store %arg20[%c0_63, %c0_64], %165 {strides = array<i32>} : memref<16x128xf32, #tpu.memory_space<vmem>>, vector<16x128xf32>,
    return
  }
  func.func @transform_0(%arg0: i32) -> (i32, i32) {
    %c0_i32 = arith.constant 0 : i32
    %c0_i32_0 = arith.constant 0 : i32
    return %arg0, %c0_i32 : i32, i32
  }
  func.func @transform_1(%arg0: i32) -> (i32, i32) {
    %c0_i32 = arith.constant 0 : i32
    %c0_i32_0 = arith.constant 0 : i32
    return %arg0, %c0_i32 : i32, i32
  }
  func.func @transform_2(%arg0: i32) -> (i32, i32) {
    %c0_i32 = arith.constant 0 : i32
    %c0_i32_0 = arith.constant 0 : i32
    return %arg0, %c0_i32 : i32, i32
  }
  func.func @transform_3(%arg0: i32) -> (i32, i32) {
    %c0_i32 = arith.constant 0 : i32
    %c0_i32_0 = arith.constant 0 : i32
    %c0_i32_1 = arith.constant 0 : i32
    return %c0_i32, %c0_i32_0 : i32, i32
  }
  func.func @transform_4(%arg0: i32) -> (i32, i32) {
    %c0_i32 = arith.constant 0 : i32
    %c0_i32_0 = arith.constant 0 : i32
    %c0_i32_1 = arith.constant 0 : i32
    return %c0_i32, %c0_i32_0 : i32, i32
  }
  func.func @transform_5(%arg0: i32) -> (i32, i32) {
    %c0_i32 = arith.constant 0 : i32
    %c0_i32_0 = arith.constant 0 : i32
    %c0_i32_1 = arith.constant 0 : i32
    return %c0_i32, %c0_i32_0 : i32, i32
  }
  func.func @transform_6(%arg0: i32) -> (i32, i32) {
    %c0_i32 = arith.constant 0 : i32
    %c0_i32_0 = arith.constant 0 : i32
    %c0_i32_1 = arith.constant 0 : i32
    return %c0_i32, %c0_i32_0 : i32, i32
  }
  func.func @transform_7(%arg0: i32) -> (i32, i32) {
    %c0_i32 = arith.constant 0 : i32
    %c0_i32_0 = arith.constant 0 : i32
    %c0_i32_1 = arith.constant 0 : i32
    return %c0_i32, %c0_i32_0 : i32, i32
  }
  func.func @transform_8(%arg0: i32) -> (i32, i32) {
    %c0_i32 = arith.constant 0 : i32
    %c0_i32_0 = arith.constant 0 : i32
    %c0_i32_1 = arith.constant 0 : i32
    return %c0_i32, %c0_i32_0 : i32, i32
  }
  func.func @transform_9(%arg0: i32) -> (i32, i32) {
    %c0_i32 = arith.constant 0 : i32
    %c0_i32_0 = arith.constant 0 : i32
    %c0_i32_1 = arith.constant 0 : i32
    return %c0_i32, %c0_i32_0 : i32, i32
  }
  func.func @transform_10(%arg0: i32) -> (i32, i32) {
    %c0_i32 = arith.constant 0 : i32
    %c0_i32_0 = arith.constant 0 : i32
    %c0_i32_1 = arith.constant 0 : i32
    return %c0_i32, %c0_i32_0 : i32, i32
  }
  func.func @transform_11(%arg0: i32) -> (i32, i32) {
    %c0_i32 = arith.constant 0 : i32
    %c0_i32_0 = arith.constant 0 : i32
    %c0_i32_1 = arith.constant 0 : i32
    return %c0_i32, %c0_i32_0 : i32, i32
  }
  func.func @transform_12(%arg0: i32) -> (i32, i32) {
    %c0_i32 = arith.constant 0 : i32
    %c0_i32_0 = arith.constant 0 : i32
    %c0_i32_1 = arith.constant 0 : i32
    return %c0_i32, %c0_i32_0 : i32, i32
  }
  func.func @transform_13(%arg0: i32) -> (i32, i32) {
    %c0_i32 = arith.constant 0 : i32
    %c0_i32_0 = arith.constant 0 : i32
    %c0_i32_1 = arith.constant 0 : i32
    return %c0_i32, %c0_i32_0 : i32, i32
  }
  func.func @transform_14(%arg0: i32) -> (i32, i32) {
    %c0_i32 = arith.constant 0 : i32
    %c0_i32_0 = arith.constant 0 : i32
    %c0_i32_1 = arith.constant 0 : i32
    return %c0_i32, %c0_i32_0 : i32, i32
  }
  func.func @transform_15(%arg0: i32) -> (i32, i32) {
    %c0_i32 = arith.constant 0 : i32
    %c0_i32_0 = arith.constant 0 : i32
    %c0_i32_1 = arith.constant 0 : i32
    return %c0_i32, %c0_i32_0 : i32, i32
  }
  func.func @transform_16(%arg0: i32) -> (i32, i32) {
    %c0_i32 = arith.constant 0 : i32
    %c0_i32_0 = arith.constant 0 : i32
    %c0_i32_1 = arith.constant 0 : i32
    return %c0_i32, %c0_i32_0 : i32, i32
  }
  func.func @transform_17(%arg0: i32) -> (i32, i32) {
    %c0_i32 = arith.constant 0 : i32
    %c0_i32_0 = arith.constant 0 : i32
    %c0_i32_1 = arith.constant 0 : i32
    return %c0_i32, %c0_i32_0 : i32, i32
  }
  func.func @transform_18(%arg0: i32) -> (i32, i32) {
    %c0_i32 = arith.constant 0 : i32
    %c0_i32_0 = arith.constant 0 : i32
    %c0_i32_1 = arith.constant 0 : i32
    return %c0_i32, %c0_i32_0 : i32, i32
  }
  func.func @transform_19(%arg0: i32) -> (i32, i32) {
    %c0_i32 = arith.constant 0 : i32
    %c0_i32_0 = arith.constant 0 : i32
    return %arg0, %c0_i32 : i32, i32
  }
}

</mosaic_0001>

<bundles_post_ra>
// kernel: tpu_custom_call.1
= control target key start
LH: loop header
LB: loop body
LE: loop exit
PB: predicated region body
PF: predicated region fallthrough
CT: control target
= control target key end

     0   :  { %s16297_s0 = inlined_call_operand.hbm [shape: f32[16,64], index: 0, kind: input, shape index: {}]   ;;  %s16298_s1 = inlined_call_operand.hbm [shape: bf16[16,1024], index: 1, kind: input, shape index: {}]   ;;  %s16299_s2 = inlined_call_operand.hbm [shape: bf16[16,1024], index: 2, kind: input, shape index: {}]   ;;  %s16300_s3 = inlined_call_operand.vmem [shape: f32[64,32], index: 3, kind: input, shape index: {}]   ;;  %s16301_s4 = inlined_call_operand.hbm [shape: f32[1,32], index: 4, kind: input, shape index: {}]   ;;  %s16302_s5 = inlined_call_operand.vmem [shape: bf16[1024,32], index: 5, kind: input, shape index: {}]   ;;  %s16303_s6 = inlined_call_operand.hbm [shape: f32[1,32], index: 6, kind: input, shape index: {}]   ;;  %s16304_s7 = inlined_call_operand.hbm [shape: f32[32,96], index: 7, kind: input, shape index: {}]   ;;  %s16305_s8 = inlined_call_operand.hbm [shape: f32[1,96], index: 8, kind: input, shape index: {}]   ;;  %s16306_s9 = inlined_call_operand.hbm [shape: f32[32,32], index: 9, kind: input, shape index: {}]   ;;  %s16307_s10 = inlined_call_operand.hbm [shape: f32[1,32], index: 10, kind: input, shape index: {}]   ;;  %s16308_s11 = inlined_call_operand.vmem [shape: f32[96,24], index: 11, kind: input, shape index: {}]   ;;  %s16309_s12 = inlined_call_operand.hbm [shape: f32[24,96], index: 12, kind: input, shape index: {}]   ;;  %s16310_s13 = inlined_call_operand.hbm [shape: bf16[96,2048], index: 13, kind: input, shape index: {}]   ;;  %s16311_s14 = inlined_call_operand.hbm [shape: f32[1,2048], index: 14, kind: input, shape index: {}]   ;;  %s16312_s15 = inlined_call_operand.hbm [shape: bf16[2048,1024], index: 15, kind: input, shape index: {}]   ;;  %s16313_s16 = inlined_call_operand.hbm [shape: f32[1,1024], index: 16, kind: input, shape index: {}]   ;;  %s16314_s17 = inlined_call_operand.hbm [shape: bf16[1024,128], index: 17, kind: input, shape index: {}]   ;;  %s16315_s18 = inlined_call_operand.hbm [shape: f32[1,128], index: 18, kind: input, shape index: {}]   ;;  %s16316_s19 = inlined_call_operand.hbm [shape: f32[16,128], index: 19, kind: output, shape index: {}]  }
   0x1   :  { %16326 = sst [smem:[#allocation43_spill]] %s16297_s0 }
   0x2   :  { %16327 = sst [smem:[#allocation44_spill]] %s16298_s1 }
   0x3   :  { %16328 = sst [smem:[#allocation45_spill]] %s16299_s2 }
   0x4   :  { %16329 = sst [smem:[#allocation46_spill]] %s16300_s3 }
   0x5   :  { %16330 = sst [smem:[#allocation47_spill]] %s16316_s19 }
   0x6   :  { %24 = vsyncpa [#allocation3], 0 }
   0x7   :  { %25 = vsyncpa [#allocation6], 0 }
   0x8   :  { %26 = vsyncpa [#allocation9], 0 }
   0x9   :  { %27 = vsyncpa [#allocation12], 0 }
   0xa   :  { %28 = vsyncpa [#allocation15], 0 }
   0xb   :  { %29 = vsyncpa [#allocation18], 0 }
   0xc   :  { %30 = vsyncpa [#allocation21], 0 }
   0xd   :  { %31 = vsyncpa [#allocation24], 0 }
   0xe   :  { %32 = vsyncpa [#allocation27], 0 }
   0xf   :  { %33 = vsyncpa [#allocation4], 0  ;;  %s14878_s0 = smov [#allocation5]   ;;  %s16331_s1 = sld [smem:[#allocation44_spill]] }
  0x10   :  { %s51_s30 = sshll.u32 %s14878_s0, 4  ;;  %s52_s30 = int_to_ptr.vmem [resolvable:$true] %s51_s30 }
  0x15   :  { %s14484_s22 = scalar_lea.hbm %s16331_s1, 1024 }
  0x16   :  { %p14485_p0 = scmp.ne.s32.totalorder %s16331_s1, %s14484_s22  ;;  %p14488_p1 = scmp.lt.u32.totalorder %s14484_s22, %s16331_s1 }
  0x18   :  { %p14490_p2 = pnand %p14488_p1, %p14485_p0 }
  0x1a   :  { %14493 = shalt.err (!%p14490_p2)
}
  0x1b   :  { %s14494_s3 = scalar_lea.vmem %s52_s30, 1024  ;;  %p14499_p4 = scmp.lt.s32.totalorder %s52_s30, %s52_s30 }
  0x1c   :  { %p14495_p3 = scmp.ne.s32.totalorder %s52_s30, %s14494_s3  ;;  %p14500_p5 = scmp.lt.s32.totalorder %s14494_s3, %s14494_s3 }
  0x1e   :  { %p14501_p6 = por %p14500_p5, %p14499_p4 }
  0x20   :  { %p14502_p7 = pnand %p14501_p6, %p14495_p3 }
  0x22   :  { %14505 = shalt.err (!%p14502_p7)
}
  0x23   :  { %s14879_s26 = smov 512   ;;  %s14880_s27 = smov 32  }
  0x24   :  { %57 = dma.hbm_to_vmem [thread:$0]  %s16331_s1, 1024, %s52_s30, [#allocation6], %s14879_s26, %s14879_s26, %s14880_s27  }
  0x25   :  { %s14881_s0 = smov [#allocation8]   ;;  %s14506_s2 = scalar_lea.hbm %s16301_s4, 16 }
  0x26   :  { %s78_s20 = sshll.u32 %s14881_s0, 4  ;;  %p14507_p8 = scmp.ne.s32.totalorder %s16301_s4, %s14506_s2  ;;  %s79_s20 = int_to_ptr.vmem [resolvable:$true] %s78_s20 }
  0x27   :  { %p14510_p9 = scmp.lt.u32.totalorder %s14506_s2, %s16301_s4 }
  0x29   :  { %p14512_p10 = pnand %p14510_p9, %p14507_p8 }
  0x2b   :  { %14515 = shalt.err (!%p14512_p10)
}
  0x2c   :  { %s14516_s19 = scalar_lea.vmem %s79_s20, 16  ;;  %s14520_s30 = scalar_lea.vmem %s79_s20, 32 }
  0x2d   :  { %p14517_p11 = scmp.ne.s32.totalorder %s79_s20, %s14516_s19  ;;  %p14521_p12 = scmp.lt.s32.totalorder %s79_s20, %s79_s20 }
  0x2e   :  { %p14522_p13 = scmp.lt.s32.totalorder %s14520_s30, %s14516_s19 }
  0x30   :  { %p14523_p0 = por %p14522_p13, %p14521_p12 }
  0x32   :  { %p14524_p1 = pnand %p14523_p0, %p14517_p11 }
  0x34   :  { %14527 = shalt.err (!%p14524_p1)
}
  0x35   :  { %81 = dma.hbm_to_vmem [thread:$0]  %s16301_s4, 16, %s79_s20, [#allocation9]  }
  0x36   :  { %s14882_s29 = smov [#allocation11]   ;;  %s14883_s21 = smov [#allocation14]  }
  0x37   :  { %s99_s0 = sshll.u32 %s14882_s29, 4  ;;  %s121_s22 = sshll.u32 %s14883_s21, 4  ;;  %s100_s0 = int_to_ptr.vmem [resolvable:$true] %s99_s0  ;;  %s15034_s22 = int_to_ptr.vmem [resolvable:$true] %s121_s22 }
  0x38   :  { %s14528_s24 = scalar_lea.hbm %s16304_s7, 512 }
  0x39   :  { %p14529_p2 = scmp.ne.s32.totalorder %s16304_s7, %s14528_s24  ;;  %p14532_p3 = scmp.lt.u32.totalorder %s14528_s24, %s16304_s7 }
  0x3b   :  { %p14534_p4 = pnand %p14532_p3, %p14529_p2 }
  0x3d   :  { %14537 = shalt.err (!%p14534_p4)
}
  0x3e   :  { %s14538_s4 = scalar_lea.vmem %s100_s0, 512  ;;  %p14543_p6 = scmp.lt.s32.totalorder %s100_s0, %s100_s0 }
  0x3f   :  { %p14539_p5 = scmp.ne.s32.totalorder %s100_s0, %s14538_s4  ;;  %p14544_p7 = scmp.lt.s32.totalorder %s14538_s4, %s14538_s4 }
  0x41   :  { %p14545_p8 = por %p14544_p7, %p14543_p6 }
  0x43   :  { %p14546_p9 = pnand %p14545_p8, %p14539_p5 }
  0x45   :  { %14549 = shalt.err (!%p14546_p9)
}
  0x46   :  { %s14884_s20 = smov 128   ;;  %s14885_s1 = smov 8  }
  0x47   :  { %105 = dma.hbm_to_vmem [thread:$0]  %s16304_s7, 512, %s100_s0, [#allocation12], %s14884_s20, %s14884_s20, %s14885_s1  }
  0x48   :  { %s14550_s23 = scalar_lea.hbm %s16306_s9, 512 }
  0x49   :  { %p14551_p10 = scmp.ne.s32.totalorder %s16306_s9, %s14550_s23  ;;  %p14554_p11 = scmp.lt.u32.totalorder %s14550_s23, %s16306_s9 }
  0x4b   :  { %p14556_p12 = pnand %p14554_p11, %p14551_p10 }
  0x4d   :  { %14559 = shalt.err (!%p14556_p12)
}
  0x4e   :  { %s14560_s30 = scalar_lea.vmem %s15034_s22, 512  ;;  %p14565_p0 = scmp.lt.s32.totalorder %s15034_s22, %s15034_s22 }
  0x4f   :  { %p14561_p13 = scmp.ne.s32.totalorder %s15034_s22, %s14560_s30  ;;  %p14566_p1 = scmp.lt.s32.totalorder %s14560_s30, %s14560_s30 }
  0x51   :  { %p14567_p2 = por %p14566_p1, %p14565_p0 }
  0x53   :  { %p14568_p3 = pnand %p14567_p2, %p14561_p13 }
  0x55   :  { %14571 = shalt.err (!%p14568_p3)
}
  0x56   :  { %127 = dma.hbm_to_vmem [thread:$0]  %s16306_s9, 512, %s15034_s22, [#allocation15], %s14884_s20, %s14884_s20, %s14885_s1  }
  0x57   :  { %s14886_s4 = smov [#allocation17]   ;;  %s14887_s29 = smov [#allocation20]  }
  0x58   :  { %s145_s28 = sshll.u32 %s14886_s4, 4  ;;  %s170_s21 = sshll.u32 %s14887_s29, 4  ;;  %s146_s28 = int_to_ptr.vmem [resolvable:$true] %s145_s28  ;;  %s171_s21 = int_to_ptr.vmem [resolvable:$true] %s170_s21 }
  0x59   :  { %s14572_s24 = scalar_lea.hbm %s16309_s12, 384 }
  0x5a   :  { %p14573_p4 = scmp.ne.s32.totalorder %s16309_s12, %s14572_s24  ;;  %p14576_p5 = scmp.lt.u32.totalorder %s14572_s24, %s16309_s12 }
  0x5c   :  { %p14578_p6 = pnand %p14576_p5, %p14573_p4 }
  0x5e   :  { %14581 = shalt.err (!%p14578_p6)
}
  0x5f   :  { %s14582_s9 = scalar_lea.vmem %s146_s28, 384  ;;  %p14587_p8 = scmp.lt.s32.totalorder %s146_s28, %s146_s28 }
  0x60   :  { %p14583_p7 = scmp.ne.s32.totalorder %s146_s28, %s14582_s9  ;;  %p14588_p9 = scmp.lt.s32.totalorder %s14582_s9, %s14582_s9 }
  0x62   :  { %p14589_p10 = por %p14588_p9, %p14587_p8 }
  0x64   :  { %p14590_p11 = pnand %p14589_p10, %p14583_p7 }
  0x66   :  { %14593 = shalt.err (!%p14590_p11)
}
  0x67   :  { %151 = dma.hbm_to_vmem [thread:$0]  %s16309_s12, 384, %s146_s28, [#allocation18], %s14884_s20, %s14884_s20, %s14885_s1  }
  0x68   :  { %s14594_s29 = scalar_lea.hbm %s16311_s14, 256 }
  0x69   :  { %p14595_p12 = scmp.ne.s32.totalorder %s16311_s14, %s14594_s29  ;;  %p14598_p13 = scmp.lt.u32.totalorder %s14594_s29, %s16311_s14 }
  0x6b   :  { %p14600_p0 = pnand %p14598_p13, %p14595_p12 }
  0x6d   :  { %14603 = shalt.err (!%p14600_p0)
}
  0x6e   :  { %s14604_s19 = scalar_lea.vmem %s171_s21, 256  ;;  %p14609_p2 = scmp.lt.s32.totalorder %s171_s21, %s171_s21 }
  0x6f   :  { %p14605_p1 = scmp.ne.s32.totalorder %s171_s21, %s14604_s19  ;;  %p14610_p3 = scmp.lt.s32.totalorder %s14604_s19, %s14604_s19 }
  0x71   :  { %p14611_p4 = por %p14610_p3, %p14609_p2 }
  0x73   :  { %p14612_p5 = pnand %p14611_p4, %p14605_p1 }
  0x75   :  { %14615 = shalt.err (!%p14612_p5)
}
  0x76   :  { %173 = dma.hbm_to_vmem [thread:$0]  %s16311_s14, 256, %s171_s21, [#allocation21]  }
  0x77   :  { %s14888_s3 = smov [#allocation23]   ;;  %s14889_s9 = smov [#allocation2]  }
  0x78   :  { %s192_s30 = sshll.u32 %s14888_s3, 4  ;;  %s39_s22 = sshll.u32 %s14889_s9, 4  ;;  %s193_s30 = int_to_ptr.vmem [resolvable:$true] %s192_s30  ;;  %s15098_s22 = int_to_ptr.vmem [resolvable:$true] %s39_s22 }
  0x79   :  { %s14616_s4 = scalar_lea.hbm %s16313_s16, 128 }
  0x7a   :  { %p14617_p6 = scmp.ne.s32.totalorder %s16313_s16, %s14616_s4  ;;  %p14620_p7 = scmp.lt.u32.totalorder %s14616_s4, %s16313_s16 }
  0x7c   :  { %p14622_p8 = pnand %p14620_p7, %p14617_p6 }
  0x7e   :  { %14625 = shalt.err (!%p14622_p8)
}
  0x7f   :  { %s14626_s14 = scalar_lea.vmem %s193_s30, 128  ;;  %p14631_p10 = scmp.lt.s32.totalorder %s193_s30, %s193_s30 }
  0x80   :  { %p14627_p9 = scmp.ne.s32.totalorder %s193_s30, %s14626_s14  ;;  %p14632_p11 = scmp.lt.s32.totalorder %s14626_s14, %s14626_s14 }
  0x82   :  { %p14633_p12 = por %p14632_p11, %p14631_p10 }
  0x84   :  { %p14634_p13 = pnand %p14633_p12, %p14627_p9 }
  0x86   :  { %14637 = shalt.err (!%p14634_p13)
}
  0x87   :  { %195 = dma.hbm_to_vmem [thread:$0]  %s16313_s16, 128, %s193_s30, [#allocation24]  }
  0x88   :  { %s16332_s28 = sld [smem:[#allocation43_spill]] }
  0x8e   :  { %s14638_s3 = scalar_lea.hbm %s16332_s28, 256 }
  0x8f   :  { %p14639_p0 = scmp.ne.s32.totalorder %s16332_s28, %s14638_s3  ;;  %p14642_p1 = scmp.lt.u32.totalorder %s14638_s3, %s16332_s28 }
  0x91   :  { %p14644_p2 = pnand %p14642_p1, %p14639_p0 }
  0x93   :  { %14647 = shalt.err (!%p14644_p2)
}
  0x94   :  { %s14648_s29 = scalar_lea.vmem %s15098_s22, 256  ;;  %p14653_p4 = scmp.lt.s32.totalorder %s15098_s22, %s15098_s22 }
  0x95   :  { %p14649_p3 = scmp.ne.s32.totalorder %s15098_s22, %s14648_s29  ;;  %p14654_p5 = scmp.lt.s32.totalorder %s14648_s29, %s14648_s29 }
  0x97   :  { %p14655_p6 = por %p14654_p5, %p14653_p4 }
  0x99   :  { %p14656_p7 = pnand %p14655_p6, %p14649_p3 }
  0x9b   :  { %14659 = shalt.err (!%p14656_p7)
}
  0x9c   :  { %45 = dma.hbm_to_vmem [thread:$0]  %s16332_s28, 256, %s15098_s22, [#allocation3], %s14884_s20, %s14884_s20, %s14885_s1  }
  0x9d   :  { %s14890_s2 = smov [#allocation7]   ;;  %s14891_s24 = smov [#allocation10]  }
  0x9e   :  { %s63_s23 = sshll.u32 %s14890_s2, 4  ;;  %s90_s14 = sshll.u32 %s14891_s24, 4  ;;  %s64_s23 = int_to_ptr.vmem [resolvable:$true] %s63_s23  ;;  %s91_s14 = int_to_ptr.vmem [resolvable:$true] %s90_s14 }
  0x9f   :  { %s16333_s19 = sld [smem:[#allocation45_spill]] }
  0xa5   :  { %s14660_s12 = scalar_lea.hbm %s16333_s19, 1024 }
  0xa6   :  { %p14661_p8 = scmp.ne.s32.totalorder %s16333_s19, %s14660_s12  ;;  %p14664_p9 = scmp.lt.u32.totalorder %s14660_s12, %s16333_s19 }
  0xa8   :  { %p14666_p10 = pnand %p14664_p9, %p14661_p8 }
  0xaa   :  { %14669 = shalt.err (!%p14666_p10)
}
  0xab   :  { %s14670_s22 = scalar_lea.vmem %s64_s23, 1024  ;;  %p14675_p12 = scmp.lt.s32.totalorder %s64_s23, %s64_s23 }
  0xac   :  { %p14671_p11 = scmp.ne.s32.totalorder %s64_s23, %s14670_s22  ;;  %p14676_p13 = scmp.lt.s32.totalorder %s14670_s22, %s14670_s22 }
  0xae   :  { %p14677_p0 = por %p14676_p13, %p14675_p12 }
  0xb0   :  { %p14678_p1 = pnand %p14677_p0, %p14671_p11 }
  0xb2   :  { %14681 = shalt.err (!%p14678_p1)
}
  0xb3   :  { %69 = dma.hbm_to_vmem [thread:$0]  %s16333_s19, 1024, %s64_s23, [#allocation6], %s14879_s26, %s14879_s26, %s14880_s27  }
  0xb4   :  { %s14682_s30 = scalar_lea.hbm %s16303_s6, 16 }
  0xb5   :  { %p14683_p2 = scmp.ne.s32.totalorder %s16303_s6, %s14682_s30  ;;  %p14686_p3 = scmp.lt.u32.totalorder %s14682_s30, %s16303_s6 }
  0xb7   :  { %p14688_p4 = pnand %p14686_p3, %p14683_p2 }
  0xb9   :  { %14691 = shalt.err (!%p14688_p4)
}
  0xba   :  { %s14692_s12 = scalar_lea.vmem %s91_s14, 16  ;;  %s14696_s3 = scalar_lea.vmem %s91_s14, 32 }
  0xbb   :  { %p14693_p5 = scmp.ne.s32.totalorder %s91_s14, %s14692_s12  ;;  %p14697_p6 = scmp.lt.s32.totalorder %s91_s14, %s91_s14 }
  0xbc   :  { %p14698_p7 = scmp.lt.s32.totalorder %s14696_s3, %s14692_s12 }
  0xbe   :  { %p14699_p8 = por %p14698_p7, %p14697_p6 }
  0xc0   :  { %p14700_p9 = pnand %p14699_p8, %p14693_p5 }
  0xc2   :  { %14703 = shalt.err (!%p14700_p9)
}
  0xc3   :  { %93 = dma.hbm_to_vmem [thread:$0]  %s16303_s6, 16, %s91_s14, [#allocation9]  }
  0xc4   :  { %s14892_s9 = smov [#allocation13]   ;;  %s14893_s0 = smov [#allocation16]  }
  0xc5   :  { %s112_s7 = sshll.u32 %s14892_s9, 4  ;;  %s134_s22 = sshll.u32 %s14893_s0, 4  ;;  %s113_s7 = int_to_ptr.vmem [resolvable:$true] %s112_s7  ;;  %s135_s22 = int_to_ptr.vmem [resolvable:$true] %s134_s22 }
  0xc6   :  { %s14704_s29 = scalar_lea.hbm %s16305_s8, 16 }
  0xc7   :  { %p14705_p10 = scmp.ne.s32.totalorder %s16305_s8, %s14704_s29  ;;  %p14708_p11 = scmp.lt.u32.totalorder %s14704_s29, %s16305_s8 }
  0xc9   :  { %p14710_p12 = pnand %p14708_p11, %p14705_p10 }
  0xcb   :  { %14713 = shalt.err (!%p14710_p12)
}
  0xcc   :  { %s14714_s6 = scalar_lea.vmem %s113_s7, 16  ;;  %s14718_s14 = scalar_lea.vmem %s113_s7, 32 }
  0xcd   :  { %p14715_p13 = scmp.ne.s32.totalorder %s113_s7, %s14714_s6  ;;  %p14719_p0 = scmp.lt.s32.totalorder %s113_s7, %s113_s7 }
  0xce   :  { %p14720_p1 = scmp.lt.s32.totalorder %s14718_s14, %s14714_s6 }
  0xd0   :  { %p14721_p2 = por %p14720_p1, %p14719_p0 }
  0xd2   :  { %p14722_p3 = pnand %p14721_p2, %p14715_p13 }
  0xd4   :  { %14725 = shalt.err (!%p14722_p3)
}
  0xd5   :  { %115 = dma.hbm_to_vmem [thread:$0]  %s16305_s8, 16, %s113_s7, [#allocation12]  }
  0xd6   :  { %s14726_s23 = scalar_lea.hbm %s16307_s10, 16 }
  0xd7   :  { %p14727_p4 = scmp.ne.s32.totalorder %s16307_s10, %s14726_s23  ;;  %p14730_p5 = scmp.lt.u32.totalorder %s14726_s23, %s16307_s10 }
  0xd9   :  { %p14732_p6 = pnand %p14730_p5, %p14727_p4 }
  0xdb   :  { %14735 = shalt.err (!%p14732_p6)
}
  0xdc   :  { %s14736_s4 = scalar_lea.vmem %s135_s22, 16  ;;  %s14740_s29 = scalar_lea.vmem %s135_s22, 32 }
  0xdd   :  { %p14737_p7 = scmp.ne.s32.totalorder %s135_s22, %s14736_s4  ;;  %p14741_p8 = scmp.lt.s32.totalorder %s135_s22, %s135_s22 }
  0xde   :  { %p14742_p9 = scmp.lt.s32.totalorder %s14740_s29, %s14736_s4 }
  0xe0   :  { %p14743_p10 = por %p14742_p9, %p14741_p8 }
  0xe2   :  { %p14744_p11 = pnand %p14743_p10, %p14737_p7 }
  0xe4   :  { %14747 = shalt.err (!%p14744_p11)
}
  0xe5   :  { %137 = dma.hbm_to_vmem [thread:$0]  %s16307_s10, 16, %s135_s22, [#allocation15]  }
  0xe6   :  { %s14894_s16 = smov [#allocation19]   ;;  %s14748_s6 = scalar_lea.hbm %s16310_s13, 12288 }
  0xe7   :  { %s157_s30 = sshll.u32 %s14894_s16, 4  ;;  %p14749_p12 = scmp.ne.s32.totalorder %s16310_s13, %s14748_s6  ;;  %s158_s30 = int_to_ptr.vmem [resolvable:$true] %s157_s30 }
  0xe8   :  { %p14752_p13 = scmp.lt.u32.totalorder %s14748_s6, %s16310_s13 }
  0xea   :  { %p14754_p0 = pnand %p14752_p13, %p14749_p12 }
  0xec   :  { %14757 = shalt.err (!%p14754_p0)
}
  0xed   :  { %s14758_s3 = scalar_lea.vmem %s158_s30, 12288  ;;  %p14763_p2 = scmp.lt.s32.totalorder %s158_s30, %s158_s30 }
  0xee   :  { %p14759_p1 = scmp.ne.s32.totalorder %s158_s30, %s14758_s3  ;;  %p14764_p3 = scmp.lt.s32.totalorder %s14758_s3, %s14758_s3 }
  0xf0   :  { %p14765_p4 = por %p14764_p3, %p14763_p2 }
  0xf2   :  { %p14766_p5 = pnand %p14765_p4, %p14759_p1 }
  0xf4   :  { %14769 = shalt.err (!%p14766_p5)
}
  0xf5   :  { %s14895_s10 = smov 1024   ;;  %s14896_s22 = smov 64  }
  0xf6   :  { %163 = dma.hbm_to_vmem [thread:$0]  %s16310_s13, 12288, %s158_s30, [#allocation18], %s14895_s10, %s14895_s10, %s14896_s22  }
  0xf7   :  { %s14897_s9 = smov [#allocation22]   ;;  %s14898_s28 = smov [#allocation25]  }
  0xf8   :  { %s179_s0 = sshll.u32 %s14897_s9, 4  ;;  %s201_s4 = sshll.u32 %s14898_s28, 4  ;;  %s180_s0 = int_to_ptr.vmem [resolvable:$true] %s179_s0  ;;  %s202_s4 = int_to_ptr.vmem [resolvable:$true] %s201_s4 }
  0xf9   :  { %s14770_s7 = scalar_lea.hbm %s16312_s15, 131072 }
  0xfa   :  { %p14771_p6 = scmp.ne.s32.totalorder %s16312_s15, %s14770_s7  ;;  %p14774_p7 = scmp.lt.u32.totalorder %s14770_s7, %s16312_s15 }
  0xfc   :  { %p14776_p8 = pnand %p14774_p7, %p14771_p6 }
  0xfe   :  { %14779 = shalt.err (!%p14776_p8)
}
  0xff   :  { %s14780_s13 = scalar_lea.vmem %s180_s0, 131072  ;;  %p14785_p10 = scmp.lt.s32.totalorder %s180_s0, %s180_s0 }
 0x100   :  { %p14781_p9 = scmp.ne.s32.totalorder %s180_s0, %s14780_s13  ;;  %p14786_p11 = scmp.lt.s32.totalorder %s14780_s13, %s14780_s13 }
 0x102   :  { %p14787_p12 = por %p14786_p11, %p14785_p10 }
 0x104   :  { %p14788_p13 = pnand %p14787_p12, %p14781_p9 }
 0x106   :  { %14791 = shalt.err (!%p14788_p13)
}
 0x107   :  { %185 = dma.hbm_to_vmem [thread:$0]  %s16312_s15, 131072, %s180_s0, [#allocation21], %s14879_s26, %s14879_s26, %s14880_s27  }
 0x108   :  { %s14792_s12 = scalar_lea.hbm %s16314_s17, 8192 }
 0x109   :  { %p14793_p0 = scmp.ne.s32.totalorder %s16314_s17, %s14792_s12  ;;  %p14796_p1 = scmp.lt.u32.totalorder %s14792_s12, %s16314_s17 }
 0x10b   :  { %p14798_p2 = pnand %p14796_p1, %p14793_p0 }
 0x10d   :  { %14801 = shalt.err (!%p14798_p2)
}
 0x10e   :  { %s14802_s9 = scalar_lea.vmem %s202_s4, 8192  ;;  %p14807_p4 = scmp.lt.s32.totalorder %s202_s4, %s202_s4 }
 0x10f   :  { %p14803_p3 = scmp.ne.s32.totalorder %s202_s4, %s14802_s9  ;;  %p14808_p5 = scmp.lt.s32.totalorder %s14802_s9, %s14802_s9 }
 0x111   :  { %p14809_p6 = por %p14808_p5, %p14807_p4 }
 0x113   :  { %p14810_p7 = pnand %p14809_p6, %p14803_p3 }
 0x115   :  { %14813 = shalt.err (!%p14810_p7)
}
 0x116   :  { %s14899_s15 = smov 4   ;;  %s14900_s28 = smov [#allocation26]  }
 0x117   :  { %207 = dma.hbm_to_vmem [thread:$0]  %s16314_s17, 8192, %s202_s4, [#allocation24], %s14896_s22, %s14896_s22, %s14899_s15  }
 0x118   :  { %s214_s29 = sshll.u32 %s14900_s28, 4  ;;  %s14814_s16 = scalar_lea.hbm %s16315_s18, 16  ;;  %s215_s29 = int_to_ptr.vmem [resolvable:$true] %s214_s29 }
 0x119   :  { %p14815_p8 = scmp.ne.s32.totalorder %s16315_s18, %s14814_s16  ;;  %p14818_p9 = scmp.lt.u32.totalorder %s14814_s16, %s16315_s18 }
 0x11b   :  { %p14820_p10 = pnand %p14818_p9, %p14815_p8 }
 0x11d   :  { %14823 = shalt.err (!%p14820_p10)
}
 0x11e   :  { %s14824_s30 = scalar_lea.vmem %s215_s29, 16  ;;  %s14828_s17 = scalar_lea.vmem %s215_s29, 32 }
 0x11f   :  { %p14825_p11 = scmp.ne.s32.totalorder %s215_s29, %s14824_s30  ;;  %p14829_p12 = scmp.lt.s32.totalorder %s215_s29, %s215_s29 }
 0x120   :  { %p14830_p13 = scmp.lt.s32.totalorder %s14828_s17, %s14824_s30 }
 0x122   :  { %p14831_p0 = por %p14830_p13, %p14829_p12 }
 0x124   :  { %p14832_p1 = pnand %p14831_p0, %p14825_p11 }
 0x126   :  { %14835 = shalt.err (!%p14832_p1)
}
 0x127   :  { %217 = dma.hbm_to_vmem [thread:$0]  %s16315_s18, 16, %s215_s29, [#allocation27]  }
 0x128   :  { %14858 = dma.done.wait [#allocation3], 256  }
 0x129   :  { %14859 = vsyncadd [#allocation3], 4294967040 }
 0x12a   :  { %14860 = dma.done.wait [#allocation6], 2048  }
 0x12b   :  { %14861 = vsyncadd [#allocation6], 4294965248 }
 0x12c   :  { %14862 = dma.done.wait [#allocation9], 32  }
 0x12d   :  { %14863 = vsyncadd [#allocation9], 4294967264 }
 0x12e   :  { %14864 = dma.done.wait [#allocation12], 528  }
 0x12f   :  { %14865 = vsyncadd [#allocation12], 4294966768 }
 0x130   :  { %14866 = dma.done.wait [#allocation15], 528  }
 0x131   :  { %14867 = vsyncadd [#allocation15], 4294966768 }
 0x132   :  { %14868 = dma.done.wait [#allocation18], 12672  }
 0x133   :  { %14869 = vsyncadd [#allocation18], 4294954624 }
 0x134   :  { %14870 = dma.done.wait [#allocation21], 131328  }
 0x135   :  { %14871 = vsyncadd [#allocation21], 4294835968 }
 0x136   :  { %14872 = dma.done.wait [#allocation24], 8320  }
 0x137   :  { %14873 = vsyncadd [#allocation24], 4294958976 }
 0x138   :  { %14874 = dma.done.wait [#allocation27], 16  }
 0x139   :  { %14875 = vsyncadd [#allocation27], 4294967280  ;;  %s16334_s25 = sld [smem:[#allocation46_spill]]  ;;  %v15246_v3 = vld [vmem:[%s16302_s5 + $0x40] sm:$0xff]   ;;  %v15264_v8 = vld [vmem:[%s16302_s5 + $0x48] sm:$0xff]   ;;  %vm284_vm0 = vcmask 523264  }
 0x13a   :  { %v15251_v4 = vld [vmem:[%s16302_s5] sm:$0xff]   ;;  %13442 = vmatprep.subr.bf16.mxu1 %v15246_v3  ;;  %v15269_v9 = vld [vmem:[%s16302_s5 + $0x8] sm:$0xff]   ;;  %v15281_v13 = vld [vmem:[%s16302_s5 + $0x50] sm:$0xff]   ;;  %vm1320_vm1 = vcmask 261120   ;;  %vm1634_vm2 = vcmask 785408   ;;  %s14903_s6 = smov 112  }
 0x13b   :  { %13443 = vmatpush3.bf16.msra.mxu1 %v15251_v4  ;;  %v15286_v14 = vld [vmem:[%s16302_s5 + $0x10] sm:$0xff]   ;;  %v15299_v18 = vld [vmem:[%s16302_s5 + $0x58] sm:$0xff]   ;;  %v267_v19 = vld [vmem:[#allocation2] sm:$0xff]  ;;  %s14904_s13 = smov 16   ;;  %vm1810_vm3 = vcmask 64512   ;;  %vm1813_vm4 = vcmask 130048  }
 0x13c   :  { %13444 = vmatprep.subr.bf16.mxu1 %v15264_v8  ;;  %v15304_v20 = vld [vmem:[%s16302_s5 + $0x18] sm:$0xff]   ;;  %13815 = vmatprep.mubr.msk.f32.mxu0 %vm284_vm0, %v267_v19  ;;  %v15311_v21 = vld [vmem:[%s16302_s5 + $0x60] sm:$0xff]   ;;  %v268_v23 = vld [vmem:[#allocation2 + $0x8] sm:$0xff]  ;;  %vm1816_vm5 = vcmask 195584  }
 0x13d   :  { %v15317_v22 = vld [vmem:[%s16302_s5 + $0xc0] sm:$0xff]   ;;  %v15333_v26 = vld [vmem:[%s16302_s5 + $0x68] sm:$0xff]   ;;  %v15358_v30 = vld [vmem:[%s16302_s5 + $0x70] sm:$0xff]  }
 0x13e   :  { %v15322_v24 = vld [vmem:[%s16302_s5 + $0x20] sm:$0xff]   ;;  %v15340_v27 = vld [vmem:[%s16302_s5 + $0xc8] sm:$0xff]   ;;  %v15365_v31 = vld [vmem:[%s16302_s5 + $0xd0] sm:$0xff]  }
 0x13f   :  { %v269_v0 = vld [vmem:[%s16334_s25] sm:$0xff]  ;;  %v270_v1 = vld [vmem:[%s16334_s25 + $0x8] sm:$0xff]  ;;  %v271_v5 = vld [vmem:[%s16334_s25 + $0x10] sm:$0xff]  ;;  %13445 = vmatpush3.bf16.msra.mxu1 %v15269_v9 }
 0x140   :  { %v13992_v2 = vpack.c.bf16 %v270_v1, %v269_v0  ;;  %v272_v6 = vld [vmem:[%s16334_s25 + $0x18] sm:$0xff]  ;;  %v273_v10 = vld [vmem:[%s16334_s25 + $0x20] sm:$0xff]  ;;  %v274_v11 = vld [vmem:[%s16334_s25 + $0x28] sm:$0xff]  ;;  %13446 = vmatprep.subr.bf16.mxu1 %v15281_v13 }
 0x141   :  { %v13996_v7 = vpack.c.bf16 %v272_v6, %v271_v5  ;;  %v14000_v12 = vpack.c.bf16 %v274_v11, %v273_v10  ;;  %v275_v15 = vld [vmem:[%s16334_s25 + $0x30] sm:$0xff]  ;;  %v276_v16 = vld [vmem:[%s16334_s25 + $0x38] sm:$0xff]  ;;  %v15327_v25 = vld [vmem:[%s16302_s5 + $0x80] sm:$0xff]  }
 0x142   :  { %13993 = vmatprep.subr.bf16.mxu0 %v13992_v2  ;;  %v14004_v17 = vpack.c.bf16 %v276_v16, %v275_v15  ;;  %v15345_v28 = vld [vmem:[%s16302_s5 + $0x28] sm:$0xff]   ;;  %v15370_v32 = vld [vmem:[%s16302_s5 + $0x30] sm:$0xff]   ;;  %v15382_v34 = vld [vmem:[%s16302_s5 + $0x78] sm:$0xff]  }
 0x143   :  { %13995 = vmatpush3.bf16.msra.mxu0 %v13992_v2  ;;  %13447 = vmatpush3.bf16.msra.mxu1 %v15286_v14  ;;  %v15351_v29 = vld [vmem:[%s16302_s5 + $0x88] sm:$0xff]   ;;  %v15375_v33 = vld [vmem:[%s16302_s5 + $0x90] sm:$0xff]   ;;  %v15389_v35 = vld [vmem:[%s16302_s5 + $0xd8] sm:$0xff]  }
 0x144   :  { %13997 = vmatprep.subr.bf16.mxu0 %v13996_v7  ;;  %13448 = vmatprep.subr.bf16.mxu1 %v15299_v18  ;;  %v15394_v36 = vld [vmem:[%s16302_s5 + $0x38] sm:$0xff]   ;;  %v366_v38 = vld [vmem:[#allocation5] sm:$0xff]  ;;  %v15406_v41 = vld [vmem:[%s16302_s5 + $0xe0] sm:$0xff]  }
 0x145   :  { %v15399_v37 = vld [vmem:[%s16302_s5 + $0x98] sm:$0xff]   ;;  %v370_v39 = vld [vmem:[#allocation5 + $0x20] sm:$0xff]  ;;  %v15413_v42 = vld [vmem:[%s16302_s5 + $0x140] sm:$0xff]  }
 0x146   :  { %v12134_v40 = vcombine.high %v366_v38, %v370_v39  ;;  %v15418_v43 = vld [vmem:[%s16302_s5 + $0xa0] sm:$0xff]   ;;  %v12133_v44 = vcombine.low %v366_v38, %v370_v39  ;;  %v15430_v46 = vld [vmem:[%s16302_s5 + $0xe8] sm:$0xff]   ;;  %v15454_v50 = vld [vmem:[%s16302_s5 + $0xf0] sm:$0xff]  }
 0x147   :  { %13999 = vmatpush3.bf16.msra.mxu0 %v13996_v7  ;;  %13449 = vmatpush3.bf16.msra.mxu1 %v15304_v20  ;;  %v15423_v45 = vld [vmem:[%s16302_s5 + $0x100] sm:$0xff]   ;;  %v15437_v47 = vld [vmem:[%s16302_s5 + $0x148] sm:$0xff]   ;;  %v15461_v51 = vld [vmem:[%s16302_s5 + $0x150] sm:$0xff]  }
 0x148   :  { %14001 = vmatprep.subr.bf16.mxu0 %v14000_v12  ;;  %13450 = vmatprep.subr.bf16.mxu1 %v15311_v21  ;;  %v15442_v48 = vld [vmem:[%s16302_s5 + $0xa8] sm:$0xff]   ;;  %v15466_v52 = vld [vmem:[%s16302_s5 + $0xb0] sm:$0xff]   ;;  %v15478_v54 = vld [vmem:[%s16302_s5 + $0xf8] sm:$0xff]  }
 0x149   :  { %965 = vmatprep.mubr.bf16.mxu1 %v12134_v40  ;;  %v15447_v49 = vld [vmem:[%s16302_s5 + $0x108] sm:$0xff]   ;;  %v15471_v53 = vld [vmem:[%s16302_s5 + $0x110] sm:$0xff]   ;;  %v15485_v55 = vld [vmem:[%s16302_s5 + $0x158] sm:$0xff]  }
 0x14a   :  { %v15490_v56 = vld [vmem:[%s16302_s5 + $0xb8] sm:$0xff]   ;;  %v15504_v61 = vld [vmem:[%s16302_s5 + $0x160] sm:$0xff]   ;;  %v15528_v2 = vld [vmem:[%s16302_s5 + $0x168] sm:$0xff]  }
 0x14b   :  { %14003 = vmatpush3.bf16.msra.mxu0 %v14000_v12  ;;  %13451 = vmatpush3.bf16.msra.mxu1 %v15322_v24  ;;  %v15495_v57 = vld [vmem:[%s16302_s5 + $0x118] sm:$0xff]   ;;  %v15509_v62 = vld [vmem:[%s16302_s5 + $0x1c0] sm:$0xff]   ;;  %v15533_v5 = vld [vmem:[%s16302_s5 + $0x1c8] sm:$0xff]  }
 0x14c   :  { %14005 = vmatprep.subr.bf16.mxu0 %v14004_v17  ;;  %13452 = vmatprep.subr.bf16.mxu1 %v15333_v26  ;;  %v367_v58 = vld [vmem:[#allocation5 + $0x8] sm:$0xff]  ;;  %v15514_v0 = vld [vmem:[%s16302_s5 + $0x120] sm:$0xff]   ;;  %v15538_v6 = vld [vmem:[%s16302_s5 + $0x128] sm:$0xff]  }
 0x14d   :  { %v371_v59 = vld [vmem:[#allocation5 + $0x28] sm:$0xff]  ;;  %v15521_v1 = vld [vmem:[%s16302_s5 + $0x180] sm:$0xff]   ;;  %v15545_v7 = vld [vmem:[%s16302_s5 + $0x188] sm:$0xff]  }
 0x14e   :  { %v12136_v60 = vcombine.high %v367_v58, %v371_v59  ;;  %v12135_v63 = vcombine.low %v367_v58, %v371_v59  ;;  %v15552_v10 = vld [vmem:[%s16302_s5 + $0x170] sm:$0xff]   ;;  %v15576_v16 = vld [vmem:[%s16302_s5 + $0x178] sm:$0xff]   ;;  %v368_v38 = vld [vmem:[#allocation5 + $0x10] sm:$0xff] }
 0x14f   :  { %14007 = vmatpush3.bf16.msra.mxu0 %v14004_v17  ;;  %13453 = vmatpush3.bf16.msra.mxu1 %v15345_v28  ;;  %v15557_v11 = vld [vmem:[%s16302_s5 + $0x1d0] sm:$0xff]   ;;  %v15581_v17 = vld [vmem:[%s16302_s5 + $0x1d8] sm:$0xff]   ;;  %v372_v39 = vld [vmem:[#allocation5 + $0x30] sm:$0xff] }
 0x150   :  { %13464 = vmatprep.subr.bf16.mxu0 %v15317_v22  ;;  %13454 = vmatprep.subr.bf16.mxu1 %v15358_v30  ;;  %v15562_v12 = vld [vmem:[%s16302_s5 + $0x130] sm:$0xff]   ;;  %v15586_v19 = vld [vmem:[%s16302_s5 + $0x138] sm:$0xff]   ;;  %v12138_v40 = vcombine.high %v368_v38, %v372_v39  ;;  %v12137_v58 = vcombine.low %v368_v38, %v372_v39  ;;  %v15607_v59 = vld [vmem:[%s16302_s5 + $0x1a0] sm:$0xff]  }
 0x151   :  { %v15569_v15 = vld [vmem:[%s16302_s5 + $0x190] sm:$0xff]   ;;  %16335 = vst [vmem:[#allocation39_spill] sm:$0xff] %v15607_v59  ;;  %v373_v39 = vld [vmem:[#allocation5 + $0x38] sm:$0xff] }
 0x152   :  { %13816 = vmatmul.mubr.msk.f32.vlgmr.msra.gmra.mrb[0].mxu0 %vm284_vm0, %v268_v23  ;;  %v15593_v23 = vld [vmem:[%s16302_s5 + $0x198] sm:$0xff]   ;;  %v15628_v38 = vld [vmem:[%s16302_s5 + $0x1f0] sm:$0xff]  }
 0x153   :  { %13465 = vmatpush3.bf16.msra.mxu0 %v15327_v25  ;;  %13455 = vmatpush3.bf16.msra.mxu1 %v15370_v32  ;;  %16338 = vst [vmem:[#allocation42_spill] sm:$0xff] %v15628_v38 }
 0x154   :  { %13466 = vmatprep.subr.bf16.mxu0 %v15340_v27  ;;  %13456 = vmatprep.subr.bf16.mxu1 %v15382_v34 }
 0x155   :  { %1006 = vmatprep.mubr.bf16.mxu0 %v12136_v60  ;;  %v15613_v60 = vld [vmem:[%s16302_s5 + $0x1e8] sm:$0xff]  }
 0x156   :  { %16336 = vst [vmem:[#allocation40_spill] sm:$0xff] %v15613_v60 }
 0x157   :  { %13467 = vmatpush3.bf16.msra.mxu0 %v15351_v29  ;;  %13457 = vmatpush3.bf16.msra.mxu1 %v15394_v36 }
 0x158   :  { %13468 = vmatprep.subr.bf16.mxu0 %v15365_v31  ;;  %13486 = vmatprep.subr.bf16.mxu1 %v15413_v42 }
 0x15a   :  { %966 = vmatmul.mubr.bf16.vlgmr.msra.gmra.mrb[0].mxu1 %v12133_v44  ;;  %v15600_v44 = vld [vmem:[%s16302_s5 + $0x1e0] sm:$0xff]  }
 0x15b   :  { %13469 = vmatpush3.bf16.msra.mxu0 %v15375_v33  ;;  %13487 = vmatpush3.bf16.msra.mxu1 %v15423_v45 }
 0x15c   :  { %13470 = vmatprep.subr.bf16.mxu0 %v15389_v35  ;;  %13488 = vmatprep.subr.bf16.mxu1 %v15437_v47 }
 0x15d   :  { %1047 = vmatprep.mubr.bf16.mxu1 %v12138_v40 }
 0x15f   :  { %13471 = vmatpush3.bf16.msra.mxu0 %v15399_v37  ;;  %13489 = vmatpush3.bf16.msra.mxu1 %v15447_v49 }
 0x160   :  { %13472 = vmatprep.subr.bf16.mxu0 %v15406_v41  ;;  %13490 = vmatprep.subr.bf16.mxu1 %v15461_v51 }
 0x163   :  { %13473 = vmatpush3.bf16.msra.mxu0 %v15418_v43  ;;  %13491 = vmatpush3.bf16.msra.mxu1 %v15471_v53 }
 0x164   :  { %13474 = vmatprep.subr.bf16.mxu0 %v15430_v46  ;;  %13492 = vmatprep.subr.bf16.mxu1 %v15485_v55 }
 0x167   :  { %13475 = vmatpush3.bf16.msra.mxu0 %v15442_v48  ;;  %13493 = vmatpush3.bf16.msra.mxu1 %v15495_v57 }
 0x168   :  { %13476 = vmatprep.subr.bf16.mxu0 %v15454_v50  ;;  %13494 = vmatprep.subr.bf16.mxu1 %v15504_v61 }
 0x16b   :  { %13477 = vmatpush3.bf16.msra.mxu0 %v15466_v52  ;;  %13495 = vmatpush3.bf16.msra.mxu1 %v15514_v0 }
 0x16c   :  { %13478 = vmatprep.subr.bf16.mxu0 %v15478_v54  ;;  %13496 = vmatprep.subr.bf16.mxu1 %v15528_v2 }
 0x16f   :  { %13479 = vmatpush3.bf16.msra.mxu0 %v15490_v56  ;;  %13497 = vmatpush3.bf16.msra.mxu1 %v15538_v6 }
 0x170   :  { %13508 = vmatprep.subr.bf16.mxu0 %v15509_v62  ;;  %13498 = vmatprep.subr.bf16.mxu1 %v15552_v10 }
 0x172   :  { %1007 = vmatmul.mubr.bf16.vlgmr.msra.gmra.mrb[4].mxu0 %v12135_v63  ;;  %v15621_v63 = vld [vmem:[%s16302_s5 + $0x1a8] sm:$0xff]  }
 0x173   :  { %13509 = vmatpush3.bf16.msra.mxu0 %v15521_v1  ;;  %13499 = vmatpush3.bf16.msra.mxu1 %v15562_v12  ;;  %16337 = vst [vmem:[#allocation41_spill] sm:$0xff] %v15621_v63 }
 0x174   :  { %13510 = vmatprep.subr.bf16.mxu0 %v15533_v5  ;;  %13500 = vmatprep.subr.bf16.mxu1 %v15576_v16 }
 0x177   :  { %13511 = vmatpush3.bf16.msra.mxu0 %v15545_v7  ;;  %13501 = vmatpush3.bf16.msra.mxu1 %v15586_v19 }
 0x178   :  { %13512 = vmatprep.subr.bf16.mxu0 %v15557_v11  ;;  %13530 = vmatprep.subr.bf16.mxu1 %v15246_v3  ;;  %v369_v3 = vld [vmem:[#allocation5 + $0x18] sm:$0xff] }
 0x179   :  { %v12140_v40 = vcombine.high %v369_v3, %v373_v39 }
 0x17a   :  { %1048 = vmatmul.mubr.bf16.vlgmr.msra.gmra.mrb[4].mxu1 %v12137_v58  ;;  %v1097_v58 = vld [vmem:[#allocation7] sm:$0xff] }
 0x17b   :  { %13513 = vmatpush3.bf16.msra.mxu0 %v15569_v15  ;;  %13531 = vmatpush3.bf16.msra.mxu1 %v15251_v4 }
 0x17c   :  { %13514 = vmatprep.subr.bf16.mxu0 %v15581_v17  ;;  %13532 = vmatprep.subr.bf16.mxu1 %v15264_v8  ;;  %v15642_v8 = vld [vmem:[%s16302_s5 + $0x1f8] sm:$0xff]  }
 0x17d   :  { %1088 = vmatprep.mubr.bf16.mxu0 %v12140_v40 }
 0x17f   :  { %13515 = vmatpush3.bf16.msra.mxu0 %v15593_v23  ;;  %13533 = vmatpush3.bf16.msra.mxu1 %v15269_v9  ;;  %v1098_v9 = vld [vmem:[#allocation7 + $0x8] sm:$0xff] }
 0x180   :  { %13516 = vmatprep.subr.bf16.mxu0 %v15600_v44  ;;  %13534 = vmatprep.subr.bf16.mxu1 %v15281_v13  ;;  %v1102_v13 = vld [vmem:[#allocation7 + $0x28] sm:$0xff] }
 0x181   :  { %v12208_v40 = vcombine.high %v1098_v9, %v1102_v13 }
 0x183   :  { %13517 = vmatpush3.bf16.msra.mxu0 %v15607_v59  ;;  %v1101_v59 = vld [vmem:[#allocation7 + $0x20] sm:$0xff]  ;;  %13535 = vmatpush3.bf16.msra.mxu1 %v15286_v14  ;;  %v1099_v14 = vld [vmem:[#allocation7 + $0x10] sm:$0xff] }
 0x184   :  { %13518 = vmatprep.subr.bf16.mxu0 %v15613_v60  ;;  %v12206_v4 = vcombine.high %v1097_v58, %v1101_v59  ;;  %v15635_v60 = vld [vmem:[%s16302_s5 + $0x1b0] sm:$0xff]   ;;  %13536 = vmatprep.subr.bf16.mxu1 %v15299_v18  ;;  %v1103_v18 = vld [vmem:[#allocation7 + $0x30] sm:$0xff] }
 0x186   :  { %1177 = vmatprep.mubr.bf16.mxu1 %v12206_v4 }
 0x187   :  { %13519 = vmatpush3.bf16.msra.mxu0 %v15621_v63  ;;  %v15647_v63 = vld [vmem:[%s16302_s5 + $0x1b8] sm:$0xff]   ;;  %13537 = vmatpush3.bf16.msra.mxu1 %v15304_v20  ;;  %v12205_v20 = vcombine.low %v1097_v58, %v1101_v59  ;;  %s14901_s5 = smov 96  }
 0x188   :  { %13520 = vmatprep.subr.bf16.mxu0 %v15628_v38  ;;  %v12139_v38 = vcombine.low %v369_v3, %v373_v39  ;;  %13538 = vmatprep.subr.bf16.mxu1 %v15311_v21  ;;  %v12210_v21 = vcombine.high %v1099_v14, %v1103_v18 }
 0x18b   :  { %13521 = vmatpush3.bf16.msra.mxu0 %v15635_v60  ;;  %13539 = vmatpush3.bf16.msra.mxu1 %v15322_v24  ;;  %v1104_v24 = vld [vmem:[#allocation7 + $0x38] sm:$0xff] }
 0x18c   :  { %13522 = vmatprep.subr.bf16.mxu0 %v15642_v8  ;;  %13540 = vmatprep.subr.bf16.mxu1 %v15333_v26 }
 0x18f   :  { %13523 = vmatpush3.bf16.msra.mxu0 %v15647_v63  ;;  %13541 = vmatpush3.bf16.msra.mxu1 %v15345_v28  ;;  %v1310_v28 = vld [vmem:[#allocation11 + $0x8] sm:$0xff] }
 0x190   :  { %13552 = vmatprep.subr.bf16.mxu0 %v15317_v22  ;;  %13542 = vmatprep.subr.bf16.mxu1 %v15358_v30  ;;  %v1100_v22 = vld [vmem:[#allocation7 + $0x18] sm:$0xff] }
 0x191   :  { %v12212_v26 = vcombine.high %v1100_v22, %v1104_v24  ;;  %v1311_v30 = vld [vmem:[#allocation11 + $0x10] sm:$0xff] }
 0x192   :  { %1089 = vmatmul.mubr.bf16.vlgmr.msra.gmra.mrb[8].mxu0 %v12139_v38 }
 0x193   :  { %13553 = vmatpush3.bf16.msra.mxu0 %v15327_v25  ;;  %1218 = vmatprep.mubr.bf16.mxu0 %v12208_v40  ;;  %v12207_v25 = vcombine.low %v1098_v9, %v1102_v13 }
 0x194   :  { %13554 = vmatprep.subr.bf16.mxu0 %v15340_v27  ;;  %13543 = vmatpush3.bf16.msra.mxu1 %v15370_v32  ;;  %v1309_v27 = vld [vmem:[#allocation11] sm:$0xff]  ;;  %v12209_v32 = vcombine.low %v1099_v14, %v1103_v18 }
 0x195   :  { %13544 = vmatprep.subr.bf16.mxu1 %v15382_v34  ;;  %v16339_v34 = vld [vmem:[#allocation39_spill] sm:$0xff] }
 0x197   :  { %13555 = vmatpush3.bf16.msra.mxu0 %v15351_v29  ;;  %v14008_v29 = vpack.c.bf16 %v1310_v28, %v1309_v27 }
 0x198   :  { %13556 = vmatprep.subr.bf16.mxu0 %v15365_v31  ;;  %13545 = vmatpush3.bf16.msra.mxu1 %v15394_v36  ;;  %v1312_v31 = vld [vmem:[#allocation11 + $0x18] sm:$0xff] }
 0x199   :  { %13574 = vmatprep.subr.bf16.mxu1 %v15413_v42  ;;  %v16341_v36 = vld [vmem:[#allocation41_spill] sm:$0xff] }
 0x19a   :  { %v12129_v42 = vld [vmem:[#allocation8] ss:$0 sm:$0xff] }
 0x19b   :  { %13557 = vmatpush3.bf16.msra.mxu0 %v15375_v33  ;;  %1178 = vmatmul.mubr.bf16.vlgmr.msra.gmra.mrb[8].mxu1 %v12205_v20  ;;  %v14012_v33 = vpack.c.bf16 %v1312_v31, %v1311_v30 }
 0x19c   :  { %13558 = vmatprep.subr.bf16.mxu0 %v15389_v35  ;;  %13575 = vmatpush3.bf16.msra.mxu1 %v15423_v45  ;;  %v16340_v35 = vld [vmem:[#allocation40_spill] sm:$0xff] }
 0x19d   :  { %13576 = vmatprep.subr.bf16.mxu1 %v15437_v47  ;;  %1259 = vmatprep.mubr.bf16.mxu1 %v12210_v21 }
 0x19f   :  { %13559 = vmatpush3.bf16.msra.mxu0 %v15399_v37  ;;  %v16342_v37 = vld [vmem:[#allocation42_spill] sm:$0xff] }
 0x1a0   :  { %13560 = vmatprep.subr.bf16.mxu0 %v15406_v41  ;;  %13577 = vmatpush3.bf16.msra.mxu1 %v15447_v49  ;;  %v12211_v41 = vcombine.low %v1100_v22, %v1104_v24 }
 0x1a1   :  { %13578 = vmatprep.subr.bf16.mxu1 %v15461_v51 }
 0x1a3   :  { %13561 = vmatpush3.bf16.msra.mxu0 %v15418_v43 }
 0x1a4   :  { %13562 = vmatprep.subr.bf16.mxu0 %v15430_v46  ;;  %13579 = vmatpush3.bf16.msra.mxu1 %v15471_v53 }
 0x1a5   :  { %13580 = vmatprep.subr.bf16.mxu1 %v15485_v55 }
 0x1a7   :  { %13563 = vmatpush3.bf16.msra.mxu0 %v15442_v48 }
 0x1a8   :  { %13564 = vmatprep.subr.bf16.mxu0 %v15454_v50  ;;  %13581 = vmatpush3.bf16.msra.mxu1 %v15495_v57 }
 0x1a9   :  { %13582 = vmatprep.subr.bf16.mxu1 %v15504_v61 }
 0x1ab   :  { %13565 = vmatpush3.bf16.msra.mxu0 %v15466_v52 }
 0x1ac   :  { %13566 = vmatprep.subr.bf16.mxu0 %v15478_v54  ;;  %13583 = vmatpush3.bf16.msra.mxu1 %v15514_v0  ;;  %v12132_v54 = vld [vmem:[#allocation10] ss:$0 sm:$0xff] }
 0x1ad   :  { %13584 = vmatprep.subr.bf16.mxu1 %v15528_v2 }
 0x1af   :  { %13567 = vmatpush3.bf16.msra.mxu0 %v15490_v56 }
 0x1b0   :  { %13596 = vmatprep.subr.bf16.mxu0 %v15509_v62  ;;  %13585 = vmatpush3.bf16.msra.mxu1 %v15538_v6 }
 0x1b1   :  { %13586 = vmatprep.subr.bf16.mxu1 %v15552_v10 }
 0x1b2   :  { %1219 = vmatmul.mubr.bf16.vlgmr.msra.gmra.mrb[12].mxu0 %v12207_v25 }
 0x1b3   :  { %13597 = vmatpush3.bf16.msra.mxu0 %v15521_v1  ;;  %1300 = vmatprep.mubr.bf16.mxu0 %v12212_v26 }
 0x1b4   :  { %13598 = vmatprep.subr.bf16.mxu0 %v15533_v5  ;;  %13587 = vmatpush3.bf16.msra.mxu1 %v15562_v12 }
 0x1b5   :  { %13588 = vmatprep.subr.bf16.mxu1 %v15576_v16 }
 0x1b7   :  { %13599 = vmatpush3.bf16.msra.mxu0 %v15545_v7 }
 0x1b8   :  { %13600 = vmatprep.subr.bf16.mxu0 %v15557_v11  ;;  %13589 = vmatpush3.bf16.msra.mxu1 %v15586_v19 }
 0x1b9   :  { %14009 = vmatprep.subr.bf16.mxu1 %v14008_v29 }
 0x1bb   :  { %13601 = vmatpush3.bf16.msra.mxu0 %v15569_v15  ;;  %1260 = vmatmul.mubr.bf16.vlgmr.msra.gmra.mrb[12].mxu1 %v12209_v32 }
 0x1bc   :  { %13602 = vmatprep.subr.bf16.mxu0 %v15581_v17  ;;  %14011 = vmatpush3.bf16.msra.mxu1 %v14008_v29 }
 0x1bd   :  { %14013 = vmatprep.subr.bf16.mxu1 %v14012_v33 }
 0x1bf   :  { %13603 = vmatpush3.bf16.msra.mxu0 %v15593_v23 }
 0x1c0   :  { %13604 = vmatprep.subr.bf16.mxu0 %v15600_v44  ;;  %14015 = vmatpush3.bf16.msra.mxu1 %v14012_v33 }
 0x1c1   :  { %14017 = vmatprep.subr.bf16.mxu1 %v14008_v29 }
 0x1c3   :  { %13605 = vmatpush3.bf16.msra.mxu0 %v16339_v34 }
 0x1c4   :  { %13606 = vmatprep.subr.bf16.mxu0 %v16340_v35 }
 0x1c7   :  { %13607 = vmatpush3.bf16.msra.mxu0 %v16341_v36 }
 0x1c8   :  { %13608 = vmatprep.subr.bf16.mxu0 %v16342_v37 }
 0x1cb   :  { %13609 = vmatpush3.bf16.msra.mxu0 %v15635_v60 }
 0x1cc   :  { %13610 = vmatprep.subr.bf16.mxu0 %v15642_v8 }
 0x1cf   :  { %13611 = vmatpush3.bf16.msra.mxu0 %v15647_v63 }
 0x1d0   :  { %14025 = vmatprep.subr.bf16.mxu0 %v14008_v29 }
 0x1d2   :  { %1301 = vmatmul.mubr.bf16.vlgmr.msra.gmra.mrb[16].mxu0 %v12211_v41 }
 0x1d3   :  { %14027 = vmatpush3.bf16.msra.mxu0 %v14008_v29 }
 0x1d4   :  { %14029 = vmatprep.subr.bf16.mxu0 %v14012_v33 }
 0x1d7   :  { %14031 = vmatpush3.bf16.msra.mxu0 %v14012_v33 }
 0x225   :  { %v13817_v43 = vpop.f32.mrb[0].mxu0 }
 0x226   :  { %v363_v45 = vadd.f32 %v13817_v43, %v12129_v42  ;;  %v357_v46 = vpop.f32.mrb[1].mxu0 }
 0x227   :  { %v358_v47 = vadd.f32 %v12129_v42, %v357_v46 }
 0x229   :  { %13826 = vmatprep.mubr.msk.f32.mxu1 %vm1320_vm1, %v358_v47 }
 0x22a   :  { %13827 = vmatmul.mubr.msk.f32.vlgmr.msra.gmra.mrb[16].mxu1 %vm1320_vm1, %v363_v45 }
 0x22b   :  { %14019 = vmatpush3.bf16.msra.mxu1 %v14008_v29 }
 0x22c   :  { %14021 = vmatprep.subr.bf16.mxu1 %v14012_v33 }
 0x22d   :  { %v13458_v48 = vpop.f32.mrb[0].mxu1 }
 0x22e   :  { %v13459_v49 = vpop.f32.mrb[1].mxu1 }
 0x22f   :  { %14023 = vmatpush3.bf16.msra.mxu1 %v14012_v33  ;;  %v13460_v50 = vadd.f32 %v13459_v49, %v13458_v48  ;;  %v13461_v51 = vpop.f32.mrb[2].mxu1  ;;  %v12213_v49 = vld [vmem:[#allocation13] ss:$0 sm:$0xff] }
 0x230   :  { %v13462_v52 = vpop.f32.mrb[3].mxu1 }
 0x231   :  { %v13463_v53 = vadd.f32 %v13462_v52, %v13461_v51  ;;  %v968_v55 = vadd.f32 %v13460_v50, %v12132_v54 }
 0x233   :  { %v971_v1 = vadd.f32 %v13463_v53, %v12132_v54 }
 0x245   :  { %v13480_v56 = vpop.f32.mrb[4].mxu0 }
 0x246   :  { %v13481_v57 = vpop.f32.mrb[5].mxu0 }
 0x247   :  { %v13482_v61 = vadd.f32 %v13481_v57, %v13480_v56  ;;  %v13483_v62 = vpop.f32.mrb[6].mxu0  ;;  %v1604_v56 = vld [vmem:[%s16308_s11 + $0x10] sm:$0xff] }
 0x248   :  { %v13484_v0 = vpop.f32.mrb[7].mxu0 }
 0x249   :  { %v1009_v2 = vadd.f32 %v13482_v61, %v968_v55  ;;  %v13485_v5 = vadd.f32 %v13484_v0, %v13483_v62  ;;  %v1603_v55 = vld [vmem:[%s16308_s11 + $0x8] sm:$0xff]  ;;  %v1605_v61 = vld [vmem:[%s16308_s11 + $0x18] sm:$0xff]  ;;  %v1606_v0 = vld [vmem:[%s16308_s11 + $0x20] sm:$0xff] }
 0x24a   :  { %v15740_v62 = vpack.c.bf16 %v1605_v61, %v1604_v56 }
 0x24b   :  { %v1012_v6 = vadd.f32 %v13485_v5, %v971_v1  ;;  %v1607_v1 = vld [vmem:[%s16308_s11 + $0x28] sm:$0xff]  ;;  %v1608_v5 = vld [vmem:[%s16308_s11 + $0x30] sm:$0xff] }
 0x24d   :  { %v13502_v7 = vpop.f32.mrb[4].mxu1 }
 0x24e   :  { %v13503_v10 = vpop.f32.mrb[5].mxu1 }
 0x24f   :  { %v13504_v11 = vadd.f32 %v13503_v10, %v13502_v7  ;;  %v13505_v12 = vpop.f32.mrb[6].mxu1 }
 0x250   :  { %v13506_v15 = vpop.f32.mrb[7].mxu1 }
 0x251   :  { %v1050_v16 = vadd.f32 %v13504_v11, %v1009_v2  ;;  %v13507_v17 = vadd.f32 %v13506_v15, %v13505_v12  ;;  %v15751_v2 = vpack.c.bf16 %v1607_v1, %v1606_v0  ;;  %v1610_v12 = vld [vmem:[%s16308_s11 + $0x40] sm:$0xff]  ;;  %v1611_v15 = vld [vmem:[%s16308_s11 + $0x48] sm:$0xff] }
 0x253   :  { %v1053_v19 = vadd.f32 %v13507_v17, %v1012_v6  ;;  %v1609_v6 = vld [vmem:[%s16308_s11 + $0x38] sm:$0xff]  ;;  %v1612_v17 = vld [vmem:[%s16308_s11 + $0x50] sm:$0xff] }
 0x254   :  { %v15761_v7 = vpack.c.bf16 %v1609_v6, %v1608_v5 }
 0x265   :  { %v13524_v23 = vpop.f32.mrb[8].mxu0 }
 0x266   :  { %v13525_v44 = vpop.f32.mrb[9].mxu0 }
 0x267   :  { %v13526_v59 = vadd.f32 %v13525_v44, %v13524_v23  ;;  %v13527_v60 = vpop.f32.mrb[10].mxu0 }
 0x268   :  { %v13528_v63 = vpop.f32.mrb[11].mxu0 }
 0x269   :  { %v1091_v38 = vadd.f32 %v13526_v59, %v1050_v16  ;;  %v13529_v3 = vadd.f32 %v13528_v63, %v13527_v60  ;;  %v15772_v16 = vpack.c.bf16 %v1611_v15, %v1610_v12 }
 0x26b   :  { %v1094_v39 = vadd.f32 %v13529_v3, %v1053_v19  ;;  %13837 = vmatprep.mubr.msk.f32.mxu1 %vm1320_vm1, %v1091_v38  ;;  %v1613_v19 = vld [vmem:[%s16308_s11 + $0x58] sm:$0xff] }
 0x26c   :  { %v15782_v23 = vpack.c.bf16 %v1613_v19, %v1612_v17 }
 0x26d   :  { %13838 = vmatmul.mubr.msk.f32.vlgmr.msra.gmra.mrb[18].mxu1 %vm1320_vm1, %v1094_v39 }
 0x26e   :  { %v13546_v58 = vpop.f32.mrb[8].mxu1 }
 0x26f   :  { %v13547_v4 = vpop.f32.mrb[9].mxu1 }
 0x270   :  { %v13548_v8 = vadd.f32 %v13547_v4, %v13546_v58  ;;  %v13549_v9 = vpop.f32.mrb[10].mxu1 }
 0x271   :  { %v13550_v13 = vpop.f32.mrb[11].mxu1 }
 0x272   :  { %v13551_v40 = vadd.f32 %v13550_v13, %v13549_v9  ;;  %v1180_v14 = vadd.f32 %v13548_v8, %v12132_v54 }
 0x274   :  { %v1183_v25 = vadd.f32 %v13551_v40, %v12132_v54  ;;  %v1602_v54 = vld [vmem:[%s16308_s11] sm:$0xff]  ;;  %s14902_s11 = smov 120  }
 0x275   :  { %v15735_v57 = vpack.c.bf16 %v1603_v55, %v1602_v54 }
 0x277   :  { %14033 = vmatprep.subr.bf16.mxu1 %v15735_v57 }
 0x278   :  { %14035 = vmatpush3.bf16.msra.mxu1 %v15735_v57 }
 0x279   :  { %14037 = vmatprep.subr.bf16.mxu1 %v15740_v62 }
 0x27c   :  { %14039 = vmatpush3.bf16.msra.mxu1 %v15740_v62 }
 0x27d   :  { %14041 = vmatprep.subr.bf16.mxu1 %v15751_v2 }
 0x280   :  { %14043 = vmatpush3.bf16.msra.mxu1 %v15751_v2 }
 0x281   :  { %14045 = vmatprep.subr.bf16.mxu1 %v15761_v7 }
 0x284   :  { %14047 = vmatpush3.bf16.msra.mxu1 %v15761_v7 }
 0x285   :  { %v13568_v18 = vpop.f32.mrb[12].mxu0  ;;  %14049 = vmatprep.subr.bf16.mxu1 %v15772_v16 }
 0x286   :  { %v13569_v20 = vpop.f32.mrb[13].mxu0 }
 0x287   :  { %v13570_v21 = vadd.f32 %v13569_v20, %v13568_v18  ;;  %v13571_v22 = vpop.f32.mrb[14].mxu0 }
 0x288   :  { %v13572_v24 = vpop.f32.mrb[15].mxu0  ;;  %14051 = vmatpush3.bf16.msra.mxu1 %v15772_v16 }
 0x289   :  { %v1221_v26 = vadd.f32 %v13570_v21, %v1180_v14  ;;  %v13573_v27 = vadd.f32 %v13572_v24, %v13571_v22  ;;  %14053 = vmatprep.subr.bf16.mxu1 %v15782_v23 }
 0x28b   :  { %v1224_v28 = vadd.f32 %v13573_v27, %v1183_v25 }
 0x28c   :  { %14055 = vmatpush3.bf16.msra.mxu1 %v15782_v23 }
 0x28e   :  { %v13590_v29 = vpop.f32.mrb[12].mxu1 }
 0x28f   :  { %v13591_v30 = vpop.f32.mrb[13].mxu1 }
 0x290   :  { %v13592_v31 = vadd.f32 %v13591_v30, %v13590_v29  ;;  %v13593_v32 = vpop.f32.mrb[14].mxu1 }
 0x291   :  { %v13594_v33 = vpop.f32.mrb[15].mxu1 }
 0x292   :  { %v1262_v34 = vadd.f32 %v13592_v31, %v1221_v26  ;;  %v13595_v35 = vadd.f32 %v13594_v33, %v13593_v32 }
 0x294   :  { %v1265_v36 = vadd.f32 %v13595_v35, %v1224_v28 }
 0x2a5   :  { %v13612_v37 = vpop.f32.mrb[16].mxu0 }
 0x2a6   :  { %v13613_v41 = vpop.f32.mrb[17].mxu0 }
 0x2a7   :  { %v13614_v42 = vadd.f32 %v13613_v41, %v13612_v37  ;;  %v13615_v43 = vpop.f32.mrb[18].mxu0 }
 0x2a8   :  { %v13616_v45 = vpop.f32.mrb[19].mxu0 }
 0x2a9   :  { %v1303_v46 = vadd.f32 %v13614_v42, %v1262_v34  ;;  %v13617_v47 = vadd.f32 %v13616_v45, %v13615_v43 }
 0x2ab   :  { %v1306_v48 = vadd.f32 %v13617_v47, %v1265_v36  ;;  %13848 = vmatprep.mubr.msk.f32.mxu0 %vm1320_vm1, %v1303_v46 }
 0x2ad   :  { %13849 = vmatmul.mubr.msk.f32.vlgmr.msra.gmra.mrb[2].mxu0 %vm1320_vm1, %v1306_v48 }
 0x2fd   :  { %v13828_v50 = vpop.f32.mrb[16].mxu1 }
 0x2fe   :  { %v15717_v51 = vadd.f32 %v13828_v50, %v12213_v49  ;;  %v1393_v52 = vpop.f32.mrb[17].mxu1 }
 0x2ff   :  { %v1394_v53 = vadd.f32 %v12213_v49, %v1393_v52 }
 0x300   :  { %1568 = vrot.lane.b32.xlu1 %v15717_v51, %s14901_s5 }
 0x301   :  { %1566 = vrot.lane.b32.xlu0 %v1394_v53, %s14901_s5 }
 0x304   :  { %1624 = vrot.lane.b32.xlu1 %v15717_v51, %s14880_s27 }
 0x305   :  { %1622 = vrot.lane.b32.xlu0 %v1394_v53, %s14880_s27 }
 0x309   :  { %1584 = vrot.lane.b32.xlu0 %v1394_v53, %s14896_s22 }
 0x340   :  { %v13839_v10 = vpop.f32.mrb[18].mxu1 }
 0x341   :  { %v1474_v11 = vpop.f32.mrb[19].mxu1  ;;  %v15811_v20 = vadd.f32 %v13839_v10, %v12213_v49 }
 0x342   :  { %v15796_v4 = vadd.f32 %v12213_v49, %v1474_v11 }
 0x372   :  { %v1569_v3 = vpop.permute.xlu1 %1568 }
 0x373   :  { %v1567_v38 = vpop.permute.xlu0 %1566  ;;  %v1581_v24 = vsel %vm1320_vm1, %v1569_v3, %v15811_v20 }
 0x374   :  { %v1580_v9 = vsel %vm1320_vm1, %v1567_v38, %v15796_v4 }
 0x376   :  { %v1625_v58 = vpop.permute.xlu1 %1624 }
 0x377   :  { %v1623_v39 = vpop.permute.xlu0 %1622  ;;  %v1629_v25 = vsel %vm1320_vm1, %v15717_v51, %v1625_v58 }
 0x378   :  { %v1628_v13 = vsel %vm1320_vm1, %v1394_v53, %v1623_v39 }
 0x37b   :  { %v15798_v8 = vpop.permute.xlu0 %1584 }
 0x37c   :  { %v1630_v14 = vsel %vm284_vm0, %v1628_v13, %v15798_v8 }
 0x380   :  { %v13850_v44 = vpop.f32.mrb[2].mxu0 }
 0x381   :  { %v15786_v59 = vadd.f32 %v13850_v44, %v12213_v49  ;;  %v1555_v60 = vpop.f32.mrb[3].mxu0 }
 0x382   :  { %v15788_v63 = vadd.f32 %v12213_v49, %v1555_v60 }
 0x383   :  { %1576 = vrot.lane.b32.xlu0 %v15786_v59, %s14880_s27 }
 0x384   :  { %1574 = vrot.lane.b32.xlu1 %v15788_v63, %s14880_s27 }
 0x388   :  { %1586 = vrot.lane.b32.xlu1 %v15717_v51, %s14896_s22 }
 0x3f5   :  { %v15813_v21 = vpop.permute.xlu0 %1576 }
 0x3f6   :  { %v15803_v40 = vpop.permute.xlu1 %1574  ;;  %v15825_v27 = vsel %vm284_vm0, %v1581_v24, %v15813_v21 }
 0x3f7   :  { %v15809_v18 = vsel %vm284_vm0, %v1580_v9, %v15803_v40 }
 0x3f8   :  { %v1632_v22 = vmul.f32 %v1630_v14, %v15809_v18  ;;  %v1614_v14 = vld [vmem:[#allocation17] sm:$0xff] }
 0x3fa   :  { %v15820_v26 = vpop.permute.xlu1 %1586  ;;  %13875 = vmatprep.mubr.msk.f32.mxu1 %vm1634_vm2, %v1632_v22  ;;  %v1615_v22 = vld [vmem:[#allocation17 + $0x8] sm:$0xff] }
 0x3fb   :  { %v1631_v28 = vsel %vm284_vm0, %v1629_v25, %v15820_v26  ;;  %v15843_v24 = vpack.c.bf16 %v1615_v22, %v1614_v14  ;;  %v15849_v25 = vld [vmem:[#allocation17 + $0x10] sm:$0xff] }
 0x3fc   :  { %v1633_v29 = vmul.f32 %v1631_v28, %v15825_v27 }
 0x3fd   :  { %14057 = vmatprep.subr.bf16.mxu0 %v15843_v24  ;;  %14093 = vmatprep.subr.bf16.mxu1 %v15843_v24 }
 0x3fe   :  { %13876 = vmatmul.mubr.msk.f32.vlgmr.msra.gmra.mrb[20].mxu1 %vm1634_vm2, %v1633_v29  ;;  %14059 = vmatpush3.bf16.msra.mxu0 %v15843_v24 }
 0x3ff   :  { %14095 = vmatpush3.bf16.msra.mxu1 %v15843_v24  ;;  %13882 = vmatprep.subr.mxu0 %v15849_v25 }
 0x400   :  { %13929 = vmatprep.subr.mxu1 %v15849_v25 }
 0x402   :  { %13883 = vmatpush3.msra.mxu0 %v15849_v25 }
 0x403   :  { %13930 = vmatpush3.msra.mxu1 %v15849_v25 }
 0x4d1   :  { %v13877_v30 = vpop.f32.mrb[20].mxu1 }
 0x4d2   :  { %v1717_v31 = vmul.f32 0.5, %v13877_v30  ;;  %v1707_v32 = vpop.f32.mrb[21].mxu1 }
 0x4d3   :  { %v1716_v33 = vmul.f32 0.5, %v1707_v32 }
 0x4d4   :  { %1722 = vrot.lane.b32.xlu1 %v1717_v31, %s14902_s11 }
 0x4d5   :  { %1720 = vrot.lane.b32.xlu0 %v1716_v33, %s14902_s11 }
 0x4d8   :  { %1730 = vrot.lane.b32.xlu1 %v1717_v31, %s14903_s6 }
 0x4d9   :  { %1728 = vrot.lane.b32.xlu0 %v1716_v33, %s14903_s6 }
 0x546   :  { %v1723_v34 = vpop.permute.xlu1 %1722 }
 0x547   :  { %v1721_v35 = vpop.permute.xlu0 %1720  ;;  %v1727_v36 = vmax.f32 %v1717_v31, %v1723_v34 }
 0x548   :  { %v1726_v37 = vmax.f32 %v1716_v33, %v1721_v35 }
 0x54a   :  { %v1731_v41 = vpop.permute.xlu1 %1730 }
 0x54b   :  { %v1735_v42 = vmax.f32 %v1727_v36, %v1731_v41  ;;  %v1729_v43 = vpop.permute.xlu0 %1728 }
 0x54c   :  { %v1734_v45 = vmax.f32 %v1726_v37, %v1729_v43 }
 0x54d   :  { %1746 = vrot.lane.b32.xlu1 %v1735_v42, %s14885_s1  ;;  %v1737_v10 = vsub.f32 %v1717_v31, %v1735_v42 }
 0x54e   :  { %1744 = vrot.lane.b32.xlu0 %v1734_v45, %s14885_s1  ;;  %v1736_v11 = vsub.f32 %v1716_v33, %v1734_v45 }
 0x54f   :  { %v1740_v12 = vmul.f32 1.442695, %v1737_v10 }
 0x550   :  { %v1738_v15 = vmul.f32 1.442695, %v1736_v11 }
 0x551   :  { %1758 = vrot.lane.b32.xlu1 %v1735_v42, %s14904_s13 }
 0x552   :  { %1756 = vrot.lane.b32.xlu0 %v1734_v45, %s14904_s13 }
 0x5bf   :  { %v1747_v46 = vpop.permute.xlu1 %1746 }
 0x5c0   :  { %v1751_v47 = vsub.f32 %v1717_v31, %v1747_v46  ;;  %v1745_v48 = vpop.permute.xlu0 %1744 }
 0x5c1   :  { %v1750_v49 = vsub.f32 %v1716_v33, %v1745_v48  ;;  %v1617_v48 = vld [vmem:[#allocation14] sm:$0xff] }
 0x5c2   :  { %v1754_v50 = vmul.f32 1.442695, %v1751_v47 }
 0x5c3   :  { %v1752_v51 = vmul.f32 1.442695, %v1750_v49  ;;  %v1759_v52 = vpop.permute.xlu1 %1758  ;;  %v1618_v49 = vld [vmem:[#allocation14 + $0x8] sm:$0xff] }
 0x5c4   :  { %14435 = vpow2.f32 %v1754_v50  ;;  %v1763_v53 = vsub.f32 %v1717_v31, %v1759_v52  ;;  %v1757_v54 = vpop.permute.xlu0 %1756  ;;  %v15869_v50 = vpack.c.bf16 %v1618_v49, %v1617_v48  ;;  %v1620_v52 = vld [vmem:[#allocation14 + $0x18] sm:$0xff] }
 0x5c5   :  { %14437 = vpow2.f32 %v1752_v51  ;;  %v1762_v55 = vsub.f32 %v1716_v33, %v1757_v54  ;;  %v1619_v51 = vld [vmem:[#allocation14 + $0x10] sm:$0xff] }
 0x5c6   :  { %v1766_v56 = vmul.f32 1.442695, %v1763_v53  ;;  %14061 = vmatprep.subr.bf16.mxu0 %v15869_v50  ;;  %14097 = vmatprep.subr.bf16.mxu1 %v15869_v50  ;;  %v15874_v53 = vpack.c.bf16 %v1620_v52, %v1619_v51 }
 0x5c7   :  { %v1764_v61 = vmul.f32 1.442695, %v1762_v55 }
 0x5c8   :  { %14439 = vpow2.f32 %v1766_v56 }
 0x5c9   :  { %14441 = vpow2.f32 %v1764_v61 }
 0x5ca   :  { %14443 = vpow2.f32 %v1740_v12 }
 0x5cb   :  { %14445 = vpow2.f32 %v1738_v15 }
 0x5ce   :  { %v14436_v0 = vpop.eup %14435 }
 0x5cf   :  { %v14438_v1 = vpop.eup %14437  ;;  %1772 = vrot.lane.b32.xlu1 %v14436_v0, %s14902_s11 }
 0x5d0   :  { %1770 = vrot.lane.b32.xlu0 %v14438_v1, %s14902_s11 }
 0x5d2   :  { %v14440_v5 = vpop.eup %14439 }
 0x5d3   :  { %v14442_v6 = vpop.eup %14441  ;;  %1782 = vrot.lane.b32.xlu1 %v14440_v5, %s14903_s6 }
 0x5d4   :  { %1780 = vrot.lane.b32.xlu0 %v14442_v6, %s14903_s6  ;;  %v14444_v44 = vpop.eup %14443 }
 0x5d5   :  { %v14446_v60 = vpop.eup %14445 }
 0x641   :  { %v1773_v17 = vpop.permute.xlu1 %1772 }
 0x642   :  { %v1771_v19 = vpop.permute.xlu0 %1770  ;;  %v1777_v38 = vadd.f32 %v14444_v44, %v1773_v17 }
 0x643   :  { %v1776_v3 = vadd.f32 %v14446_v60, %v1771_v19 }
 0x645   :  { %v1783_v39 = vpop.permute.xlu1 %1782 }
 0x646   :  { %v1787_v58 = vadd.f32 %v1783_v39, %v1777_v38  ;;  %v1781_v9 = vpop.permute.xlu0 %1780 }
 0x647   :  { %v1786_v13 = vadd.f32 %v1781_v9, %v1776_v3 }
 0x648   :  { %14447 = vrcp.f32 %v1787_v58 }
 0x649   :  { %14449 = vrcp.f32 %v1786_v13 }
 0x652   :  { %v14448_v28 = vpop.eup %14447 }
 0x653   :  { %v14450_v29 = vpop.eup %14449  ;;  %1796 = vrot.lane.b32.xlu1 %v14448_v28, %s14885_s1  ;;  %v1791_v30 = vmul.f32 %v14448_v28, %v14444_v44 }
 0x654   :  { %1794 = vrot.lane.b32.xlu0 %v14450_v29, %s14885_s1  ;;  %v1790_v31 = vmul.f32 %v14450_v29, %v14446_v60 }
 0x657   :  { %1804 = vrot.lane.b32.xlu1 %v14448_v28, %s14904_s13 }
 0x658   :  { %1802 = vrot.lane.b32.xlu0 %v14450_v29, %s14904_s13 }
 0x65b   :  { %1594 = vrot.lane.b32.xlu1 %v15811_v20, %s14901_s5 }
 0x65c   :  { %1592 = vrot.lane.b32.xlu0 %v15796_v4, %s14901_s5 }
 0x6c5   :  { %v1797_v32 = vpop.permute.xlu1 %1796 }
 0x6c6   :  { %v1795_v33 = vpop.permute.xlu0 %1794  ;;  %v1801_v35 = vmul.f32 %v14436_v0, %v1797_v32 }
 0x6c7   :  { %v1800_v34 = vmul.f32 %v14438_v1, %v1795_v33 }
 0x6c8   :  { %v1812_v45 = vsel %vm1810_vm3, %v1791_v30, %v1801_v35 }
 0x6c9   :  { %v1805_v36 = vpop.permute.xlu1 %1804  ;;  %v1811_v43 = vsel %vm1810_vm3, %v1790_v31, %v1800_v34 }
 0x6ca   :  { %v1809_v37 = vmul.f32 %v14440_v5, %v1805_v36  ;;  %v1803_v41 = vpop.permute.xlu0 %1802 }
 0x6cb   :  { %v1808_v42 = vmul.f32 %v14442_v6, %v1803_v41 }
 0x6cc   :  { %v1815_v47 = vsel %vm1813_vm4, %v1812_v45, %v1809_v37 }
 0x6cd   :  { %v1814_v46 = vsel %vm1813_vm4, %v1811_v43, %v1808_v42  ;;  %v1595_v54 = vpop.permute.xlu1 %1594 }
 0x6ce   :  { %13884 = vmatprep.mubr.msk.f32.mxu0 %vm1816_vm5, %v1814_v46  ;;  %v1593_v55 = vpop.permute.xlu0 %1592  ;;  %v1599_v56 = vsel %vm1320_vm1, %v15820_v26, %v1595_v54 }
 0x6cf   :  { %13885 = vmatmul.mubr.msk.f32.vlgmr.msra.gmra.mrb[20].mxu0 %vm1816_vm5, %v1815_v47  ;;  %v1598_v61 = vsel %vm1320_vm1, %v15798_v8, %v1593_v55  ;;  %v15885_v0 = vsel %vm284_vm0, %v1599_v56, %v15786_v59 }
 0x6d0   :  { %14063 = vmatpush3.bf16.msra.mxu0 %v15869_v50  ;;  %v15890_v6 = vsel %vm284_vm0, %v1598_v61, %v15788_v63 }
 0x6d1   :  { %14065 = vmatprep.subr.bf16.mxu0 %v15874_v53 }
 0x6d4   :  { %14067 = vmatpush3.bf16.msra.mxu0 %v15874_v53 }
 0x6d5   :  { %14069 = vmatprep.subr.bf16.mxu0 %v15735_v57 }
 0x7a2   :  { %v13886_v1 = vpop.f32.mrb[20].mxu0 }
 0x7a3   :  { %v1899_v5 = vmul.f32 %v13886_v1, %v15885_v0  ;;  %v1889_v10 = vpop.f32.mrb[21].mxu0 }
 0x7a4   :  { %v1898_v11 = vmul.f32 %v1889_v10, %v15890_v6 }
 0x7a5   :  { %1904 = vrot.lane.b32.xlu1 %v1899_v5, %s14901_s5 }
 0x7a6   :  { %1902 = vrot.lane.b32.xlu0 %v1898_v11, %s14901_s5 }
 0x7a9   :  { %1912 = vrot.lane.b32.xlu1 %v1899_v5, %s14896_s22 }
 0x7aa   :  { %1910 = vrot.lane.b32.xlu0 %v1898_v11, %s14896_s22 }
 0x7ad   :  { %2007 = vrot.lane.b32.xlu1 %v15811_v20, %s14880_s27 }
 0x7ae   :  { %2005 = vrot.lane.b32.xlu0 %v15796_v4, %s14880_s27 }
 0x7b1   :  { %2013 = vrot.lane.b32.xlu1 %v15811_v20, %s14896_s22 }
 0x7b2   :  { %2011 = vrot.lane.b32.xlu0 %v15796_v4, %s14896_s22 }
 0x817   :  { %v1905_v8 = vpop.permute.xlu1 %1904 }
 0x818   :  { %v1903_v26 = vpop.permute.xlu0 %1902  ;;  %v1909_v17 = vadd.f32 %v1905_v8, %v1899_v5 }
 0x819   :  { %v1908_v12 = vadd.f32 %v1903_v26, %v1898_v11 }
 0x81b   :  { %v1913_v15 = vpop.permute.xlu1 %1912 }
 0x81c   :  { %v1911_v19 = vpop.permute.xlu0 %1910  ;;  %v1917_v60 = vadd.f32 %v1913_v15, %v1909_v17 }
 0x81d   :  { %v1916_v44 = vadd.f32 %v1911_v19, %v1908_v12 }
 0x81f   :  { %13895 = vmatprep.mubr.msk.f32.mxu0 %vm1320_vm1, %v1916_v44  ;;  %v2008_v13 = vpop.permute.xlu1 %2007 }
 0x820   :  { %13896 = vmatmul.mubr.msk.f32.vlgmr.msra.gmra.mrb[22].mxu0 %vm1320_vm1, %v1917_v60  ;;  %v2006_v38 = vpop.permute.xlu0 %2005  ;;  %v2018_v14 = vsel %vm1320_vm1, %v15811_v20, %v2008_v13 }
 0x821   :  { %14071 = vmatpush3.bf16.msra.mxu0 %v15735_v57  ;;  %v2017_v3 = vsel %vm1320_vm1, %v15796_v4, %v2006_v38 }
 0x822   :  { %14073 = vmatprep.subr.bf16.mxu0 %v15740_v62 }
 0x823   :  { %v2014_v4 = vpop.permute.xlu1 %2013 }
 0x824   :  { %v2012_v39 = vpop.permute.xlu0 %2011  ;;  %v2020_v22 = vsel %vm284_vm0, %v2018_v14, %v2014_v4 }
 0x825   :  { %14075 = vmatpush3.bf16.msra.mxu0 %v15740_v62  ;;  %v2019_v58 = vsel %vm284_vm0, %v2017_v3, %v2012_v39  ;;  %v2022_v28 = vmul.f32 %v2020_v22, %v15825_v27 }
 0x826   :  { %v2021_v9 = vmul.f32 %v2019_v58, %v15809_v18  ;;  %14077 = vmatprep.subr.bf16.mxu0 %v15751_v2 }
 0x828   :  { %13922 = vmatprep.mubr.msk.f32.mxu0 %vm1634_vm2, %v2021_v9 }
 0x829   :  { %14079 = vmatpush3.bf16.msra.mxu0 %v15751_v2 }
 0x82a   :  { %14081 = vmatprep.subr.bf16.mxu0 %v15761_v7 }
 0x82d   :  { %14083 = vmatpush3.bf16.msra.mxu0 %v15761_v7 }
 0x82e   :  { %14085 = vmatprep.subr.bf16.mxu0 %v15772_v16 }
 0x831   :  { %14087 = vmatpush3.bf16.msra.mxu0 %v15772_v16 }
 0x832   :  { %14089 = vmatprep.subr.bf16.mxu0 %v15782_v23 }
 0x835   :  { %14091 = vmatpush3.bf16.msra.mxu0 %v15782_v23 }
 0x836   :  { %14129 = vmatprep.subr.bf16.mxu0 %v15843_v24 }
 0x838   :  { %13923 = vmatmul.mubr.msk.f32.vlgmr.msra.gmra.mrb[24].mxu0 %vm1634_vm2, %v2022_v28 }
 0x839   :  { %14131 = vmatpush3.bf16.msra.mxu0 %v15843_v24 }
 0x83a   :  { %13976 = vmatprep.subr.mxu0 %v15849_v25 }
 0x83d   :  { %13977 = vmatpush3.msra.mxu0 %v15849_v25 }
 0x83e   :  { %14133 = vmatprep.subr.bf16.mxu0 %v15869_v50 }
 0x8f3   :  { %v15933_v20 = vpop.f32.mrb[22].mxu0 }
 0x8f4   :  { %v15935_v29 = vpop.f32.mrb[23].mxu0 }
 0x90b   :  { %v13924_v30 = vpop.f32.mrb[24].mxu0 }
 0x90c   :  { %v2105_v31 = vmul.f32 0.5, %v13924_v30  ;;  %v2095_v32 = vpop.f32.mrb[25].mxu0 }
 0x90d   :  { %v2104_v33 = vmul.f32 0.5, %v2095_v32 }
 0x90e   :  { %2110 = vrot.lane.b32.xlu1 %v2105_v31, %s14902_s11 }
 0x90f   :  { %2108 = vrot.lane.b32.xlu0 %v2104_v33, %s14902_s11 }
 0x912   :  { %2118 = vrot.lane.b32.xlu1 %v2105_v31, %s14903_s6 }
 0x913   :  { %2116 = vrot.lane.b32.xlu0 %v2104_v33, %s14903_s6 }
 0x980   :  { %v2111_v24 = vpop.permute.xlu1 %2110 }
 0x981   :  { %v2109_v25 = vpop.permute.xlu0 %2108  ;;  %v2115_v34 = vmax.f32 %v2105_v31, %v2111_v24 }
 0x982   :  { %v2114_v35 = vmax.f32 %v2104_v33, %v2109_v25 }
 0x984   :  { %v2119_v36 = vpop.permute.xlu1 %2118 }
 0x985   :  { %v2123_v37 = vmax.f32 %v2115_v34, %v2119_v36  ;;  %v2117_v41 = vpop.permute.xlu0 %2116 }
 0x986   :  { %v2122_v42 = vmax.f32 %v2114_v35, %v2117_v41 }
 0x987   :  { %2134 = vrot.lane.b32.xlu1 %v2123_v37, %s14885_s1  ;;  %v2125_v8 = vsub.f32 %v2105_v31, %v2123_v37 }
 0x988   :  { %2132 = vrot.lane.b32.xlu0 %v2122_v42, %s14885_s1  ;;  %v2124_v26 = vsub.f32 %v2104_v33, %v2122_v42 }
 0x989   :  { %v2128_v12 = vmul.f32 1.442695, %v2125_v8 }
 0x98a   :  { %v2126_v15 = vmul.f32 1.442695, %v2124_v26 }
 0x98b   :  { %2146 = vrot.lane.b32.xlu1 %v2123_v37, %s14904_s13 }
 0x98c   :  { %2144 = vrot.lane.b32.xlu0 %v2122_v42, %s14904_s13 }
 0x9f9   :  { %v2135_v43 = vpop.permute.xlu1 %2134 }
 0x9fa   :  { %v2139_v45 = vsub.f32 %v2105_v31, %v2135_v43  ;;  %v2133_v46 = vpop.permute.xlu0 %2132 }
 0x9fb   :  { %v2138_v47 = vsub.f32 %v2104_v33, %v2133_v46 }
 0x9fc   :  { %v2142_v48 = vmul.f32 1.442695, %v2139_v45 }
 0x9fd   :  { %v2140_v49 = vmul.f32 1.442695, %v2138_v47  ;;  %v2147_v51 = vpop.permute.xlu1 %2146 }
 0x9fe   :  { %14451 = vpow2.f32 %v2142_v48  ;;  %v2151_v52 = vsub.f32 %v2105_v31, %v2147_v51  ;;  %v2145_v54 = vpop.permute.xlu0 %2144 }
 0x9ff   :  { %14453 = vpow2.f32 %v2140_v49  ;;  %v2150_v55 = vsub.f32 %v2104_v33, %v2145_v54 }
 0xa00   :  { %v2154_v56 = vmul.f32 1.442695, %v2151_v52 }
 0xa01   :  { %v2152_v61 = vmul.f32 1.442695, %v2150_v55 }
 0xa02   :  { %14455 = vpow2.f32 %v2154_v56 }
 0xa03   :  { %14457 = vpow2.f32 %v2152_v61 }
 0xa04   :  { %14459 = vpow2.f32 %v2128_v12 }
 0xa05   :  { %14461 = vpow2.f32 %v2126_v15 }
 0xa08   :  { %v14452_v1 = vpop.eup %14451 }
 0xa09   :  { %v14454_v5 = vpop.eup %14453  ;;  %2160 = vrot.lane.b32.xlu1 %v14452_v1, %s14902_s11 }
 0xa0a   :  { %2158 = vrot.lane.b32.xlu0 %v14454_v5, %s14902_s11 }
 0xa0c   :  { %v14456_v10 = vpop.eup %14455 }
 0xa0d   :  { %v14458_v11 = vpop.eup %14457  ;;  %2170 = vrot.lane.b32.xlu1 %v14456_v10, %s14903_s6 }
 0xa0e   :  { %2168 = vrot.lane.b32.xlu0 %v14458_v11, %s14903_s6  ;;  %v14460_v44 = vpop.eup %14459 }
 0xa0f   :  { %v14462_v60 = vpop.eup %14461 }
 0xa7b   :  { %v2161_v17 = vpop.permute.xlu1 %2160 }
 0xa7c   :  { %v2159_v19 = vpop.permute.xlu0 %2158  ;;  %v2165_v38 = vadd.f32 %v14460_v44, %v2161_v17 }
 0xa7d   :  { %v2164_v3 = vadd.f32 %v14462_v60, %v2159_v19 }
 0xa7f   :  { %v2171_v39 = vpop.permute.xlu1 %2170 }
 0xa80   :  { %v2175_v58 = vadd.f32 %v2171_v39, %v2165_v38  ;;  %v2169_v9 = vpop.permute.xlu0 %2168 }
 0xa81   :  { %v2174_v13 = vadd.f32 %v2169_v9, %v2164_v3 }
 0xa82   :  { %14463 = vrcp.f32 %v2175_v58 }
 0xa83   :  { %14465 = vrcp.f32 %v2174_v13 }
 0xa8c   :  { %v14464_v4 = vpop.eup %14463 }
 0xa8d   :  { %v14466_v14 = vpop.eup %14465  ;;  %2184 = vrot.lane.b32.xlu1 %v14464_v4, %s14885_s1  ;;  %v2179_v22 = vmul.f32 %v14464_v4, %v14460_v44 }
 0xa8e   :  { %2182 = vrot.lane.b32.xlu0 %v14466_v14, %s14885_s1  ;;  %v2178_v28 = vmul.f32 %v14466_v14, %v14462_v60 }
 0xa91   :  { %2192 = vrot.lane.b32.xlu1 %v14464_v4, %s14904_s13 }
 0xa92   :  { %2190 = vrot.lane.b32.xlu0 %v14466_v14, %s14904_s13 }
 0xaff   :  { %v2185_v30 = vpop.permute.xlu1 %2184 }
 0xb00   :  { %v2183_v31 = vpop.permute.xlu0 %2182  ;;  %v2189_v33 = vmul.f32 %v14452_v1, %v2185_v30  ;;  %v2390_v1 = vsel %vm1320_vm1, %v15788_v63, %v15803_v40 }
 0xb01   :  { %v2188_v32 = vmul.f32 %v14454_v5, %v2183_v31 }
 0xb02   :  { %v2199_v37 = vsel %vm1810_vm3, %v2179_v22, %v2189_v33 }
 0xb03   :  { %v2193_v24 = vpop.permute.xlu1 %2192  ;;  %v2198_v36 = vsel %vm1810_vm3, %v2178_v28, %v2188_v32 }
 0xb04   :  { %v2197_v25 = vmul.f32 %v14456_v10, %v2193_v24  ;;  %v2191_v34 = vpop.permute.xlu0 %2190 }
 0xb05   :  { %v2196_v35 = vmul.f32 %v14458_v11, %v2191_v34 }
 0xb06   :  { %v2201_v42 = vsel %vm1813_vm4, %v2199_v37, %v2197_v25 }
 0xb07   :  { %v2200_v41 = vsel %vm1813_vm4, %v2198_v36, %v2196_v35 }
 0xb08   :  { %13931 = vmatprep.mubr.msk.f32.mxu1 %vm1816_vm5, %v2200_v41 }
 0xb09   :  { %13932 = vmatmul.mubr.msk.f32.vlgmr.msra.gmra.mrb[22].mxu1 %vm1816_vm5, %v2201_v42 }
 0xb0a   :  { %14099 = vmatpush3.bf16.msra.mxu1 %v15869_v50 }
 0xb0b   :  { %14101 = vmatprep.subr.bf16.mxu1 %v15874_v53 }
 0xb0e   :  { %14103 = vmatpush3.bf16.msra.mxu1 %v15874_v53 }
 0xb0f   :  { %14105 = vmatprep.subr.bf16.mxu1 %v15735_v57 }
 0xbdc   :  { %v13933_v43 = vpop.f32.mrb[22].mxu1 }
 0xbdd   :  { %v2284_v45 = vmul.f32 %v13933_v43, %v15885_v0  ;;  %v2274_v46 = vpop.f32.mrb[23].mxu1 }
 0xbde   :  { %v2283_v47 = vmul.f32 %v2274_v46, %v15890_v6 }
 0xbdf   :  { %2289 = vrot.lane.b32.xlu1 %v2284_v45, %s14901_s5 }
 0xbe0   :  { %2287 = vrot.lane.b32.xlu0 %v2283_v47, %s14901_s5 }
 0xbe3   :  { %2297 = vrot.lane.b32.xlu1 %v2284_v45, %s14896_s22 }
 0xbe4   :  { %2295 = vrot.lane.b32.xlu0 %v2283_v47, %s14896_s22 }
 0xbe7   :  { %2386 = vrot.lane.b32.xlu1 %v15786_v59, %s14896_s22 }
 0xbe8   :  { %2384 = vrot.lane.b32.xlu0 %v15788_v63, %s14896_s22  ;;  %v2391_v63 = vsel %vm1320_vm1, %v15786_v59, %v15813_v21 }
 0xc51   :  { %v2290_v48 = vpop.permute.xlu1 %2289 }
 0xc52   :  { %v2288_v49 = vpop.permute.xlu0 %2287  ;;  %v2294_v54 = vadd.f32 %v2290_v48, %v2284_v45 }
 0xc53   :  { %v2293_v51 = vadd.f32 %v2288_v49, %v2283_v47 }
 0xc55   :  { %v2298_v52 = vpop.permute.xlu1 %2297 }
 0xc56   :  { %v2296_v55 = vpop.permute.xlu0 %2295  ;;  %v2302_v61 = vadd.f32 %v2298_v52, %v2294_v54 }
 0xc57   :  { %v2301_v56 = vadd.f32 %v2296_v55, %v2293_v51 }
 0xc59   :  { %13942 = vmatprep.mubr.msk.f32.mxu1 %vm1320_vm1, %v2301_v56 }
 0xc5a   :  { %13943 = vmatmul.mubr.msk.f32.vlgmr.msra.gmra.mrb[24].mxu1 %vm1320_vm1, %v2302_v61  ;;  %v2385_v5 = vpop.permute.xlu0 %2384 }
 0xc5b   :  { %14107 = vmatpush3.bf16.msra.mxu1 %v15735_v57  ;;  %v2392_v10 = vsel %vm284_vm0, %v2390_v1, %v2385_v5  ;;  %v2387_v57 = vpop.permute.xlu1 %2386 }
 0xc5c   :  { %v2394_v11 = vmul.f32 %v2392_v10, %v15809_v18  ;;  %14109 = vmatprep.subr.bf16.mxu1 %v15740_v62 }
 0xc5e   :  { %13969 = vmatprep.mubr.msk.f32.mxu1 %vm1634_vm2, %v2394_v11 }
 0xc5f   :  { %14111 = vmatpush3.bf16.msra.mxu1 %v15740_v62  ;;  %v2393_v62 = vsel %vm284_vm0, %v2391_v63, %v2387_v57 }
 0xc60   :  { %14113 = vmatprep.subr.bf16.mxu1 %v15751_v2 }
 0xc63   :  { %14115 = vmatpush3.bf16.msra.mxu1 %v15751_v2  ;;  %v2395_v2 = vmul.f32 %v2393_v62, %v15825_v27 }
 0xc64   :  { %14117 = vmatprep.subr.bf16.mxu1 %v15761_v7 }
 0xc67   :  { %14119 = vmatpush3.bf16.msra.mxu1 %v15761_v7  ;;  %v15998_v7 = vld [vmem:[#allocation16] ss:$0 sm:$0xff] }
 0xc68   :  { %14121 = vmatprep.subr.bf16.mxu1 %v15772_v16 }
 0xc6b   :  { %14123 = vmatpush3.bf16.msra.mxu1 %v15772_v16 }
 0xc6c   :  { %14125 = vmatprep.subr.bf16.mxu1 %v15782_v23 }
 0xc6f   :  { %14127 = vmatpush3.bf16.msra.mxu1 %v15782_v23 }
 0xc72   :  { %13970 = vmatmul.mubr.msk.f32.vlgmr.msra.gmra.mrb[26].mxu1 %vm1634_vm2, %v2395_v2 }
 0xd2d   :  { %v13944_v40 = vpop.f32.mrb[24].mxu1 }
 0xd2e   :  { %v16001_v18 = vadd.f32 %v13944_v40, %v15998_v7  ;;  %v2375_v16 = vpop.f32.mrb[25].mxu1 }
 0xd2f   :  { %v16004_v8 = vadd.f32 %v15998_v7, %v2375_v16 }
 0xd31   :  { %v14297_v59 = vpack.i.bf16 %v16001_v18, %v16004_v8  ;;  %v2794_v18 = vld [vmem:[#allocation19 + $0x80] sm:$0xff] }
 0xd32   :  { %v2802_v8 = vld [vmem:[#allocation19 + $0xc0] sm:$0xff] }
 0xd45   :  { %v13971_v21 = vpop.f32.mrb[26].mxu1 }
 0xd46   :  { %v2478_v26 = vmul.f32 0.5, %v13971_v21  ;;  %v2468_v23 = vpop.f32.mrb[27].mxu1 }
 0xd47   :  { %v2477_v12 = vmul.f32 0.5, %v2468_v23 }
 0xd48   :  { %2483 = vrot.lane.b32.xlu1 %v2478_v26, %s14902_s11 }
 0xd49   :  { %2481 = vrot.lane.b32.xlu0 %v2477_v12, %s14902_s11 }
 0xd4c   :  { %2491 = vrot.lane.b32.xlu1 %v2478_v26, %s14903_s6 }
 0xd4d   :  { %2489 = vrot.lane.b32.xlu0 %v2477_v12, %s14903_s6 }
 0xdba   :  { %v2484_v27 = vpop.permute.xlu1 %2483 }
 0xdbb   :  { %v2482_v15 = vpop.permute.xlu0 %2481  ;;  %v2488_v17 = vmax.f32 %v2478_v26, %v2484_v27 }
 0xdbc   :  { %v2487_v19 = vmax.f32 %v2477_v12, %v2482_v15 }
 0xdbe   :  { %v2492_v44 = vpop.permute.xlu1 %2491 }
 0xdbf   :  { %v2496_v60 = vmax.f32 %v2488_v17, %v2492_v44  ;;  %v2490_v38 = vpop.permute.xlu0 %2489 }
 0xdc0   :  { %v2495_v3 = vmax.f32 %v2487_v19, %v2490_v38 }
 0xdc1   :  { %2507 = vrot.lane.b32.xlu1 %v2496_v60, %s14885_s1  ;;  %v2498_v36 = vsub.f32 %v2478_v26, %v2496_v60 }
 0xdc2   :  { %2505 = vrot.lane.b32.xlu0 %v2495_v3, %s14885_s1  ;;  %v2497_v37 = vsub.f32 %v2477_v12, %v2495_v3 }
 0xdc3   :  { %v2501_v41 = vmul.f32 1.442695, %v2498_v36 }
 0xdc4   :  { %v2499_v42 = vmul.f32 1.442695, %v2497_v37 }
 0xdc5   :  { %2519 = vrot.lane.b32.xlu1 %v2496_v60, %s14904_s13 }
 0xdc6   :  { %2517 = vrot.lane.b32.xlu0 %v2495_v3, %s14904_s13 }
 0xe33   :  { %v2508_v39 = vpop.permute.xlu1 %2507 }
 0xe34   :  { %v2512_v58 = vsub.f32 %v2478_v26, %v2508_v39  ;;  %v2506_v9 = vpop.permute.xlu0 %2505  ;;  %v2778_v39 = vld [vmem:[#allocation19] sm:$0xff] }
 0xe35   :  { %v2511_v13 = vsub.f32 %v2477_v12, %v2506_v9  ;;  %v2779_v9 = vld [vmem:[#allocation19 + $0x8] sm:$0xff] }
 0xe36   :  { %v2515_v4 = vmul.f32 1.442695, %v2512_v58  ;;  %v2786_v58 = vld [vmem:[#allocation19 + $0x40] sm:$0xff] }
 0xe37   :  { %v2513_v14 = vmul.f32 1.442695, %v2511_v13  ;;  %v2520_v22 = vpop.permute.xlu1 %2519  ;;  %v12239_v13 = vcombine.low %v2778_v39, %v2786_v58 }
 0xe38   :  { %14467 = vpow2.f32 %v2515_v4  ;;  %v2524_v28 = vsub.f32 %v2478_v26, %v2520_v22  ;;  %v2518_v30 = vpop.permute.xlu0 %2517  ;;  %v12240_v4 = vcombine.high %v2778_v39, %v2786_v58 }
 0xe39   :  { %14469 = vpow2.f32 %v2513_v14  ;;  %v2523_v31 = vsub.f32 %v2477_v12, %v2518_v30  ;;  %v2787_v14 = vld [vmem:[#allocation19 + $0x48] sm:$0xff] }
 0xe3a   :  { %v2527_v32 = vmul.f32 1.442695, %v2524_v28  ;;  %v12242_v22 = vcombine.high %v2779_v9, %v2787_v14  ;;  %v12256_v28 = vcombine.high %v2794_v18, %v2802_v8  ;;  %v2795_v30 = vld [vmem:[#allocation19 + $0x88] sm:$0xff] }
 0xe3b   :  { %v2525_v33 = vmul.f32 1.442695, %v2523_v31  ;;  %v2803_v31 = vld [vmem:[#allocation19 + $0xc8] sm:$0xff] }
 0xe3c   :  { %14471 = vpow2.f32 %v2527_v32  ;;  %v2810_v32 = vld [vmem:[#allocation19 + $0x100] sm:$0xff]  ;;  %3484 = vmatprep.subr.bf16.mxu1 %v12242_v22  ;;  %v12257_v36 = vcombine.low %v2795_v30, %v2803_v31 }
 0xe3d   :  { %14473 = vpow2.f32 %v2525_v33  ;;  %v12258_v33 = vcombine.high %v2795_v30, %v2803_v31  ;;  %v2797_v30 = vld [vmem:[#allocation19 + $0x98] sm:$0xff] }
 0xe3e   :  { %14475 = vpow2.f32 %v2501_v41  ;;  %v2805_v31 = vld [vmem:[#allocation19 + $0xd8] sm:$0xff] }
 0xe3f   :  { %14477 = vpow2.f32 %v2499_v42  ;;  %v2826_v42 = vld [vmem:[#allocation19 + $0x180] sm:$0xff] }
 0xe42   :  { %v14468_v24 = vpop.eup %14467 }
 0xe43   :  { %v14470_v25 = vpop.eup %14469  ;;  %2533 = vrot.lane.b32.xlu1 %v14468_v24, %s14902_s11 }
 0xe44   :  { %2531 = vrot.lane.b32.xlu0 %v14470_v25, %s14902_s11 }
 0xe46   :  { %v14472_v34 = vpop.eup %14471 }
 0xe47   :  { %v14474_v35 = vpop.eup %14473  ;;  %2543 = vrot.lane.b32.xlu1 %v14472_v34, %s14903_s6 }
 0xe48   :  { %2541 = vrot.lane.b32.xlu0 %v14474_v35, %s14903_s6  ;;  %v14476_v46 = vpop.eup %14475 }
 0xe49   :  { %v14478_v47 = vpop.eup %14477 }
 0xeb5   :  { %v2534_v43 = vpop.permute.xlu1 %2533 }
 0xeb6   :  { %v2532_v45 = vpop.permute.xlu0 %2531  ;;  %v2538_v48 = vadd.f32 %v14476_v46, %v2534_v43  ;;  %v2834_v43 = vld [vmem:[#allocation19 + $0x1c0] sm:$0xff] }
 0xeb7   :  { %v2537_v49 = vadd.f32 %v14478_v47, %v2532_v45  ;;  %v2827_v45 = vld [vmem:[#allocation19 + $0x188] sm:$0xff] }
 0xeb9   :  { %v2544_v51 = vpop.permute.xlu1 %2543 }
 0xeba   :  { %v2548_v52 = vadd.f32 %v2544_v51, %v2538_v48  ;;  %v2542_v54 = vpop.permute.xlu0 %2541 }
 0xebb   :  { %v2547_v55 = vadd.f32 %v2542_v54, %v2537_v49  ;;  %v12288_v49 = vcombine.high %v2826_v42, %v2834_v43  ;;  %v2850_v54 = vld [vmem:[#allocation19 + $0x240] sm:$0xff] }
 0xebc   :  { %14479 = vrcp.f32 %v2548_v52  ;;  %v2842_v52 = vld [vmem:[#allocation19 + $0x200] sm:$0xff] }
 0xebd   :  { %14481 = vrcp.f32 %v2547_v55  ;;  %v2843_v55 = vld [vmem:[#allocation19 + $0x208] sm:$0xff] }
 0xec6   :  { %v14480_v56 = vpop.eup %14479 }
 0xec7   :  { %v14482_v61 = vpop.eup %14481  ;;  %2557 = vrot.lane.b32.xlu1 %v14480_v56, %s14885_s1  ;;  %v2552_v1 = vmul.f32 %v14480_v56, %v14476_v46  ;;  %v2835_v46 = vld [vmem:[#allocation19 + $0x1c8] sm:$0xff] }
 0xec8   :  { %2555 = vrot.lane.b32.xlu0 %v14482_v61, %s14885_s1  ;;  %v2551_v5 = vmul.f32 %v14482_v61, %v14478_v47  ;;  %v12290_v51 = vcombine.high %v2827_v45, %v2835_v46 }
 0xecb   :  { %2565 = vrot.lane.b32.xlu1 %v14480_v56, %s14904_s13  ;;  %v2851_v56 = vld [vmem:[#allocation19 + $0x248] sm:$0xff] }
 0xecc   :  { %2563 = vrot.lane.b32.xlu0 %v14482_v61, %s14904_s13  ;;  %v12287_v61 = vcombine.low %v2826_v42, %v2834_v43  ;;  %v12261_v42 = vcombine.low %v2797_v30, %v2805_v31 }
 0xf39   :  { %v2558_v10 = vpop.permute.xlu1 %2557 }
 0xf3a   :  { %v2556_v11 = vpop.permute.xlu0 %2555  ;;  %v2562_v63 = vmul.f32 %v14468_v24, %v2558_v10  ;;  %v2818_v24 = vld [vmem:[#allocation19 + $0x140] sm:$0xff]  ;;  %v12306_v10 = vcombine.high %v2843_v55, %v2851_v56 }
 0xf3b   :  { %v2561_v57 = vmul.f32 %v14470_v25, %v2556_v11  ;;  %v2811_v25 = vld [vmem:[#allocation19 + $0x108] sm:$0xff]  ;;  %v12272_v37 = vcombine.high %v2810_v32, %v2818_v24  ;;  %v12271_v47 = vcombine.low %v2810_v32, %v2818_v24  ;;  %v12303_v11 = vcombine.low %v2842_v52, %v2850_v54 }
 0xf3c   :  { %v2572_v26 = vsel %vm1810_vm3, %v2552_v1, %v2562_v63  ;;  %v12289_v1 = vcombine.low %v2827_v45, %v2835_v46  ;;  %v2858_v63 = vld [vmem:[#allocation19 + $0x280] sm:$0xff]  ;;  %v2828_v46 = vld [vmem:[#allocation19 + $0x190] sm:$0xff] }
 0xf3d   :  { %v2566_v62 = vpop.permute.xlu1 %2565  ;;  %v2571_v21 = vsel %vm1810_vm3, %v2551_v5, %v2561_v57  ;;  %v12304_v5 = vcombine.high %v2842_v52, %v2850_v54  ;;  %v12305_v57 = vcombine.low %v2843_v55, %v2851_v56  ;;  %v2844_v56 = vld [vmem:[#allocation19 + $0x210] sm:$0xff] }
 0xf3e   :  { %v2570_v2 = vmul.f32 %v14472_v34, %v2566_v62  ;;  %v2564_v40 = vpop.permute.xlu0 %2563  ;;  %v2819_v34 = vld [vmem:[#allocation19 + $0x148] sm:$0xff]  ;;  %v2866_v62 = vld [vmem:[#allocation19 + $0x2c0] sm:$0xff] }
 0xf3f   :  { %v2569_v16 = vmul.f32 %v14474_v35, %v2564_v40  ;;  %v12255_v35 = vcombine.low %v2794_v18, %v2802_v8  ;;  %v12274_v41 = vcombine.high %v2811_v25, %v2819_v34  ;;  %v12273_v48 = vcombine.low %v2811_v25, %v2819_v34  ;;  %v2796_v8 = vld [vmem:[#allocation19 + $0x90] sm:$0xff] }
 0xf40   :  { %v2574_v12 = vsel %vm1813_vm4, %v2572_v26, %v2570_v2  ;;  %v2859_v2 = vld [vmem:[#allocation19 + $0x288] sm:$0xff]  ;;  %v12320_v40 = vcombine.high %v2858_v63, %v2866_v62 }
 0xf41   :  { %v2573_v23 = vsel %vm1813_vm4, %v2571_v21, %v2569_v16  ;;  %v2867_v16 = vld [vmem:[#allocation19 + $0x2c8] sm:$0xff]  ;;  %v12319_v21 = vcombine.low %v2858_v63, %v2866_v62  ;;  %v2860_v62 = vld [vmem:[#allocation19 + $0x290] sm:$0xff] }
 0xf42   :  { %13978 = vmatprep.mubr.msk.f32.mxu0 %vm1816_vm5, %v2573_v23  ;;  %v12321_v26 = vcombine.low %v2859_v2, %v2867_v16  ;;  %v12322_v23 = vcombine.high %v2859_v2, %v2867_v16  ;;  %v2868_v2 = vld [vmem:[#allocation19 + $0x2d0] sm:$0xff]  ;;  %v2869_v16 = vld [vmem:[#allocation19 + $0x2d8] sm:$0xff] }
 0xf43   :  { %13979 = vmatmul.mubr.msk.f32.vlgmr.msra.gmra.mrb[26].mxu0 %vm1816_vm5, %v2574_v12  ;;  %v2780_v12 = vld [vmem:[#allocation19 + $0x10] sm:$0xff] }
 0xf44   :  { %14135 = vmatpush3.bf16.msra.mxu0 %v15869_v50 }
 0xf45   :  { %14137 = vmatprep.subr.bf16.mxu0 %v15874_v53 }
 0xf48   :  { %14139 = vmatpush3.bf16.msra.mxu0 %v15874_v53 }
 0xf49   :  { %3441 = vmatprep.subr.bf16.mxu0 %v12240_v4  ;;  %v2002_v4 = vadd.f32 %v15933_v20, %v15998_v7 }
0x1016   :  { %v13980_v27 = vpop.f32.mrb[26].mxu0 }
0x1017   :  { %v2657_v15 = vmul.f32 %v13980_v27, %v15885_v0  ;;  %v2647_v17 = vpop.f32.mrb[27].mxu0  ;;  %v2788_v27 = vld [vmem:[#allocation19 + $0x50] sm:$0xff] }
0x1018   :  { %v2656_v19 = vmul.f32 %v2647_v17, %v15890_v6  ;;  %v12244_v17 = vcombine.high %v2780_v12, %v2788_v27 }
0x1019   :  { %2662 = vrot.lane.b32.xlu1 %v2657_v15, %s14901_s5 }
0x101a   :  { %2660 = vrot.lane.b32.xlu0 %v2656_v19, %s14901_s5 }
0x101d   :  { %2670 = vrot.lane.b32.xlu1 %v2657_v15, %s14896_s22 }
0x101e   :  { %2668 = vrot.lane.b32.xlu0 %v2656_v19, %s14896_s22 }
0x1022   :  { %14298 = vrot.lane.b32.xlu0 %v14297_v59, %s14880_s27  ;;  %v12241_v59 = vcombine.low %v2779_v9, %v2787_v14  ;;  %v1997_v14 = vadd.f32 %v15998_v7, %v15935_v29  ;;  %v2812_v29 = vld [vmem:[#allocation19 + $0x110] sm:$0xff]  ;;  %s14906_s27 = smov [#allocation28]  }
0x1024   :  { %3485 = vmatpush1.bf16.msra.mxu1 %v12241_v59 }
0x1025   :  { %3486 = vmatprep.subr.bf16.mxu1 %v12258_v33 }
0x1028   :  { %3487 = vmatpush1.bf16.msra.mxu1 %v12257_v36  ;;  %v2813_v36 = vld [vmem:[#allocation19 + $0x118] sm:$0xff] }
0x1029   :  { %3488 = vmatprep.subr.bf16.mxu1 %v12274_v41 }
0x102c   :  { %3489 = vmatpush1.bf16.msra.mxu1 %v12273_v48  ;;  %v2829_v48 = vld [vmem:[#allocation19 + $0x198] sm:$0xff] }
0x102d   :  { %3490 = vmatprep.subr.bf16.mxu1 %v12290_v51 }
0x1030   :  { %3491 = vmatpush1.bf16.msra.mxu1 %v12289_v1  ;;  %v2845_v1 = vld [vmem:[#allocation19 + $0x218] sm:$0xff] }
0x1031   :  { %3492 = vmatprep.subr.bf16.mxu1 %v12306_v10 }
0x1034   :  { %3493 = vmatpush1.bf16.msra.mxu1 %v12305_v57 }
0x1035   :  { %3494 = vmatprep.subr.bf16.mxu1 %v12322_v23  ;;  %v12324_v23 = vcombine.high %v2860_v62, %v2868_v2 }
0x1038   :  { %3495 = vmatpush1.bf16.msra.mxu1 %v12321_v26 }
0x108b   :  { %v2663_v50 = vpop.permute.xlu1 %2662 }
0x108c   :  { %v2661_v53 = vpop.permute.xlu0 %2660  ;;  %v2667_v60 = vadd.f32 %v2663_v50, %v2657_v15  ;;  %v2781_v15 = vld [vmem:[#allocation19 + $0x18] sm:$0xff]  ;;  %v12243_v50 = vcombine.low %v2780_v12, %v2788_v27  ;;  %v2782_v27 = vld [vmem:[#allocation19 + $0x20] sm:$0xff] }
0x108d   :  { %v2666_v44 = vadd.f32 %v2661_v53, %v2656_v19  ;;  %v2789_v19 = vld [vmem:[#allocation19 + $0x58] sm:$0xff] }
0x108e   :  { %v12245_v53 = vcombine.low %v2781_v15, %v2789_v19 }
0x108f   :  { %v2671_v0 = vpop.permute.xlu1 %2670 }
0x1090   :  { %v2669_v38 = vpop.permute.xlu0 %2668  ;;  %v2675_v3 = vadd.f32 %v2671_v0, %v2667_v60  ;;  %v14905_v0 = vmov 0  }
0x1091   :  { %v2674_v6 = vadd.f32 %v2669_v38, %v2666_v44  ;;  %v12246_v44 = vcombine.high %v2781_v15, %v2789_v19  ;;  %3516 = vmatprep.mubr.bf16.mxu1 %v14905_v0  ;;  %v2790_v15 = vld [vmem:[#allocation19 + $0x60] sm:$0xff]  ;;  %v2791_v19 = vld [vmem:[#allocation19 + $0x68] sm:$0xff] }
0x1093   :  { %13989 = vmatprep.mubr.msk.f32.mxu0 %vm1320_vm1, %v2674_v6  ;;  %3570 = vmatprep.subr.bf16.mxu1 %v12246_v44  ;;  %v12248_v44 = vcombine.high %v2782_v27, %v2790_v15 }
0x1094   :  { %13990 = vmatmul.mubr.msk.f32.vlgmr.msra.gmra.mrb[28].mxu0 %vm1320_vm1, %v2675_v3  ;;  %v14299_v58 = vpop.permute.xlu0 %14298 }
0x1095   :  { %3442 = vmatpush1.bf16.msra.mxu0 %v12239_v13  ;;  %3473 = vmatprep.mubr.bf16.mxu0 %v14905_v0  ;;  %v14301_v9 = vunpack.i.h.bf16 %v14299_v58  ;;  %v14300_v13 = vunpack.i.l.bf16 %v14299_v58  ;;  %v12247_v58 = vcombine.low %v2782_v27, %v2790_v15 }
0x1096   :  { %3443 = vmatprep.subr.bf16.mxu0 %v12256_v28  ;;  %v2804_v28 = vld [vmem:[#allocation19 + $0xd0] sm:$0xff] }
0x1097   :  { %v2774_v32 = vsel %vm1320_vm1, %v2002_v4, %v14301_v9  ;;  %v2773_v33 = vsel %vm1320_vm1, %v1997_v14, %v14300_v13  ;;  %v12260_v20 = vcombine.high %v2796_v8, %v2804_v28  ;;  %v12259_v41 = vcombine.low %v2796_v8, %v2804_v28  ;;  %v2814_v14 = vld [vmem:[#allocation19 + $0x120] sm:$0xff]  ;;  %v2815_v8 = vld [vmem:[#allocation19 + $0x128] sm:$0xff] }
0x1099   :  { %3444 = vmatpush1.bf16.msra.mxu0 %v12255_v35  ;;  %v12262_v35 = vcombine.high %v2797_v30, %v2805_v31 }
0x109a   :  { %3445 = vmatprep.subr.bf16.mxu0 %v12272_v37  ;;  %v2821_v37 = vld [vmem:[#allocation19 + $0x158] sm:$0xff] }
0x109b   :  { %v12278_v45 = vcombine.high %v2813_v36, %v2821_v37  ;;  %v12277_v52 = vcombine.low %v2813_v36, %v2821_v37  ;;  %v2846_v36 = vld [vmem:[#allocation19 + $0x220] sm:$0xff] }
0x109c   :  { %v2854_v37 = vld [vmem:[#allocation19 + $0x260] sm:$0xff] }
0x109d   :  { %3446 = vmatpush1.bf16.msra.mxu0 %v12271_v47  ;;  %v2836_v47 = vld [vmem:[#allocation19 + $0x1d0] sm:$0xff] }
0x109e   :  { %3447 = vmatprep.subr.bf16.mxu0 %v12288_v49  ;;  %v2837_v49 = vld [vmem:[#allocation19 + $0x1d8] sm:$0xff]  ;;  %v12292_v54 = vcombine.high %v2828_v46, %v2836_v47  ;;  %v12291_v10 = vcombine.low %v2828_v46, %v2836_v47  ;;  %v12312_v46 = vcombine.high %v2846_v36, %v2854_v37 }
0x109f   :  { %v12294_v55 = vcombine.high %v2829_v48, %v2837_v49 }
0x10a1   :  { %3448 = vmatpush1.bf16.msra.mxu0 %v12287_v61  ;;  %v2852_v61 = vld [vmem:[#allocation19 + $0x250] sm:$0xff] }
0x10a2   :  { %3449 = vmatprep.subr.bf16.mxu0 %v12304_v5  ;;  %v2853_v5 = vld [vmem:[#allocation19 + $0x258] sm:$0xff]  ;;  %v12308_v57 = vcombine.high %v2844_v56, %v2852_v61 }
0x10a3   :  { %v12310_v63 = vcombine.high %v2845_v1, %v2853_v5  ;;  %v12309_v26 = vcombine.low %v2845_v1, %v2853_v5  ;;  %v2784_v1 = vld [vmem:[#allocation19 + $0x30] sm:$0xff] }
0x10a4   :  { %v2792_v5 = vld [vmem:[#allocation19 + $0x70] sm:$0xff] }
0x10a5   :  { %3450 = vmatpush1.bf16.msra.mxu0 %v12303_v11  ;;  %v12293_v11 = vcombine.low %v2829_v48, %v2837_v49  ;;  %v2862_v48 = vld [vmem:[#allocation19 + $0x2a0] sm:$0xff] }
0x10a6   :  { %3451 = vmatprep.subr.bf16.mxu0 %v12320_v40  ;;  %v2861_v40 = vld [vmem:[#allocation19 + $0x298] sm:$0xff]  ;;  %v2870_v49 = vld [vmem:[#allocation19 + $0x2e0] sm:$0xff] }
0x10a7   :  { %v12326_v12 = vcombine.high %v2861_v40, %v2869_v16 }
0x10a9   :  { %3452 = vmatpush1.bf16.msra.mxu0 %v12319_v21  ;;  %v12307_v21 = vcombine.low %v2844_v56, %v2852_v61  ;;  %v12328_v56 = vcombine.high %v2862_v48, %v2870_v49 }
0x10aa   :  { %3527 = vmatprep.subr.bf16.mxu0 %v12244_v17  ;;  %v2783_v17 = vld [vmem:[#allocation19 + $0x28] sm:$0xff] }
0x10ab   :  { %v12249_v9 = vcombine.low %v2783_v17, %v2791_v19 }
0x1167   :  { %v13991_v60 = vpop.f32.mrb[28].mxu0 }
0x1168   :  { %v2754_v38 = vadd.f32 %v13991_v60, %v15998_v7  ;;  %v2748_v6 = vpop.f32.mrb[29].mxu0  ;;  %v12250_v60 = vcombine.high %v2783_v17, %v2791_v19  ;;  %v2816_v17 = vld [vmem:[#allocation19 + $0x130] sm:$0xff] }
0x1169   :  { %v2749_v3 = vadd.f32 %v15998_v7, %v2748_v6  ;;  %v2820_v7 = vld [vmem:[#allocation19 + $0x150] sm:$0xff]  ;;  %v2806_v6 = vld [vmem:[#allocation19 + $0xe0] sm:$0xff] }
0x116a   :  { %v12276_v43 = vcombine.high %v2812_v29, %v2820_v7  ;;  %v12275_v51 = vcombine.low %v2812_v29, %v2820_v7  ;;  %v2824_v19 = vld [vmem:[#allocation19 + $0x170] sm:$0xff] }
0x116b   :  { %v14302_v39 = vpack.i.bf16 %v2754_v38, %v2749_v3  ;;  %v2798_v38 = vld [vmem:[#allocation19 + $0xa0] sm:$0xff]  ;;  %v2799_v3 = vld [vmem:[#allocation19 + $0xa8] sm:$0xff] }
0x116c   :  { %v12264_v13 = vcombine.high %v2798_v38, %v2806_v6 }
0x116d   :  { %14303 = vrot.lane.b32.xlu1 %v14302_v39, %s14896_s22  ;;  %v2807_v39 = vld [vmem:[#allocation19 + $0xe8] sm:$0xff]  ;;  %s12109_s22 = sshll.u32 %s14906_s27, 4  ;;  %s12110_s22 = int_to_ptr.vmem [resolvable:$true] %s12109_s22 }
0x116e   :  { %v12266_v4 = vcombine.high %v2799_v3, %v2807_v39  ;;  %v12265_v28 = vcombine.low %v2799_v3, %v2807_v39  ;;  %v2832_v3 = vld [vmem:[#allocation19 + $0x1b0] sm:$0xff]  ;;  %s14836_s5 = scalar_lea.vmem %s12110_s22, 256  ;;  %p14841_p3 = scmp.lt.s32.totalorder %s12110_s22, %s12110_s22 }
0x116f   :  { %v2840_v39 = vld [vmem:[#allocation19 + $0x1f0] sm:$0xff]  ;;  %p14837_p2 = scmp.ne.s32.totalorder %s12110_s22, %s14836_s5  ;;  %p14842_p4 = scmp.lt.s32.totalorder %s14836_s5, %s14836_s5 }
0x1171   :  { %p14843_p5 = por %p14842_p4, %p14841_p3 }
0x1173   :  { %p14844_p6 = pnand %p14843_p5, %p14837_p2 }
0x11df   :  { %v14304_v18 = vpop.permute.xlu1 %14303 }
0x11e0   :  { %v14306_v59 = vunpack.i.h.bf16 %v14304_v18  ;;  %v14305_v22 = vunpack.i.l.bf16 %v14304_v18  ;;  %v2822_v18 = vld [vmem:[#allocation19 + $0x160] sm:$0xff] }
0x11e1   :  { %v12280_v30 = vcombine.high %v2814_v14, %v2822_v18 }
0x11e2   :  { %v2775_v24 = vsel %vm284_vm0, %v2773_v33, %v14305_v22  ;;  %v2776_v25 = vsel %vm284_vm0, %v2774_v32, %v14306_v59  ;;  %v2823_v59 = vld [vmem:[#allocation19 + $0x168] sm:$0xff]  ;;  %v12263_v22 = vcombine.low %v2798_v38, %v2806_v6  ;;  %v2830_v32 = vld [vmem:[#allocation19 + $0x1a0] sm:$0xff]  ;;  %v12284_v38 = vcombine.high %v2816_v17, %v2824_v19 }
0x11e3   :  { %v16058_v34 = vpack.c.bf16 %v2776_v25, %v2775_v24  ;;  %v12282_v31 = vcombine.high %v2815_v8, %v2823_v59  ;;  %v2838_v33 = vld [vmem:[#allocation19 + $0x1e0] sm:$0xff]  ;;  %v2831_v24 = vld [vmem:[#allocation19 + $0x1a8] sm:$0xff] }
0x11e4   :  { %v2839_v25 = vld [vmem:[#allocation19 + $0x1e8] sm:$0xff]  ;;  %v12296_v29 = vcombine.high %v2830_v32, %v2838_v33 }
0x11e5   :  { %12335 = vmatmul.mubr.msk.bf16.vlgmr.msra.gmra.mrb[32].mxu0 %vm1634_vm2, %v16058_v34  ;;  %12336 = vmatmul.mubr.msk.bf16.vlgmr.msra.gmra.mrb[28].mxu1 %vm1634_vm2, %v16058_v34  ;;  %v12298_v7 = vcombine.high %v2831_v24, %v2839_v25 }
0x11e6   :  { %3528 = vmatpush1.bf16.msra.mxu0 %v12243_v50  ;;  %3571 = vmatpush1.bf16.msra.mxu1 %v12245_v53  ;;  %v12323_v50 = vcombine.low %v2860_v62, %v2868_v2  ;;  %v12325_v53 = vcombine.low %v2861_v40, %v2869_v16  ;;  %v12252_v62 = vcombine.high %v2784_v1, %v2792_v5  ;;  %v2800_v40 = vld [vmem:[#allocation19 + $0xb0] sm:$0xff] }
0x11e7   :  { %3529 = vmatprep.subr.bf16.mxu0 %v12260_v20  ;;  %3572 = vmatprep.subr.bf16.mxu1 %v12262_v35  ;;  %v12279_v20 = vcombine.low %v2814_v14, %v2822_v18  ;;  %v12281_v35 = vcombine.low %v2815_v8, %v2823_v59  ;;  %v2808_v16 = vld [vmem:[#allocation19 + $0xf0] sm:$0xff]  ;;  %v12300_v14 = vcombine.high %v2832_v3, %v2840_v39 }
0x11e8   :  { %3559 = vmatprep.mubr.bf16.mxu0 %v14905_v0  ;;  %3602 = vmatprep.mubr.bf16.mxu1 %v14905_v0  ;;  %v12268_v27 = vcombine.high %v2800_v40, %v2808_v16  ;;  %v2848_v8 = vld [vmem:[#allocation19 + $0x230] sm:$0xff] }
0x11e9   :  { %v2856_v59 = vld [vmem:[#allocation19 + $0x270] sm:$0xff] }
0x11ea   :  { %3530 = vmatpush1.bf16.msra.mxu0 %v12259_v41  ;;  %3573 = vmatpush1.bf16.msra.mxu1 %v12261_v42  ;;  %v2847_v41 = vld [vmem:[#allocation19 + $0x228] sm:$0xff] }
0x11eb   :  { %3531 = vmatprep.subr.bf16.mxu0 %v12276_v43  ;;  %3574 = vmatprep.subr.bf16.mxu1 %v12278_v45  ;;  %v2855_v42 = vld [vmem:[#allocation19 + $0x268] sm:$0xff]  ;;  %v12295_v43 = vcombine.low %v2830_v32, %v2838_v33  ;;  %v12297_v45 = vcombine.low %v2831_v24, %v2839_v25  ;;  %v12316_v32 = vcombine.high %v2848_v8, %v2856_v59  ;;  %v2864_v33 = vld [vmem:[#allocation19 + $0x2b0] sm:$0xff]  ;;  %v2865_v25 = vld [vmem:[#allocation19 + $0x2b8] sm:$0xff] }
0x11ec   :  { %v12314_v47 = vcombine.high %v2847_v41, %v2855_v42  ;;  %v2872_v24 = vld [vmem:[#allocation19 + $0x2f0] sm:$0xff] }
0x11ee   :  { %3532 = vmatpush1.bf16.msra.mxu0 %v12275_v51  ;;  %3575 = vmatpush1.bf16.msra.mxu1 %v12277_v52  ;;  %v2863_v51 = vld [vmem:[#allocation19 + $0x2a8] sm:$0xff] }
0x11ef   :  { %3533 = vmatprep.subr.bf16.mxu0 %v12292_v54  ;;  %3576 = vmatprep.subr.bf16.mxu1 %v12294_v55  ;;  %v2871_v52 = vld [vmem:[#allocation19 + $0x2e8] sm:$0xff]  ;;  %v12311_v54 = vcombine.low %v2846_v36, %v2854_v37  ;;  %v12313_v55 = vcombine.low %v2847_v41, %v2855_v42  ;;  %v3833_v37 = vld [vmem:[#allocation22] sm:$0xff]  ;;  %v3834_v42 = vld [vmem:[#allocation22 + $0x8] sm:$0xff] }
0x11f0   :  { %v12330_v61 = vcombine.high %v2863_v51, %v2871_v52  ;;  %v3837_v41 = vld [vmem:[#allocation22 + $0x20] sm:$0xff] }
0x11f2   :  { %3534 = vmatpush1.bf16.msra.mxu0 %v12291_v10  ;;  %3577 = vmatpush1.bf16.msra.mxu1 %v12293_v11  ;;  %v2785_v10 = vld [vmem:[#allocation19 + $0x38] sm:$0xff] }
0x11f3   :  { %3535 = vmatprep.subr.bf16.mxu0 %v12308_v57  ;;  %3578 = vmatprep.subr.bf16.mxu1 %v12310_v63  ;;  %v2793_v11 = vld [vmem:[#allocation19 + $0x78] sm:$0xff]  ;;  %v12327_v57 = vcombine.low %v2862_v48, %v2870_v49  ;;  %v12329_v63 = vcombine.low %v2863_v51, %v2871_v52  ;;  %v3841_v49 = vld [vmem:[#allocation22 + $0x40] sm:$0xff] }
0x11f4   :  { %v12254_v2 = vcombine.high %v2785_v10, %v2793_v11  ;;  %v3845_v51 = vld [vmem:[#allocation22 + $0x60] sm:$0xff]  ;;  %v3842_v52 = vld [vmem:[#allocation22 + $0x48] sm:$0xff] }
0x11f6   :  { %3536 = vmatpush1.bf16.msra.mxu0 %v12307_v21  ;;  %3579 = vmatpush1.bf16.msra.mxu1 %v12309_v26  ;;  %v2801_v21 = vld [vmem:[#allocation19 + $0xb8] sm:$0xff] }
0x11f7   :  { %3537 = vmatprep.subr.bf16.mxu0 %v12324_v23  ;;  %3580 = vmatprep.subr.bf16.mxu1 %v12326_v12  ;;  %v2809_v26 = vld [vmem:[#allocation19 + $0xf8] sm:$0xff]  ;;  %v12251_v23 = vcombine.low %v2784_v1, %v2792_v5  ;;  %v12253_v12 = vcombine.low %v2785_v10, %v2793_v11  ;;  %v3849_v5 = vld [vmem:[#allocation22 + $0x80] sm:$0xff] }
0x11f8   :  { %v12270_v15 = vcombine.high %v2801_v21, %v2809_v26  ;;  %v3853_v10 = vld [vmem:[#allocation22 + $0xa0] sm:$0xff]  ;;  %v3850_v11 = vld [vmem:[#allocation22 + $0x88] sm:$0xff] }
0x11fa   :  { %3538 = vmatpush1.bf16.msra.mxu0 %v12323_v50  ;;  %3581 = vmatpush1.bf16.msra.mxu1 %v12325_v53  ;;  %v2817_v50 = vld [vmem:[#allocation19 + $0x138] sm:$0xff] }
0x11fb   :  { %3613 = vmatprep.subr.bf16.mxu0 %v12248_v44  ;;  %3656 = vmatprep.subr.bf16.mxu1 %v12250_v60  ;;  %v2825_v53 = vld [vmem:[#allocation19 + $0x178] sm:$0xff]  ;;  %v12267_v44 = vcombine.low %v2800_v40, %v2808_v16  ;;  %v12269_v60 = vcombine.low %v2801_v21, %v2809_v26  ;;  %v3857_v16 = vld [vmem:[#allocation22 + $0xc0] sm:$0xff] }
0x11fc   :  { %v12286_v6 = vcombine.high %v2817_v50, %v2825_v53  ;;  %v3861_v21 = vld [vmem:[#allocation22 + $0xe0] sm:$0xff]  ;;  %v3858_v26 = vld [vmem:[#allocation22 + $0xc8] sm:$0xff] }
0x11fd   :  { %12337 = vmatmul.mubr.msk.bf16.vlgmr.msra.gmra.mrb[36].mxu0 %vm1634_vm2, %v16058_v34  ;;  %12338 = vmatmul.mubr.msk.bf16.vlgmr.msra.gmra.mrb[32].mxu1 %vm1634_vm2, %v16058_v34 }
0x11fe   :  { %3614 = vmatpush1.bf16.msra.mxu0 %v12247_v58  ;;  %3657 = vmatpush1.bf16.msra.mxu1 %v12249_v9  ;;  %v2833_v58 = vld [vmem:[#allocation19 + $0x1b8] sm:$0xff] }
0x11ff   :  { %3615 = vmatprep.subr.bf16.mxu0 %v12264_v13  ;;  %3658 = vmatprep.subr.bf16.mxu1 %v12266_v4  ;;  %v2841_v9 = vld [vmem:[#allocation19 + $0x1f8] sm:$0xff]  ;;  %v12283_v13 = vcombine.low %v2816_v17, %v2824_v19  ;;  %v12285_v4 = vcombine.low %v2817_v50, %v2825_v53  ;;  %v3865_v17 = vld [vmem:[#allocation22 + $0x100] sm:$0xff] }
0x1200   :  { %3645 = vmatprep.mubr.bf16.mxu0 %v14905_v0  ;;  %3688 = vmatprep.mubr.bf16.mxu1 %v14905_v0  ;;  %v12302_v18 = vcombine.high %v2833_v58, %v2841_v9  ;;  %v3869_v19 = vld [vmem:[#allocation22 + $0x120] sm:$0xff]  ;;  %v3866_v50 = vld [vmem:[#allocation22 + $0x108] sm:$0xff] }
0x1201   :  { %v3870_v53 = vld [vmem:[#allocation22 + $0x128] sm:$0xff] }
0x1202   :  { %3616 = vmatpush1.bf16.msra.mxu0 %v12263_v22  ;;  %3659 = vmatpush1.bf16.msra.mxu1 %v12265_v28  ;;  %v2849_v22 = vld [vmem:[#allocation19 + $0x238] sm:$0xff] }
0x1203   :  { %3617 = vmatprep.subr.bf16.mxu0 %v12280_v30  ;;  %3660 = vmatprep.subr.bf16.mxu1 %v12282_v31  ;;  %v2857_v28 = vld [vmem:[#allocation19 + $0x278] sm:$0xff]  ;;  %v12299_v30 = vcombine.low %v2832_v3, %v2840_v39  ;;  %v12301_v31 = vcombine.low %v2833_v58, %v2841_v9  ;;  %v3873_v3 = vld [vmem:[#allocation22 + $0x140] sm:$0xff] }
0x1204   :  { %v3877_v39 = vld [vmem:[#allocation22 + $0x160] sm:$0xff]  ;;  %v3874_v58 = vld [vmem:[#allocation22 + $0x148] sm:$0xff] }
0x1205   :  { %v3878_v9 = vld [vmem:[#allocation22 + $0x168] sm:$0xff] }
0x1206   :  { %3618 = vmatpush1.bf16.msra.mxu0 %v12279_v20  ;;  %3661 = vmatpush1.bf16.msra.mxu1 %v12281_v35  ;;  %v2873_v20 = vld [vmem:[#allocation19 + $0x2f8] sm:$0xff]  ;;  %v12315_v35 = vcombine.low %v2848_v8, %v2856_v59  ;;  %v3881_v8 = vld [vmem:[#allocation22 + $0x180] sm:$0xff] }
0x1207   :  { %3619 = vmatprep.subr.bf16.mxu0 %v12296_v29  ;;  %3662 = vmatprep.subr.bf16.mxu1 %v12298_v7  ;;  %v12317_v29 = vcombine.low %v2849_v22, %v2857_v28  ;;  %v12332_v7 = vcombine.high %v2864_v33, %v2872_v24  ;;  %v12334_v36 = vcombine.high %v2865_v25, %v2873_v20  ;;  %v3885_v59 = vld [vmem:[#allocation22 + $0x1a0] sm:$0xff] }
0x120a   :  { %3620 = vmatpush1.bf16.msra.mxu0 %v12295_v43  ;;  %3663 = vmatpush1.bf16.msra.mxu1 %v12297_v45  ;;  %v3838_v43 = vld [vmem:[#allocation22 + $0x28] sm:$0xff]  ;;  %v12331_v45 = vcombine.low %v2864_v33, %v2872_v24  ;;  %v3893_v24 = vld [vmem:[#allocation22 + $0x1e0] sm:$0xff] }
0x120b   :  { %3621 = vmatprep.subr.bf16.mxu0 %v12312_v46  ;;  %3664 = vmatprep.subr.bf16.mxu1 %v12314_v47  ;;  %v12333_v46 = vcombine.low %v2865_v25, %v2873_v20  ;;  %v12344_v47 = vcombine.high %v3833_v37, %v3837_v41  ;;  %v12346_v48 = vcombine.high %v3834_v42, %v3838_v43  ;;  %v3890_v25 = vld [vmem:[#allocation22 + $0x1c8] sm:$0xff] }
0x120c   :  { %v3894_v20 = vld [vmem:[#allocation22 + $0x1e8] sm:$0xff] }
0x120e   :  { %3622 = vmatpush1.bf16.msra.mxu0 %v12311_v54  ;;  %3665 = vmatpush1.bf16.msra.mxu1 %v12313_v55  ;;  %v3846_v54 = vld [vmem:[#allocation22 + $0x68] sm:$0xff]  ;;  %v12343_v55 = vcombine.low %v3833_v37, %v3837_v41 }
0x120f   :  { %3623 = vmatprep.subr.bf16.mxu0 %v12328_v56  ;;  %3666 = vmatprep.subr.bf16.mxu1 %v12330_v61  ;;  %v12345_v56 = vcombine.low %v3834_v42, %v3838_v43  ;;  %v12352_v61 = vcombine.high %v3841_v49, %v3845_v51  ;;  %v12354_v1 = vcombine.high %v3842_v52, %v3846_v54  ;;  %v16088_v37 = vld [vmem:[#allocation22 + $0x428] sm:$0xff] }
0x1212   :  { %3624 = vmatpush1.bf16.msra.mxu0 %v12327_v57  ;;  %3667 = vmatpush1.bf16.msra.mxu1 %v12329_v63  ;;  %v3854_v57 = vld [vmem:[#allocation22 + $0xa8] sm:$0xff]  ;;  %v12351_v63 = vcombine.low %v3841_v49, %v3845_v51 }
0x1213   :  { %3699 = vmatprep.subr.bf16.mxu0 %v12252_v62  ;;  %3742 = vmatprep.subr.bf16.mxu1 %v12254_v2  ;;  %v12353_v62 = vcombine.low %v3842_v52, %v3846_v54  ;;  %v12360_v2 = vcombine.high %v3849_v5, %v3853_v10  ;;  %v12362_v40 = vcombine.high %v3850_v11, %v3854_v57  ;;  %v3898_v49 = vld [vmem:[#allocation22 + $0x208] sm:$0xff] }
0x1214   :  { %v3902_v51 = vld [vmem:[#allocation22 + $0x228] sm:$0xff]  ;;  %v12401_v54 = vcombine.low %v3890_v25, %v3894_v20 }
0x1215   :  { %12339 = vmatmul.mubr.msk.bf16.vlgmr.msra.gmra.mrb[40].mxu0 %vm1634_vm2, %v16058_v34  ;;  %12340 = vmatmul.mubr.msk.bf16.vlgmr.msra.gmra.mrb[36].mxu1 %vm1634_vm2, %v16058_v34 }
0x1216   :  { %3700 = vmatpush1.bf16.msra.mxu0 %v12251_v23  ;;  %3743 = vmatpush1.bf16.msra.mxu1 %v12253_v12  ;;  %v3862_v23 = vld [vmem:[#allocation22 + $0xe8] sm:$0xff]  ;;  %v12359_v12 = vcombine.low %v3849_v5, %v3853_v10 }
0x1217   :  { %3701 = vmatprep.subr.bf16.mxu0 %v12268_v27  ;;  %3744 = vmatprep.subr.bf16.mxu1 %v12270_v15  ;;  %v12361_v27 = vcombine.low %v3850_v11, %v3854_v57  ;;  %v12368_v15 = vcombine.high %v3857_v16, %v3861_v21  ;;  %v3906_v5 = vld [vmem:[#allocation22 + $0x248] sm:$0xff]  ;;  %v12409_v57 = vcombine.low %v3898_v49, %v3902_v51 }
0x1218   :  { %3731 = vmatprep.mubr.bf16.mxu0 %v14905_v0  ;;  %3774 = vmatprep.mubr.bf16.mxu1 %v14905_v0  ;;  %v12318_v0 = vcombine.high %v2849_v22, %v2857_v28  ;;  %v3882_v22 = vld [vmem:[#allocation22 + $0x188] sm:$0xff] }
0x1219   :  { %v3886_v28 = vld [vmem:[#allocation22 + $0x1a8] sm:$0xff] }
0x121a   :  { %3702 = vmatpush1.bf16.msra.mxu0 %v12267_v44  ;;  %3745 = vmatpush1.bf16.msra.mxu1 %v12269_v60  ;;  %v12367_v44 = vcombine.low %v3857_v16, %v3861_v21  ;;  %v12369_v60 = vcombine.low %v3858_v26, %v3862_v23  ;;  %v12394_v33 = vcombine.high %v3882_v22, %v3886_v28  ;;  %v3910_v10 = vld [vmem:[#allocation22 + $0x268] sm:$0xff] }
0x121b   :  { %3703 = vmatprep.subr.bf16.mxu0 %v12284_v38  ;;  %3746 = vmatprep.subr.bf16.mxu1 %v12286_v6  ;;  %v12376_v38 = vcombine.high %v3865_v17, %v3869_v19  ;;  %v12378_v6 = vcombine.high %v3866_v50, %v3870_v53  ;;  %v12393_v41 = vcombine.low %v3882_v22, %v3886_v28  ;;  %v3914_v16 = vld [vmem:[#allocation22 + $0x288] sm:$0xff] }
0x121c   :  { %v3918_v21 = vld [vmem:[#allocation22 + $0x2a8] sm:$0xff] }
0x121e   :  { %3704 = vmatpush1.bf16.msra.mxu0 %v12283_v13  ;;  %3747 = vmatpush1.bf16.msra.mxu1 %v12285_v4  ;;  %v12375_v13 = vcombine.low %v3865_v17, %v3869_v19  ;;  %v12377_v4 = vcombine.low %v3866_v50, %v3870_v53  ;;  %v3922_v17 = vld [vmem:[#allocation22 + $0x2c8] sm:$0xff]  ;;  %v12425_v53 = vcombine.low %v3914_v16, %v3918_v21 }
0x121f   :  { %3705 = vmatprep.subr.bf16.mxu0 %v12300_v14  ;;  %3748 = vmatprep.subr.bf16.mxu1 %v12302_v18  ;;  %v12384_v14 = vcombine.high %v3873_v3, %v3877_v39  ;;  %v12386_v18 = vcombine.high %v3874_v58, %v3878_v9  ;;  %v3926_v19 = vld [vmem:[#allocation22 + $0x2e8] sm:$0xff] }
0x1222   :  { %3706 = vmatpush1.bf16.msra.mxu0 %v12299_v30  ;;  %3749 = vmatpush1.bf16.msra.mxu1 %v12301_v31  ;;  %v12383_v30 = vcombine.low %v3873_v3, %v3877_v39  ;;  %v12385_v31 = vcombine.low %v3874_v58, %v3878_v9  ;;  %v3930_v3 = vld [vmem:[#allocation22 + $0x308] sm:$0xff]  ;;  %v12433_v9 = vcombine.low %v3922_v17, %v3926_v19 }
0x1223   :  { %3707 = vmatprep.subr.bf16.mxu0 %v12316_v32  ;;  %3750 = vmatprep.subr.bf16.mxu1 %v12318_v0  ;;  %v3889_v32 = vld [vmem:[#allocation22 + $0x1c0] sm:$0xff]  ;;  %v12392_v0 = vcombine.high %v3881_v8, %v3885_v59  ;;  %v3934_v39 = vld [vmem:[#allocation22 + $0x328] sm:$0xff] }
0x1224   :  { %v12399_v52 = vcombine.low %v3889_v32, %v3893_v24  ;;  %v12441_v28 = vcombine.low %v3930_v3, %v3934_v39 }
0x1226   :  { %3708 = vmatpush1.bf16.msra.mxu0 %v12315_v35  ;;  %3751 = vmatpush1.bf16.msra.mxu1 %v12317_v29  ;;  %v16082_v35 = vld [vmem:[#allocation22 + $0x400] sm:$0xff] }
0x1227   :  { %3709 = vmatprep.subr.bf16.mxu0 %v12332_v7  ;;  %3752 = vmatprep.subr.bf16.mxu1 %v12334_v36  ;;  %v16084_v29 = vld [vmem:[#allocation22 + $0x420] sm:$0xff]  ;;  %v16086_v7 = vld [vmem:[#allocation22 + $0x408] sm:$0xff]  ;;  %v12391_v36 = vcombine.low %v3881_v8, %v3885_v59 }
0x1228   :  { %v12471_v42 = vcombine.low %v16082_v35, %v16084_v29  ;;  %v12473_v43 = vcombine.low %v16086_v7, %v16088_v37  ;;  %v3938_v8 = vld [vmem:[#allocation22 + $0x348] sm:$0xff] }
0x1229   :  { %v3942_v59 = vld [vmem:[#allocation22 + $0x368] sm:$0xff] }
0x122a   :  { %3710 = vmatpush1.bf16.msra.mxu0 %v12331_v45  ;;  %3753 = vmatpush1.bf16.msra.mxu1 %v12333_v46  ;;  %v12400_v45 = vcombine.high %v3889_v32, %v3893_v24  ;;  %v12402_v46 = vcombine.high %v3890_v25, %v3894_v20  ;;  %v3945_v32 = vld [vmem:[#allocation22 + $0x380] sm:$0xff]  ;;  %v3950_v24 = vld [vmem:[#allocation22 + $0x3a8] sm:$0xff]  ;;  %v12449_v20 = vcombine.low %v3938_v8, %v3942_v59 }
0x122b   :  { %10019 = vmatprep.subr.bf16.mxu0 %v12344_v47  ;;  %10363 = vmatprep.subr.bf16.mxu1 %v12346_v48  ;;  %v3897_v47 = vld [vmem:[#allocation22 + $0x200] sm:$0xff] }
0x122c   :  { %v3901_v48 = vld [vmem:[#allocation22 + $0x220] sm:$0xff] }
0x122d   :  { %12341 = vmatmul.mubr.msk.bf16.vlgmr.msra.gmra.mrb[44].mxu0 %vm1634_vm2, %v16058_v34  ;;  %12342 = vmatmul.mubr.msk.bf16.vlgmr.msra.gmra.mrb[40].mxu1 %vm1634_vm2, %v16058_v34  ;;  %v12370_v34 = vcombine.high %v3858_v26, %v3862_v23  ;;  %v12407_v11 = vcombine.low %v3897_v47, %v3901_v48  ;;  %v12417_v23 = vcombine.low %v3906_v5, %v3910_v10 }
0x122e   :  { %10020 = vmatpush1.bf16.msra.mxu0 %v12343_v55  ;;  %10364 = vmatpush1.bf16.msra.mxu1 %v12345_v56  ;;  %v12408_v55 = vcombine.high %v3897_v47, %v3901_v48  ;;  %v12410_v56 = vcombine.high %v3898_v49, %v3902_v51  ;;  %v3954_v47 = vld [vmem:[#allocation22 + $0x3c8] sm:$0xff] }
0x122f   :  { %10021 = vmatprep.subr.bf16.mxu0 %v12352_v61  ;;  %10365 = vmatprep.subr.bf16.mxu1 %v12354_v1  ;;  %v3905_v61 = vld [vmem:[#allocation22 + $0x240] sm:$0xff]  ;;  %v3958_v48 = vld [vmem:[#allocation22 + $0x3e8] sm:$0xff] }
0x1230   :  { %v3909_v1 = vld [vmem:[#allocation22 + $0x260] sm:$0xff] }
0x1231   :  { %v12415_v26 = vcombine.low %v3905_v61, %v3909_v1 }
0x1232   :  { %10022 = vmatpush1.bf16.msra.mxu0 %v12351_v63  ;;  %10366 = vmatpush1.bf16.msra.mxu1 %v12353_v62  ;;  %v12416_v63 = vcombine.high %v3905_v61, %v3909_v1  ;;  %v12418_v62 = vcombine.high %v3906_v5, %v3910_v10  ;;  %v12472_v61 = vcombine.high %v16082_v35, %v16084_v29  ;;  %v2878_v5 = vlaneseq }
0x1233   :  { %10023 = vmatprep.subr.bf16.mxu0 %v12360_v2  ;;  %10367 = vmatprep.subr.bf16.mxu1 %v12362_v40  ;;  %v3913_v2 = vld [vmem:[#allocation22 + $0x280] sm:$0xff]  ;;  %v12474_v1 = vcombine.high %v16086_v7, %v16088_v37 }
0x1234   :  { %v3917_v40 = vld [vmem:[#allocation22 + $0x2a0] sm:$0xff]  ;;  %v16098_v10 = vshrl.u32 %v2878_v5, 7 }
0x1235   :  { %v12423_v50 = vcombine.low %v3913_v2, %v3917_v40 }
0x1236   :  { %10024 = vmatpush1.bf16.msra.mxu0 %v12359_v12  ;;  %10368 = vmatpush1.bf16.msra.mxu1 %v12361_v27  ;;  %v12424_v12 = vcombine.high %v3913_v2, %v3917_v40  ;;  %v12426_v27 = vcombine.high %v3914_v16, %v3918_v21  ;;  %v16112_v2 = vsub.s32 3, %v16098_v10  ;;  %v16143_v7 = vsub.s32 4, %v16098_v10 }
0x1237   :  { %10025 = vmatprep.subr.bf16.mxu0 %v12368_v15  ;;  %10369 = vmatprep.subr.bf16.mxu1 %v12370_v34  ;;  %v3921_v15 = vld [vmem:[#allocation22 + $0x2c0] sm:$0xff]  ;;  %v16149_v5 = vsub.s32 5, %v16098_v10 }
0x1238   :  { %v3925_v34 = vld [vmem:[#allocation22 + $0x2e0] sm:$0xff] }
0x1239   :  { %v12431_v58 = vcombine.low %v3921_v15, %v3925_v34 }
0x123a   :  { %10026 = vmatpush1.bf16.msra.mxu0 %v12367_v44  ;;  %10370 = vmatpush1.bf16.msra.mxu1 %v12369_v60  ;;  %v12432_v44 = vcombine.high %v3921_v15, %v3925_v34  ;;  %v12434_v60 = vcombine.high %v3922_v17, %v3926_v19 }
0x123b   :  { %10027 = vmatprep.subr.bf16.mxu0 %v12376_v38  ;;  %10371 = vmatprep.subr.bf16.mxu1 %v12378_v6  ;;  %v3929_v38 = vld [vmem:[#allocation22 + $0x300] sm:$0xff] }
0x123c   :  { %v3933_v6 = vld [vmem:[#allocation22 + $0x320] sm:$0xff] }
0x123d   :  { %v12439_v22 = vcombine.low %v3929_v38, %v3933_v6 }
0x123e   :  { %10028 = vmatpush1.bf16.msra.mxu0 %v12375_v13  ;;  %10372 = vmatpush1.bf16.msra.mxu1 %v12377_v4  ;;  %v12440_v13 = vcombine.high %v3929_v38, %v3933_v6  ;;  %v12442_v4 = vcombine.high %v3930_v3, %v3934_v39 }
0x123f   :  { %10029 = vmatprep.subr.bf16.mxu0 %v12384_v14  ;;  %10373 = vmatprep.subr.bf16.mxu1 %v12386_v18  ;;  %v3937_v14 = vld [vmem:[#allocation22 + $0x340] sm:$0xff] }
0x1240   :  { %v3941_v18 = vld [vmem:[#allocation22 + $0x360] sm:$0xff] }
0x1241   :  { %v12447_v25 = vcombine.low %v3937_v14, %v3941_v18 }
0x1242   :  { %10030 = vmatpush1.bf16.msra.mxu0 %v12383_v30  ;;  %10374 = vmatpush1.bf16.msra.mxu1 %v12385_v31  ;;  %v12448_v30 = vcombine.high %v3937_v14, %v3941_v18  ;;  %v12450_v31 = vcombine.high %v3938_v8, %v3942_v59 }
0x1243   :  { %10031 = vmatprep.subr.bf16.mxu0 %v12392_v0  ;;  %10375 = vmatprep.subr.bf16.mxu1 %v12394_v33  ;;  %v3949_v0 = vld [vmem:[#allocation22 + $0x3a0] sm:$0xff]  ;;  %v3946_v33 = vld [vmem:[#allocation22 + $0x388] sm:$0xff] }
0x1244   :  { %v12455_v49 = vcombine.low %v3945_v32, %v3949_v0  ;;  %v12457_v51 = vcombine.low %v3946_v33, %v3950_v24 }
0x1246   :  { %10032 = vmatpush1.bf16.msra.mxu0 %v12391_v36  ;;  %10376 = vmatpush1.bf16.msra.mxu1 %v12393_v41  ;;  %v12456_v36 = vcombine.high %v3945_v32, %v3949_v0  ;;  %v12458_v41 = vcombine.high %v3946_v33, %v3950_v24  ;;  %v3973_v32 = vld [vmem:[#allocation22 + $0x460] sm:$0xff]  ;;  %v3970_v0 = vld [vmem:[#allocation22 + $0x448] sm:$0xff] }
0x1247   :  { %10033 = vmatprep.subr.bf16.mxu0 %v12400_v45  ;;  %10377 = vmatprep.subr.bf16.mxu1 %v12402_v46  ;;  %v3953_v45 = vld [vmem:[#allocation22 + $0x3c0] sm:$0xff]  ;;  %v3974_v33 = vld [vmem:[#allocation22 + $0x468] sm:$0xff] }
0x1248   :  { %v3957_v46 = vld [vmem:[#allocation22 + $0x3e0] sm:$0xff] }
0x124a   :  { %10034 = vmatpush1.bf16.msra.mxu0 %v12399_v52  ;;  %10378 = vmatpush1.bf16.msra.mxu1 %v12401_v54  ;;  %v12464_v52 = vcombine.high %v3953_v45, %v3957_v46  ;;  %v12466_v54 = vcombine.high %v3954_v47, %v3958_v48 }
0x124b   :  { %10035 = vmatprep.subr.bf16.mxu0 %v12408_v55  ;;  %10379 = vmatprep.subr.bf16.mxu1 %v12410_v56  ;;  %v12463_v55 = vcombine.low %v3953_v45, %v3957_v46  ;;  %v12465_v56 = vcombine.low %v3954_v47, %v3958_v48  ;;  %v3981_v45 = vld [vmem:[#allocation22 + $0x4a0] sm:$0xff]  ;;  %v3978_v46 = vld [vmem:[#allocation22 + $0x488] sm:$0xff] }
0x124c   :  { %v3982_v47 = vld [vmem:[#allocation22 + $0x4a8] sm:$0xff] }
0x124d   :  { %v12489_v29 = vcombine.low %v3978_v46, %v3982_v47 }
0x124e   :  { %10036 = vmatpush1.bf16.msra.mxu0 %v12407_v11  ;;  %10380 = vmatpush1.bf16.msra.mxu1 %v12409_v57  ;;  %v16101_v11 = vsub.s32 0, %v16098_v10  ;;  %v16104_v57 = vsub.s32 2, %v16098_v10 }
0x124f   :  { %10037 = vmatprep.subr.bf16.mxu0 %v12416_v63  ;;  %10381 = vmatprep.subr.bf16.mxu1 %v12418_v62  ;;  %v16106_v63 = vld [vmem:[#allocation20] sm:$0xff]  ;;  %v16109_v62 = vsub.s32 1, %v16098_v10 }
0x1250   :  { %v2881_v40 = vrot.slane %v16106_v63, %v16101_v11  ;;  %v2889_v16 = vrot.slane %v16106_v63, %v16104_v57 }
0x1251   :  { %v2885_v21 = vrot.slane %v16106_v63, %v16109_v62 }
0x1252   :  { %10038 = vmatpush1.bf16.msra.mxu0 %v12415_v26  ;;  %10382 = vmatpush1.bf16.msra.mxu1 %v12417_v23  ;;  %v2893_v26 = vrot.slane %v16106_v63, %v16112_v2 }
0x1253   :  { %10039 = vmatprep.subr.bf16.mxu0 %v12424_v12  ;;  %10383 = vmatprep.subr.bf16.mxu1 %v12426_v27 }
0x1256   :  { %10040 = vmatpush1.bf16.msra.mxu0 %v12423_v50  ;;  %10384 = vmatpush1.bf16.msra.mxu1 %v12425_v53 }
0x1257   :  { %10041 = vmatprep.subr.bf16.mxu0 %v12432_v44  ;;  %10385 = vmatprep.subr.bf16.mxu1 %v12434_v60 }
0x125a   :  { %10042 = vmatpush1.bf16.msra.mxu0 %v12431_v58  ;;  %10386 = vmatpush1.bf16.msra.mxu1 %v12433_v9 }
0x125b   :  { %10043 = vmatprep.subr.bf16.mxu0 %v12440_v13  ;;  %10387 = vmatprep.subr.bf16.mxu1 %v12442_v4 }
0x125e   :  { %10044 = vmatpush1.bf16.msra.mxu0 %v12439_v22  ;;  %10388 = vmatpush1.bf16.msra.mxu1 %v12441_v28  ;;  %v3969_v28 = vld [vmem:[#allocation22 + $0x440] sm:$0xff] }
0x125f   :  { %10045 = vmatprep.subr.bf16.mxu0 %v12448_v30  ;;  %10389 = vmatprep.subr.bf16.mxu1 %v12450_v31  ;;  %v12479_v48 = vcombine.low %v3969_v28, %v3973_v32 }
0x1262   :  { %10046 = vmatpush1.bf16.msra.mxu0 %v12447_v25  ;;  %10390 = vmatpush1.bf16.msra.mxu1 %v12449_v20  ;;  %v3977_v20 = vld [vmem:[#allocation22 + $0x480] sm:$0xff] }
0x1263   :  { %10047 = vmatprep.subr.bf16.mxu0 %v12456_v36  ;;  %10391 = vmatprep.subr.bf16.mxu1 %v12458_v41  ;;  %v12480_v36 = vcombine.high %v3969_v28, %v3973_v32  ;;  %v12482_v41 = vcombine.high %v3970_v0, %v3974_v33  ;;  %v12487_v35 = vcombine.low %v3977_v20, %v3981_v45 }
0x1266   :  { %10048 = vmatpush1.bf16.msra.mxu0 %v12455_v49  ;;  %10392 = vmatpush1.bf16.msra.mxu1 %v12457_v51  ;;  %v12481_v49 = vcombine.low %v3970_v0, %v3974_v33  ;;  %v12488_v51 = vcombine.high %v3977_v20, %v3981_v45 }
0x1267   :  { %10049 = vmatprep.subr.bf16.mxu0 %v12464_v52  ;;  %10393 = vmatprep.subr.bf16.mxu1 %v12466_v54  ;;  %v12490_v52 = vcombine.high %v3978_v46, %v3982_v47  ;;  %v3985_v54 = vld [vmem:[#allocation22 + $0x4c0] sm:$0xff] }
0x126a   :  { %10050 = vmatpush1.bf16.msra.mxu0 %v12463_v55  ;;  %10394 = vmatpush1.bf16.msra.mxu1 %v12465_v56  ;;  %v3989_v55 = vld [vmem:[#allocation22 + $0x4e0] sm:$0xff]  ;;  %v3986_v56 = vld [vmem:[#allocation22 + $0x4c8] sm:$0xff] }
0x126b   :  { %10062 = vmatprep.subr.bf16.mxu0 %v12472_v61  ;;  %10406 = vmatprep.subr.bf16.mxu1 %v12474_v1  ;;  %v3990_v61 = vld [vmem:[#allocation22 + $0x4e8] sm:$0xff]  ;;  %v12496_v37 = vcombine.high %v3985_v54, %v3989_v55  ;;  %v3993_v1 = vld [vmem:[#allocation22 + $0x500] sm:$0xff] }
0x12b8   :  { %v3475_v23 = vpop.f32.mrb[32].mxu0  ;;  %v3518_v12 = vpop.f32.mrb[28].mxu1 }
0x12b9   :  { %v3476_v27 = vadd.f32 %v3475_v23, %v2881_v40  ;;  %v3519_v15 = vadd.f32 %v3518_v12, %v2889_v16  ;;  %v3477_v34 = vpop.f32.mrb[33].mxu0  ;;  %v3520_v17 = vpop.f32.mrb[29].mxu1  ;;  %v12495_v23 = vcombine.low %v3985_v54, %v3989_v55  ;;  %v12497_v12 = vcombine.low %v3986_v56, %v3990_v61 }
0x12ba   :  { %v3478_v19 = vadd.f32 %v3477_v34, %v2885_v21  ;;  %v3521_v50 = vadd.f32 %v3520_v17, %v2893_v26  ;;  %v3479_v53 = vpop.f32.mrb[34].mxu0  ;;  %v3522_v44 = vpop.f32.mrb[30].mxu1 }
0x12bb   :  { %v3480_v60 = vadd.f32 %v3479_v53, %v2881_v40  ;;  %v3523_v38 = vadd.f32 %v3522_v44, %v2889_v16  ;;  %v3481_v6 = vpop.f32.mrb[35].mxu0  ;;  %v3524_v3 = vpop.f32.mrb[31].mxu1  ;;  %v3785_v9 = vmax.f32 %v3476_v27, 0.0  ;;  %v3787_v13 = vmax.f32 %v3519_v15, 0.0  ;;  %v3997_v16 = vld [vmem:[#allocation22 + $0x520] sm:$0xff]  ;;  %v4002_v44 = vld [vmem:[#allocation22 + $0x548] sm:$0xff] }
0x12bc   :  { %v3482_v39 = vadd.f32 %v3481_v6, %v2885_v21  ;;  %v3525_v58 = vadd.f32 %v3524_v3, %v2893_v26  ;;  %v3786_v18 = vmax.f32 %v3478_v19, 0.0  ;;  %v3788_v8 = vmax.f32 %v3521_v50, 0.0  ;;  %v3994_v21 = vld [vmem:[#allocation22 + $0x508] sm:$0xff]  ;;  %v4001_v19 = vld [vmem:[#allocation22 + $0x540] sm:$0xff] }
0x12bd   :  { %v3801_v4 = vmax.f32 %v3480_v60, 0.0  ;;  %v3803_v14 = vmax.f32 %v3523_v38, 0.0  ;;  %v16152_v40 = vsub.s32 7, %v16098_v10  ;;  %v3998_v26 = vld [vmem:[#allocation22 + $0x528] sm:$0xff]  ;;  %v2897_v27 = vrot.slane %v16106_v63, %v16143_v7 }
0x12be   :  { %v3802_v59 = vmax.f32 %v3482_v39, 0.0  ;;  %v3804_v22 = vmax.f32 %v3525_v58, 0.0  ;;  %v12504_v34 = vcombine.high %v3993_v1, %v3997_v16  ;;  %v12506_v17 = vcombine.high %v3994_v21, %v3998_v26  ;;  %v4006_v60 = vld [vmem:[#allocation22 + $0x568] sm:$0xff] }
0x12bf   :  { %v16122_v30 = vpack.c.bf16 %v3801_v4, %v3785_v9  ;;  %v16124_v31 = vpack.c.bf16 %v3803_v14, %v3787_v13  ;;  %v2901_v50 = vrot.slane %v16106_v63, %v16149_v5  ;;  %v2909_v53 = vrot.slane %v16106_v63, %v16152_v40  ;;  %v4009_v9 = vld [vmem:[#allocation22 + $0x580] sm:$0xff] }
0x12c0   :  { %v16126_v24 = vpack.c.bf16 %v3802_v59, %v3786_v18  ;;  %v16128_v25 = vpack.c.bf16 %v3804_v22, %v3788_v8  ;;  %v12503_v3 = vcombine.low %v3993_v1, %v3997_v16  ;;  %v12505_v39 = vcombine.low %v3994_v21, %v3998_v26  ;;  %v4013_v13 = vld [vmem:[#allocation22 + $0x5a0] sm:$0xff]  ;;  %v4010_v22 = vld [vmem:[#allocation22 + $0x588] sm:$0xff] }
0x12c1   :  { %v12514_v59 = vcombine.high %v4002_v44, %v4006_v60  ;;  %v12513_v47 = vcombine.low %v4002_v44, %v4006_v60  ;;  %v4018_v21 = vld [vmem:[#allocation22 + $0x5c8] sm:$0xff] }
0x12c2   :  { %10051 = vmatprep.mubr.bf16.mxu0 %v16126_v24  ;;  %10395 = vmatprep.mubr.bf16.mxu1 %v16126_v24  ;;  %v4022_v26 = vld [vmem:[#allocation22 + $0x5e8] sm:$0xff] }
0x12c3   :  { %10052 = vmatmul.mubr.bf16.vlgmr.msra.gmra.mrb[48].mxu0 %v16122_v30  ;;  %10396 = vmatmul.mubr.bf16.vlgmr.msra.gmra.mrb[44].mxu1 %v16122_v30  ;;  %v4026_v44 = vld [vmem:[#allocation22 + $0x608] sm:$0xff] }
0x12c4   :  { %10063 = vmatpush1.bf16.msra.mxu0 %v12471_v42  ;;  %10407 = vmatpush1.bf16.msra.mxu1 %v12473_v43  ;;  %v12498_v42 = vcombine.high %v3986_v56, %v3990_v61  ;;  %v16146_v43 = vsub.s32 6, %v16098_v10  ;;  %v4005_v10 = vld [vmem:[#allocation22 + $0x560] sm:$0xff]  ;;  %v4030_v60 = vld [vmem:[#allocation22 + $0x628] sm:$0xff] }
0x12c5   :  { %10094 = vmatprep.mubr.bf16.mxu0 %v16128_v25  ;;  %10438 = vmatprep.mubr.bf16.mxu1 %v16128_v25  ;;  %v12512_v58 = vcombine.high %v4001_v19, %v4005_v10  ;;  %v12511_v20 = vcombine.low %v4001_v19, %v4005_v10  ;;  %v12530_v10 = vcombine.high %v4018_v21, %v4022_v26 }
0x12c6   :  { %10064 = vmatprep.subr.bf16.mxu0 %v12480_v36  ;;  %10408 = vmatprep.subr.bf16.mxu1 %v12482_v41  ;;  %v2905_v15 = vrot.slane %v16106_v63, %v16146_v43  ;;  %v4014_v63 = vld [vmem:[#allocation22 + $0x5a8] sm:$0xff] }
0x12c8   :  { %10065 = vmatpush1.bf16.msra.mxu0 %v12479_v48  ;;  %10409 = vmatpush1.bf16.msra.mxu1 %v12481_v49  ;;  %v12520_v48 = vcombine.high %v4009_v9, %v4013_v13 }
0x12c9   :  { %10066 = vmatprep.subr.bf16.mxu0 %v12488_v51  ;;  %10410 = vmatprep.subr.bf16.mxu1 %v12490_v52  ;;  %v12522_v52 = vcombine.high %v4010_v22, %v4014_v63 }
0x12cc   :  { %10067 = vmatpush1.bf16.msra.mxu0 %v12487_v35  ;;  %10411 = vmatpush1.bf16.msra.mxu1 %v12489_v29  ;;  %v4017_v35 = vld [vmem:[#allocation22 + $0x5c0] sm:$0xff] }
0x12cd   :  { %10068 = vmatprep.subr.bf16.mxu0 %v12496_v37  ;;  %10412 = vmatprep.subr.bf16.mxu1 %v12498_v42  ;;  %v4021_v29 = vld [vmem:[#allocation22 + $0x5e0] sm:$0xff] }
0x12ce   :  { %v12528_v19 = vcombine.high %v4017_v35, %v4021_v29 }
0x12d0   :  { %v3561_v38 = vpop.f32.mrb[36].mxu0  ;;  %v3604_v6 = vpop.f32.mrb[32].mxu1  ;;  %10069 = vmatpush1.bf16.msra.mxu0 %v12495_v23  ;;  %10413 = vmatpush1.bf16.msra.mxu1 %v12497_v12 }
0x12d1   :  { %v3562_v4 = vadd.f32 %v3561_v38, %v2897_v27  ;;  %v3605_v14 = vadd.f32 %v3604_v6, %v2905_v15  ;;  %v3563_v18 = vpop.f32.mrb[37].mxu0  ;;  %v3606_v8 = vpop.f32.mrb[33].mxu1  ;;  %10070 = vmatprep.subr.bf16.mxu0 %v12504_v34  ;;  %10414 = vmatprep.subr.bf16.mxu1 %v12506_v17  ;;  %v12521_v17 = vcombine.low %v4010_v22, %v4014_v63  ;;  %v16170_v22 = vld [vmem:[#allocation20 + $0x8] sm:$0xff]  ;;  %v4041_v63 = vld [vmem:[#allocation22 + $0x680] sm:$0xff] }
0x12d2   :  { %v3564_v28 = vadd.f32 %v3563_v18, %v2901_v50  ;;  %v3607_v32 = vadd.f32 %v3606_v8, %v2909_v53  ;;  %v3565_v0 = vpop.f32.mrb[38].mxu0  ;;  %v3608_v33 = vpop.f32.mrb[34].mxu1  ;;  %v12527_v38 = vcombine.low %v4017_v35, %v4021_v29  ;;  %v12529_v6 = vcombine.low %v4018_v21, %v4022_v26 }
0x12d3   :  { %v3566_v36 = vadd.f32 %v3565_v0, %v2897_v27  ;;  %v3609_v41 = vadd.f32 %v3608_v33, %v2905_v15  ;;  %v3567_v45 = vpop.f32.mrb[39].mxu0  ;;  %v3610_v46 = vpop.f32.mrb[35].mxu1  ;;  %v3789_v54 = vmax.f32 %v3562_v4, 0.0  ;;  %v3791_v55 = vmax.f32 %v3605_v14, 0.0  ;;  %v4038_v4 = vld [vmem:[#allocation22 + $0x668] sm:$0xff] }
0x12d4   :  { %v3568_v49 = vadd.f32 %v3567_v45, %v2901_v50  ;;  %v3611_v51 = vadd.f32 %v3610_v46, %v2909_v53  ;;  %10071 = vmatpush1.bf16.msra.mxu0 %v12503_v3  ;;  %10415 = vmatpush1.bf16.msra.mxu1 %v12505_v39  ;;  %v3790_v37 = vmax.f32 %v3564_v28, 0.0  ;;  %v3792_v42 = vmax.f32 %v3607_v32, 0.0  ;;  %v4025_v50 = vld [vmem:[#allocation22 + $0x600] sm:$0xff]  ;;  %v4042_v32 = vld [vmem:[#allocation22 + $0x688] sm:$0xff] }
0x12d5   :  { %v3805_v56 = vmax.f32 %v3566_v36, 0.0  ;;  %v3807_v61 = vmax.f32 %v3609_v41, 0.0  ;;  %10072 = vmatprep.subr.bf16.mxu0 %v12512_v58  ;;  %10416 = vmatprep.subr.bf16.mxu1 %v12514_v59  ;;  %v12519_v27 = vcombine.low %v4009_v9, %v4013_v13  ;;  %v4029_v53 = vld [vmem:[#allocation22 + $0x620] sm:$0xff]  ;;  %v12538_v39 = vcombine.high %v4026_v44, %v4030_v60  ;;  %v4034_v13 = vld [vmem:[#allocation22 + $0x648] sm:$0xff] }
0x12d6   :  { %v3806_v1 = vmax.f32 %v3568_v49, 0.0  ;;  %v3808_v16 = vmax.f32 %v3611_v51, 0.0  ;;  %v12536_v3 = vcombine.high %v4025_v50, %v4029_v53  ;;  %v4033_v58 = vld [vmem:[#allocation22 + $0x640] sm:$0xff]  ;;  %v12535_v14 = vcombine.low %v4025_v50, %v4029_v53  ;;  %v4046_v0 = vld [vmem:[#allocation22 + $0x6a8] sm:$0xff] }
0x12d7   :  { %v16162_v23 = vpack.c.bf16 %v3805_v56, %v3789_v54  ;;  %v16164_v12 = vpack.c.bf16 %v3807_v61, %v3791_v55  ;;  %v4037_v9 = vld [vmem:[#allocation22 + $0x660] sm:$0xff]  ;;  %v12537_v18 = vcombine.low %v4026_v44, %v4030_v60  ;;  %v12546_v59 = vcombine.high %v4034_v13, %v4038_v4  ;;  %v4054_v54 = vld [vmem:[#allocation22 + $0x6e8] sm:$0xff] }
0x12d8   :  { %v16166_v15 = vpack.c.bf16 %v3806_v1, %v3790_v37  ;;  %v16168_v34 = vpack.c.bf16 %v3808_v16, %v3792_v42  ;;  %10073 = vmatpush1.bf16.msra.mxu0 %v12511_v20  ;;  %10417 = vmatpush1.bf16.msra.mxu1 %v12513_v47  ;;  %v12544_v8 = vcombine.high %v4033_v58, %v4037_v9  ;;  %v4045_v28 = vld [vmem:[#allocation22 + $0x6a0] sm:$0xff] }
0x12d9   :  { %10074 = vmatprep.subr.bf16.mxu0 %v12520_v48  ;;  %10418 = vmatprep.subr.bf16.mxu1 %v12522_v52  ;;  %v12543_v33 = vcombine.low %v4033_v58, %v4037_v9  ;;  %v12545_v20 = vcombine.low %v4034_v13, %v4038_v4  ;;  %v2913_v36 = vrot.slane %v16170_v22, %v16101_v11  ;;  %v4049_v47 = vld [vmem:[#allocation22 + $0x6c0] sm:$0xff]  ;;  %v4050_v52 = vld [vmem:[#allocation22 + $0x6c8] sm:$0xff] }
0x12da   :  { %v2921_v41 = vrot.slane %v16170_v22, %v16104_v57  ;;  %v12552_v45 = vcombine.high %v4041_v63, %v4045_v28  ;;  %v12554_v46 = vcombine.high %v4042_v32, %v4046_v0  ;;  %v4053_v48 = vld [vmem:[#allocation22 + $0x6e0] sm:$0xff]  ;;  %v2917_v49 = vrot.slane %v16170_v22, %v16109_v62 }
0x12db   :  { %v2925_v51 = vrot.slane %v16170_v22, %v16112_v2  ;;  %v12551_v61 = vcombine.low %v4041_v63, %v4045_v28  ;;  %v12553_v35 = vcombine.low %v4042_v32, %v4046_v0  ;;  %v12560_v29 = vcombine.high %v4049_v47, %v4053_v48  ;;  %v4057_v37 = vld [vmem:[#allocation22 + $0x700] sm:$0xff] }
0x12dc   :  { %10075 = vmatpush1.bf16.msra.mxu0 %v12519_v27  ;;  %10419 = vmatpush1.bf16.msra.mxu1 %v12521_v17  ;;  %v4061_v42 = vld [vmem:[#allocation22 + $0x720] sm:$0xff]  ;;  %v12562_v27 = vcombine.high %v4050_v52, %v4054_v54  ;;  %v4058_v17 = vld [vmem:[#allocation22 + $0x708] sm:$0xff]  ;;  %v12559_v60 = vcombine.low %v4049_v47, %v4053_v48  ;;  %v12561_v58 = vcombine.low %v4050_v52, %v4054_v54 }
0x12dd   :  { %10076 = vmatprep.subr.bf16.mxu0 %v12528_v19  ;;  %10420 = vmatprep.subr.bf16.mxu1 %v12530_v10  ;;  %v4062_v19 = vld [vmem:[#allocation22 + $0x728] sm:$0xff]  ;;  %v12568_v9 = vcombine.high %v4057_v37, %v4061_v42  ;;  %v4065_v28 = vld [vmem:[#allocation22 + $0x740] sm:$0xff]  ;;  %v12567_v48 = vcombine.low %v4057_v37, %v4061_v42 }
0x12de   :  { %v4069_v32 = vld [vmem:[#allocation22 + $0x760] sm:$0xff]  ;;  %v12569_v52 = vcombine.low %v4058_v17, %v4062_v19 }
0x12df   :  { %v12576_v54 = vcombine.high %v4065_v28, %v4069_v32 }
0x12e0   :  { %10077 = vmatpush1.bf16.msra.mxu0 %v12527_v38  ;;  %10421 = vmatpush1.bf16.msra.mxu1 %v12529_v6 }
0x12e1   :  { %10078 = vmatprep.subr.bf16.mxu0 %v12536_v3  ;;  %10422 = vmatprep.subr.bf16.mxu1 %v12538_v39 }
0x12e4   :  { %10079 = vmatpush1.bf16.msra.mxu0 %v12535_v14  ;;  %10423 = vmatpush1.bf16.msra.mxu1 %v12537_v18  ;;  %v12570_v14 = vcombine.high %v4058_v17, %v4062_v19  ;;  %v4086_v17 = vld [vmem:[#allocation22 + $0x7e8] sm:$0xff] }
0x12e5   :  { %10080 = vmatprep.subr.bf16.mxu0 %v12544_v8  ;;  %10424 = vmatprep.subr.bf16.mxu1 %v12546_v59 }
0x12e8   :  { %v3647_v55 = vpop.f32.mrb[40].mxu0  ;;  %v3690_v56 = vpop.f32.mrb[36].mxu1  ;;  %10081 = vmatpush1.bf16.msra.mxu0 %v12543_v33  ;;  %10425 = vmatpush1.bf16.msra.mxu1 %v12545_v20 }
0x12e9   :  { %v3648_v1 = vadd.f32 %v3647_v55, %v2913_v36  ;;  %v3691_v16 = vadd.f32 %v3690_v56, %v2921_v41  ;;  %v3649_v21 = vpop.f32.mrb[41].mxu0  ;;  %v3692_v26 = vpop.f32.mrb[37].mxu1  ;;  %10082 = vmatprep.subr.bf16.mxu0 %v12552_v45  ;;  %10426 = vmatprep.subr.bf16.mxu1 %v12554_v46  ;;  %v4070_v45 = vld [vmem:[#allocation22 + $0x768] sm:$0xff]  ;;  %v4073_v56 = vld [vmem:[#allocation22 + $0x780] sm:$0xff] }
0x12ea   :  { %v3650_v10 = vadd.f32 %v3649_v21, %v2917_v49  ;;  %v3693_v50 = vadd.f32 %v3692_v26, %v2925_v51  ;;  %v3651_v53 = vpop.f32.mrb[42].mxu0  ;;  %v3694_v44 = vpop.f32.mrb[38].mxu1  ;;  %v4081_v21 = vld [vmem:[#allocation22 + $0x7c0] sm:$0xff] }
0x12eb   :  { %v3652_v38 = vadd.f32 %v3651_v53, %v2913_v36  ;;  %v3695_v6 = vadd.f32 %v3694_v44, %v2921_v41  ;;  %v3653_v3 = vpop.f32.mrb[43].mxu0  ;;  %v3696_v39 = vpop.f32.mrb[39].mxu1  ;;  %v3793_v18 = vmax.f32 %v3648_v1, 0.0  ;;  %v3795_v8 = vmax.f32 %v3691_v16, 0.0  ;;  %v4066_v41 = vld [vmem:[#allocation22 + $0x748] sm:$0xff]  ;;  %v4085_v26 = vld [vmem:[#allocation22 + $0x7e0] sm:$0xff] }
0x12ec   :  { %v3654_v13 = vadd.f32 %v3653_v3, %v2917_v49  ;;  %v3697_v4 = vadd.f32 %v3696_v39, %v2925_v51  ;;  %10083 = vmatpush1.bf16.msra.mxu0 %v12551_v61  ;;  %10427 = vmatpush1.bf16.msra.mxu1 %v12553_v35  ;;  %v3794_v0 = vmax.f32 %v3650_v10, 0.0  ;;  %v3796_v33 = vmax.f32 %v3693_v50, 0.0  ;;  %v4077_v61 = vld [vmem:[#allocation22 + $0x7a0] sm:$0xff]  ;;  %v4074_v35 = vld [vmem:[#allocation22 + $0x788] sm:$0xff] }
0x12ed   :  { %v3809_v59 = vmax.f32 %v3652_v38, 0.0  ;;  %v3811_v63 = vmax.f32 %v3695_v6, 0.0  ;;  %10084 = vmatprep.subr.bf16.mxu0 %v12560_v29  ;;  %10428 = vmatprep.subr.bf16.mxu1 %v12562_v27  ;;  %v12578_v55 = vcombine.high %v4066_v41, %v4070_v45  ;;  %v4078_v29 = vld [vmem:[#allocation22 + $0x7a8] sm:$0xff]  ;;  %v12575_v1 = vcombine.low %v4065_v28, %v4069_v32  ;;  %v4089_v44 = vld [vmem:[#allocation22 + $0x800] sm:$0xff] }
0x12ee   :  { %v3810_v20 = vmax.f32 %v3654_v13, 0.0  ;;  %v3812_v36 = vmax.f32 %v3697_v4, 0.0  ;;  %v12577_v16 = vcombine.low %v4066_v41, %v4070_v45  ;;  %v12584_v37 = vcombine.high %v4073_v56, %v4077_v61  ;;  %v4082_v27 = vld [vmem:[#allocation22 + $0x7c8] sm:$0xff]  ;;  %v4105_v41 = vld [vmem:[#allocation22 + $0x880] sm:$0xff] }
0x12ef   :  { %v16180_v46 = vpack.c.bf16 %v3809_v59, %v3793_v18  ;;  %v16182_v47 = vpack.c.bf16 %v3811_v63, %v3795_v8  ;;  %v12586_v42 = vcombine.high %v4074_v35, %v4078_v29  ;;  %v12583_v19 = vcombine.low %v4073_v56, %v4077_v61  ;;  %v4090_v38 = vld [vmem:[#allocation22 + $0x808] sm:$0xff]  ;;  %v4101_v18 = vld [vmem:[#allocation22 + $0x860] sm:$0xff] }
0x12f0   :  { %v16184_v49 = vpack.c.bf16 %v3810_v20, %v3794_v0  ;;  %v16186_v51 = vpack.c.bf16 %v3812_v36, %v3796_v33  ;;  %10085 = vmatpush1.bf16.msra.mxu0 %v12559_v60  ;;  %10429 = vmatpush1.bf16.msra.mxu1 %v12561_v58  ;;  %v12585_v10 = vcombine.low %v4074_v35, %v4078_v29  ;;  %v4093_v60 = vld [vmem:[#allocation22 + $0x820] sm:$0xff]  ;;  %v4094_v6 = vld [vmem:[#allocation22 + $0x828] sm:$0xff] }
0x12f1   :  { %10086 = vmatprep.subr.bf16.mxu0 %v12568_v9  ;;  %10430 = vmatprep.subr.bf16.mxu1 %v12570_v14  ;;  %v12592_v50 = vcombine.high %v4081_v21, %v4085_v26  ;;  %v12594_v53 = vcombine.high %v4082_v27, %v4086_v17  ;;  %v12591_v3 = vcombine.low %v4081_v21, %v4085_v26  ;;  %v4097_v14 = vld [vmem:[#allocation22 + $0x840] sm:$0xff]  ;;  %v4098_v63 = vld [vmem:[#allocation22 + $0x848] sm:$0xff] }
0x12f2   :  { %v12593_v39 = vcombine.low %v4082_v27, %v4086_v17  ;;  %v2929_v58 = vrot.slane %v16170_v22, %v16143_v7  ;;  %v2937_v9 = vrot.slane %v16170_v22, %v16146_v43  ;;  %v12600_v13 = vcombine.high %v4089_v44, %v4093_v60  ;;  %v4102_v28 = vld [vmem:[#allocation22 + $0x868] sm:$0xff]  ;;  %v4109_v45 = vld [vmem:[#allocation22 + $0x8a0] sm:$0xff] }
0x12f3   :  { %v12602_v4 = vcombine.high %v4090_v38, %v4094_v6  ;;  %v2933_v8 = vrot.slane %v16170_v22, %v16149_v5  ;;  %v2941_v59 = vrot.slane %v16170_v22, %v16152_v40  ;;  %v12599_v33 = vcombine.low %v4089_v44, %v4093_v60  ;;  %v4106_v61 = vld [vmem:[#allocation22 + $0x888] sm:$0xff] }
0x12f4   :  { %10087 = vmatpush1.bf16.msra.mxu0 %v12567_v48  ;;  %10431 = vmatpush1.bf16.msra.mxu1 %v12569_v52  ;;  %v12601_v20 = vcombine.low %v4090_v38, %v4094_v6  ;;  %v12608_v36 = vcombine.high %v4097_v14, %v4101_v18  ;;  %v12607_v56 = vcombine.low %v4097_v14, %v4101_v18  ;;  %v4110_v22 = vld [vmem:[#allocation22 + $0x8a8] sm:$0xff] }
0x12f5   :  { %10088 = vmatprep.subr.bf16.mxu0 %v12576_v54  ;;  %10432 = vmatprep.subr.bf16.mxu1 %v12578_v55 }
0x12f8   :  { %10089 = vmatpush1.bf16.msra.mxu0 %v12575_v1  ;;  %10433 = vmatpush1.bf16.msra.mxu1 %v12577_v16 }
0x12f9   :  { %10090 = vmatprep.subr.bf16.mxu0 %v12584_v37  ;;  %10434 = vmatprep.subr.bf16.mxu1 %v12586_v42  ;;  %v12609_v37 = vcombine.low %v4098_v63, %v4102_v28  ;;  %v12610_v42 = vcombine.high %v4098_v63, %v4102_v28 }
0x12fc   :  { %10091 = vmatpush1.bf16.msra.mxu0 %v12583_v19  ;;  %10435 = vmatpush1.bf16.msra.mxu1 %v12585_v10  ;;  %v12616_v19 = vcombine.high %v4105_v41, %v4109_v45 }
0x12fd   :  { %10092 = vmatprep.subr.bf16.mxu0 %v12592_v50  ;;  %10436 = vmatprep.subr.bf16.mxu1 %v12594_v53  ;;  %v12618_v53 = vcombine.high %v4106_v61, %v4110_v22 }
0x1300   :  { %v3733_v32 = vpop.f32.mrb[44].mxu0  ;;  %v3776_v0 = vpop.f32.mrb[40].mxu1  ;;  %10093 = vmatpush1.bf16.msra.mxu0 %v12591_v3  ;;  %10437 = vmatpush1.bf16.msra.mxu1 %v12593_v39 }
0x1301   :  { %v3734_v48 = vadd.f32 %v3733_v32, %v2929_v58  ;;  %v3777_v52 = vadd.f32 %v3776_v0, %v2937_v9  ;;  %v3735_v54 = vpop.f32.mrb[45].mxu0  ;;  %v3778_v55 = vpop.f32.mrb[41].mxu1  ;;  %10105 = vmatprep.subr.bf16.mxu0 %v12600_v13  ;;  %10449 = vmatprep.subr.bf16.mxu1 %v12602_v4  ;;  %v4113_v13 = vld [vmem:[#allocation22 + $0x8c0] sm:$0xff]  ;;  %v12615_v32 = vcombine.low %v4105_v41, %v4109_v45  ;;  %v4130_v45 = vld [vmem:[#allocation22 + $0x948] sm:$0xff] }
0x1302   :  { %v3736_v35 = vadd.f32 %v3735_v54, %v2933_v8  ;;  %v3779_v29 = vadd.f32 %v3778_v55, %v2941_v59  ;;  %v3737_v1 = vpop.f32.mrb[46].mxu0  ;;  %v3780_v16 = vpop.f32.mrb[42].mxu1  ;;  %v4117_v4 = vld [vmem:[#allocation22 + $0x8e0] sm:$0xff]  ;;  %v12617_v0 = vcombine.low %v4106_v61, %v4110_v22  ;;  %v4126_v54 = vld [vmem:[#allocation22 + $0x928] sm:$0xff] }
0x1303   :  { %v3738_v21 = vadd.f32 %v3737_v1, %v2929_v58  ;;  %v3781_v26 = vadd.f32 %v3780_v16, %v2937_v9  ;;  %v3739_v27 = vpop.f32.mrb[47].mxu0  ;;  %v3782_v17 = vpop.f32.mrb[43].mxu1  ;;  %10095 = vmatmul.mubr.bf16.vlgmr.msra.gmra.mrb[48].mxu0 %v16124_v31  ;;  %10439 = vmatmul.mubr.bf16.vlgmr.msra.gmra.mrb[44].mxu1 %v16124_v31  ;;  %v3797_v44 = vmax.f32 %v3734_v48, 0.0  ;;  %v3799_v60 = vmax.f32 %v3777_v52, 0.0  ;;  %v4125_v48 = vld [vmem:[#allocation22 + $0x920] sm:$0xff]  ;;  %v4122_v52 = vld [vmem:[#allocation22 + $0x908] sm:$0xff] }
0x1304   :  { %v3740_v10 = vadd.f32 %v3739_v27, %v2933_v8  ;;  %v3783_v50 = vadd.f32 %v3782_v17, %v2941_v59  ;;  %10106 = vmatpush1.bf16.msra.mxu0 %v12599_v33  ;;  %10137 = vmatprep.mubr.bf16.mxu0 %v16166_v15  ;;  %v3798_v3 = vmax.f32 %v3736_v35, 0.0  ;;  %v3800_v39 = vmax.f32 %v3779_v29, 0.0  ;;  %v4114_v8 = vld [vmem:[#allocation22 + $0x8c8] sm:$0xff]  ;;  %v4133_v41 = vld [vmem:[#allocation22 + $0x960] sm:$0xff] }
0x1305   :  { %v3813_v38 = vmax.f32 %v3738_v21, 0.0  ;;  %v3815_v6 = vmax.f32 %v3781_v26, 0.0  ;;  %10450 = vmatpush1.bf16.msra.mxu1 %v12601_v20  ;;  %10481 = vmatprep.mubr.bf16.mxu1 %v16166_v15  ;;  %v4118_v59 = vld [vmem:[#allocation22 + $0x8e8] sm:$0xff]  ;;  %v12624_v33 = vcombine.high %v4113_v13, %v4117_v4  ;;  %v12623_v55 = vcombine.low %v4113_v13, %v4117_v4  ;;  %v4137_v21 = vld [vmem:[#allocation22 + $0x980] sm:$0xff] }
0x1306   :  { %v3814_v58 = vmax.f32 %v3740_v10, 0.0  ;;  %v3816_v9 = vmax.f32 %v3783_v50, 0.0  ;;  %10107 = vmatprep.subr.bf16.mxu0 %v12608_v36  ;;  %10451 = vmatprep.subr.bf16.mxu1 %v12610_v42  ;;  %v12626_v20 = vcombine.high %v4114_v8, %v4118_v59  ;;  %v4121_v36 = vld [vmem:[#allocation22 + $0x900] sm:$0xff]  ;;  %v12625_v35 = vcombine.low %v4114_v8, %v4118_v59  ;;  %v4134_v16 = vld [vmem:[#allocation22 + $0x968] sm:$0xff] }
0x1307   :  { %v16200_v14 = vpack.c.bf16 %v3813_v38, %v3797_v44  ;;  %v16202_v18 = vpack.c.bf16 %v3815_v6, %v3799_v60  ;;  %v12632_v29 = vcombine.high %v4121_v36, %v4125_v48  ;;  %v12634_v1 = vcombine.high %v4122_v52, %v4126_v54  ;;  %v4141_v26 = vld [vmem:[#allocation22 + $0x9a0] sm:$0xff]  ;;  %v4138_v27 = vld [vmem:[#allocation22 + $0x988] sm:$0xff] }
0x1308   :  { %v16204_v63 = vpack.c.bf16 %v3814_v58, %v3798_v3  ;;  %v16206_v28 = vpack.c.bf16 %v3816_v9, %v3800_v39  ;;  %10108 = vmatpush1.bf16.msra.mxu0 %v12607_v56  ;;  %v4129_v56 = vld [vmem:[#allocation22 + $0x940] sm:$0xff]  ;;  %v12631_v61 = vcombine.low %v4121_v36, %v4125_v48  ;;  %v12633_v22 = vcombine.low %v4122_v52, %v4126_v54  ;;  %v4142_v17 = vld [vmem:[#allocation22 + $0x9a8] sm:$0xff] }
0x1309   :  { %10452 = vmatpush1.bf16.msra.mxu1 %v12609_v37  ;;  %10109 = vmatprep.subr.bf16.mxu0 %v12616_v19  ;;  %v12640_v37 = vcombine.high %v4129_v56, %v4133_v41  ;;  %v12642_v42 = vcombine.high %v4130_v45, %v4134_v16  ;;  %v12639_v19 = vcombine.low %v4129_v56, %v4133_v41  ;;  %v4145_v44 = vld [vmem:[#allocation22 + $0x9c0] sm:$0xff]  ;;  %v4146_v38 = vld [vmem:[#allocation22 + $0x9c8] sm:$0xff] }
0x130a   :  { %10453 = vmatprep.subr.bf16.mxu1 %v12618_v53  ;;  %v12641_v10 = vcombine.low %v4130_v45, %v4134_v16  ;;  %v12648_v50 = vcombine.high %v4137_v21, %v4141_v26  ;;  %v12650_v53 = vcombine.high %v4138_v27, %v4142_v17  ;;  %v4149_v60 = vld [vmem:[#allocation22 + $0x9e0] sm:$0xff]  ;;  %v4150_v6 = vld [vmem:[#allocation22 + $0x9e8] sm:$0xff]  ;;  %v12647_v3 = vcombine.low %v4137_v21, %v4141_v26 }
0x130b   :  { %v12649_v39 = vcombine.low %v4138_v27, %v4142_v17  ;;  %v12656_v58 = vcombine.high %v4145_v44, %v4149_v60  ;;  %v12658_v9 = vcombine.high %v4146_v38, %v4150_v6  ;;  %v4153_v13 = vld [vmem:[#allocation22 + $0xa00] sm:$0xff]  ;;  %v4154_v8 = vld [vmem:[#allocation22 + $0xa08] sm:$0xff] }
0x130c   :  { %10110 = vmatpush1.bf16.msra.mxu0 %v12615_v32  ;;  %v4157_v4 = vld [vmem:[#allocation22 + $0xa20] sm:$0xff]  ;;  %v4158_v59 = vld [vmem:[#allocation22 + $0xa28] sm:$0xff]  ;;  %v12655_v32 = vcombine.low %v4145_v44, %v4149_v60 }
0x130d   :  { %10454 = vmatpush1.bf16.msra.mxu1 %v12617_v0  ;;  %10111 = vmatprep.subr.bf16.mxu0 %v12624_v33  ;;  %v12657_v0 = vcombine.low %v4146_v38, %v4150_v6  ;;  %v12664_v33 = vcombine.high %v4153_v13, %v4157_v4  ;;  %v4161_v36 = vld [vmem:[#allocation22 + $0xa40] sm:$0xff]  ;;  %v4162_v52 = vld [vmem:[#allocation22 + $0xa48] sm:$0xff] }
0x130e   :  { %10455 = vmatprep.subr.bf16.mxu1 %v12626_v20  ;;  %v12666_v20 = vcombine.high %v4154_v8, %v4158_v59  ;;  %v4165_v48 = vld [vmem:[#allocation22 + $0xa60] sm:$0xff]  ;;  %v4166_v54 = vld [vmem:[#allocation22 + $0xa68] sm:$0xff] }
0x130f   :  { %v4169_v56 = vld [vmem:[#allocation22 + $0xa80] sm:$0xff]  ;;  %v4170_v45 = vld [vmem:[#allocation22 + $0xa88] sm:$0xff] }
0x1310   :  { %10112 = vmatpush1.bf16.msra.mxu0 %v12623_v55  ;;  %v12663_v55 = vcombine.low %v4153_v13, %v4157_v4  ;;  %v4173_v41 = vld [vmem:[#allocation22 + $0xaa0] sm:$0xff]  ;;  %v4174_v16 = vld [vmem:[#allocation22 + $0xaa8] sm:$0xff] }
0x1311   :  { %10456 = vmatpush1.bf16.msra.mxu1 %v12625_v35  ;;  %10113 = vmatprep.subr.bf16.mxu0 %v12632_v29  ;;  %v12665_v35 = vcombine.low %v4154_v8, %v4158_v59  ;;  %v12672_v29 = vcombine.high %v4161_v36, %v4165_v48  ;;  %v4177_v21 = vld [vmem:[#allocation22 + $0xac0] sm:$0xff]  ;;  %v4178_v27 = vld [vmem:[#allocation22 + $0xac8] sm:$0xff] }
0x1312   :  { %10457 = vmatprep.subr.bf16.mxu1 %v12634_v1  ;;  %v12674_v1 = vcombine.high %v4162_v52, %v4166_v54  ;;  %v4181_v26 = vld [vmem:[#allocation22 + $0xae0] sm:$0xff]  ;;  %v4182_v17 = vld [vmem:[#allocation22 + $0xae8] sm:$0xff] }
0x1313   :  { %v4185_v44 = vld [vmem:[#allocation22 + $0xb00] sm:$0xff]  ;;  %v4186_v38 = vld [vmem:[#allocation22 + $0xb08] sm:$0xff] }
0x1314   :  { %10114 = vmatpush1.bf16.msra.mxu0 %v12631_v61  ;;  %v12671_v61 = vcombine.low %v4161_v36, %v4165_v48  ;;  %v4189_v60 = vld [vmem:[#allocation22 + $0xb20] sm:$0xff]  ;;  %v4190_v6 = vld [vmem:[#allocation22 + $0xb28] sm:$0xff] }
0x1315   :  { %10458 = vmatpush1.bf16.msra.mxu1 %v12633_v22  ;;  %10115 = vmatprep.subr.bf16.mxu0 %v12640_v37  ;;  %v12673_v22 = vcombine.low %v4162_v52, %v4166_v54  ;;  %v12680_v37 = vcombine.high %v4169_v56, %v4173_v41  ;;  %v4193_v13 = vld [vmem:[#allocation22 + $0xb40] sm:$0xff]  ;;  %v4194_v8 = vld [vmem:[#allocation22 + $0xb48] sm:$0xff] }
0x1316   :  { %10459 = vmatprep.subr.bf16.mxu1 %v12642_v42  ;;  %v12682_v42 = vcombine.high %v4170_v45, %v4174_v16  ;;  %v4197_v4 = vld [vmem:[#allocation22 + $0xb60] sm:$0xff]  ;;  %v4198_v59 = vld [vmem:[#allocation22 + $0xb68] sm:$0xff] }
0x1317   :  { %v4201_v36 = vld [vmem:[#allocation22 + $0xb80] sm:$0xff]  ;;  %v4202_v52 = vld [vmem:[#allocation22 + $0xb88] sm:$0xff] }
0x1318   :  { %10116 = vmatpush1.bf16.msra.mxu0 %v12639_v19  ;;  %v12679_v19 = vcombine.low %v4169_v56, %v4173_v41  ;;  %v4205_v48 = vld [vmem:[#allocation22 + $0xba0] sm:$0xff]  ;;  %v4206_v54 = vld [vmem:[#allocation22 + $0xba8] sm:$0xff] }
0x1319   :  { %10460 = vmatpush1.bf16.msra.mxu1 %v12641_v10  ;;  %10117 = vmatprep.subr.bf16.mxu0 %v12648_v50  ;;  %v12681_v10 = vcombine.low %v4170_v45, %v4174_v16  ;;  %v12688_v50 = vcombine.high %v4177_v21, %v4181_v26  ;;  %v4209_v56 = vld [vmem:[#allocation22 + $0xbc0] sm:$0xff]  ;;  %v4210_v45 = vld [vmem:[#allocation22 + $0xbc8] sm:$0xff] }
0x131a   :  { %10461 = vmatprep.subr.bf16.mxu1 %v12650_v53  ;;  %v12690_v53 = vcombine.high %v4178_v27, %v4182_v17  ;;  %v4213_v41 = vld [vmem:[#allocation22 + $0xbe0] sm:$0xff]  ;;  %v4214_v16 = vld [vmem:[#allocation22 + $0xbe8] sm:$0xff] }
0x131c   :  { %10118 = vmatpush1.bf16.msra.mxu0 %v12647_v3  ;;  %v12687_v3 = vcombine.low %v4177_v21, %v4181_v26  ;;  %v4217_v21 = vld [vmem:[#allocation22 + $0xc00] sm:$0xff] }
0x131d   :  { %10462 = vmatpush1.bf16.msra.mxu1 %v12649_v39  ;;  %10119 = vmatprep.subr.bf16.mxu0 %v12656_v58  ;;  %v12689_v39 = vcombine.low %v4178_v27, %v4182_v17  ;;  %v12696_v58 = vcombine.high %v4185_v44, %v4189_v60  ;;  %v4221_v26 = vld [vmem:[#allocation22 + $0xc20] sm:$0xff]  ;;  %v4218_v27 = vld [vmem:[#allocation22 + $0xc08] sm:$0xff] }
0x131e   :  { %10463 = vmatprep.subr.bf16.mxu1 %v12658_v9  ;;  %v12698_v9 = vcombine.high %v4186_v38, %v4190_v6  ;;  %v4222_v17 = vld [vmem:[#allocation22 + $0xc28] sm:$0xff] }
0x1320   :  { %10120 = vmatpush1.bf16.msra.mxu0 %v12655_v32  ;;  %v12695_v32 = vcombine.low %v4185_v44, %v4189_v60  ;;  %v4225_v44 = vld [vmem:[#allocation22 + $0xc40] sm:$0xff] }
0x1321   :  { %10464 = vmatpush1.bf16.msra.mxu1 %v12657_v0  ;;  %10121 = vmatprep.subr.bf16.mxu0 %v12664_v33  ;;  %v12697_v0 = vcombine.low %v4186_v38, %v4190_v6  ;;  %v12704_v33 = vcombine.high %v4193_v13, %v4197_v4  ;;  %v4229_v60 = vld [vmem:[#allocation22 + $0xc60] sm:$0xff]  ;;  %v12727_v38 = vcombine.low %v4217_v21, %v4221_v26  ;;  %v4226_v6 = vld [vmem:[#allocation22 + $0xc48] sm:$0xff] }
0x1322   :  { %10465 = vmatprep.subr.bf16.mxu1 %v12666_v20  ;;  %v12706_v20 = vcombine.high %v4194_v8, %v4198_v59 }
0x1324   :  { %10122 = vmatpush1.bf16.msra.mxu0 %v12663_v55  ;;  %v12703_v55 = vcombine.low %v4193_v13, %v4197_v4  ;;  %v4237_v13 = vld [vmem:[#allocation22 + $0xca0] sm:$0xff] }
0x1325   :  { %10466 = vmatpush1.bf16.msra.mxu1 %v12665_v35  ;;  %10123 = vmatprep.subr.bf16.mxu0 %v12672_v29  ;;  %v12705_v35 = vcombine.low %v4194_v8, %v4198_v59  ;;  %v12712_v29 = vcombine.high %v4201_v36, %v4205_v48  ;;  %v4234_v8 = vld [vmem:[#allocation22 + $0xc88] sm:$0xff] }
0x1326   :  { %10467 = vmatprep.subr.bf16.mxu1 %v12674_v1  ;;  %v12714_v1 = vcombine.high %v4202_v52, %v4206_v54  ;;  %v4238_v59 = vld [vmem:[#allocation22 + $0xca8] sm:$0xff] }
0x1328   :  { %10124 = vmatpush1.bf16.msra.mxu0 %v12671_v61  ;;  %v12711_v61 = vcombine.low %v4201_v36, %v4205_v48  ;;  %v4241_v36 = vld [vmem:[#allocation22 + $0xcc0] sm:$0xff] }
0x1329   :  { %10468 = vmatpush1.bf16.msra.mxu1 %v12673_v22  ;;  %10125 = vmatprep.subr.bf16.mxu0 %v12680_v37  ;;  %v12713_v22 = vcombine.low %v4202_v52, %v4206_v54  ;;  %v12720_v37 = vcombine.high %v4209_v56, %v4213_v41  ;;  %v4245_v48 = vld [vmem:[#allocation22 + $0xce0] sm:$0xff]  ;;  %v4242_v52 = vld [vmem:[#allocation22 + $0xcc8] sm:$0xff] }
0x132a   :  { %10469 = vmatprep.subr.bf16.mxu1 %v12682_v42  ;;  %v12722_v42 = vcombine.high %v4210_v45, %v4214_v16  ;;  %v4246_v54 = vld [vmem:[#allocation22 + $0xce8] sm:$0xff] }
0x132c   :  { %10126 = vmatpush1.bf16.msra.mxu0 %v12679_v19  ;;  %v12719_v19 = vcombine.low %v4209_v56, %v4213_v41  ;;  %v4249_v56 = vld [vmem:[#allocation22 + $0xd00] sm:$0xff] }
0x132d   :  { %10470 = vmatpush1.bf16.msra.mxu1 %v12681_v10  ;;  %10127 = vmatprep.subr.bf16.mxu0 %v12688_v50  ;;  %v12721_v10 = vcombine.low %v4210_v45, %v4214_v16  ;;  %v12728_v50 = vcombine.high %v4217_v21, %v4221_v26  ;;  %v4253_v41 = vld [vmem:[#allocation22 + $0xd20] sm:$0xff]  ;;  %v4250_v45 = vld [vmem:[#allocation22 + $0xd08] sm:$0xff] }
0x132e   :  { %10471 = vmatprep.subr.bf16.mxu1 %v12690_v53  ;;  %v12730_v53 = vcombine.high %v4218_v27, %v4222_v17  ;;  %v4254_v16 = vld [vmem:[#allocation22 + $0xd28] sm:$0xff]  ;;  %v4257_v21 = vld [vmem:[#allocation22 + $0xd40] sm:$0xff] }
0x132f   :  { %v4261_v26 = vld [vmem:[#allocation22 + $0xd60] sm:$0xff] }
0x1330   :  { %10128 = vmatpush1.bf16.msra.mxu0 %v12687_v3  ;;  %v4230_v3 = vld [vmem:[#allocation22 + $0xc68] sm:$0xff] }
0x1331   :  { %10472 = vmatpush1.bf16.msra.mxu1 %v12689_v39  ;;  %10129 = vmatprep.subr.bf16.mxu0 %v12696_v58  ;;  %v12729_v39 = vcombine.low %v4218_v27, %v4222_v17  ;;  %v12736_v58 = vcombine.high %v4225_v44, %v4229_v60  ;;  %v12738_v4 = vcombine.high %v4226_v6, %v4230_v3  ;;  %v4258_v27 = vld [vmem:[#allocation22 + $0xd48] sm:$0xff] }
0x1332   :  { %10473 = vmatprep.subr.bf16.mxu1 %v12698_v9  ;;  %v4233_v9 = vld [vmem:[#allocation22 + $0xc80] sm:$0xff]  ;;  %v4262_v17 = vld [vmem:[#allocation22 + $0xd68] sm:$0xff] }
0x1334   :  { %10130 = vmatpush1.bf16.msra.mxu0 %v12695_v32  ;;  %v12735_v32 = vcombine.low %v4225_v44, %v4229_v60  ;;  %v4265_v44 = vld [vmem:[#allocation22 + $0xd80] sm:$0xff] }
0x1335   :  { %10474 = vmatpush1.bf16.msra.mxu1 %v12697_v0  ;;  %10131 = vmatprep.subr.bf16.mxu0 %v12704_v33  ;;  %v12737_v0 = vcombine.low %v4226_v6, %v4230_v3  ;;  %v12744_v33 = vcombine.high %v4233_v9, %v4237_v13  ;;  %v4269_v60 = vld [vmem:[#allocation22 + $0xda0] sm:$0xff]  ;;  %v4270_v6 = vld [vmem:[#allocation22 + $0xda8] sm:$0xff]  ;;  %v12767_v3 = vcombine.low %v4257_v21, %v4261_v26 }
0x1336   :  { %10475 = vmatprep.subr.bf16.mxu1 %v12706_v20  ;;  %v12746_v20 = vcombine.high %v4234_v8, %v4238_v59 }
0x1338   :  { %10132 = vmatpush1.bf16.msra.mxu0 %v12703_v55  ;;  %v12743_v55 = vcombine.low %v4233_v9, %v4237_v13  ;;  %v4273_v13 = vld [vmem:[#allocation22 + $0xdc0] sm:$0xff] }
0x1339   :  { %10476 = vmatpush1.bf16.msra.mxu1 %v12705_v35  ;;  %10133 = vmatprep.subr.bf16.mxu0 %v12712_v29  ;;  %v12745_v35 = vcombine.low %v4234_v8, %v4238_v59  ;;  %v12752_v29 = vcombine.high %v4241_v36, %v4245_v48  ;;  %v4274_v8 = vld [vmem:[#allocation22 + $0xdc8] sm:$0xff] }
0x133a   :  { %10477 = vmatprep.subr.bf16.mxu1 %v12714_v1  ;;  %v12754_v1 = vcombine.high %v4242_v52, %v4246_v54  ;;  %v4278_v59 = vld [vmem:[#allocation22 + $0xde8] sm:$0xff] }
0x133c   :  { %10134 = vmatpush1.bf16.msra.mxu0 %v12711_v61  ;;  %v12751_v61 = vcombine.low %v4241_v36, %v4245_v48  ;;  %v4281_v36 = vld [vmem:[#allocation22 + $0xe00] sm:$0xff] }
0x133d   :  { %10478 = vmatpush1.bf16.msra.mxu1 %v12713_v22  ;;  %10135 = vmatprep.subr.bf16.mxu0 %v12720_v37  ;;  %v12753_v22 = vcombine.low %v4242_v52, %v4246_v54  ;;  %v12760_v37 = vcombine.high %v4249_v56, %v4253_v41  ;;  %v4285_v48 = vld [vmem:[#allocation22 + $0xe20] sm:$0xff]  ;;  %v4282_v52 = vld [vmem:[#allocation22 + $0xe08] sm:$0xff] }
0x133e   :  { %10479 = vmatprep.subr.bf16.mxu1 %v12722_v42  ;;  %v12762_v42 = vcombine.high %v4250_v45, %v4254_v16  ;;  %v4286_v54 = vld [vmem:[#allocation22 + $0xe28] sm:$0xff] }
0x1340   :  { %10136 = vmatpush1.bf16.msra.mxu0 %v12719_v19  ;;  %v12759_v19 = vcombine.low %v4249_v56, %v4253_v41  ;;  %v4289_v56 = vld [vmem:[#allocation22 + $0xe40] sm:$0xff] }
0x1341   :  { %10480 = vmatpush1.bf16.msra.mxu1 %v12721_v10  ;;  %10148 = vmatprep.subr.bf16.mxu0 %v12728_v50  ;;  %v12761_v10 = vcombine.low %v4250_v45, %v4254_v16  ;;  %v12768_v50 = vcombine.high %v4257_v21, %v4261_v26  ;;  %v4293_v41 = vld [vmem:[#allocation22 + $0xe60] sm:$0xff]  ;;  %v4290_v45 = vld [vmem:[#allocation22 + $0xe48] sm:$0xff] }
0x1342   :  { %10492 = vmatprep.subr.bf16.mxu1 %v12730_v53  ;;  %v12770_v53 = vcombine.high %v4258_v27, %v4262_v17  ;;  %v4294_v16 = vld [vmem:[#allocation22 + $0xe68] sm:$0xff]  ;;  %v4297_v21 = vld [vmem:[#allocation22 + $0xe80] sm:$0xff] }
0x1343   :  { %10138 = vmatmul.mubr.bf16.vlgmr.msra.gmra.mrb[48].mxu0 %v16162_v23  ;;  %v4301_v26 = vld [vmem:[#allocation22 + $0xea0] sm:$0xff] }
0x1344   :  { %10482 = vmatmul.mubr.bf16.vlgmr.msra.gmra.mrb[44].mxu1 %v16162_v23  ;;  %10149 = vmatpush1.bf16.msra.mxu0 %v12727_v38  ;;  %v4266_v38 = vld [vmem:[#allocation22 + $0xd88] sm:$0xff] }
0x1345   :  { %10180 = vmatprep.mubr.bf16.mxu0 %v16168_v34  ;;  %10493 = vmatpush1.bf16.msra.mxu1 %v12729_v39  ;;  %v12769_v39 = vcombine.low %v4258_v27, %v4262_v17  ;;  %v12778_v9 = vcombine.high %v4266_v38, %v4270_v6  ;;  %v4298_v27 = vld [vmem:[#allocation22 + $0xe88] sm:$0xff] }
0x1346   :  { %10524 = vmatprep.mubr.bf16.mxu1 %v16168_v34  ;;  %10150 = vmatprep.subr.bf16.mxu0 %v12736_v58  ;;  %v12776_v58 = vcombine.high %v4265_v44, %v4269_v60  ;;  %v4302_v17 = vld [vmem:[#allocation22 + $0xea8] sm:$0xff] }
0x1347   :  { %10494 = vmatprep.subr.bf16.mxu1 %v12738_v4  ;;  %v4277_v4 = vld [vmem:[#allocation22 + $0xde0] sm:$0xff] }
0x1348   :  { %10151 = vmatpush1.bf16.msra.mxu0 %v12735_v32  ;;  %v12775_v32 = vcombine.low %v4265_v44, %v4269_v60  ;;  %v4305_v44 = vld [vmem:[#allocation22 + $0xec0] sm:$0xff] }
0x1349   :  { %10495 = vmatpush1.bf16.msra.mxu1 %v12737_v0  ;;  %10152 = vmatprep.subr.bf16.mxu0 %v12744_v33  ;;  %v12777_v0 = vcombine.low %v4266_v38, %v4270_v6  ;;  %v12784_v33 = vcombine.high %v4273_v13, %v4277_v4  ;;  %v4309_v60 = vld [vmem:[#allocation22 + $0xee0] sm:$0xff]  ;;  %v4306_v38 = vld [vmem:[#allocation22 + $0xec8] sm:$0xff] }
0x134a   :  { %10496 = vmatprep.subr.bf16.mxu1 %v12746_v20  ;;  %v12786_v20 = vcombine.high %v4274_v8, %v4278_v59  ;;  %v4310_v6 = vld [vmem:[#allocation22 + $0xee8] sm:$0xff] }
0x134c   :  { %10153 = vmatpush1.bf16.msra.mxu0 %v12743_v55  ;;  %v12783_v55 = vcombine.low %v4273_v13, %v4277_v4  ;;  %v4313_v13 = vld [vmem:[#allocation22 + $0xf00] sm:$0xff] }
0x134d   :  { %10497 = vmatpush1.bf16.msra.mxu1 %v12745_v35  ;;  %10154 = vmatprep.subr.bf16.mxu0 %v12752_v29  ;;  %v12785_v35 = vcombine.low %v4274_v8, %v4278_v59  ;;  %v12792_v29 = vcombine.high %v4281_v36, %v4285_v48  ;;  %v4317_v4 = vld [vmem:[#allocation22 + $0xf20] sm:$0xff]  ;;  %v4314_v8 = vld [vmem:[#allocation22 + $0xf08] sm:$0xff] }
0x134e   :  { %10498 = vmatprep.subr.bf16.mxu1 %v12754_v1  ;;  %v12794_v1 = vcombine.high %v4282_v52, %v4286_v54  ;;  %v4318_v59 = vld [vmem:[#allocation22 + $0xf28] sm:$0xff] }
0x1350   :  { %10155 = vmatpush1.bf16.msra.mxu0 %v12751_v61  ;;  %v12791_v61 = vcombine.low %v4281_v36, %v4285_v48  ;;  %v4321_v36 = vld [vmem:[#allocation22 + $0xf40] sm:$0xff] }
0x1351   :  { %10499 = vmatpush1.bf16.msra.mxu1 %v12753_v22  ;;  %10156 = vmatprep.subr.bf16.mxu0 %v12760_v37  ;;  %v12793_v22 = vcombine.low %v4282_v52, %v4286_v54  ;;  %v12800_v37 = vcombine.high %v4289_v56, %v4293_v41  ;;  %v4325_v48 = vld [vmem:[#allocation22 + $0xf60] sm:$0xff]  ;;  %v4322_v52 = vld [vmem:[#allocation22 + $0xf48] sm:$0xff] }
0x1352   :  { %10500 = vmatprep.subr.bf16.mxu1 %v12762_v42  ;;  %v12802_v42 = vcombine.high %v4290_v45, %v4294_v16  ;;  %v4326_v54 = vld [vmem:[#allocation22 + $0xf68] sm:$0xff] }
0x1354   :  { %10157 = vmatpush1.bf16.msra.mxu0 %v12759_v19  ;;  %v12799_v19 = vcombine.low %v4289_v56, %v4293_v41  ;;  %v4329_v56 = vld [vmem:[#allocation22 + $0xf80] sm:$0xff] }
0x1355   :  { %10501 = vmatpush1.bf16.msra.mxu1 %v12761_v10  ;;  %10158 = vmatprep.subr.bf16.mxu0 %v12768_v50  ;;  %v12801_v10 = vcombine.low %v4290_v45, %v4294_v16  ;;  %v12808_v50 = vcombine.high %v4297_v21, %v4301_v26  ;;  %v4333_v41 = vld [vmem:[#allocation22 + $0xfa0] sm:$0xff]  ;;  %v4330_v45 = vld [vmem:[#allocation22 + $0xf88] sm:$0xff] }
0x1356   :  { %10502 = vmatprep.subr.bf16.mxu1 %v12770_v53  ;;  %v12810_v53 = vcombine.high %v4298_v27, %v4302_v17  ;;  %v4334_v16 = vld [vmem:[#allocation22 + $0xfa8] sm:$0xff] }
0x1358   :  { %10159 = vmatpush1.bf16.msra.mxu0 %v12767_v3  ;;  %v12807_v3 = vcombine.low %v4297_v21, %v4301_v26  ;;  %v4337_v21 = vld [vmem:[#allocation22 + $0xfc0] sm:$0xff] }
0x1359   :  { %10503 = vmatpush1.bf16.msra.mxu1 %v12769_v39  ;;  %10160 = vmatprep.subr.bf16.mxu0 %v12776_v58  ;;  %v12809_v39 = vcombine.low %v4298_v27, %v4302_v17  ;;  %v12816_v58 = vcombine.high %v4305_v44, %v4309_v60  ;;  %v4341_v26 = vld [vmem:[#allocation22 + $0xfe0] sm:$0xff]  ;;  %v4338_v27 = vld [vmem:[#allocation22 + $0xfc8] sm:$0xff] }
0x135a   :  { %10504 = vmatprep.subr.bf16.mxu1 %v12778_v9  ;;  %v12818_v9 = vcombine.high %v4306_v38, %v4310_v6  ;;  %v4342_v17 = vld [vmem:[#allocation22 + $0xfe8] sm:$0xff] }
0x135c   :  { %10161 = vmatpush1.bf16.msra.mxu0 %v12775_v32  ;;  %v12815_v32 = vcombine.low %v4305_v44, %v4309_v60  ;;  %v4345_v44 = vld [vmem:[#allocation22 + $0x1000] sm:$0xff] }
0x135d   :  { %10505 = vmatpush1.bf16.msra.mxu1 %v12777_v0  ;;  %10162 = vmatprep.subr.bf16.mxu0 %v12784_v33  ;;  %v12817_v0 = vcombine.low %v4306_v38, %v4310_v6  ;;  %v12824_v33 = vcombine.high %v4313_v13, %v4317_v4  ;;  %v4349_v60 = vld [vmem:[#allocation22 + $0x1020] sm:$0xff]  ;;  %v4346_v38 = vld [vmem:[#allocation22 + $0x1008] sm:$0xff] }
0x135e   :  { %10506 = vmatprep.subr.bf16.mxu1 %v12786_v20  ;;  %v12826_v20 = vcombine.high %v4314_v8, %v4318_v59  ;;  %v4350_v6 = vld [vmem:[#allocation22 + $0x1028] sm:$0xff] }
0x1360   :  { %10163 = vmatpush1.bf16.msra.mxu0 %v12783_v55  ;;  %v12823_v55 = vcombine.low %v4313_v13, %v4317_v4  ;;  %v4353_v13 = vld [vmem:[#allocation22 + $0x1040] sm:$0xff] }
0x1361   :  { %10507 = vmatpush1.bf16.msra.mxu1 %v12785_v35  ;;  %10164 = vmatprep.subr.bf16.mxu0 %v12792_v29  ;;  %v12825_v35 = vcombine.low %v4314_v8, %v4318_v59  ;;  %v12832_v29 = vcombine.high %v4321_v36, %v4325_v48  ;;  %v4357_v4 = vld [vmem:[#allocation22 + $0x1060] sm:$0xff]  ;;  %v12855_v8 = vcombine.low %v4345_v44, %v4349_v60  ;;  %v4354_v59 = vld [vmem:[#allocation22 + $0x1048] sm:$0xff] }
0x1362   :  { %10508 = vmatprep.subr.bf16.mxu1 %v12794_v1  ;;  %v12834_v1 = vcombine.high %v4322_v52, %v4326_v54 }
0x1364   :  { %10165 = vmatpush1.bf16.msra.mxu0 %v12791_v61  ;;  %v12831_v61 = vcombine.low %v4321_v36, %v4325_v48  ;;  %v4365_v36 = vld [vmem:[#allocation22 + $0x10a0] sm:$0xff] }
0x1365   :  { %10509 = vmatpush1.bf16.msra.mxu1 %v12793_v22  ;;  %10166 = vmatprep.subr.bf16.mxu0 %v12800_v37  ;;  %v12833_v22 = vcombine.low %v4322_v52, %v4326_v54  ;;  %v12840_v37 = vcombine.high %v4329_v56, %v4333_v41  ;;  %v4362_v52 = vld [vmem:[#allocation22 + $0x1088] sm:$0xff] }
0x1366   :  { %10510 = vmatprep.subr.bf16.mxu1 %v12802_v42  ;;  %v12842_v42 = vcombine.high %v4330_v45, %v4334_v16  ;;  %v4366_v54 = vld [vmem:[#allocation22 + $0x10a8] sm:$0xff] }
0x1368   :  { %10167 = vmatpush1.bf16.msra.mxu0 %v12799_v19  ;;  %v12839_v19 = vcombine.low %v4329_v56, %v4333_v41  ;;  %v4369_v56 = vld [vmem:[#allocation22 + $0x10c0] sm:$0xff] }
0x1369   :  { %10511 = vmatpush1.bf16.msra.mxu1 %v12801_v10  ;;  %10168 = vmatprep.subr.bf16.mxu0 %v12808_v50  ;;  %v12841_v10 = vcombine.low %v4330_v45, %v4334_v16  ;;  %v12848_v50 = vcombine.high %v4337_v21, %v4341_v26  ;;  %v4373_v41 = vld [vmem:[#allocation22 + $0x10e0] sm:$0xff]  ;;  %v4370_v45 = vld [vmem:[#allocation22 + $0x10c8] sm:$0xff] }
0x136a   :  { %10512 = vmatprep.subr.bf16.mxu1 %v12810_v53  ;;  %v12850_v53 = vcombine.high %v4338_v27, %v4342_v17  ;;  %v4374_v16 = vld [vmem:[#allocation22 + $0x10e8] sm:$0xff] }
0x136c   :  { %10169 = vmatpush1.bf16.msra.mxu0 %v12807_v3  ;;  %v12847_v3 = vcombine.low %v4337_v21, %v4341_v26  ;;  %v4377_v21 = vld [vmem:[#allocation22 + $0x1100] sm:$0xff] }
0x136d   :  { %10513 = vmatpush1.bf16.msra.mxu1 %v12809_v39  ;;  %10170 = vmatprep.subr.bf16.mxu0 %v12816_v58  ;;  %v12849_v39 = vcombine.low %v4338_v27, %v4342_v17  ;;  %v12856_v58 = vcombine.high %v4345_v44, %v4349_v60  ;;  %v4381_v26 = vld [vmem:[#allocation22 + $0x1120] sm:$0xff]  ;;  %v4378_v27 = vld [vmem:[#allocation22 + $0x1108] sm:$0xff] }
0x136e   :  { %10514 = vmatprep.subr.bf16.mxu1 %v12818_v9  ;;  %v12858_v9 = vcombine.high %v4346_v38, %v4350_v6  ;;  %v4382_v17 = vld [vmem:[#allocation22 + $0x1128] sm:$0xff]  ;;  %v4385_v44 = vld [vmem:[#allocation22 + $0x1140] sm:$0xff] }
0x136f   :  { %v4389_v60 = vld [vmem:[#allocation22 + $0x1160] sm:$0xff] }
0x1370   :  { %10171 = vmatpush1.bf16.msra.mxu0 %v12815_v32  ;;  %v4358_v32 = vld [vmem:[#allocation22 + $0x1068] sm:$0xff] }
0x1371   :  { %10515 = vmatpush1.bf16.msra.mxu1 %v12817_v0  ;;  %10172 = vmatprep.subr.bf16.mxu0 %v12824_v33  ;;  %v12857_v0 = vcombine.low %v4346_v38, %v4350_v6  ;;  %v12864_v33 = vcombine.high %v4353_v13, %v4357_v4  ;;  %v12866_v48 = vcombine.high %v4354_v59, %v4358_v32  ;;  %v4386_v38 = vld [vmem:[#allocation22 + $0x1148] sm:$0xff] }
0x1372   :  { %10516 = vmatprep.subr.bf16.mxu1 %v12826_v20  ;;  %v4361_v20 = vld [vmem:[#allocation22 + $0x1080] sm:$0xff]  ;;  %v4390_v6 = vld [vmem:[#allocation22 + $0x1168] sm:$0xff] }
0x1374   :  { %10173 = vmatpush1.bf16.msra.mxu0 %v12823_v55  ;;  %v12863_v55 = vcombine.low %v4353_v13, %v4357_v4  ;;  %v4393_v13 = vld [vmem:[#allocation22 + $0x1180] sm:$0xff] }
0x1375   :  { %10517 = vmatpush1.bf16.msra.mxu1 %v12825_v35  ;;  %10174 = vmatprep.subr.bf16.mxu0 %v12832_v29  ;;  %v12865_v35 = vcombine.low %v4354_v59, %v4358_v32  ;;  %v12872_v29 = vcombine.high %v4361_v20, %v4365_v36  ;;  %v4397_v4 = vld [vmem:[#allocation22 + $0x11a0] sm:$0xff]  ;;  %v4398_v59 = vld [vmem:[#allocation22 + $0x11a8] sm:$0xff]  ;;  %v12895_v32 = vcombine.low %v4385_v44, %v4389_v60 }
0x1376   :  { %10518 = vmatprep.subr.bf16.mxu1 %v12834_v1  ;;  %v12874_v1 = vcombine.high %v4362_v52, %v4366_v54 }
0x1378   :  { %10175 = vmatpush1.bf16.msra.mxu0 %v12831_v61  ;;  %v12871_v61 = vcombine.low %v4361_v20, %v4365_v36  ;;  %v4401_v36 = vld [vmem:[#allocation22 + $0x11c0] sm:$0xff] }
0x1379   :  { %10519 = vmatpush1.bf16.msra.mxu1 %v12833_v22  ;;  %10176 = vmatprep.subr.bf16.mxu0 %v12840_v37  ;;  %v12873_v22 = vcombine.low %v4362_v52, %v4366_v54  ;;  %v12880_v37 = vcombine.high %v4369_v56, %v4373_v41  ;;  %v4402_v52 = vld [vmem:[#allocation22 + $0x11c8] sm:$0xff] }
0x137a   :  { %10520 = vmatprep.subr.bf16.mxu1 %v12842_v42  ;;  %v12882_v42 = vcombine.high %v4370_v45, %v4374_v16  ;;  %v4406_v54 = vld [vmem:[#allocation22 + $0x11e8] sm:$0xff] }
0x137c   :  { %10177 = vmatpush1.bf16.msra.mxu0 %v12839_v19  ;;  %v12879_v19 = vcombine.low %v4369_v56, %v4373_v41  ;;  %v4409_v56 = vld [vmem:[#allocation22 + $0x1200] sm:$0xff] }
0x137d   :  { %10521 = vmatpush1.bf16.msra.mxu1 %v12841_v10  ;;  %10178 = vmatprep.subr.bf16.mxu0 %v12848_v50  ;;  %v12881_v10 = vcombine.low %v4370_v45, %v4374_v16  ;;  %v12888_v50 = vcombine.high %v4377_v21, %v4381_v26  ;;  %v4413_v41 = vld [vmem:[#allocation22 + $0x1220] sm:$0xff]  ;;  %v4410_v45 = vld [vmem:[#allocation22 + $0x1208] sm:$0xff] }
0x137e   :  { %10522 = vmatprep.subr.bf16.mxu1 %v12850_v53  ;;  %v12890_v53 = vcombine.high %v4378_v27, %v4382_v17  ;;  %v4414_v16 = vld [vmem:[#allocation22 + $0x1228] sm:$0xff] }
0x1380   :  { %10179 = vmatpush1.bf16.msra.mxu0 %v12847_v3  ;;  %v12887_v3 = vcombine.low %v4377_v21, %v4381_v26  ;;  %v4417_v21 = vld [vmem:[#allocation22 + $0x1240] sm:$0xff] }
0x1381   :  { %10523 = vmatpush1.bf16.msra.mxu1 %v12849_v39  ;;  %10191 = vmatprep.subr.bf16.mxu0 %v12856_v58  ;;  %v12889_v39 = vcombine.low %v4378_v27, %v4382_v17  ;;  %v12896_v58 = vcombine.high %v4385_v44, %v4389_v60  ;;  %v4421_v26 = vld [vmem:[#allocation22 + $0x1260] sm:$0xff]  ;;  %v4418_v27 = vld [vmem:[#allocation22 + $0x1248] sm:$0xff] }
0x1382   :  { %10535 = vmatprep.subr.bf16.mxu1 %v12858_v9  ;;  %v12898_v9 = vcombine.high %v4386_v38, %v4390_v6  ;;  %v4422_v17 = vld [vmem:[#allocation22 + $0x1268] sm:$0xff]  ;;  %v4425_v44 = vld [vmem:[#allocation22 + $0x1280] sm:$0xff] }
0x1383   :  { %10181 = vmatmul.mubr.bf16.vlgmr.msra.gmra.mrb[48].mxu0 %v16164_v12  ;;  %v4429_v60 = vld [vmem:[#allocation22 + $0x12a0] sm:$0xff] }
0x1384   :  { %10525 = vmatmul.mubr.bf16.vlgmr.msra.gmra.mrb[44].mxu1 %v16164_v12  ;;  %10192 = vmatpush1.bf16.msra.mxu0 %v12855_v8  ;;  %v4394_v8 = vld [vmem:[#allocation22 + $0x1188] sm:$0xff] }
0x1385   :  { %10223 = vmatprep.mubr.bf16.mxu0 %v16184_v49  ;;  %10536 = vmatpush1.bf16.msra.mxu1 %v12857_v0  ;;  %v12897_v0 = vcombine.low %v4386_v38, %v4390_v6  ;;  %v12906_v20 = vcombine.high %v4394_v8, %v4398_v59  ;;  %v4426_v38 = vld [vmem:[#allocation22 + $0x1288] sm:$0xff] }
0x1386   :  { %10567 = vmatprep.mubr.bf16.mxu1 %v16184_v49  ;;  %10193 = vmatprep.subr.bf16.mxu0 %v12864_v33  ;;  %v12904_v33 = vcombine.high %v4393_v13, %v4397_v4  ;;  %v4430_v6 = vld [vmem:[#allocation22 + $0x12a8] sm:$0xff] }
0x1387   :  { %10537 = vmatprep.subr.bf16.mxu1 %v12866_v48  ;;  %v4405_v48 = vld [vmem:[#allocation22 + $0x11e0] sm:$0xff] }
0x1388   :  { %10194 = vmatpush1.bf16.msra.mxu0 %v12863_v55  ;;  %v12903_v55 = vcombine.low %v4393_v13, %v4397_v4  ;;  %v4433_v13 = vld [vmem:[#allocation22 + $0x12c0] sm:$0xff] }
0x1389   :  { %10538 = vmatpush1.bf16.msra.mxu1 %v12865_v35  ;;  %10195 = vmatprep.subr.bf16.mxu0 %v12872_v29  ;;  %v12905_v35 = vcombine.low %v4394_v8, %v4398_v59  ;;  %v12912_v29 = vcombine.high %v4401_v36, %v4405_v48  ;;  %v4437_v4 = vld [vmem:[#allocation22 + $0x12e0] sm:$0xff]  ;;  %v4434_v8 = vld [vmem:[#allocation22 + $0x12c8] sm:$0xff] }
0x138a   :  { %10539 = vmatprep.subr.bf16.mxu1 %v12874_v1  ;;  %v12914_v1 = vcombine.high %v4402_v52, %v4406_v54  ;;  %v4438_v59 = vld [vmem:[#allocation22 + $0x12e8] sm:$0xff] }
0x138c   :  { %10196 = vmatpush1.bf16.msra.mxu0 %v12871_v61  ;;  %v12911_v61 = vcombine.low %v4401_v36, %v4405_v48  ;;  %v4441_v36 = vld [vmem:[#allocation22 + $0x1300] sm:$0xff] }
0x138d   :  { %10540 = vmatpush1.bf16.msra.mxu1 %v12873_v22  ;;  %10197 = vmatprep.subr.bf16.mxu0 %v12880_v37  ;;  %v12913_v22 = vcombine.low %v4402_v52, %v4406_v54  ;;  %v12920_v37 = vcombine.high %v4409_v56, %v4413_v41  ;;  %v4445_v48 = vld [vmem:[#allocation22 + $0x1320] sm:$0xff]  ;;  %v4442_v52 = vld [vmem:[#allocation22 + $0x1308] sm:$0xff] }
0x138e   :  { %10541 = vmatprep.subr.bf16.mxu1 %v12882_v42  ;;  %v12922_v42 = vcombine.high %v4410_v45, %v4414_v16  ;;  %v4446_v54 = vld [vmem:[#allocation22 + $0x1328] sm:$0xff] }
0x1390   :  { %10198 = vmatpush1.bf16.msra.mxu0 %v12879_v19  ;;  %v12919_v19 = vcombine.low %v4409_v56, %v4413_v41  ;;  %v4449_v56 = vld [vmem:[#allocation22 + $0x1340] sm:$0xff] }
0x1391   :  { %10542 = vmatpush1.bf16.msra.mxu1 %v12881_v10  ;;  %10199 = vmatprep.subr.bf16.mxu0 %v12888_v50  ;;  %v12921_v10 = vcombine.low %v4410_v45, %v4414_v16  ;;  %v12928_v50 = vcombine.high %v4417_v21, %v4421_v26  ;;  %v4453_v41 = vld [vmem:[#allocation22 + $0x1360] sm:$0xff]  ;;  %v4450_v45 = vld [vmem:[#allocation22 + $0x1348] sm:$0xff] }
0x1392   :  { %10543 = vmatprep.subr.bf16.mxu1 %v12890_v53  ;;  %v12930_v53 = vcombine.high %v4418_v27, %v4422_v17  ;;  %v4454_v16 = vld [vmem:[#allocation22 + $0x1368] sm:$0xff] }
0x1394   :  { %10200 = vmatpush1.bf16.msra.mxu0 %v12887_v3  ;;  %v12927_v3 = vcombine.low %v4417_v21, %v4421_v26  ;;  %v4457_v21 = vld [vmem:[#allocation22 + $0x1380] sm:$0xff] }
0x1395   :  { %10544 = vmatpush1.bf16.msra.mxu1 %v12889_v39  ;;  %10201 = vmatprep.subr.bf16.mxu0 %v12896_v58  ;;  %v12929_v39 = vcombine.low %v4418_v27, %v4422_v17  ;;  %v12936_v58 = vcombine.high %v4425_v44, %v4429_v60  ;;  %v4461_v26 = vld [vmem:[#allocation22 + $0x13a0] sm:$0xff]  ;;  %v4458_v27 = vld [vmem:[#allocation22 + $0x1388] sm:$0xff] }
0x1396   :  { %10545 = vmatprep.subr.bf16.mxu1 %v12898_v9  ;;  %v12938_v9 = vcombine.high %v4426_v38, %v4430_v6  ;;  %v4462_v17 = vld [vmem:[#allocation22 + $0x13a8] sm:$0xff] }
0x1398   :  { %10202 = vmatpush1.bf16.msra.mxu0 %v12895_v32  ;;  %v12935_v32 = vcombine.low %v4425_v44, %v4429_v60  ;;  %v4465_v44 = vld [vmem:[#allocation22 + $0x13c0] sm:$0xff] }
0x1399   :  { %10546 = vmatpush1.bf16.msra.mxu1 %v12897_v0  ;;  %10203 = vmatprep.subr.bf16.mxu0 %v12904_v33  ;;  %v12937_v0 = vcombine.low %v4426_v38, %v4430_v6  ;;  %v12944_v33 = vcombine.high %v4433_v13, %v4437_v4  ;;  %v4469_v60 = vld [vmem:[#allocation22 + $0x13e0] sm:$0xff]  ;;  %v4466_v38 = vld [vmem:[#allocation22 + $0x13c8] sm:$0xff] }
0x139a   :  { %10547 = vmatprep.subr.bf16.mxu1 %v12906_v20  ;;  %v12946_v20 = vcombine.high %v4434_v8, %v4438_v59  ;;  %v4470_v6 = vld [vmem:[#allocation22 + $0x13e8] sm:$0xff] }
0x139c   :  { %10204 = vmatpush1.bf16.msra.mxu0 %v12903_v55  ;;  %v12943_v55 = vcombine.low %v4433_v13, %v4437_v4  ;;  %v4473_v13 = vld [vmem:[#allocation22 + $0x1400] sm:$0xff] }
0x139d   :  { %10548 = vmatpush1.bf16.msra.mxu1 %v12905_v35  ;;  %10205 = vmatprep.subr.bf16.mxu0 %v12912_v29  ;;  %v12945_v35 = vcombine.low %v4434_v8, %v4438_v59  ;;  %v12952_v29 = vcombine.high %v4441_v36, %v4445_v48  ;;  %v4477_v4 = vld [vmem:[#allocation22 + $0x1420] sm:$0xff]  ;;  %v4474_v8 = vld [vmem:[#allocation22 + $0x1408] sm:$0xff] }
0x139e   :  { %10549 = vmatprep.subr.bf16.mxu1 %v12914_v1  ;;  %v12954_v1 = vcombine.high %v4442_v52, %v4446_v54  ;;  %v4478_v59 = vld [vmem:[#allocation22 + $0x1428] sm:$0xff] }
0x13a0   :  { %10206 = vmatpush1.bf16.msra.mxu0 %v12911_v61  ;;  %v12951_v61 = vcombine.low %v4441_v36, %v4445_v48  ;;  %v4481_v36 = vld [vmem:[#allocation22 + $0x1440] sm:$0xff] }
0x13a1   :  { %10550 = vmatpush1.bf16.msra.mxu1 %v12913_v22  ;;  %10207 = vmatprep.subr.bf16.mxu0 %v12920_v37  ;;  %v12953_v22 = vcombine.low %v4442_v52, %v4446_v54  ;;  %v12960_v37 = vcombine.high %v4449_v56, %v4453_v41  ;;  %v4485_v48 = vld [vmem:[#allocation22 + $0x1460] sm:$0xff]  ;;  %v12983_v52 = vcombine.low %v4473_v13, %v4477_v4  ;;  %v4482_v54 = vld [vmem:[#allocation22 + $0x1448] sm:$0xff] }
0x13a2   :  { %10551 = vmatprep.subr.bf16.mxu1 %v12922_v42  ;;  %v12962_v42 = vcombine.high %v4450_v45, %v4454_v16 }
0x13a4   :  { %10208 = vmatpush1.bf16.msra.mxu0 %v12919_v19  ;;  %v12959_v19 = vcombine.low %v4449_v56, %v4453_v41  ;;  %v4493_v56 = vld [vmem:[#allocation22 + $0x14a0] sm:$0xff] }
0x13a5   :  { %10552 = vmatpush1.bf16.msra.mxu1 %v12921_v10  ;;  %10209 = vmatprep.subr.bf16.mxu0 %v12928_v50  ;;  %v12961_v10 = vcombine.low %v4450_v45, %v4454_v16  ;;  %v12968_v50 = vcombine.high %v4457_v21, %v4461_v26  ;;  %v4490_v45 = vld [vmem:[#allocation22 + $0x1488] sm:$0xff] }
0x13a6   :  { %10553 = vmatprep.subr.bf16.mxu1 %v12930_v53  ;;  %v12970_v53 = vcombine.high %v4458_v27, %v4462_v17  ;;  %v4494_v16 = vld [vmem:[#allocation22 + $0x14a8] sm:$0xff] }
0x13a8   :  { %10210 = vmatpush1.bf16.msra.mxu0 %v12927_v3  ;;  %v12967_v3 = vcombine.low %v4457_v21, %v4461_v26  ;;  %v4497_v21 = vld [vmem:[#allocation22 + $0x14c0] sm:$0xff] }
0x13a9   :  { %10554 = vmatpush1.bf16.msra.mxu1 %v12929_v39  ;;  %10211 = vmatprep.subr.bf16.mxu0 %v12936_v58  ;;  %v12969_v39 = vcombine.low %v4458_v27, %v4462_v17  ;;  %v12976_v58 = vcombine.high %v4465_v44, %v4469_v60  ;;  %v4501_v26 = vld [vmem:[#allocation22 + $0x14e0] sm:$0xff]  ;;  %v4498_v27 = vld [vmem:[#allocation22 + $0x14c8] sm:$0xff] }
0x13aa   :  { %10555 = vmatprep.subr.bf16.mxu1 %v12938_v9  ;;  %v12978_v9 = vcombine.high %v4466_v38, %v4470_v6  ;;  %v4502_v17 = vld [vmem:[#allocation22 + $0x14e8] sm:$0xff] }
0x13ac   :  { %10212 = vmatpush1.bf16.msra.mxu0 %v12935_v32  ;;  %v12975_v32 = vcombine.low %v4465_v44, %v4469_v60  ;;  %v4505_v44 = vld [vmem:[#allocation22 + $0x1500] sm:$0xff] }
0x13ad   :  { %10556 = vmatpush1.bf16.msra.mxu1 %v12937_v0  ;;  %10213 = vmatprep.subr.bf16.mxu0 %v12944_v33  ;;  %v12977_v0 = vcombine.low %v4466_v38, %v4470_v6  ;;  %v12984_v33 = vcombine.high %v4473_v13, %v4477_v4  ;;  %v4509_v60 = vld [vmem:[#allocation22 + $0x1520] sm:$0xff]  ;;  %v4506_v38 = vld [vmem:[#allocation22 + $0x1508] sm:$0xff] }
0x13ae   :  { %10557 = vmatprep.subr.bf16.mxu1 %v12946_v20  ;;  %v12986_v20 = vcombine.high %v4474_v8, %v4478_v59  ;;  %v4510_v6 = vld [vmem:[#allocation22 + $0x1528] sm:$0xff]  ;;  %v4513_v13 = vld [vmem:[#allocation22 + $0x1540] sm:$0xff] }
0x13af   :  { %v4517_v4 = vld [vmem:[#allocation22 + $0x1560] sm:$0xff] }
0x13b0   :  { %10214 = vmatpush1.bf16.msra.mxu0 %v12943_v55  ;;  %v4486_v55 = vld [vmem:[#allocation22 + $0x1468] sm:$0xff] }
0x13b1   :  { %10558 = vmatpush1.bf16.msra.mxu1 %v12945_v35  ;;  %10215 = vmatprep.subr.bf16.mxu0 %v12952_v29  ;;  %v12985_v35 = vcombine.low %v4474_v8, %v4478_v59  ;;  %v12992_v29 = vcombine.high %v4481_v36, %v4485_v48  ;;  %v12994_v41 = vcombine.high %v4482_v54, %v4486_v55  ;;  %v4514_v8 = vld [vmem:[#allocation22 + $0x1548] sm:$0xff] }
0x13b2   :  { %10559 = vmatprep.subr.bf16.mxu1 %v12954_v1  ;;  %v4489_v1 = vld [vmem:[#allocation22 + $0x1480] sm:$0xff]  ;;  %v4518_v59 = vld [vmem:[#allocation22 + $0x1568] sm:$0xff] }
0x13b4   :  { %10216 = vmatpush1.bf16.msra.mxu0 %v12951_v61  ;;  %v12991_v61 = vcombine.low %v4481_v36, %v4485_v48  ;;  %v4521_v36 = vld [vmem:[#allocation22 + $0x1580] sm:$0xff] }
0x13b5   :  { %10560 = vmatpush1.bf16.msra.mxu1 %v12953_v22  ;;  %10217 = vmatprep.subr.bf16.mxu0 %v12960_v37  ;;  %v12993_v22 = vcombine.low %v4482_v54, %v4486_v55  ;;  %v13000_v37 = vcombine.high %v4489_v1, %v4493_v56  ;;  %v4525_v48 = vld [vmem:[#allocation22 + $0x15a0] sm:$0xff]  ;;  %v4526_v54 = vld [vmem:[#allocation22 + $0x15a8] sm:$0xff]  ;;  %v13023_v55 = vcombine.low %v4513_v13, %v4517_v4 }
0x13b6   :  { %10561 = vmatprep.subr.bf16.mxu1 %v12962_v42  ;;  %v13002_v42 = vcombine.high %v4490_v45, %v4494_v16 }
0x13b8   :  { %10218 = vmatpush1.bf16.msra.mxu0 %v12959_v19  ;;  %v12999_v19 = vcombine.low %v4489_v1, %v4493_v56  ;;  %v4529_v56 = vld [vmem:[#allocation22 + $0x15c0] sm:$0xff] }
0x13b9   :  { %10562 = vmatpush1.bf16.msra.mxu1 %v12961_v10  ;;  %10219 = vmatprep.subr.bf16.mxu0 %v12968_v50  ;;  %v13001_v10 = vcombine.low %v4490_v45, %v4494_v16  ;;  %v13008_v50 = vcombine.high %v4497_v21, %v4501_v26  ;;  %v4530_v45 = vld [vmem:[#allocation22 + $0x15c8] sm:$0xff] }
0x13ba   :  { %10563 = vmatprep.subr.bf16.mxu1 %v12970_v53  ;;  %v13010_v53 = vcombine.high %v4498_v27, %v4502_v17  ;;  %v4534_v16 = vld [vmem:[#allocation22 + $0x15e8] sm:$0xff] }
0x13bc   :  { %10220 = vmatpush1.bf16.msra.mxu0 %v12967_v3  ;;  %v13007_v3 = vcombine.low %v4497_v21, %v4501_v26  ;;  %v4537_v21 = vld [vmem:[#allocation22 + $0x1600] sm:$0xff] }
0x13bd   :  { %10564 = vmatpush1.bf16.msra.mxu1 %v12969_v39  ;;  %10221 = vmatprep.subr.bf16.mxu0 %v12976_v58  ;;  %v13009_v39 = vcombine.low %v4498_v27, %v4502_v17  ;;  %v13016_v58 = vcombine.high %v4505_v44, %v4509_v60  ;;  %v4541_v26 = vld [vmem:[#allocation22 + $0x1620] sm:$0xff]  ;;  %v4538_v27 = vld [vmem:[#allocation22 + $0x1608] sm:$0xff] }
0x13be   :  { %10565 = vmatprep.subr.bf16.mxu1 %v12978_v9  ;;  %v13018_v9 = vcombine.high %v4506_v38, %v4510_v6  ;;  %v4542_v17 = vld [vmem:[#allocation22 + $0x1628] sm:$0xff] }
0x13c0   :  { %10222 = vmatpush1.bf16.msra.mxu0 %v12975_v32  ;;  %v13015_v32 = vcombine.low %v4505_v44, %v4509_v60  ;;  %v4545_v44 = vld [vmem:[#allocation22 + $0x1640] sm:$0xff] }
0x13c1   :  { %10566 = vmatpush1.bf16.msra.mxu1 %v12977_v0  ;;  %10234 = vmatprep.subr.bf16.mxu0 %v12984_v33  ;;  %v13017_v0 = vcombine.low %v4506_v38, %v4510_v6  ;;  %v13024_v33 = vcombine.high %v4513_v13, %v4517_v4  ;;  %v4549_v60 = vld [vmem:[#allocation22 + $0x1660] sm:$0xff]  ;;  %v4546_v38 = vld [vmem:[#allocation22 + $0x1648] sm:$0xff] }
0x13c2   :  { %10578 = vmatprep.subr.bf16.mxu1 %v12986_v20  ;;  %v13026_v20 = vcombine.high %v4514_v8, %v4518_v59  ;;  %v4550_v6 = vld [vmem:[#allocation22 + $0x1668] sm:$0xff]  ;;  %v4553_v13 = vld [vmem:[#allocation22 + $0x1680] sm:$0xff] }
0x13c3   :  { %10224 = vmatmul.mubr.bf16.vlgmr.msra.gmra.mrb[48].mxu0 %v16180_v46  ;;  %v4557_v4 = vld [vmem:[#allocation22 + $0x16a0] sm:$0xff] }
0x13c4   :  { %10568 = vmatmul.mubr.bf16.vlgmr.msra.gmra.mrb[44].mxu1 %v16180_v46  ;;  %10235 = vmatpush1.bf16.msra.mxu0 %v12983_v52  ;;  %v4522_v52 = vld [vmem:[#allocation22 + $0x1588] sm:$0xff] }
0x13c5   :  { %10266 = vmatprep.mubr.bf16.mxu0 %v16186_v51  ;;  %10579 = vmatpush1.bf16.msra.mxu1 %v12985_v35  ;;  %v13025_v35 = vcombine.low %v4514_v8, %v4518_v59  ;;  %v13034_v1 = vcombine.high %v4522_v52, %v4526_v54  ;;  %v4554_v8 = vld [vmem:[#allocation22 + $0x1688] sm:$0xff] }
0x13c6   :  { %10610 = vmatprep.mubr.bf16.mxu1 %v16186_v51  ;;  %10236 = vmatprep.subr.bf16.mxu0 %v12992_v29  ;;  %v13032_v29 = vcombine.high %v4521_v36, %v4525_v48  ;;  %v4558_v59 = vld [vmem:[#allocation22 + $0x16a8] sm:$0xff] }
0x13c7   :  { %10580 = vmatprep.subr.bf16.mxu1 %v12994_v41  ;;  %v4533_v41 = vld [vmem:[#allocation22 + $0x15e0] sm:$0xff] }
0x13c8   :  { %10237 = vmatpush1.bf16.msra.mxu0 %v12991_v61  ;;  %v13031_v61 = vcombine.low %v4521_v36, %v4525_v48  ;;  %v4561_v36 = vld [vmem:[#allocation22 + $0x16c0] sm:$0xff] }
0x13c9   :  { %10581 = vmatpush1.bf16.msra.mxu1 %v12993_v22  ;;  %10238 = vmatprep.subr.bf16.mxu0 %v13000_v37  ;;  %v13033_v22 = vcombine.low %v4522_v52, %v4526_v54  ;;  %v13040_v37 = vcombine.high %v4529_v56, %v4533_v41  ;;  %v4565_v48 = vld [vmem:[#allocation22 + $0x16e0] sm:$0xff]  ;;  %v4562_v52 = vld [vmem:[#allocation22 + $0x16c8] sm:$0xff] }
0x13ca   :  { %10582 = vmatprep.subr.bf16.mxu1 %v13002_v42  ;;  %v13042_v42 = vcombine.high %v4530_v45, %v4534_v16  ;;  %v4566_v54 = vld [vmem:[#allocation22 + $0x16e8] sm:$0xff] }
0x13cc   :  { %10239 = vmatpush1.bf16.msra.mxu0 %v12999_v19  ;;  %v13039_v19 = vcombine.low %v4529_v56, %v4533_v41  ;;  %v4569_v56 = vld [vmem:[#allocation22 + $0x1700] sm:$0xff] }
0x13cd   :  { %10583 = vmatpush1.bf16.msra.mxu1 %v13001_v10  ;;  %10240 = vmatprep.subr.bf16.mxu0 %v13008_v50  ;;  %v13041_v10 = vcombine.low %v4530_v45, %v4534_v16  ;;  %v13048_v50 = vcombine.high %v4537_v21, %v4541_v26  ;;  %v4573_v41 = vld [vmem:[#allocation22 + $0x1720] sm:$0xff]  ;;  %v4570_v45 = vld [vmem:[#allocation22 + $0x1708] sm:$0xff] }
0x13ce   :  { %10584 = vmatprep.subr.bf16.mxu1 %v13010_v53  ;;  %v13050_v53 = vcombine.high %v4538_v27, %v4542_v17  ;;  %v4574_v16 = vld [vmem:[#allocation22 + $0x1728] sm:$0xff] }
0x13d0   :  { %10241 = vmatpush1.bf16.msra.mxu0 %v13007_v3  ;;  %v13047_v3 = vcombine.low %v4537_v21, %v4541_v26  ;;  %v4577_v21 = vld [vmem:[#allocation22 + $0x1740] sm:$0xff] }
0x13d1   :  { %10585 = vmatpush1.bf16.msra.mxu1 %v13009_v39  ;;  %10242 = vmatprep.subr.bf16.mxu0 %v13016_v58  ;;  %v13049_v39 = vcombine.low %v4538_v27, %v4542_v17  ;;  %v13056_v58 = vcombine.high %v4545_v44, %v4549_v60  ;;  %v4581_v26 = vld [vmem:[#allocation22 + $0x1760] sm:$0xff]  ;;  %v4578_v27 = vld [vmem:[#allocation22 + $0x1748] sm:$0xff] }
0x13d2   :  { %10586 = vmatprep.subr.bf16.mxu1 %v13018_v9  ;;  %v13058_v9 = vcombine.high %v4546_v38, %v4550_v6  ;;  %v4582_v17 = vld [vmem:[#allocation22 + $0x1768] sm:$0xff] }
0x13d4   :  { %10243 = vmatpush1.bf16.msra.mxu0 %v13015_v32  ;;  %v13055_v32 = vcombine.low %v4545_v44, %v4549_v60  ;;  %v4585_v44 = vld [vmem:[#allocation22 + $0x1780] sm:$0xff] }
0x13d5   :  { %10587 = vmatpush1.bf16.msra.mxu1 %v13017_v0  ;;  %10244 = vmatprep.subr.bf16.mxu0 %v13024_v33  ;;  %v13057_v0 = vcombine.low %v4546_v38, %v4550_v6  ;;  %v13064_v33 = vcombine.high %v4553_v13, %v4557_v4  ;;  %v4589_v60 = vld [vmem:[#allocation22 + $0x17a0] sm:$0xff]  ;;  %v4586_v38 = vld [vmem:[#allocation22 + $0x1788] sm:$0xff] }
0x13d6   :  { %10588 = vmatprep.subr.bf16.mxu1 %v13026_v20  ;;  %v13066_v20 = vcombine.high %v4554_v8, %v4558_v59  ;;  %v4590_v6 = vld [vmem:[#allocation22 + $0x17a8] sm:$0xff] }
0x13d8   :  { %10245 = vmatpush1.bf16.msra.mxu0 %v13023_v55  ;;  %v13063_v55 = vcombine.low %v4553_v13, %v4557_v4  ;;  %v4593_v13 = vld [vmem:[#allocation22 + $0x17c0] sm:$0xff] }
0x13d9   :  { %10589 = vmatpush1.bf16.msra.mxu1 %v13025_v35  ;;  %10246 = vmatprep.subr.bf16.mxu0 %v13032_v29  ;;  %v13065_v35 = vcombine.low %v4554_v8, %v4558_v59  ;;  %v13072_v29 = vcombine.high %v4561_v36, %v4565_v48  ;;  %v4597_v4 = vld [vmem:[#allocation22 + $0x17e0] sm:$0xff]  ;;  %v4594_v8 = vld [vmem:[#allocation22 + $0x17c8] sm:$0xff] }
0x13da   :  { %10590 = vmatprep.subr.bf16.mxu1 %v13034_v1  ;;  %v13074_v1 = vcombine.high %v4562_v52, %v4566_v54  ;;  %v4598_v59 = vld [vmem:[#allocation22 + $0x17e8] sm:$0xff] }
0x13dc   :  { %10247 = vmatpush1.bf16.msra.mxu0 %v13031_v61  ;;  %v13071_v61 = vcombine.low %v4561_v36, %v4565_v48  ;;  %v4601_v36 = vld [vmem:[#allocation22 + $0x1800] sm:$0xff] }
0x13dd   :  { %10591 = vmatpush1.bf16.msra.mxu1 %v13033_v22  ;;  %10248 = vmatprep.subr.bf16.mxu0 %v13040_v37  ;;  %v13073_v22 = vcombine.low %v4562_v52, %v4566_v54  ;;  %v13080_v37 = vcombine.high %v4569_v56, %v4573_v41  ;;  %v4605_v48 = vld [vmem:[#allocation22 + $0x1820] sm:$0xff]  ;;  %v4602_v52 = vld [vmem:[#allocation22 + $0x1808] sm:$0xff] }
0x13de   :  { %10592 = vmatprep.subr.bf16.mxu1 %v13042_v42  ;;  %v13082_v42 = vcombine.high %v4570_v45, %v4574_v16  ;;  %v4606_v54 = vld [vmem:[#allocation22 + $0x1828] sm:$0xff] }
0x13e0   :  { %10249 = vmatpush1.bf16.msra.mxu0 %v13039_v19  ;;  %v13079_v19 = vcombine.low %v4569_v56, %v4573_v41  ;;  %v4609_v56 = vld [vmem:[#allocation22 + $0x1840] sm:$0xff] }
0x13e1   :  { %10593 = vmatpush1.bf16.msra.mxu1 %v13041_v10  ;;  %10250 = vmatprep.subr.bf16.mxu0 %v13048_v50  ;;  %v13081_v10 = vcombine.low %v4570_v45, %v4574_v16  ;;  %v13088_v50 = vcombine.high %v4577_v21, %v4581_v26  ;;  %v4613_v41 = vld [vmem:[#allocation22 + $0x1860] sm:$0xff]  ;;  %v13111_v45 = vcombine.low %v4601_v36, %v4605_v48  ;;  %v4610_v16 = vld [vmem:[#allocation22 + $0x1848] sm:$0xff] }
0x13e2   :  { %10594 = vmatprep.subr.bf16.mxu1 %v13050_v53  ;;  %v13090_v53 = vcombine.high %v4578_v27, %v4582_v17 }
0x13e4   :  { %10251 = vmatpush1.bf16.msra.mxu0 %v13047_v3  ;;  %v13087_v3 = vcombine.low %v4577_v21, %v4581_v26  ;;  %v4621_v21 = vld [vmem:[#allocation22 + $0x18a0] sm:$0xff] }
0x13e5   :  { %10595 = vmatpush1.bf16.msra.mxu1 %v13049_v39  ;;  %10252 = vmatprep.subr.bf16.mxu0 %v13056_v58  ;;  %v13089_v39 = vcombine.low %v4578_v27, %v4582_v17  ;;  %v13096_v58 = vcombine.high %v4585_v44, %v4589_v60  ;;  %v4618_v27 = vld [vmem:[#allocation22 + $0x1888] sm:$0xff] }
0x13e6   :  { %10596 = vmatprep.subr.bf16.mxu1 %v13058_v9  ;;  %v13098_v9 = vcombine.high %v4586_v38, %v4590_v6  ;;  %v4622_v17 = vld [vmem:[#allocation22 + $0x18a8] sm:$0xff] }
0x13e8   :  { %10253 = vmatpush1.bf16.msra.mxu0 %v13055_v32  ;;  %v13095_v32 = vcombine.low %v4585_v44, %v4589_v60  ;;  %v4625_v44 = vld [vmem:[#allocation22 + $0x18c0] sm:$0xff] }
0x13e9   :  { %10597 = vmatpush1.bf16.msra.mxu1 %v13057_v0  ;;  %10254 = vmatprep.subr.bf16.mxu0 %v13064_v33  ;;  %v13097_v0 = vcombine.low %v4586_v38, %v4590_v6  ;;  %v13104_v33 = vcombine.high %v4593_v13, %v4597_v4  ;;  %v4629_v60 = vld [vmem:[#allocation22 + $0x18e0] sm:$0xff]  ;;  %v4626_v38 = vld [vmem:[#allocation22 + $0x18c8] sm:$0xff] }
0x13ea   :  { %10598 = vmatprep.subr.bf16.mxu1 %v13066_v20  ;;  %v13106_v20 = vcombine.high %v4594_v8, %v4598_v59  ;;  %v4630_v6 = vld [vmem:[#allocation22 + $0x18e8] sm:$0xff] }
0x13ec   :  { %10255 = vmatpush1.bf16.msra.mxu0 %v13063_v55  ;;  %v13103_v55 = vcombine.low %v4593_v13, %v4597_v4  ;;  %v4633_v13 = vld [vmem:[#allocation22 + $0x1900] sm:$0xff] }
0x13ed   :  { %10599 = vmatpush1.bf16.msra.mxu1 %v13065_v35  ;;  %10256 = vmatprep.subr.bf16.mxu0 %v13072_v29  ;;  %v13105_v35 = vcombine.low %v4594_v8, %v4598_v59  ;;  %v13112_v29 = vcombine.high %v4601_v36, %v4605_v48  ;;  %v4637_v4 = vld [vmem:[#allocation22 + $0x1920] sm:$0xff]  ;;  %v4634_v8 = vld [vmem:[#allocation22 + $0x1908] sm:$0xff] }
0x13ee   :  { %10600 = vmatprep.subr.bf16.mxu1 %v13074_v1  ;;  %v13114_v1 = vcombine.high %v4602_v52, %v4606_v54  ;;  %v4638_v59 = vld [vmem:[#allocation22 + $0x1928] sm:$0xff]  ;;  %v4641_v36 = vld [vmem:[#allocation22 + $0x1940] sm:$0xff] }
0x13ef   :  { %v4645_v48 = vld [vmem:[#allocation22 + $0x1960] sm:$0xff] }
0x13f0   :  { %10257 = vmatpush1.bf16.msra.mxu0 %v13071_v61  ;;  %v4614_v61 = vld [vmem:[#allocation22 + $0x1868] sm:$0xff] }
0x13f1   :  { %10601 = vmatpush1.bf16.msra.mxu1 %v13073_v22  ;;  %10258 = vmatprep.subr.bf16.mxu0 %v13080_v37  ;;  %v13113_v22 = vcombine.low %v4602_v52, %v4606_v54  ;;  %v13120_v37 = vcombine.high %v4609_v56, %v4613_v41  ;;  %v13122_v26 = vcombine.high %v4610_v16, %v4614_v61  ;;  %v4642_v52 = vld [vmem:[#allocation22 + $0x1948] sm:$0xff] }
0x13f2   :  { %10602 = vmatprep.subr.bf16.mxu1 %v13082_v42  ;;  %v4617_v42 = vld [vmem:[#allocation22 + $0x1880] sm:$0xff]  ;;  %v4646_v54 = vld [vmem:[#allocation22 + $0x1968] sm:$0xff] }
0x13f4   :  { %10259 = vmatpush1.bf16.msra.mxu0 %v13079_v19  ;;  %v13119_v19 = vcombine.low %v4609_v56, %v4613_v41  ;;  %v4649_v56 = vld [vmem:[#allocation22 + $0x1980] sm:$0xff] }
0x13f5   :  { %10603 = vmatpush1.bf16.msra.mxu1 %v13081_v10  ;;  %10260 = vmatprep.subr.bf16.mxu0 %v13088_v50  ;;  %v13121_v10 = vcombine.low %v4610_v16, %v4614_v61  ;;  %v13128_v50 = vcombine.high %v4617_v42, %v4621_v21  ;;  %v4653_v41 = vld [vmem:[#allocation22 + $0x19a0] sm:$0xff]  ;;  %v4654_v16 = vld [vmem:[#allocation22 + $0x19a8] sm:$0xff]  ;;  %v13151_v61 = vcombine.low %v4641_v36, %v4645_v48 }
0x13f6   :  { %10604 = vmatprep.subr.bf16.mxu1 %v13090_v53  ;;  %v13130_v53 = vcombine.high %v4618_v27, %v4622_v17 }
0x13f8   :  { %10261 = vmatpush1.bf16.msra.mxu0 %v13087_v3  ;;  %v13127_v3 = vcombine.low %v4617_v42, %v4621_v21  ;;  %v4657_v21 = vld [vmem:[#allocation22 + $0x19c0] sm:$0xff] }
0x13f9   :  { %10605 = vmatpush1.bf16.msra.mxu1 %v13089_v39  ;;  %10262 = vmatprep.subr.bf16.mxu0 %v13096_v58  ;;  %v13129_v39 = vcombine.low %v4618_v27, %v4622_v17  ;;  %v13136_v58 = vcombine.high %v4625_v44, %v4629_v60  ;;  %v4658_v27 = vld [vmem:[#allocation22 + $0x19c8] sm:$0xff] }
0x13fa   :  { %10606 = vmatprep.subr.bf16.mxu1 %v13098_v9  ;;  %v13138_v9 = vcombine.high %v4626_v38, %v4630_v6  ;;  %v4662_v17 = vld [vmem:[#allocation22 + $0x19e8] sm:$0xff] }
0x13fc   :  { %10263 = vmatpush1.bf16.msra.mxu0 %v13095_v32  ;;  %v13135_v32 = vcombine.low %v4625_v44, %v4629_v60  ;;  %v4665_v44 = vld [vmem:[#allocation22 + $0x1a00] sm:$0xff] }
0x13fd   :  { %10607 = vmatpush1.bf16.msra.mxu1 %v13097_v0  ;;  %10264 = vmatprep.subr.bf16.mxu0 %v13104_v33  ;;  %v13137_v0 = vcombine.low %v4626_v38, %v4630_v6  ;;  %v13144_v33 = vcombine.high %v4633_v13, %v4637_v4  ;;  %v4669_v60 = vld [vmem:[#allocation22 + $0x1a20] sm:$0xff]  ;;  %v4666_v38 = vld [vmem:[#allocation22 + $0x1a08] sm:$0xff] }
0x13fe   :  { %10608 = vmatprep.subr.bf16.mxu1 %v13106_v20  ;;  %v13146_v20 = vcombine.high %v4634_v8, %v4638_v59  ;;  %v4670_v6 = vld [vmem:[#allocation22 + $0x1a28] sm:$0xff] }
0x1400   :  { %10265 = vmatpush1.bf16.msra.mxu0 %v13103_v55  ;;  %v13143_v55 = vcombine.low %v4633_v13, %v4637_v4  ;;  %v4673_v13 = vld [vmem:[#allocation22 + $0x1a40] sm:$0xff] }
0x1401   :  { %10609 = vmatpush1.bf16.msra.mxu1 %v13105_v35  ;;  %10277 = vmatprep.subr.bf16.mxu0 %v13112_v29  ;;  %v13145_v35 = vcombine.low %v4634_v8, %v4638_v59  ;;  %v13152_v29 = vcombine.high %v4641_v36, %v4645_v48  ;;  %v4677_v4 = vld [vmem:[#allocation22 + $0x1a60] sm:$0xff]  ;;  %v4674_v8 = vld [vmem:[#allocation22 + $0x1a48] sm:$0xff] }
0x1402   :  { %10621 = vmatprep.subr.bf16.mxu1 %v13114_v1  ;;  %v13154_v1 = vcombine.high %v4642_v52, %v4646_v54  ;;  %v4678_v59 = vld [vmem:[#allocation22 + $0x1a68] sm:$0xff]  ;;  %v4681_v36 = vld [vmem:[#allocation22 + $0x1a80] sm:$0xff] }
0x1403   :  { %10267 = vmatmul.mubr.bf16.vlgmr.msra.gmra.mrb[48].mxu0 %v16182_v47  ;;  %v4685_v48 = vld [vmem:[#allocation22 + $0x1aa0] sm:$0xff] }
0x1404   :  { %10611 = vmatmul.mubr.bf16.vlgmr.msra.gmra.mrb[44].mxu1 %v16182_v47  ;;  %10278 = vmatpush1.bf16.msra.mxu0 %v13111_v45  ;;  %v4650_v45 = vld [vmem:[#allocation22 + $0x1988] sm:$0xff] }
0x1405   :  { %10309 = vmatprep.mubr.bf16.mxu0 %v16204_v63  ;;  %10622 = vmatpush1.bf16.msra.mxu1 %v13113_v22  ;;  %v13153_v22 = vcombine.low %v4642_v52, %v4646_v54  ;;  %v13162_v42 = vcombine.high %v4650_v45, %v4654_v16  ;;  %v4682_v52 = vld [vmem:[#allocation22 + $0x1a88] sm:$0xff] }
0x1406   :  { %10653 = vmatprep.mubr.bf16.mxu1 %v16204_v63  ;;  %10279 = vmatprep.subr.bf16.mxu0 %v13120_v37  ;;  %v13160_v37 = vcombine.high %v4649_v56, %v4653_v41  ;;  %v4686_v54 = vld [vmem:[#allocation22 + $0x1aa8] sm:$0xff] }
0x1407   :  { %10623 = vmatprep.subr.bf16.mxu1 %v13122_v26  ;;  %v4661_v26 = vld [vmem:[#allocation22 + $0x19e0] sm:$0xff] }
0x1408   :  { %10280 = vmatpush1.bf16.msra.mxu0 %v13119_v19  ;;  %v13159_v19 = vcombine.low %v4649_v56, %v4653_v41  ;;  %v4689_v56 = vld [vmem:[#allocation22 + $0x1ac0] sm:$0xff] }
0x1409   :  { %10624 = vmatpush1.bf16.msra.mxu1 %v13121_v10  ;;  %10281 = vmatprep.subr.bf16.mxu0 %v13128_v50  ;;  %v13161_v10 = vcombine.low %v4650_v45, %v4654_v16  ;;  %v13168_v50 = vcombine.high %v4657_v21, %v4661_v26  ;;  %v4693_v41 = vld [vmem:[#allocation22 + $0x1ae0] sm:$0xff]  ;;  %v4690_v45 = vld [vmem:[#allocation22 + $0x1ac8] sm:$0xff] }
0x140a   :  { %10625 = vmatprep.subr.bf16.mxu1 %v13130_v53  ;;  %v13170_v53 = vcombine.high %v4658_v27, %v4662_v17  ;;  %v4694_v16 = vld [vmem:[#allocation22 + $0x1ae8] sm:$0xff] }
0x140c   :  { %10282 = vmatpush1.bf16.msra.mxu0 %v13127_v3  ;;  %v13167_v3 = vcombine.low %v4657_v21, %v4661_v26  ;;  %v4697_v21 = vld [vmem:[#allocation22 + $0x1b00] sm:$0xff] }
0x140d   :  { %10626 = vmatpush1.bf16.msra.mxu1 %v13129_v39  ;;  %10283 = vmatprep.subr.bf16.mxu0 %v13136_v58  ;;  %v13169_v39 = vcombine.low %v4658_v27, %v4662_v17  ;;  %v13176_v58 = vcombine.high %v4665_v44, %v4669_v60  ;;  %v4701_v26 = vld [vmem:[#allocation22 + $0x1b20] sm:$0xff]  ;;  %v4698_v27 = vld [vmem:[#allocation22 + $0x1b08] sm:$0xff] }
0x140e   :  { %10627 = vmatprep.subr.bf16.mxu1 %v13138_v9  ;;  %v13178_v9 = vcombine.high %v4666_v38, %v4670_v6  ;;  %v4702_v17 = vld [vmem:[#allocation22 + $0x1b28] sm:$0xff] }
0x1410   :  { %10284 = vmatpush1.bf16.msra.mxu0 %v13135_v32  ;;  %v13175_v32 = vcombine.low %v4665_v44, %v4669_v60  ;;  %v4705_v44 = vld [vmem:[#allocation22 + $0x1b40] sm:$0xff] }
0x1411   :  { %10628 = vmatpush1.bf16.msra.mxu1 %v13137_v0  ;;  %10285 = vmatprep.subr.bf16.mxu0 %v13144_v33  ;;  %v13177_v0 = vcombine.low %v4666_v38, %v4670_v6  ;;  %v13184_v33 = vcombine.high %v4673_v13, %v4677_v4  ;;  %v4709_v60 = vld [vmem:[#allocation22 + $0x1b60] sm:$0xff]  ;;  %v4706_v38 = vld [vmem:[#allocation22 + $0x1b48] sm:$0xff] }
0x1412   :  { %10629 = vmatprep.subr.bf16.mxu1 %v13146_v20  ;;  %v13186_v20 = vcombine.high %v4674_v8, %v4678_v59  ;;  %v4710_v6 = vld [vmem:[#allocation22 + $0x1b68] sm:$0xff] }
0x1414   :  { %10286 = vmatpush1.bf16.msra.mxu0 %v13143_v55  ;;  %v13183_v55 = vcombine.low %v4673_v13, %v4677_v4  ;;  %v4713_v13 = vld [vmem:[#allocation22 + $0x1b80] sm:$0xff] }
0x1415   :  { %10630 = vmatpush1.bf16.msra.mxu1 %v13145_v35  ;;  %10287 = vmatprep.subr.bf16.mxu0 %v13152_v29  ;;  %v13185_v35 = vcombine.low %v4674_v8, %v4678_v59  ;;  %v13192_v29 = vcombine.high %v4681_v36, %v4685_v48  ;;  %v4717_v4 = vld [vmem:[#allocation22 + $0x1ba0] sm:$0xff]  ;;  %v4714_v8 = vld [vmem:[#allocation22 + $0x1b88] sm:$0xff] }
0x1416   :  { %10631 = vmatprep.subr.bf16.mxu1 %v13154_v1  ;;  %v13194_v1 = vcombine.high %v4682_v52, %v4686_v54  ;;  %v4718_v59 = vld [vmem:[#allocation22 + $0x1ba8] sm:$0xff] }
0x1418   :  { %10288 = vmatpush1.bf16.msra.mxu0 %v13151_v61  ;;  %v13191_v61 = vcombine.low %v4681_v36, %v4685_v48  ;;  %v4721_v36 = vld [vmem:[#allocation22 + $0x1bc0] sm:$0xff] }
0x1419   :  { %10632 = vmatpush1.bf16.msra.mxu1 %v13153_v22  ;;  %10289 = vmatprep.subr.bf16.mxu0 %v13160_v37  ;;  %v13193_v22 = vcombine.low %v4682_v52, %v4686_v54  ;;  %v13200_v37 = vcombine.high %v4689_v56, %v4693_v41  ;;  %v4725_v48 = vld [vmem:[#allocation22 + $0x1be0] sm:$0xff]  ;;  %v4722_v52 = vld [vmem:[#allocation22 + $0x1bc8] sm:$0xff] }
0x141a   :  { %10633 = vmatprep.subr.bf16.mxu1 %v13162_v42  ;;  %v13202_v42 = vcombine.high %v4690_v45, %v4694_v16  ;;  %v4726_v54 = vld [vmem:[#allocation22 + $0x1be8] sm:$0xff] }
0x141c   :  { %10290 = vmatpush1.bf16.msra.mxu0 %v13159_v19  ;;  %v13199_v19 = vcombine.low %v4689_v56, %v4693_v41  ;;  %v4729_v56 = vld [vmem:[#allocation22 + $0x1c00] sm:$0xff] }
0x141d   :  { %10634 = vmatpush1.bf16.msra.mxu1 %v13161_v10  ;;  %10291 = vmatprep.subr.bf16.mxu0 %v13168_v50  ;;  %v13201_v10 = vcombine.low %v4690_v45, %v4694_v16  ;;  %v13208_v50 = vcombine.high %v4697_v21, %v4701_v26  ;;  %v4733_v41 = vld [vmem:[#allocation22 + $0x1c20] sm:$0xff]  ;;  %v4730_v45 = vld [vmem:[#allocation22 + $0x1c08] sm:$0xff] }
0x141e   :  { %10635 = vmatprep.subr.bf16.mxu1 %v13170_v53  ;;  %v13210_v53 = vcombine.high %v4698_v27, %v4702_v17  ;;  %v4734_v16 = vld [vmem:[#allocation22 + $0x1c28] sm:$0xff] }
0x1420   :  { %10292 = vmatpush1.bf16.msra.mxu0 %v13167_v3  ;;  %v13207_v3 = vcombine.low %v4697_v21, %v4701_v26  ;;  %v4737_v21 = vld [vmem:[#allocation22 + $0x1c40] sm:$0xff] }
0x1421   :  { %10636 = vmatpush1.bf16.msra.mxu1 %v13169_v39  ;;  %10293 = vmatprep.subr.bf16.mxu0 %v13176_v58  ;;  %v13209_v39 = vcombine.low %v4698_v27, %v4702_v17  ;;  %v13216_v58 = vcombine.high %v4705_v44, %v4709_v60  ;;  %v4741_v26 = vld [vmem:[#allocation22 + $0x1c60] sm:$0xff]  ;;  %v13239_v27 = vcombine.low %v4729_v56, %v4733_v41  ;;  %v4738_v17 = vld [vmem:[#allocation22 + $0x1c48] sm:$0xff] }
0x1422   :  { %10637 = vmatprep.subr.bf16.mxu1 %v13178_v9  ;;  %v13218_v9 = vcombine.high %v4706_v38, %v4710_v6 }
0x1424   :  { %10294 = vmatpush1.bf16.msra.mxu0 %v13175_v32  ;;  %v13215_v32 = vcombine.low %v4705_v44, %v4709_v60  ;;  %v4749_v44 = vld [vmem:[#allocation22 + $0x1ca0] sm:$0xff] }
0x1425   :  { %10638 = vmatpush1.bf16.msra.mxu1 %v13177_v0  ;;  %10295 = vmatprep.subr.bf16.mxu0 %v13184_v33  ;;  %v13217_v0 = vcombine.low %v4706_v38, %v4710_v6  ;;  %v13224_v33 = vcombine.high %v4713_v13, %v4717_v4  ;;  %v4746_v38 = vld [vmem:[#allocation22 + $0x1c88] sm:$0xff] }
0x1426   :  { %10639 = vmatprep.subr.bf16.mxu1 %v13186_v20  ;;  %v13226_v20 = vcombine.high %v4714_v8, %v4718_v59  ;;  %v4750_v6 = vld [vmem:[#allocation22 + $0x1ca8] sm:$0xff] }
0x1428   :  { %10296 = vmatpush1.bf16.msra.mxu0 %v13183_v55  ;;  %v13223_v55 = vcombine.low %v4713_v13, %v4717_v4  ;;  %v4753_v13 = vld [vmem:[#allocation22 + $0x1cc0] sm:$0xff] }
0x1429   :  { %10640 = vmatpush1.bf16.msra.mxu1 %v13185_v35  ;;  %10297 = vmatprep.subr.bf16.mxu0 %v13192_v29  ;;  %v13225_v35 = vcombine.low %v4714_v8, %v4718_v59  ;;  %v13232_v29 = vcombine.high %v4721_v36, %v4725_v48  ;;  %v4757_v4 = vld [vmem:[#allocation22 + $0x1ce0] sm:$0xff]  ;;  %v4754_v8 = vld [vmem:[#allocation22 + $0x1cc8] sm:$0xff] }
0x142a   :  { %10641 = vmatprep.subr.bf16.mxu1 %v13194_v1  ;;  %v13234_v1 = vcombine.high %v4722_v52, %v4726_v54  ;;  %v4758_v59 = vld [vmem:[#allocation22 + $0x1ce8] sm:$0xff] }
0x142c   :  { %10298 = vmatpush1.bf16.msra.mxu0 %v13191_v61  ;;  %v13231_v61 = vcombine.low %v4721_v36, %v4725_v48  ;;  %v4761_v36 = vld [vmem:[#allocation22 + $0x1d00] sm:$0xff] }
0x142d   :  { %10642 = vmatpush1.bf16.msra.mxu1 %v13193_v22  ;;  %10299 = vmatprep.subr.bf16.mxu0 %v13200_v37  ;;  %v13233_v22 = vcombine.low %v4722_v52, %v4726_v54  ;;  %v13240_v37 = vcombine.high %v4729_v56, %v4733_v41  ;;  %v4765_v48 = vld [vmem:[#allocation22 + $0x1d20] sm:$0xff]  ;;  %v4762_v52 = vld [vmem:[#allocation22 + $0x1d08] sm:$0xff] }
0x142e   :  { %10643 = vmatprep.subr.bf16.mxu1 %v13202_v42  ;;  %v13242_v42 = vcombine.high %v4730_v45, %v4734_v16  ;;  %v4766_v54 = vld [vmem:[#allocation22 + $0x1d28] sm:$0xff]  ;;  %v4769_v56 = vld [vmem:[#allocation22 + $0x1d40] sm:$0xff] }
0x142f   :  { %v4773_v41 = vld [vmem:[#allocation22 + $0x1d60] sm:$0xff] }
0x1430   :  { %10300 = vmatpush1.bf16.msra.mxu0 %v13199_v19  ;;  %v4742_v19 = vld [vmem:[#allocation22 + $0x1c68] sm:$0xff] }
0x1431   :  { %10644 = vmatpush1.bf16.msra.mxu1 %v13201_v10  ;;  %10301 = vmatprep.subr.bf16.mxu0 %v13208_v50  ;;  %v13241_v10 = vcombine.low %v4730_v45, %v4734_v16  ;;  %v13248_v50 = vcombine.high %v4737_v21, %v4741_v26  ;;  %v13250_v60 = vcombine.high %v4738_v17, %v4742_v19  ;;  %v4770_v45 = vld [vmem:[#allocation22 + $0x1d48] sm:$0xff] }
0x1432   :  { %10645 = vmatprep.subr.bf16.mxu1 %v13210_v53  ;;  %v4745_v53 = vld [vmem:[#allocation22 + $0x1c80] sm:$0xff]  ;;  %v4774_v16 = vld [vmem:[#allocation22 + $0x1d68] sm:$0xff] }
0x1434   :  { %10302 = vmatpush1.bf16.msra.mxu0 %v13207_v3  ;;  %v13247_v3 = vcombine.low %v4737_v21, %v4741_v26  ;;  %v4777_v21 = vld [vmem:[#allocation22 + $0x1d80] sm:$0xff] }
0x1435   :  { %10646 = vmatpush1.bf16.msra.mxu1 %v13209_v39  ;;  %10303 = vmatprep.subr.bf16.mxu0 %v13216_v58  ;;  %v13249_v39 = vcombine.low %v4738_v17, %v4742_v19  ;;  %v13256_v58 = vcombine.high %v4745_v53, %v4749_v44  ;;  %v4781_v26 = vld [vmem:[#allocation22 + $0x1da0] sm:$0xff]  ;;  %v4782_v17 = vld [vmem:[#allocation22 + $0x1da8] sm:$0xff]  ;;  %v13279_v19 = vcombine.low %v4769_v56, %v4773_v41 }
0x1436   :  { %10647 = vmatprep.subr.bf16.mxu1 %v13218_v9  ;;  %v13258_v9 = vcombine.high %v4746_v38, %v4750_v6 }
0x1438   :  { %10304 = vmatpush1.bf16.msra.mxu0 %v13215_v32  ;;  %v13255_v32 = vcombine.low %v4745_v53, %v4749_v44  ;;  %v4785_v44 = vld [vmem:[#allocation22 + $0x1dc0] sm:$0xff] }
0x1439   :  { %10648 = vmatpush1.bf16.msra.mxu1 %v13217_v0  ;;  %10305 = vmatprep.subr.bf16.mxu0 %v13224_v33  ;;  %v13257_v0 = vcombine.low %v4746_v38, %v4750_v6  ;;  %v13264_v33 = vcombine.high %v4753_v13, %v4757_v4  ;;  %v4786_v38 = vld [vmem:[#allocation22 + $0x1dc8] sm:$0xff] }
0x143a   :  { %10649 = vmatprep.subr.bf16.mxu1 %v13226_v20  ;;  %v13266_v20 = vcombine.high %v4754_v8, %v4758_v59  ;;  %v4790_v6 = vld [vmem:[#allocation22 + $0x1de8] sm:$0xff] }
0x143c   :  { %10306 = vmatpush1.bf16.msra.mxu0 %v13223_v55  ;;  %v13263_v55 = vcombine.low %v4753_v13, %v4757_v4  ;;  %v4793_v13 = vld [vmem:[#allocation22 + $0x1e00] sm:$0xff] }
0x143d   :  { %10650 = vmatpush1.bf16.msra.mxu1 %v13225_v35  ;;  %10307 = vmatprep.subr.bf16.mxu0 %v13232_v29  ;;  %v13265_v35 = vcombine.low %v4754_v8, %v4758_v59  ;;  %v13272_v29 = vcombine.high %v4761_v36, %v4765_v48  ;;  %v4797_v4 = vld [vmem:[#allocation22 + $0x1e20] sm:$0xff]  ;;  %v4794_v8 = vld [vmem:[#allocation22 + $0x1e08] sm:$0xff] }
0x143e   :  { %10651 = vmatprep.subr.bf16.mxu1 %v13234_v1  ;;  %v13274_v1 = vcombine.high %v4762_v52, %v4766_v54  ;;  %v4798_v59 = vld [vmem:[#allocation22 + $0x1e28] sm:$0xff] }
0x1440   :  { %10308 = vmatpush1.bf16.msra.mxu0 %v13231_v61  ;;  %v13271_v61 = vcombine.low %v4761_v36, %v4765_v48  ;;  %v4801_v36 = vld [vmem:[#allocation22 + $0x1e40] sm:$0xff] }
0x1441   :  { %10652 = vmatpush1.bf16.msra.mxu1 %v13233_v22  ;;  %10320 = vmatprep.subr.bf16.mxu0 %v13240_v37  ;;  %v13273_v22 = vcombine.low %v4762_v52, %v4766_v54  ;;  %v13280_v37 = vcombine.high %v4769_v56, %v4773_v41  ;;  %v4805_v48 = vld [vmem:[#allocation22 + $0x1e60] sm:$0xff]  ;;  %v4802_v52 = vld [vmem:[#allocation22 + $0x1e48] sm:$0xff] }
0x1442   :  { %10664 = vmatprep.subr.bf16.mxu1 %v13242_v42  ;;  %v13282_v42 = vcombine.high %v4770_v45, %v4774_v16  ;;  %v4806_v54 = vld [vmem:[#allocation22 + $0x1e68] sm:$0xff]  ;;  %v4809_v56 = vld [vmem:[#allocation22 + $0x1e80] sm:$0xff] }
0x1443   :  { %10310 = vmatmul.mubr.bf16.vlgmr.msra.gmra.mrb[48].mxu0 %v16200_v14  ;;  %v4813_v41 = vld [vmem:[#allocation22 + $0x1ea0] sm:$0xff] }
0x1444   :  { %10654 = vmatmul.mubr.bf16.vlgmr.msra.gmra.mrb[44].mxu1 %v16200_v14  ;;  %10321 = vmatpush1.bf16.msra.mxu0 %v13239_v27  ;;  %v4778_v27 = vld [vmem:[#allocation22 + $0x1d88] sm:$0xff] }
0x1445   :  { %10352 = vmatprep.mubr.bf16.mxu0 %v16206_v28  ;;  %10665 = vmatpush1.bf16.msra.mxu1 %v13241_v10  ;;  %v13281_v10 = vcombine.low %v4770_v45, %v4774_v16  ;;  %v13290_v53 = vcombine.high %v4778_v27, %v4782_v17  ;;  %v4810_v45 = vld [vmem:[#allocation22 + $0x1e88] sm:$0xff] }
0x1446   :  { %10696 = vmatprep.mubr.bf16.mxu1 %v16206_v28  ;;  %10322 = vmatprep.subr.bf16.mxu0 %v13248_v50  ;;  %v13288_v50 = vcombine.high %v4777_v21, %v4781_v26  ;;  %v4814_v16 = vld [vmem:[#allocation22 + $0x1ea8] sm:$0xff] }
0x1447   :  { %10666 = vmatprep.subr.bf16.mxu1 %v13250_v60  ;;  %v4789_v60 = vld [vmem:[#allocation22 + $0x1de0] sm:$0xff] }
0x1448   :  { %10323 = vmatpush1.bf16.msra.mxu0 %v13247_v3  ;;  %v13287_v3 = vcombine.low %v4777_v21, %v4781_v26  ;;  %v4817_v21 = vld [vmem:[#allocation22 + $0x1ec0] sm:$0xff] }
0x1449   :  { %10667 = vmatpush1.bf16.msra.mxu1 %v13249_v39  ;;  %10324 = vmatprep.subr.bf16.mxu0 %v13256_v58  ;;  %v13289_v39 = vcombine.low %v4778_v27, %v4782_v17  ;;  %v13296_v58 = vcombine.high %v4785_v44, %v4789_v60  ;;  %v4821_v26 = vld [vmem:[#allocation22 + $0x1ee0] sm:$0xff]  ;;  %v4818_v27 = vld [vmem:[#allocation22 + $0x1ec8] sm:$0xff] }
0x144a   :  { %10668 = vmatprep.subr.bf16.mxu1 %v13258_v9  ;;  %v13298_v9 = vcombine.high %v4786_v38, %v4790_v6  ;;  %v4822_v17 = vld [vmem:[#allocation22 + $0x1ee8] sm:$0xff] }
0x144c   :  { %10325 = vmatpush1.bf16.msra.mxu0 %v13255_v32  ;;  %v13295_v32 = vcombine.low %v4785_v44, %v4789_v60  ;;  %v4825_v44 = vld [vmem:[#allocation22 + $0x1f00] sm:$0xff] }
0x144d   :  { %10669 = vmatpush1.bf16.msra.mxu1 %v13257_v0  ;;  %10326 = vmatprep.subr.bf16.mxu0 %v13264_v33  ;;  %v13297_v0 = vcombine.low %v4786_v38, %v4790_v6  ;;  %v13304_v33 = vcombine.high %v4793_v13, %v4797_v4  ;;  %v4829_v60 = vld [vmem:[#allocation22 + $0x1f20] sm:$0xff]  ;;  %v4826_v38 = vld [vmem:[#allocation22 + $0x1f08] sm:$0xff] }
0x144e   :  { %10670 = vmatprep.subr.bf16.mxu1 %v13266_v20  ;;  %v13306_v20 = vcombine.high %v4794_v8, %v4798_v59  ;;  %v4830_v6 = vld [vmem:[#allocation22 + $0x1f28] sm:$0xff] }
0x1450   :  { %10327 = vmatpush1.bf16.msra.mxu0 %v13263_v55  ;;  %v13303_v55 = vcombine.low %v4793_v13, %v4797_v4  ;;  %v4833_v13 = vld [vmem:[#allocation22 + $0x1f40] sm:$0xff] }
0x1451   :  { %10671 = vmatpush1.bf16.msra.mxu1 %v13265_v35  ;;  %10328 = vmatprep.subr.bf16.mxu0 %v13272_v29  ;;  %v13305_v35 = vcombine.low %v4794_v8, %v4798_v59  ;;  %v13312_v29 = vcombine.high %v4801_v36, %v4805_v48  ;;  %v4837_v4 = vld [vmem:[#allocation22 + $0x1f60] sm:$0xff]  ;;  %v4834_v8 = vld [vmem:[#allocation22 + $0x1f48] sm:$0xff] }
0x1452   :  { %10672 = vmatprep.subr.bf16.mxu1 %v13274_v1  ;;  %v13314_v1 = vcombine.high %v4802_v52, %v4806_v54  ;;  %v4838_v59 = vld [vmem:[#allocation22 + $0x1f68] sm:$0xff] }
0x1454   :  { %10329 = vmatpush1.bf16.msra.mxu0 %v13271_v61  ;;  %v13311_v61 = vcombine.low %v4801_v36, %v4805_v48  ;;  %v4841_v36 = vld [vmem:[#allocation22 + $0x1f80] sm:$0xff] }
0x1455   :  { %10673 = vmatpush1.bf16.msra.mxu1 %v13273_v22  ;;  %10330 = vmatprep.subr.bf16.mxu0 %v13280_v37  ;;  %v13313_v22 = vcombine.low %v4802_v52, %v4806_v54  ;;  %v13320_v37 = vcombine.high %v4809_v56, %v4813_v41  ;;  %v4845_v48 = vld [vmem:[#allocation22 + $0x1fa0] sm:$0xff]  ;;  %v4842_v52 = vld [vmem:[#allocation22 + $0x1f88] sm:$0xff] }
0x1456   :  { %10674 = vmatprep.subr.bf16.mxu1 %v13282_v42  ;;  %v13322_v42 = vcombine.high %v4810_v45, %v4814_v16  ;;  %v4846_v54 = vld [vmem:[#allocation22 + $0x1fa8] sm:$0xff] }
0x1458   :  { %10331 = vmatpush1.bf16.msra.mxu0 %v13279_v19  ;;  %v13319_v19 = vcombine.low %v4809_v56, %v4813_v41  ;;  %v4849_v56 = vld [vmem:[#allocation22 + $0x1fc0] sm:$0xff] }
0x1459   :  { %10675 = vmatpush1.bf16.msra.mxu1 %v13281_v10  ;;  %10332 = vmatprep.subr.bf16.mxu0 %v13288_v50  ;;  %v13321_v10 = vcombine.low %v4810_v45, %v4814_v16  ;;  %v13328_v50 = vcombine.high %v4817_v21, %v4821_v26  ;;  %v4853_v41 = vld [vmem:[#allocation22 + $0x1fe0] sm:$0xff]  ;;  %v4850_v45 = vld [vmem:[#allocation22 + $0x1fc8] sm:$0xff] }
0x145a   :  { %10676 = vmatprep.subr.bf16.mxu1 %v13290_v53  ;;  %v13330_v53 = vcombine.high %v4818_v27, %v4822_v17  ;;  %v4854_v16 = vld [vmem:[#allocation22 + $0x1fe8] sm:$0xff] }
0x145c   :  { %10333 = vmatpush1.bf16.msra.mxu0 %v13287_v3  ;;  %v13327_v3 = vcombine.low %v4817_v21, %v4821_v26  ;;  %v3835_v21 = vld [vmem:[#allocation22 + $0x10] sm:$0xff] }
0x145d   :  { %10677 = vmatpush1.bf16.msra.mxu1 %v13289_v39  ;;  %10334 = vmatprep.subr.bf16.mxu0 %v13296_v58  ;;  %v13329_v39 = vcombine.low %v4818_v27, %v4822_v17  ;;  %v13336_v58 = vcombine.high %v4825_v44, %v4829_v60  ;;  %v3839_v26 = vld [vmem:[#allocation22 + $0x30] sm:$0xff]  ;;  %v3836_v27 = vld [vmem:[#allocation22 + $0x18] sm:$0xff] }
0x145e   :  { %10678 = vmatprep.subr.bf16.mxu1 %v13298_v9  ;;  %v13338_v9 = vcombine.high %v4826_v38, %v4830_v6  ;;  %v3840_v17 = vld [vmem:[#allocation22 + $0x38] sm:$0xff] }
0x1460   :  { %10335 = vmatpush1.bf16.msra.mxu0 %v13295_v32  ;;  %v13335_v32 = vcombine.low %v4825_v44, %v4829_v60  ;;  %v3843_v44 = vld [vmem:[#allocation22 + $0x50] sm:$0xff] }
0x1461   :  { %10679 = vmatpush1.bf16.msra.mxu1 %v13297_v0  ;;  %10336 = vmatprep.subr.bf16.mxu0 %v13304_v33  ;;  %v13337_v0 = vcombine.low %v4826_v38, %v4830_v6  ;;  %v13344_v33 = vcombine.high %v4833_v13, %v4837_v4  ;;  %v3847_v60 = vld [vmem:[#allocation22 + $0x70] sm:$0xff]  ;;  %v12347_v38 = vcombine.low %v3835_v21, %v3839_v26  ;;  %v3844_v6 = vld [vmem:[#allocation22 + $0x58] sm:$0xff] }
0x1462   :  { %10680 = vmatprep.subr.bf16.mxu1 %v13306_v20  ;;  %v13346_v20 = vcombine.high %v4834_v8, %v4838_v59 }
0x1464   :  { %10337 = vmatpush1.bf16.msra.mxu0 %v13303_v55  ;;  %v13343_v55 = vcombine.low %v4833_v13, %v4837_v4  ;;  %v3855_v13 = vld [vmem:[#allocation22 + $0xb0] sm:$0xff] }
0x1465   :  { %10681 = vmatpush1.bf16.msra.mxu1 %v13305_v35  ;;  %10338 = vmatprep.subr.bf16.mxu0 %v13312_v29  ;;  %v13345_v35 = vcombine.low %v4834_v8, %v4838_v59  ;;  %v13352_v29 = vcombine.high %v4841_v36, %v4845_v48  ;;  %v3852_v8 = vld [vmem:[#allocation22 + $0x98] sm:$0xff] }
0x1466   :  { %10682 = vmatprep.subr.bf16.mxu1 %v13314_v1  ;;  %v13354_v1 = vcombine.high %v4842_v52, %v4846_v54  ;;  %v3856_v59 = vld [vmem:[#allocation22 + $0xb8] sm:$0xff] }
0x1468   :  { %10339 = vmatpush1.bf16.msra.mxu0 %v13311_v61  ;;  %v13351_v61 = vcombine.low %v4841_v36, %v4845_v48  ;;  %v3859_v36 = vld [vmem:[#allocation22 + $0xd0] sm:$0xff] }
0x1469   :  { %10683 = vmatpush1.bf16.msra.mxu1 %v13313_v22  ;;  %10340 = vmatprep.subr.bf16.mxu0 %v13320_v37  ;;  %v13353_v22 = vcombine.low %v4842_v52, %v4846_v54  ;;  %v13360_v37 = vcombine.high %v4849_v56, %v4853_v41  ;;  %v3863_v48 = vld [vmem:[#allocation22 + $0xf0] sm:$0xff]  ;;  %v3860_v52 = vld [vmem:[#allocation22 + $0xd8] sm:$0xff] }
0x146a   :  { %10684 = vmatprep.subr.bf16.mxu1 %v13322_v42  ;;  %v13362_v42 = vcombine.high %v4850_v45, %v4854_v16  ;;  %v3864_v54 = vld [vmem:[#allocation22 + $0xf8] sm:$0xff] }
0x146c   :  { %10341 = vmatpush1.bf16.msra.mxu0 %v13319_v19  ;;  %v13359_v19 = vcombine.low %v4849_v56, %v4853_v41  ;;  %v3867_v56 = vld [vmem:[#allocation22 + $0x110] sm:$0xff] }
0x146d   :  { %10685 = vmatpush1.bf16.msra.mxu1 %v13321_v10  ;;  %10342 = vmatprep.subr.bf16.mxu0 %v13328_v50  ;;  %v13361_v10 = vcombine.low %v4850_v45, %v4854_v16  ;;  %v12348_v50 = vcombine.high %v3835_v21, %v3839_v26  ;;  %v3871_v41 = vld [vmem:[#allocation22 + $0x130] sm:$0xff]  ;;  %v3868_v45 = vld [vmem:[#allocation22 + $0x118] sm:$0xff] }
0x146e   :  { %10686 = vmatprep.subr.bf16.mxu1 %v13330_v53  ;;  %v12350_v53 = vcombine.high %v3836_v27, %v3840_v17  ;;  %v3872_v16 = vld [vmem:[#allocation22 + $0x138] sm:$0xff]  ;;  %v3879_v21 = vld [vmem:[#allocation22 + $0x170] sm:$0xff] }
0x146f   :  { %v3876_v26 = vld [vmem:[#allocation22 + $0x158] sm:$0xff] }
0x1470   :  { %10343 = vmatpush1.bf16.msra.mxu0 %v13327_v3  ;;  %v3848_v3 = vld [vmem:[#allocation22 + $0x78] sm:$0xff] }
0x1471   :  { %10687 = vmatpush1.bf16.msra.mxu1 %v13329_v39  ;;  %10344 = vmatprep.subr.bf16.mxu0 %v13336_v58  ;;  %v12349_v39 = vcombine.low %v3836_v27, %v3840_v17  ;;  %v12356_v58 = vcombine.high %v3843_v44, %v3847_v60  ;;  %v12358_v4 = vcombine.high %v3844_v6, %v3848_v3  ;;  %v3880_v27 = vld [vmem:[#allocation22 + $0x178] sm:$0xff] }
0x1472   :  { %10688 = vmatprep.subr.bf16.mxu1 %v13338_v9  ;;  %v3851_v9 = vld [vmem:[#allocation22 + $0x90] sm:$0xff]  ;;  %v12379_v17 = vcombine.low %v3867_v56, %v3871_v41 }
0x1474   :  { %10345 = vmatpush1.bf16.msra.mxu0 %v13335_v32  ;;  %v12355_v32 = vcombine.low %v3843_v44, %v3847_v60  ;;  %v3887_v44 = vld [vmem:[#allocation22 + $0x1b0] sm:$0xff]  ;;  %v3884_v60 = vld [vmem:[#allocation22 + $0x198] sm:$0xff] }
0x1475   :  { %10689 = vmatpush1.bf16.msra.mxu1 %v13337_v0  ;;  %10346 = vmatprep.subr.bf16.mxu0 %v13344_v33  ;;  %v12357_v0 = vcombine.low %v3844_v6, %v3848_v3  ;;  %v12364_v33 = vcombine.high %v3851_v9, %v3855_v13  ;;  %v12389_v3 = vcombine.low %v3876_v26, %v3880_v27 }
0x1476   :  { %10690 = vmatprep.subr.bf16.mxu1 %v13346_v20  ;;  %v12366_v20 = vcombine.high %v3852_v8, %v3856_v59 }
0x1478   :  { %10347 = vmatpush1.bf16.msra.mxu0 %v13343_v55  ;;  %v12363_v55 = vcombine.low %v3851_v9, %v3855_v13  ;;  %v3891_v9 = vld [vmem:[#allocation22 + $0x1d0] sm:$0xff] }
0x1479   :  { %10691 = vmatpush1.bf16.msra.mxu1 %v13345_v35  ;;  %10348 = vmatprep.subr.bf16.mxu0 %v13352_v29  ;;  %v12365_v35 = vcombine.low %v3852_v8, %v3856_v59  ;;  %v12372_v29 = vcombine.high %v3859_v36, %v3863_v48  ;;  %v3895_v13 = vld [vmem:[#allocation22 + $0x1f0] sm:$0xff]  ;;  %v3896_v8 = vld [vmem:[#allocation22 + $0x1f8] sm:$0xff] }
0x147a   :  { %10692 = vmatprep.subr.bf16.mxu1 %v13354_v1  ;;  %v12374_v1 = vcombine.high %v3860_v52, %v3864_v54 }
0x147c   :  { %10349 = vmatpush1.bf16.msra.mxu0 %v13351_v61  ;;  %v12373_v61 = vcombine.low %v3860_v52, %v3864_v54  ;;  %v3904_v52 = vld [vmem:[#allocation22 + $0x238] sm:$0xff]  ;;  %v12403_v54 = vcombine.low %v3891_v9, %v3895_v13 }
0x147d   :  { %10693 = vmatpush1.bf16.msra.mxu1 %v13353_v22  ;;  %10350 = vmatprep.subr.bf16.mxu0 %v13360_v37  ;;  %v12380_v22 = vcombine.high %v3867_v56, %v3871_v41  ;;  %v12382_v37 = vcombine.high %v3868_v45, %v3872_v16  ;;  %v3911_v56 = vld [vmem:[#allocation22 + $0x270] sm:$0xff]  ;;  %v3908_v41 = vld [vmem:[#allocation22 + $0x258] sm:$0xff] }
0x147e   :  { %10694 = vmatprep.subr.bf16.mxu1 %v13362_v42  ;;  %v3875_v42 = vld [vmem:[#allocation22 + $0x150] sm:$0xff] }
0x147f   :  { %v12387_v6 = vcombine.low %v3875_v42, %v3879_v21 }
0x1480   :  { %10351 = vmatpush1.bf16.msra.mxu0 %v13359_v19  ;;  %v12381_v19 = vcombine.low %v3868_v45, %v3872_v16  ;;  %v3912_v45 = vld [vmem:[#allocation22 + $0x278] sm:$0xff] }
0x1481   :  { %10695 = vmatpush1.bf16.msra.mxu1 %v13361_v10  ;;  %10707 = vmatprep.subr.bf16.mxu0 %v12348_v50  ;;  %v12388_v10 = vcombine.high %v3875_v42, %v3879_v21  ;;  %v12390_v50 = vcombine.high %v3876_v26, %v3880_v27  ;;  %v3919_v42 = vld [vmem:[#allocation22 + $0x2b0] sm:$0xff]  ;;  %v3916_v21 = vld [vmem:[#allocation22 + $0x298] sm:$0xff] }
0x1482   :  { %11051 = vmatprep.subr.bf16.mxu1 %v12350_v53  ;;  %v3883_v53 = vld [vmem:[#allocation22 + $0x190] sm:$0xff]  ;;  %v3920_v26 = vld [vmem:[#allocation22 + $0x2b8] sm:$0xff] }
0x1483   :  { %10353 = vmatmul.mubr.bf16.vlgmr.msra.gmra.mrb[48].mxu0 %v16202_v18  ;;  %v12395_v59 = vcombine.low %v3883_v53, %v3887_v44 }
0x1484   :  { %10697 = vmatmul.mubr.bf16.vlgmr.msra.gmra.mrb[44].mxu1 %v16202_v18  ;;  %10708 = vmatpush1.bf16.msra.mxu0 %v12347_v38  ;;  %v3888_v38 = vld [vmem:[#allocation22 + $0x1b8] sm:$0xff] }
0x1485   :  { %10739 = vmatprep.mubr.bf16.mxu0 %v16126_v24  ;;  %11052 = vmatpush1.bf16.msra.mxu1 %v12349_v39  ;;  %v12396_v39 = vcombine.high %v3883_v53, %v3887_v44  ;;  %v3927_v53 = vld [vmem:[#allocation22 + $0x2f0] sm:$0xff]  ;;  %v3924_v44 = vld [vmem:[#allocation22 + $0x2d8] sm:$0xff] }
0x1486   :  { %11083 = vmatprep.mubr.bf16.mxu1 %v16126_v24  ;;  %10709 = vmatprep.subr.bf16.mxu0 %v12356_v58  ;;  %v12371_v24 = vcombine.low %v3859_v36, %v3863_v48  ;;  %v12398_v58 = vcombine.high %v3884_v60, %v3888_v38  ;;  %v3903_v36 = vld [vmem:[#allocation22 + $0x230] sm:$0xff]  ;;  %v3900_v48 = vld [vmem:[#allocation22 + $0x218] sm:$0xff] }
0x1487   :  { %11053 = vmatprep.subr.bf16.mxu1 %v12358_v4  ;;  %v3892_v4 = vld [vmem:[#allocation22 + $0x1d8] sm:$0xff] }
0x1488   :  { %10710 = vmatpush1.bf16.msra.mxu0 %v12355_v32  ;;  %v12397_v32 = vcombine.low %v3884_v60, %v3888_v38  ;;  %v3928_v60 = vld [vmem:[#allocation22 + $0x2f8] sm:$0xff] }
0x1489   :  { %11054 = vmatpush1.bf16.msra.mxu1 %v12357_v0  ;;  %10711 = vmatprep.subr.bf16.mxu0 %v12364_v33  ;;  %v12404_v0 = vcombine.high %v3891_v9, %v3895_v13  ;;  %v12406_v33 = vcombine.high %v3892_v4, %v3896_v8  ;;  %v3935_v9 = vld [vmem:[#allocation22 + $0x330] sm:$0xff]  ;;  %v3932_v13 = vld [vmem:[#allocation22 + $0x318] sm:$0xff] }
0x148a   :  { %11055 = vmatprep.subr.bf16.mxu1 %v12366_v20  ;;  %v3899_v20 = vld [vmem:[#allocation22 + $0x210] sm:$0xff] }
0x148b   :  { %v12411_v16 = vcombine.low %v3899_v20, %v3903_v36 }
0x148c   :  { %10712 = vmatpush1.bf16.msra.mxu0 %v12363_v55  ;;  %v12405_v55 = vcombine.low %v3892_v4, %v3896_v8  ;;  %v3936_v4 = vld [vmem:[#allocation22 + $0x338] sm:$0xff] }
0x148d   :  { %11056 = vmatpush1.bf16.msra.mxu1 %v12365_v35  ;;  %10713 = vmatprep.subr.bf16.mxu0 %v12372_v29  ;;  %v12412_v35 = vcombine.high %v3899_v20, %v3903_v36  ;;  %v12414_v29 = vcombine.high %v3900_v48, %v3904_v52  ;;  %v3943_v20 = vld [vmem:[#allocation22 + $0x370] sm:$0xff]  ;;  %v3940_v36 = vld [vmem:[#allocation22 + $0x358] sm:$0xff] }
0x148e   :  { %11057 = vmatprep.subr.bf16.mxu1 %v12374_v1  ;;  %v3907_v1 = vld [vmem:[#allocation22 + $0x250] sm:$0xff] }
0x148f   :  { %v12419_v27 = vcombine.low %v3907_v1, %v3911_v56 }
0x1490   :  { %10714 = vmatpush1.bf16.msra.mxu0 %v12371_v24  ;;  %v12413_v24 = vcombine.low %v3900_v48, %v3904_v52  ;;  %v3944_v48 = vld [vmem:[#allocation22 + $0x378] sm:$0xff] }
0x1491   :  { %11058 = vmatpush1.bf16.msra.mxu1 %v12373_v61  ;;  %10715 = vmatprep.subr.bf16.mxu0 %v12380_v22  ;;  %v12420_v61 = vcombine.high %v3907_v1, %v3911_v56  ;;  %v12422_v22 = vcombine.high %v3908_v41, %v3912_v45  ;;  %v3951_v1 = vld [vmem:[#allocation22 + $0x3b0] sm:$0xff]  ;;  %v3948_v56 = vld [vmem:[#allocation22 + $0x398] sm:$0xff] }
0x1492   :  { %11059 = vmatprep.subr.bf16.mxu1 %v12382_v37  ;;  %v3915_v37 = vld [vmem:[#allocation22 + $0x290] sm:$0xff] }
0x1493   :  { %v12427_v38 = vcombine.low %v3915_v37, %v3919_v42 }
0x1494   :  { %10716 = vmatpush1.bf16.msra.mxu0 %v12379_v17  ;;  %v12421_v17 = vcombine.low %v3908_v41, %v3912_v45  ;;  %v3952_v41 = vld [vmem:[#allocation22 + $0x3b8] sm:$0xff] }
0x1495   :  { %11060 = vmatpush1.bf16.msra.mxu1 %v12381_v19  ;;  %10717 = vmatprep.subr.bf16.mxu0 %v12388_v10  ;;  %v12428_v19 = vcombine.high %v3915_v37, %v3919_v42  ;;  %v12430_v10 = vcombine.high %v3916_v21, %v3920_v26  ;;  %v3959_v37 = vld [vmem:[#allocation22 + $0x3f0] sm:$0xff]  ;;  %v3956_v42 = vld [vmem:[#allocation22 + $0x3d8] sm:$0xff] }
0x1496   :  { %11061 = vmatprep.subr.bf16.mxu1 %v12390_v50  ;;  %v3923_v50 = vld [vmem:[#allocation22 + $0x2d0] sm:$0xff] }
0x1497   :  { %v12435_v8 = vcombine.low %v3923_v50, %v3927_v53 }
0x1498   :  { %10718 = vmatpush1.bf16.msra.mxu0 %v12387_v6  ;;  %v12429_v6 = vcombine.low %v3916_v21, %v3920_v26  ;;  %v3960_v21 = vld [vmem:[#allocation22 + $0x3f8] sm:$0xff] }
0x1499   :  { %11062 = vmatpush1.bf16.msra.mxu1 %v12389_v3  ;;  %10719 = vmatprep.subr.bf16.mxu0 %v12396_v39  ;;  %v12436_v3 = vcombine.high %v3923_v50, %v3927_v53  ;;  %v12438_v39 = vcombine.high %v3924_v44, %v3928_v60  ;;  %v3967_v50 = vld [vmem:[#allocation22 + $0x430] sm:$0xff]  ;;  %v3964_v53 = vld [vmem:[#allocation22 + $0x418] sm:$0xff] }
0x149a   :  { %11063 = vmatprep.subr.bf16.mxu1 %v12398_v58  ;;  %v3931_v58 = vld [vmem:[#allocation22 + $0x310] sm:$0xff] }
0x149b   :  { %v12443_v52 = vcombine.low %v3931_v58, %v3935_v9 }
0x149c   :  { %10720 = vmatpush1.bf16.msra.mxu0 %v12395_v59  ;;  %v12437_v59 = vcombine.low %v3924_v44, %v3928_v60  ;;  %v3968_v44 = vld [vmem:[#allocation22 + $0x438] sm:$0xff] }
0x149d   :  { %11064 = vmatpush1.bf16.msra.mxu1 %v12397_v32  ;;  %10721 = vmatprep.subr.bf16.mxu0 %v12404_v0  ;;  %v12444_v32 = vcombine.high %v3931_v58, %v3935_v9  ;;  %v12446_v0 = vcombine.high %v3932_v13, %v3936_v4  ;;  %v3975_v58 = vld [vmem:[#allocation22 + $0x470] sm:$0xff] }
0x149e   :  { %11065 = vmatprep.subr.bf16.mxu1 %v12406_v33  ;;  %v3939_v33 = vld [vmem:[#allocation22 + $0x350] sm:$0xff] }
0x149f   :  { %v12451_v45 = vcombine.low %v3939_v33, %v3943_v20 }
0x14a0   :  { %10722 = vmatpush1.bf16.msra.mxu0 %v12403_v54  ;;  %v12445_v54 = vcombine.low %v3932_v13, %v3936_v4  ;;  %v3972_v13 = vld [vmem:[#allocation22 + $0x458] sm:$0xff] }
0x14a1   :  { %11066 = vmatpush1.bf16.msra.mxu1 %v12405_v55  ;;  %10723 = vmatprep.subr.bf16.mxu0 %v12412_v35  ;;  %v12452_v55 = vcombine.high %v3939_v33, %v3943_v20  ;;  %v12454_v35 = vcombine.high %v3940_v36, %v3944_v48  ;;  %v3976_v4 = vld [vmem:[#allocation22 + $0x478] sm:$0xff] }
0x14a2   :  { %11067 = vmatprep.subr.bf16.mxu1 %v12414_v29  ;;  %v3947_v29 = vld [vmem:[#allocation22 + $0x390] sm:$0xff]  ;;  %v12486_v33 = vcombine.high %v3972_v13, %v3976_v4  ;;  %v3980_v20 = vld [vmem:[#allocation22 + $0x498] sm:$0xff] }
0x14a3   :  { %v12459_v26 = vcombine.low %v3947_v29, %v3951_v1 }
0x14a4   :  { %10724 = vmatpush1.bf16.msra.mxu0 %v12411_v16  ;;  %v12453_v16 = vcombine.low %v3940_v36, %v3944_v48  ;;  %v3984_v36 = vld [vmem:[#allocation22 + $0x4b8] sm:$0xff] }
0x14a5   :  { %11068 = vmatpush1.bf16.msra.mxu1 %v12413_v24  ;;  %10725 = vmatprep.subr.bf16.mxu0 %v12420_v61  ;;  %v12460_v24 = vcombine.high %v3947_v29, %v3951_v1  ;;  %v12462_v61 = vcombine.high %v3948_v56, %v3952_v41  ;;  %v3991_v29 = vld [vmem:[#allocation22 + $0x4f0] sm:$0xff]  ;;  %v3988_v1 = vld [vmem:[#allocation22 + $0x4d8] sm:$0xff] }
0x14a6   :  { %11069 = vmatprep.subr.bf16.mxu1 %v12422_v22  ;;  %v3955_v22 = vld [vmem:[#allocation22 + $0x3d0] sm:$0xff] }
0x14a7   :  { %v12467_v60 = vcombine.low %v3955_v22, %v3959_v37 }
0x14a8   :  { %10726 = vmatpush1.bf16.msra.mxu0 %v12419_v27  ;;  %v12461_v27 = vcombine.low %v3948_v56, %v3952_v41  ;;  %v3992_v56 = vld [vmem:[#allocation22 + $0x4f8] sm:$0xff] }
0x14a9   :  { %11070 = vmatpush1.bf16.msra.mxu1 %v12421_v17  ;;  %10727 = vmatprep.subr.bf16.mxu0 %v12428_v19  ;;  %v12468_v17 = vcombine.high %v3955_v22, %v3959_v37  ;;  %v12470_v19 = vcombine.high %v3956_v42, %v3960_v21  ;;  %v3996_v22 = vld [vmem:[#allocation22 + $0x518] sm:$0xff] }
0x14aa   :  { %11071 = vmatprep.subr.bf16.mxu1 %v12430_v10  ;;  %v3963_v10 = vld [vmem:[#allocation22 + $0x410] sm:$0xff]  ;;  %v4000_v37 = vld [vmem:[#allocation22 + $0x538] sm:$0xff] }
0x14ab   :  { %v12475_v9 = vcombine.low %v3963_v10, %v3967_v50 }
0x14ac   :  { %10728 = vmatpush1.bf16.msra.mxu0 %v12427_v38  ;;  %v12469_v38 = vcombine.low %v3956_v42, %v3960_v21  ;;  %v12501_v42 = vcombine.low %v3988_v1, %v3992_v56 }
0x14ad   :  { %11072 = vmatpush1.bf16.msra.mxu1 %v12429_v6  ;;  %10729 = vmatprep.subr.bf16.mxu0 %v12436_v3  ;;  %v12476_v6 = vcombine.high %v3963_v10, %v3967_v50  ;;  %v12478_v3 = vcombine.high %v3964_v53, %v3968_v44  ;;  %v4008_v10 = vld [vmem:[#allocation22 + $0x578] sm:$0xff] }
0x14ae   :  { %11073 = vmatprep.subr.bf16.mxu1 %v12438_v39  ;;  %v3971_v39 = vld [vmem:[#allocation22 + $0x450] sm:$0xff] }
0x14af   :  { %v12483_v48 = vcombine.low %v3971_v39, %v3975_v58 }
0x14b0   :  { %10730 = vmatpush1.bf16.msra.mxu0 %v12435_v8  ;;  %v12477_v8 = vcombine.low %v3964_v53, %v3968_v44  ;;  %v12509_v53 = vcombine.low %v3996_v22, %v4000_v37 }
0x14b1   :  { %11074 = vmatpush1.bf16.msra.mxu1 %v12437_v59  ;;  %10731 = vmatprep.subr.bf16.mxu0 %v12444_v32  ;;  %v12484_v59 = vcombine.high %v3971_v39, %v3975_v58  ;;  %v3979_v32 = vld [vmem:[#allocation22 + $0x490] sm:$0xff]  ;;  %v4016_v39 = vld [vmem:[#allocation22 + $0x5b8] sm:$0xff] }
0x14b2   :  { %11075 = vmatprep.subr.bf16.mxu1 %v12446_v0  ;;  %v3983_v0 = vld [vmem:[#allocation22 + $0x4b0] sm:$0xff] }
0x14b3   :  { %v12491_v41 = vcombine.low %v3979_v32, %v3983_v0 }
0x14b4   :  { %10732 = vmatpush1.bf16.msra.mxu0 %v12443_v52  ;;  %v12485_v52 = vcombine.low %v3972_v13, %v3976_v4 }
0x14b5   :  { %11076 = vmatpush1.bf16.msra.mxu1 %v12445_v54  ;;  %10733 = vmatprep.subr.bf16.mxu0 %v12452_v55  ;;  %v12492_v54 = vcombine.high %v3979_v32, %v3983_v0  ;;  %v12494_v55 = vcombine.high %v3980_v20, %v3984_v36  ;;  %v4020_v32 = vld [vmem:[#allocation22 + $0x5d8] sm:$0xff] }
0x14b6   :  { %11077 = vmatprep.subr.bf16.mxu1 %v12454_v35  ;;  %v3987_v35 = vld [vmem:[#allocation22 + $0x4d0] sm:$0xff]  ;;  %v4024_v0 = vld [vmem:[#allocation22 + $0x5f8] sm:$0xff] }
0x14b8   :  { %10734 = vmatpush1.bf16.msra.mxu0 %v12451_v45  ;;  %v12500_v45 = vcombine.high %v3987_v35, %v3991_v29 }
0x14b9   :  { %11078 = vmatpush1.bf16.msra.mxu1 %v12453_v16  ;;  %10735 = vmatprep.subr.bf16.mxu0 %v12460_v24  ;;  %v12502_v16 = vcombine.high %v3988_v1, %v3992_v56  ;;  %v3995_v24 = vld [vmem:[#allocation22 + $0x510] sm:$0xff]  ;;  %v12533_v1 = vcombine.low %v4020_v32, %v4024_v0 }
0x14ba   :  { %11079 = vmatprep.subr.bf16.mxu1 %v12462_v61  ;;  %v3999_v61 = vld [vmem:[#allocation22 + $0x530] sm:$0xff] }
0x14bb   :  { %v12508_v21 = vcombine.high %v3995_v24, %v3999_v61  ;;  %v12507_v50 = vcombine.low %v3995_v24, %v3999_v61  ;;  %v4040_v24 = vld [vmem:[#allocation22 + $0x678] sm:$0xff] }
0x14bc   :  { %10736 = vmatpush1.bf16.msra.mxu0 %v12459_v26  ;;  %v12510_v26 = vcombine.high %v3996_v22, %v4000_v37 }
0x14bd   :  { %11080 = vmatpush1.bf16.msra.mxu1 %v12461_v27  ;;  %10737 = vmatprep.subr.bf16.mxu0 %v12468_v17  ;;  %v4003_v27 = vld [vmem:[#allocation22 + $0x550] sm:$0xff] }
0x14be   :  { %11081 = vmatprep.subr.bf16.mxu1 %v12470_v19  ;;  %v4007_v17 = vld [vmem:[#allocation22 + $0x570] sm:$0xff]  ;;  %v4004_v19 = vld [vmem:[#allocation22 + $0x558] sm:$0xff] }
0x14bf   :  { %v12516_v44 = vcombine.high %v4003_v27, %v4007_v17  ;;  %v12515_v58 = vcombine.low %v4003_v27, %v4007_v17  ;;  %v4048_v27 = vld [vmem:[#allocation22 + $0x6b8] sm:$0xff] }
0x14c0   :  { %10738 = vmatpush1.bf16.msra.mxu0 %v12467_v60  ;;  %v12518_v60 = vcombine.high %v4004_v19, %v4008_v10 }
0x14c1   :  { %11082 = vmatpush1.bf16.msra.mxu1 %v12469_v38  ;;  %10750 = vmatprep.subr.bf16.mxu0 %v12476_v6  ;;  %v4011_v38 = vld [vmem:[#allocation22 + $0x590] sm:$0xff] }
0x14c2   :  { %11094 = vmatprep.subr.bf16.mxu1 %v12478_v3  ;;  %v4015_v6 = vld [vmem:[#allocation22 + $0x5b0] sm:$0xff]  ;;  %v4012_v3 = vld [vmem:[#allocation22 + $0x598] sm:$0xff] }
0x14c3   :  { %10740 = vmatmul.mubr.bf16.vlgmr.msra.gmra.mrb[52].mxu0 %v16122_v30  ;;  %v12524_v13 = vcombine.high %v4011_v38, %v4015_v6  ;;  %v12526_v4 = vcombine.high %v4012_v3, %v4016_v39 }
0x14c4   :  { %11084 = vmatmul.mubr.bf16.vlgmr.msra.gmra.mrb[48].mxu1 %v16122_v30  ;;  %10751 = vmatpush1.bf16.msra.mxu0 %v12475_v9  ;;  %v12493_v30 = vcombine.low %v3980_v20, %v3984_v36  ;;  %v12517_v9 = vcombine.low %v4004_v19, %v4008_v10  ;;  %v12525_v20 = vcombine.low %v4012_v3, %v4016_v39 }
0x14c5   :  { %10782 = vmatprep.mubr.bf16.mxu0 %v16128_v25  ;;  %11095 = vmatpush1.bf16.msra.mxu1 %v12477_v8  ;;  %v4019_v8 = vld [vmem:[#allocation22 + $0x5d0] sm:$0xff] }
0x14c6   :  { %11126 = vmatprep.mubr.bf16.mxu1 %v16128_v25  ;;  %10752 = vmatprep.subr.bf16.mxu0 %v12484_v59  ;;  %v12499_v25 = vcombine.low %v3987_v35, %v3991_v29  ;;  %v4023_v59 = vld [vmem:[#allocation22 + $0x5f0] sm:$0xff]  ;;  %v4032_v35 = vld [vmem:[#allocation22 + $0x638] sm:$0xff] }
0x14c7   :  { %11096 = vmatprep.subr.bf16.mxu1 %v12486_v33  ;;  %v12523_v33 = vcombine.low %v4011_v38, %v4015_v6  ;;  %v12532_v36 = vcombine.high %v4019_v8, %v4023_v59  ;;  %v12531_v29 = vcombine.low %v4019_v8, %v4023_v59  ;;  %v4056_v38 = vld [vmem:[#allocation22 + $0x6f8] sm:$0xff] }
0x14c8   :  { %10753 = vmatpush1.bf16.msra.mxu0 %v12483_v48  ;;  %v12534_v48 = vcombine.high %v4020_v32, %v4024_v0  ;;  %v4064_v8 = vld [vmem:[#allocation22 + $0x738] sm:$0xff] }
0x14c9   :  { %11097 = vmatpush1.bf16.msra.mxu1 %v12485_v52  ;;  %10754 = vmatprep.subr.bf16.mxu0 %v12492_v54  ;;  %v4027_v52 = vld [vmem:[#allocation22 + $0x610] sm:$0xff] }
0x14ca   :  { %11098 = vmatprep.subr.bf16.mxu1 %v12494_v55  ;;  %v4031_v54 = vld [vmem:[#allocation22 + $0x630] sm:$0xff]  ;;  %v4028_v55 = vld [vmem:[#allocation22 + $0x618] sm:$0xff] }
0x14cb   :  { %v12540_v56 = vcombine.high %v4027_v52, %v4031_v54  ;;  %v12539_v61 = vcombine.low %v4027_v52, %v4031_v54  ;;  %v12541_v22 = vcombine.low %v4028_v55, %v4032_v35  ;;  %v4072_v52 = vld [vmem:[#allocation22 + $0x778] sm:$0xff] }
0x14cc   :  { %10755 = vmatpush1.bf16.msra.mxu0 %v12491_v41  ;;  %v12542_v41 = vcombine.high %v4028_v55, %v4032_v35 }
0x14cd   :  { %11099 = vmatpush1.bf16.msra.mxu1 %v12493_v30  ;;  %10756 = vmatprep.subr.bf16.mxu0 %v12500_v45  ;;  %v4035_v30 = vld [vmem:[#allocation22 + $0x650] sm:$0xff] }
0x14ce   :  { %11100 = vmatprep.subr.bf16.mxu1 %v12502_v16  ;;  %v4039_v45 = vld [vmem:[#allocation22 + $0x670] sm:$0xff]  ;;  %v4036_v16 = vld [vmem:[#allocation22 + $0x658] sm:$0xff] }
0x14cf   :  { %v12548_v37 = vcombine.high %v4035_v30, %v4039_v45  ;;  %v12547_v17 = vcombine.low %v4035_v30, %v4039_v45  ;;  %v12549_v19 = vcombine.low %v4036_v16, %v4040_v24  ;;  %v4080_v30 = vld [vmem:[#allocation22 + $0x7b8] sm:$0xff] }
0x14d0   :  { %10757 = vmatpush1.bf16.msra.mxu0 %v12499_v25  ;;  %v12550_v25 = vcombine.high %v4036_v16, %v4040_v24 }
0x14d1   :  { %11101 = vmatpush1.bf16.msra.mxu1 %v12501_v42  ;;  %10758 = vmatprep.subr.bf16.mxu0 %v12508_v21  ;;  %v4043_v42 = vld [vmem:[#allocation22 + $0x690] sm:$0xff] }
0x14d2   :  { %11102 = vmatprep.subr.bf16.mxu1 %v12510_v26  ;;  %v4047_v21 = vld [vmem:[#allocation22 + $0x6b0] sm:$0xff]  ;;  %v4044_v26 = vld [vmem:[#allocation22 + $0x698] sm:$0xff] }
0x14d3   :  { %v12556_v10 = vcombine.high %v4043_v42, %v4047_v21  ;;  %v12555_v6 = vcombine.low %v4043_v42, %v4047_v21  ;;  %v12557_v3 = vcombine.low %v4044_v26, %v4048_v27  ;;  %v4088_v42 = vld [vmem:[#allocation22 + $0x7f8] sm:$0xff] }
0x14d4   :  { %10759 = vmatpush1.bf16.msra.mxu0 %v12507_v50  ;;  %v12558_v50 = vcombine.high %v4044_v26, %v4048_v27 }
0x14d5   :  { %11103 = vmatpush1.bf16.msra.mxu1 %v12509_v53  ;;  %10760 = vmatprep.subr.bf16.mxu0 %v12516_v44  ;;  %v4051_v53 = vld [vmem:[#allocation22 + $0x6d0] sm:$0xff] }
0x14d6   :  { %11104 = vmatprep.subr.bf16.mxu1 %v12518_v60  ;;  %v4055_v44 = vld [vmem:[#allocation22 + $0x6f0] sm:$0xff]  ;;  %v4052_v60 = vld [vmem:[#allocation22 + $0x6d8] sm:$0xff] }
0x14d7   :  { %v12564_v39 = vcombine.high %v4051_v53, %v4055_v44  ;;  %v12563_v59 = vcombine.low %v4051_v53, %v4055_v44  ;;  %v12565_v32 = vcombine.low %v4052_v60, %v4056_v38  ;;  %v4096_v53 = vld [vmem:[#allocation22 + $0x838] sm:$0xff] }
0x14d8   :  { %10761 = vmatpush1.bf16.msra.mxu0 %v12515_v58  ;;  %v12566_v58 = vcombine.high %v4052_v60, %v4056_v38 }
0x14d9   :  { %11105 = vmatpush1.bf16.msra.mxu1 %v12517_v9  ;;  %10762 = vmatprep.subr.bf16.mxu0 %v12524_v13  ;;  %v4059_v9 = vld [vmem:[#allocation22 + $0x710] sm:$0xff] }
0x14da   :  { %11106 = vmatprep.subr.bf16.mxu1 %v12526_v4  ;;  %v4063_v13 = vld [vmem:[#allocation22 + $0x730] sm:$0xff]  ;;  %v4060_v4 = vld [vmem:[#allocation22 + $0x718] sm:$0xff] }
0x14db   :  { %v12572_v0 = vcombine.high %v4059_v9, %v4063_v13  ;;  %v12571_v54 = vcombine.low %v4059_v9, %v4063_v13  ;;  %v12573_v55 = vcombine.low %v4060_v4, %v4064_v8  ;;  %v4100_v9 = vld [vmem:[#allocation22 + $0x858] sm:$0xff] }
0x14dc   :  { %10763 = vmatpush1.bf16.msra.mxu0 %v12523_v33  ;;  %v12574_v33 = vcombine.high %v4060_v4, %v4064_v8  ;;  %v4104_v13 = vld [vmem:[#allocation22 + $0x878] sm:$0xff] }
0x14dd   :  { %11107 = vmatpush1.bf16.msra.mxu1 %v12525_v20  ;;  %10764 = vmatprep.subr.bf16.mxu0 %v12532_v36  ;;  %v4067_v20 = vld [vmem:[#allocation22 + $0x750] sm:$0xff] }
0x14de   :  { %11108 = vmatprep.subr.bf16.mxu1 %v12534_v48  ;;  %v4071_v36 = vld [vmem:[#allocation22 + $0x770] sm:$0xff]  ;;  %v4068_v48 = vld [vmem:[#allocation22 + $0x758] sm:$0xff] }
0x14df   :  { %v12580_v35 = vcombine.high %v4067_v20, %v4071_v36  ;;  %v12579_v45 = vcombine.low %v4067_v20, %v4071_v36  ;;  %v12581_v16 = vcombine.low %v4068_v48, %v4072_v52  ;;  %v4112_v20 = vld [vmem:[#allocation22 + $0x8b8] sm:$0xff] }
0x14e0   :  { %10765 = vmatpush1.bf16.msra.mxu0 %v12531_v29  ;;  %v12582_v29 = vcombine.high %v4068_v48, %v4072_v52  ;;  %v12613_v48 = vcombine.low %v4100_v9, %v4104_v13 }
0x14e1   :  { %11109 = vmatpush1.bf16.msra.mxu1 %v12533_v1  ;;  %10766 = vmatprep.subr.bf16.mxu0 %v12540_v56  ;;  %v4075_v1 = vld [vmem:[#allocation22 + $0x790] sm:$0xff] }
0x14e2   :  { %11110 = vmatprep.subr.bf16.mxu1 %v12542_v41  ;;  %v4079_v56 = vld [vmem:[#allocation22 + $0x7b0] sm:$0xff]  ;;  %v4076_v41 = vld [vmem:[#allocation22 + $0x798] sm:$0xff] }
0x14e3   :  { %v12588_v24 = vcombine.high %v4075_v1, %v4079_v56  ;;  %v12587_v21 = vcombine.low %v4075_v1, %v4079_v56  ;;  %v12589_v26 = vcombine.low %v4076_v41, %v4080_v30  ;;  %v4120_v1 = vld [vmem:[#allocation22 + $0x8f8] sm:$0xff] }
0x14e4   :  { %10767 = vmatpush1.bf16.msra.mxu0 %v12539_v61  ;;  %v12590_v61 = vcombine.high %v4076_v41, %v4080_v30 }
0x14e5   :  { %11111 = vmatpush1.bf16.msra.mxu1 %v12541_v22  ;;  %10768 = vmatprep.subr.bf16.mxu0 %v12548_v37  ;;  %v4083_v22 = vld [vmem:[#allocation22 + $0x7d0] sm:$0xff] }
0x14e6   :  { %11112 = vmatprep.subr.bf16.mxu1 %v12550_v25  ;;  %v4087_v37 = vld [vmem:[#allocation22 + $0x7f0] sm:$0xff]  ;;  %v4084_v25 = vld [vmem:[#allocation22 + $0x7d8] sm:$0xff] }
0x14e7   :  { %v12596_v27 = vcombine.high %v4083_v22, %v4087_v37  ;;  %v12595_v44 = vcombine.low %v4083_v22, %v4087_v37  ;;  %v12597_v60 = vcombine.low %v4084_v25, %v4088_v42 }
0x14e8   :  { %10769 = vmatpush1.bf16.msra.mxu0 %v12547_v17  ;;  %v12598_v17 = vcombine.high %v4084_v25, %v4088_v42  ;;  %v4131_v42 = vld [vmem:[#allocation22 + $0x950] sm:$0xff] }
0x14e9   :  { %11113 = vmatpush1.bf16.msra.mxu1 %v12549_v19  ;;  %10770 = vmatprep.subr.bf16.mxu0 %v12556_v10  ;;  %v4091_v19 = vld [vmem:[#allocation22 + $0x810] sm:$0xff] }
0x14ea   :  { %11114 = vmatprep.subr.bf16.mxu1 %v12558_v50  ;;  %v4095_v10 = vld [vmem:[#allocation22 + $0x830] sm:$0xff]  ;;  %v4092_v50 = vld [vmem:[#allocation22 + $0x818] sm:$0xff] }
0x14eb   :  { %v12604_v38 = vcombine.high %v4091_v19, %v4095_v10  ;;  %v12605_v4 = vcombine.low %v4092_v50, %v4096_v53 }
0x14ec   :  { %10771 = vmatpush1.bf16.msra.mxu0 %v12555_v6  ;;  %v12606_v6 = vcombine.high %v4092_v50, %v4096_v53  ;;  %v4139_v53 = vld [vmem:[#allocation22 + $0x990] sm:$0xff] }
0x14ed   :  { %11115 = vmatpush1.bf16.msra.mxu1 %v12557_v3  ;;  %10772 = vmatprep.subr.bf16.mxu0 %v12564_v39  ;;  %v4099_v3 = vld [vmem:[#allocation22 + $0x850] sm:$0xff] }
0x14ee   :  { %11116 = vmatprep.subr.bf16.mxu1 %v12566_v58  ;;  %v4103_v39 = vld [vmem:[#allocation22 + $0x870] sm:$0xff]  ;;  %v12603_v58 = vcombine.low %v4091_v19, %v4095_v10 }
0x14ef   :  { %v12612_v8 = vcombine.high %v4099_v3, %v4103_v39  ;;  %v12611_v36 = vcombine.low %v4099_v3, %v4103_v39 }
0x14f0   :  { %10773 = vmatpush1.bf16.msra.mxu0 %v12563_v59  ;;  %v4107_v59 = vld [vmem:[#allocation22 + $0x890] sm:$0xff] }
0x14f1   :  { %11117 = vmatpush1.bf16.msra.mxu1 %v12565_v32  ;;  %10774 = vmatprep.subr.bf16.mxu0 %v12572_v0  ;;  %v4111_v32 = vld [vmem:[#allocation22 + $0x8b0] sm:$0xff]  ;;  %v12614_v0 = vcombine.high %v4100_v9, %v4104_v13 }
0x14f2   :  { %11118 = vmatprep.subr.bf16.mxu1 %v12574_v33  ;;  %v4108_v33 = vld [vmem:[#allocation22 + $0x898] sm:$0xff]  ;;  %v12620_v52 = vcombine.high %v4107_v59, %v4111_v32  ;;  %v12619_v56 = vcombine.low %v4107_v59, %v4111_v32  ;;  %v4147_v9 = vld [vmem:[#allocation22 + $0x9d0] sm:$0xff] }
0x14f3   :  { %v4151_v13 = vld [vmem:[#allocation22 + $0x9f0] sm:$0xff] }
0x14f4   :  { %10775 = vmatpush1.bf16.msra.mxu0 %v12571_v54  ;;  %v12622_v54 = vcombine.high %v4108_v33, %v4112_v20 }
0x14f5   :  { %11119 = vmatpush1.bf16.msra.mxu1 %v12573_v55  ;;  %10776 = vmatprep.subr.bf16.mxu0 %v12580_v35  ;;  %v4115_v55 = vld [vmem:[#allocation22 + $0x8d0] sm:$0xff] }
0x14f6   :  { %11120 = vmatprep.subr.bf16.mxu1 %v12582_v29  ;;  %v4119_v35 = vld [vmem:[#allocation22 + $0x8f0] sm:$0xff]  ;;  %v4116_v29 = vld [vmem:[#allocation22 + $0x8d8] sm:$0xff] }
0x14f7   :  { %v12628_v41 = vcombine.high %v4115_v55, %v4119_v35  ;;  %v12630_v30 = vcombine.high %v4116_v29, %v4120_v1  ;;  %v12629_v22 = vcombine.low %v4116_v29, %v4120_v1  ;;  %v4163_v1 = vld [vmem:[#allocation22 + $0xa50] sm:$0xff] }
0x14f8   :  { %10777 = vmatpush1.bf16.msra.mxu0 %v12579_v45  ;;  %v4123_v45 = vld [vmem:[#allocation22 + $0x910] sm:$0xff] }
0x14f9   :  { %11121 = vmatpush1.bf16.msra.mxu1 %v12581_v16  ;;  %10778 = vmatprep.subr.bf16.mxu0 %v12588_v24  ;;  %v4127_v16 = vld [vmem:[#allocation22 + $0x930] sm:$0xff]  ;;  %v4124_v24 = vld [vmem:[#allocation22 + $0x918] sm:$0xff] }
0x14fa   :  { %11122 = vmatprep.subr.bf16.mxu1 %v12590_v61  ;;  %v4128_v61 = vld [vmem:[#allocation22 + $0x938] sm:$0xff]  ;;  %v12636_v37 = vcombine.high %v4123_v45, %v4127_v16 }
0x14fb   :  { %v12638_v25 = vcombine.high %v4124_v24, %v4128_v61  ;;  %v12637_v19 = vcombine.low %v4124_v24, %v4128_v61  ;;  %v4171_v61 = vld [vmem:[#allocation22 + $0xa90] sm:$0xff] }
0x14fc   :  { %10779 = vmatpush1.bf16.msra.mxu0 %v12587_v21  ;;  %v4135_v21 = vld [vmem:[#allocation22 + $0x970] sm:$0xff] }
0x14fd   :  { %11123 = vmatpush1.bf16.msra.mxu1 %v12589_v26  ;;  %10780 = vmatprep.subr.bf16.mxu0 %v12596_v27  ;;  %v4132_v26 = vld [vmem:[#allocation22 + $0x958] sm:$0xff]  ;;  %v12644_v10 = vcombine.high %v4131_v42, %v4135_v21 }
0x14fe   :  { %11124 = vmatprep.subr.bf16.mxu1 %v12598_v17  ;;  %v4136_v27 = vld [vmem:[#allocation22 + $0x978] sm:$0xff]  ;;  %v12635_v17 = vcombine.low %v4123_v45, %v4127_v16 }
0x14ff   :  { %v12646_v50 = vcombine.high %v4132_v26, %v4136_v27  ;;  %v12645_v3 = vcombine.low %v4132_v26, %v4136_v27  ;;  %v4179_v27 = vld [vmem:[#allocation22 + $0xad0] sm:$0xff] }
0x1500   :  { %10781 = vmatpush1.bf16.msra.mxu0 %v12595_v44  ;;  %v4143_v44 = vld [vmem:[#allocation22 + $0x9b0] sm:$0xff] }
0x1501   :  { %11125 = vmatpush1.bf16.msra.mxu1 %v12597_v60  ;;  %10793 = vmatprep.subr.bf16.mxu0 %v12604_v38  ;;  %v4140_v60 = vld [vmem:[#allocation22 + $0x998] sm:$0xff]  ;;  %v12652_v39 = vcombine.high %v4139_v53, %v4143_v44  ;;  %v12651_v59 = vcombine.low %v4139_v53, %v4143_v44 }
0x1502   :  { %11137 = vmatprep.subr.bf16.mxu1 %v12606_v6  ;;  %v4144_v38 = vld [vmem:[#allocation22 + $0x9b8] sm:$0xff]  ;;  %v12643_v6 = vcombine.low %v4131_v42, %v4135_v21 }
0x1503   :  { %10783 = vmatmul.mubr.bf16.vlgmr.msra.gmra.mrb[52].mxu0 %v16124_v31  ;;  %v12653_v32 = vcombine.low %v4140_v60, %v4144_v38 }
0x1504   :  { %11127 = vmatmul.mubr.bf16.vlgmr.msra.gmra.mrb[48].mxu1 %v16124_v31  ;;  %10794 = vmatpush1.bf16.msra.mxu0 %v12603_v58  ;;  %v12621_v31 = vcombine.low %v4108_v33, %v4112_v20  ;;  %v12654_v58 = vcombine.high %v4140_v60, %v4144_v38  ;;  %v4155_v20 = vld [vmem:[#allocation22 + $0xa10] sm:$0xff] }
0x1505   :  { %10825 = vmatprep.mubr.bf16.mxu0 %v16166_v15  ;;  %11138 = vmatpush1.bf16.msra.mxu1 %v12605_v4  ;;  %v4148_v4 = vld [vmem:[#allocation22 + $0x9d8] sm:$0xff]  ;;  %v4187_v38 = vld [vmem:[#allocation22 + $0xb10] sm:$0xff] }
0x1506   :  { %11169 = vmatprep.mubr.bf16.mxu1 %v16166_v15  ;;  %10795 = vmatprep.subr.bf16.mxu0 %v12612_v8  ;;  %v12627_v15 = vcombine.low %v4115_v55, %v4119_v35  ;;  %v4152_v8 = vld [vmem:[#allocation22 + $0x9f8] sm:$0xff] }
0x1507   :  { %11139 = vmatprep.subr.bf16.mxu1 %v12614_v0  ;;  %v12660_v0 = vcombine.high %v4147_v9, %v4151_v13  ;;  %v12662_v33 = vcombine.high %v4148_v4, %v4152_v8  ;;  %v12661_v55 = vcombine.low %v4148_v4, %v4152_v8  ;;  %v4195_v8 = vld [vmem:[#allocation22 + $0xb50] sm:$0xff] }
0x1508   :  { %10796 = vmatpush1.bf16.msra.mxu0 %v12611_v36  ;;  %v4159_v36 = vld [vmem:[#allocation22 + $0xa30] sm:$0xff] }
0x1509   :  { %11140 = vmatpush1.bf16.msra.mxu1 %v12613_v48  ;;  %10797 = vmatprep.subr.bf16.mxu0 %v12620_v52  ;;  %v4156_v48 = vld [vmem:[#allocation22 + $0xa18] sm:$0xff]  ;;  %v12668_v35 = vcombine.high %v4155_v20, %v4159_v36 }
0x150a   :  { %11141 = vmatprep.subr.bf16.mxu1 %v12622_v54  ;;  %v4160_v52 = vld [vmem:[#allocation22 + $0xa38] sm:$0xff]  ;;  %v12659_v54 = vcombine.low %v4147_v9, %v4151_v13 }
0x150b   :  { %v12670_v29 = vcombine.high %v4156_v48, %v4160_v52  ;;  %v12669_v45 = vcombine.low %v4156_v48, %v4160_v52  ;;  %v4203_v52 = vld [vmem:[#allocation22 + $0xb90] sm:$0xff] }
0x150c   :  { %10798 = vmatpush1.bf16.msra.mxu0 %v12619_v56  ;;  %v4167_v56 = vld [vmem:[#allocation22 + $0xa70] sm:$0xff] }
0x150d   :  { %11142 = vmatpush1.bf16.msra.mxu1 %v12621_v31  ;;  %10799 = vmatprep.subr.bf16.mxu0 %v12628_v41  ;;  %v4164_v31 = vld [vmem:[#allocation22 + $0xa58] sm:$0xff]  ;;  %v12676_v16 = vcombine.high %v4163_v1, %v4167_v56 }
0x150e   :  { %11143 = vmatprep.subr.bf16.mxu1 %v12630_v30  ;;  %v4168_v41 = vld [vmem:[#allocation22 + $0xa78] sm:$0xff]  ;;  %v12667_v30 = vcombine.low %v4155_v20, %v4159_v36 }
0x150f   :  { %v12678_v24 = vcombine.high %v4164_v31, %v4168_v41  ;;  %v12677_v42 = vcombine.low %v4164_v31, %v4168_v41  ;;  %v4211_v41 = vld [vmem:[#allocation22 + $0xbd0] sm:$0xff] }
0x1510   :  { %10800 = vmatpush1.bf16.msra.mxu0 %v12627_v15  ;;  %v4175_v15 = vld [vmem:[#allocation22 + $0xab0] sm:$0xff] }
0x1511   :  { %11144 = vmatpush1.bf16.msra.mxu1 %v12629_v22  ;;  %10801 = vmatprep.subr.bf16.mxu0 %v12636_v37  ;;  %v4172_v22 = vld [vmem:[#allocation22 + $0xa98] sm:$0xff]  ;;  %v12684_v21 = vcombine.high %v4171_v61, %v4175_v15 }
0x1512   :  { %11145 = vmatprep.subr.bf16.mxu1 %v12638_v25  ;;  %v4176_v37 = vld [vmem:[#allocation22 + $0xab8] sm:$0xff]  ;;  %v12675_v25 = vcombine.low %v4163_v1, %v4167_v56 }
0x1513   :  { %v12686_v26 = vcombine.high %v4172_v22, %v4176_v37  ;;  %v12685_v53 = vcombine.low %v4172_v22, %v4176_v37  ;;  %v4219_v37 = vld [vmem:[#allocation22 + $0xc10] sm:$0xff] }
0x1514   :  { %10802 = vmatpush1.bf16.msra.mxu0 %v12635_v17  ;;  %v4183_v17 = vld [vmem:[#allocation22 + $0xaf0] sm:$0xff] }
0x1515   :  { %11146 = vmatpush1.bf16.msra.mxu1 %v12637_v19  ;;  %10803 = vmatprep.subr.bf16.mxu0 %v12644_v10  ;;  %v4180_v19 = vld [vmem:[#allocation22 + $0xad8] sm:$0xff]  ;;  %v12692_v44 = vcombine.high %v4179_v27, %v4183_v17 }
0x1516   :  { %11147 = vmatprep.subr.bf16.mxu1 %v12646_v50  ;;  %v4184_v10 = vld [vmem:[#allocation22 + $0xaf8] sm:$0xff]  ;;  %v12683_v50 = vcombine.low %v4171_v61, %v4175_v15 }
0x1517   :  { %v12694_v60 = vcombine.high %v4180_v19, %v4184_v10  ;;  %v12693_v9 = vcombine.low %v4180_v19, %v4184_v10  ;;  %v4227_v10 = vld [vmem:[#allocation22 + $0xc50] sm:$0xff] }
0x1518   :  { %10804 = vmatpush1.bf16.msra.mxu0 %v12643_v6  ;;  %v4191_v6 = vld [vmem:[#allocation22 + $0xb30] sm:$0xff] }
0x1519   :  { %11148 = vmatpush1.bf16.msra.mxu1 %v12645_v3  ;;  %10805 = vmatprep.subr.bf16.mxu0 %v12652_v39  ;;  %v4188_v3 = vld [vmem:[#allocation22 + $0xb18] sm:$0xff]  ;;  %v12700_v13 = vcombine.high %v4187_v38, %v4191_v6 }
0x151a   :  { %11149 = vmatprep.subr.bf16.mxu1 %v12654_v58  ;;  %v4192_v39 = vld [vmem:[#allocation22 + $0xb38] sm:$0xff]  ;;  %v12691_v58 = vcombine.low %v4179_v27, %v4183_v17 }
0x151b   :  { %v12702_v4 = vcombine.high %v4188_v3, %v4192_v39  ;;  %v12701_v20 = vcombine.low %v4188_v3, %v4192_v39  ;;  %v4235_v3 = vld [vmem:[#allocation22 + $0xc90] sm:$0xff] }
0x151c   :  { %10806 = vmatpush1.bf16.msra.mxu0 %v12651_v59  ;;  %v4199_v59 = vld [vmem:[#allocation22 + $0xb70] sm:$0xff] }
0x151d   :  { %11150 = vmatpush1.bf16.msra.mxu1 %v12653_v32  ;;  %10807 = vmatprep.subr.bf16.mxu0 %v12660_v0  ;;  %v4196_v32 = vld [vmem:[#allocation22 + $0xb58] sm:$0xff]  ;;  %v12708_v36 = vcombine.high %v4195_v8, %v4199_v59  ;;  %v4239_v39 = vld [vmem:[#allocation22 + $0xcb0] sm:$0xff] }
0x151e   :  { %11151 = vmatprep.subr.bf16.mxu1 %v12662_v33  ;;  %v4200_v0 = vld [vmem:[#allocation22 + $0xb78] sm:$0xff]  ;;  %v12699_v33 = vcombine.low %v4187_v38, %v4191_v6 }
0x151f   :  { %v12710_v48 = vcombine.high %v4196_v32, %v4200_v0  ;;  %v12709_v1 = vcombine.low %v4196_v32, %v4200_v0  ;;  %v4243_v0 = vld [vmem:[#allocation22 + $0xcd0] sm:$0xff] }
0x1520   :  { %10808 = vmatpush1.bf16.msra.mxu0 %v12659_v54  ;;  %v4207_v54 = vld [vmem:[#allocation22 + $0xbb0] sm:$0xff] }
0x1521   :  { %11152 = vmatpush1.bf16.msra.mxu1 %v12661_v55  ;;  %10809 = vmatprep.subr.bf16.mxu0 %v12668_v35  ;;  %v4204_v55 = vld [vmem:[#allocation22 + $0xb98] sm:$0xff]  ;;  %v12716_v56 = vcombine.high %v4203_v52, %v4207_v54 }
0x1522   :  { %11153 = vmatprep.subr.bf16.mxu1 %v12670_v29  ;;  %v4208_v35 = vld [vmem:[#allocation22 + $0xbb8] sm:$0xff]  ;;  %v12707_v29 = vcombine.low %v4195_v8, %v4199_v59  ;;  %v12748_v59 = vcombine.high %v4235_v3, %v4239_v39 }
0x1523   :  { %v12718_v31 = vcombine.high %v4204_v55, %v4208_v35  ;;  %v12717_v61 = vcombine.low %v4204_v55, %v4208_v35  ;;  %v4251_v55 = vld [vmem:[#allocation22 + $0xd10] sm:$0xff] }
0x1524   :  { %10810 = vmatpush1.bf16.msra.mxu0 %v12667_v30  ;;  %v4215_v30 = vld [vmem:[#allocation22 + $0xbf0] sm:$0xff] }
0x1525   :  { %11154 = vmatpush1.bf16.msra.mxu1 %v12669_v45  ;;  %10811 = vmatprep.subr.bf16.mxu0 %v12676_v16  ;;  %v4212_v45 = vld [vmem:[#allocation22 + $0xbd8] sm:$0xff]  ;;  %v12724_v15 = vcombine.high %v4211_v41, %v4215_v30  ;;  %v4255_v35 = vld [vmem:[#allocation22 + $0xd30] sm:$0xff] }
0x1526   :  { %11155 = vmatprep.subr.bf16.mxu1 %v12678_v24  ;;  %v4216_v16 = vld [vmem:[#allocation22 + $0xbf8] sm:$0xff]  ;;  %v12715_v24 = vcombine.low %v4203_v52, %v4207_v54 }
0x1527   :  { %v12726_v22 = vcombine.high %v4212_v45, %v4216_v16  ;;  %v12725_v27 = vcombine.low %v4212_v45, %v4216_v16  ;;  %v4263_v45 = vld [vmem:[#allocation22 + $0xd70] sm:$0xff]  ;;  %v4260_v16 = vld [vmem:[#allocation22 + $0xd58] sm:$0xff] }
0x1528   :  { %10812 = vmatpush1.bf16.msra.mxu0 %v12675_v25  ;;  %v4223_v25 = vld [vmem:[#allocation22 + $0xc30] sm:$0xff] }
0x1529   :  { %11156 = vmatpush1.bf16.msra.mxu1 %v12677_v42  ;;  %10813 = vmatprep.subr.bf16.mxu0 %v12684_v21  ;;  %v4220_v42 = vld [vmem:[#allocation22 + $0xc18] sm:$0xff]  ;;  %v12732_v17 = vcombine.high %v4219_v37, %v4223_v25 }
0x152a   :  { %11157 = vmatprep.subr.bf16.mxu1 %v12686_v26  ;;  %v4224_v21 = vld [vmem:[#allocation22 + $0xc38] sm:$0xff]  ;;  %v12723_v26 = vcombine.low %v4211_v41, %v4215_v30  ;;  %v4259_v30 = vld [vmem:[#allocation22 + $0xd50] sm:$0xff] }
0x152b   :  { %v12734_v19 = vcombine.high %v4220_v42, %v4224_v21  ;;  %v12733_v38 = vcombine.low %v4220_v42, %v4224_v21  ;;  %v4267_v42 = vld [vmem:[#allocation22 + $0xd90] sm:$0xff] }
0x152c   :  { %10814 = vmatpush1.bf16.msra.mxu0 %v12683_v50  ;;  %v4231_v50 = vld [vmem:[#allocation22 + $0xc70] sm:$0xff] }
0x152d   :  { %11158 = vmatpush1.bf16.msra.mxu1 %v12685_v53  ;;  %10815 = vmatprep.subr.bf16.mxu0 %v12692_v44  ;;  %v12731_v53 = vcombine.low %v4219_v37, %v4223_v25  ;;  %v4228_v44 = vld [vmem:[#allocation22 + $0xc58] sm:$0xff]  ;;  %v12740_v6 = vcombine.high %v4227_v10, %v4231_v50  ;;  %v12772_v37 = vcombine.high %v4259_v30, %v4263_v45  ;;  %v4271_v21 = vld [vmem:[#allocation22 + $0xdb0] sm:$0xff] }
0x152e   :  { %11159 = vmatprep.subr.bf16.mxu1 %v12694_v60  ;;  %v4232_v60 = vld [vmem:[#allocation22 + $0xc78] sm:$0xff] }
0x152f   :  { %v12741_v8 = vcombine.low %v4228_v44, %v4232_v60 }
0x1530   :  { %10816 = vmatpush1.bf16.msra.mxu0 %v12691_v58  ;;  %v12742_v58 = vcombine.high %v4228_v44, %v4232_v60  ;;  %v12780_v60 = vcombine.high %v4267_v42, %v4271_v21 }
0x1531   :  { %11160 = vmatpush1.bf16.msra.mxu1 %v12693_v9  ;;  %10817 = vmatprep.subr.bf16.mxu0 %v12700_v13  ;;  %v4236_v9 = vld [vmem:[#allocation22 + $0xc98] sm:$0xff] }
0x1532   :  { %11161 = vmatprep.subr.bf16.mxu1 %v12702_v4  ;;  %v4240_v13 = vld [vmem:[#allocation22 + $0xcb8] sm:$0xff]  ;;  %v12739_v4 = vcombine.low %v4227_v10, %v4231_v50  ;;  %v12771_v50 = vcombine.low %v4259_v30, %v4263_v45 }
0x1533   :  { %v12750_v32 = vcombine.high %v4236_v9, %v4240_v13  ;;  %v4284_v30 = vld [vmem:[#allocation22 + $0xe18] sm:$0xff] }
0x1534   :  { %10818 = vmatpush1.bf16.msra.mxu0 %v12699_v33  ;;  %v4247_v33 = vld [vmem:[#allocation22 + $0xcf0] sm:$0xff]  ;;  %v4288_v45 = vld [vmem:[#allocation22 + $0xe38] sm:$0xff] }
0x1535   :  { %11162 = vmatpush1.bf16.msra.mxu1 %v12701_v20  ;;  %10819 = vmatprep.subr.bf16.mxu0 %v12708_v36  ;;  %v4244_v20 = vld [vmem:[#allocation22 + $0xcd8] sm:$0xff]  ;;  %v12756_v52 = vcombine.high %v4243_v0, %v4247_v33 }
0x1536   :  { %11163 = vmatprep.subr.bf16.mxu1 %v12710_v48  ;;  %v4248_v36 = vld [vmem:[#allocation22 + $0xcf8] sm:$0xff]  ;;  %v12747_v48 = vcombine.low %v4235_v3, %v4239_v39  ;;  %v4275_v3 = vld [vmem:[#allocation22 + $0xdd0] sm:$0xff] }
0x1537   :  { %v12758_v54 = vcombine.high %v4244_v20, %v4248_v36  ;;  %v4279_v39 = vld [vmem:[#allocation22 + $0xdf0] sm:$0xff] }
0x1538   :  { %10820 = vmatpush1.bf16.msra.mxu0 %v12707_v29  ;;  %v4252_v29 = vld [vmem:[#allocation22 + $0xd18] sm:$0xff] }
0x1539   :  { %11164 = vmatpush1.bf16.msra.mxu1 %v12709_v1  ;;  %10821 = vmatprep.subr.bf16.mxu0 %v12716_v56  ;;  %v4256_v1 = vld [vmem:[#allocation22 + $0xd38] sm:$0xff]  ;;  %v12757_v56 = vcombine.low %v4244_v20, %v4248_v36 }
0x153a   :  { %11165 = vmatprep.subr.bf16.mxu1 %v12718_v31  ;;  %v12764_v31 = vcombine.high %v4251_v55, %v4255_v35  ;;  %v12766_v41 = vcombine.high %v4252_v29, %v4256_v1 }
0x153c   :  { %10822 = vmatpush1.bf16.msra.mxu0 %v12715_v24  ;;  %v4264_v24 = vld [vmem:[#allocation22 + $0xd78] sm:$0xff] }
0x153d   :  { %11166 = vmatpush1.bf16.msra.mxu1 %v12717_v61  ;;  %10823 = vmatprep.subr.bf16.mxu0 %v12724_v15  ;;  %v12763_v61 = vcombine.low %v4251_v55, %v4255_v35  ;;  %v4857_v15 = vld [vmem:[#allocation23] sm:$0xff]  ;;  %v12774_v25 = vcombine.high %v4260_v16, %v4264_v24  ;;  %v12773_v44 = vcombine.low %v4260_v16, %v4264_v24 }
0x153e   :  { %11167 = vmatprep.subr.bf16.mxu1 %v12726_v22  ;;  %v12765_v22 = vcombine.low %v4252_v29, %v4256_v1  ;;  %v4866_v10 = vrot.slane %v4857_v15, %v16109_v62  ;;  %v12787_v55 = vcombine.low %v4275_v3, %v4279_v39  ;;  %v4283_v29 = vld [vmem:[#allocation22 + $0xe10] sm:$0xff] }
0x153f   :  { %v4287_v1 = vld [vmem:[#allocation22 + $0xe30] sm:$0xff] }
0x1540   :  { %10824 = vmatpush1.bf16.msra.mxu0 %v12723_v26  ;;  %v4862_v26 = vrot.slane %v4857_v15, %v16101_v11 }
0x1541   :  { %11168 = vmatpush1.bf16.msra.mxu1 %v12725_v27  ;;  %10836 = vmatprep.subr.bf16.mxu0 %v12732_v17  ;;  %v4268_v27 = vld [vmem:[#allocation22 + $0xd98] sm:$0xff] }
0x1542   :  { %11180 = vmatprep.subr.bf16.mxu1 %v12734_v19  ;;  %v4272_v17 = vld [vmem:[#allocation22 + $0xdb8] sm:$0xff]  ;;  %v4870_v19 = vrot.slane %v4857_v15, %v16104_v57 }
0x1543   :  { %10826 = vmatmul.mubr.bf16.vlgmr.msra.gmra.mrb[52].mxu0 %v16162_v23 }
0x1544   :  { %11170 = vmatmul.mubr.bf16.vlgmr.msra.gmra.mrb[48].mxu1 %v16162_v23  ;;  %10837 = vmatpush1.bf16.msra.mxu0 %v12731_v53  ;;  %v12749_v23 = vcombine.low %v4236_v9, %v4240_v13  ;;  %v4874_v53 = vrot.slane %v4857_v15, %v16112_v2  ;;  %v4276_v13 = vld [vmem:[#allocation22 + $0xdd8] sm:$0xff]  ;;  %v12781_v2 = vcombine.low %v4268_v27, %v4272_v17 }
0x1545   :  { %10868 = vmatprep.mubr.bf16.mxu0 %v16168_v34  ;;  %11181 = vmatpush1.bf16.msra.mxu1 %v12733_v38 }
0x1546   :  { %11212 = vmatprep.mubr.bf16.mxu1 %v16168_v34  ;;  %10838 = vmatprep.subr.bf16.mxu0 %v12740_v6  ;;  %v12755_v34 = vcombine.low %v4243_v0, %v4247_v33  ;;  %v12782_v6 = vcombine.high %v4268_v27, %v4272_v17  ;;  %v12798_v27 = vcombine.high %v4284_v30, %v4288_v45  ;;  %v4291_v17 = vld [vmem:[#allocation22 + $0xe50] sm:$0xff] }
0x1547   :  { %11182 = vmatprep.subr.bf16.mxu1 %v12742_v58 }
0x1548   :  { %10839 = vmatpush1.bf16.msra.mxu0 %v12739_v4  ;;  %v4280_v4 = vld [vmem:[#allocation22 + $0xdf8] sm:$0xff] }
0x1549   :  { %11183 = vmatpush1.bf16.msra.mxu1 %v12741_v8  ;;  %10840 = vmatprep.subr.bf16.mxu0 %v12748_v59  ;;  %v12790_v35 = vcombine.high %v4276_v13, %v4280_v4 }
0x154a   :  { %11184 = vmatprep.subr.bf16.mxu1 %v12750_v32  ;;  %v12779_v32 = vcombine.low %v4267_v42, %v4271_v21  ;;  %v12796_v42 = vcombine.high %v4283_v29, %v4287_v1 }
0x154c   :  { %10841 = vmatpush1.bf16.msra.mxu0 %v12747_v48  ;;  %v12788_v48 = vcombine.high %v4275_v3, %v4279_v39  ;;  %v4299_v3 = vld [vmem:[#allocation22 + $0xe90] sm:$0xff] }
0x154d   :  { %11185 = vmatpush1.bf16.msra.mxu1 %v12749_v23  ;;  %10842 = vmatprep.subr.bf16.mxu0 %v12756_v52  ;;  %v4303_v39 = vld [vmem:[#allocation22 + $0xeb0] sm:$0xff] }
0x154e   :  { %11186 = vmatprep.subr.bf16.mxu1 %v12758_v54 }
0x1550   :  { %10843 = vmatpush1.bf16.msra.mxu0 %v12755_v34 }
0x1551   :  { %11187 = vmatpush1.bf16.msra.mxu1 %v12757_v56  ;;  %10844 = vmatprep.subr.bf16.mxu0 %v12764_v31 }
0x1552   :  { %11188 = vmatprep.subr.bf16.mxu1 %v12766_v41  ;;  %v12789_v41 = vcombine.low %v4276_v13, %v4280_v4  ;;  %v12812_v4 = vcombine.high %v4299_v3, %v4303_v39 }
0x1554   :  { %10845 = vmatpush1.bf16.msra.mxu0 %v12763_v61 }
0x1555   :  { %11189 = vmatpush1.bf16.msra.mxu1 %v12765_v22  ;;  %10846 = vmatprep.subr.bf16.mxu0 %v12772_v37 }
0x1556   :  { %v10354_v38 = vpop.f32.mrb[48].mxu0  ;;  %11190 = vmatprep.subr.bf16.mxu1 %v12774_v25 }
0x1557   :  { %v14140_v11 = vadd.f32 %v10354_v38, %v4862_v26  ;;  %v10698_v58 = vpop.f32.mrb[44].mxu1  ;;  %v10356_v9 = vpop.f32.mrb[49].mxu0 }
0x1558   :  { %v14144_v57 = vadd.f32 %v10698_v58, %v4870_v19  ;;  %v14141_v8 = vadd.f32 %v10356_v9, %v4866_v10  ;;  %v10700_v62 = vpop.f32.mrb[45].mxu1  ;;  %v10358_v59 = vpop.f32.mrb[50].mxu0  ;;  %10847 = vmatpush1.bf16.msra.mxu0 %v12771_v50  ;;  %v4292_v50 = vld [vmem:[#allocation22 + $0xe58] sm:$0xff] }
0x1559   :  { %v14145_v0 = vadd.f32 %v10700_v62, %v4874_v53  ;;  %v14142_v33 = vadd.f32 %v10358_v59, %v4862_v26  ;;  %v10702_v20 = vpop.f32.mrb[46].mxu1  ;;  %11191 = vmatpush1.bf16.msra.mxu1 %v12773_v44  ;;  %v10360_v36 = vpop.f32.mrb[51].mxu0  ;;  %10848 = vmatprep.subr.bf16.mxu0 %v12780_v60  ;;  %v11395_v34 = vmax.f32 %v14140_v11, 0.0  ;;  %v12795_v44 = vcombine.low %v4283_v29, %v4287_v1  ;;  %v4300_v11 = vld [vmem:[#allocation22 + $0xe98] sm:$0xff]  ;;  %v4311_v62 = vld [vmem:[#allocation22 + $0xef0] sm:$0xff] }
0x155a   :  { %v14146_v23 = vadd.f32 %v10702_v20, %v4870_v19  ;;  %v14143_v52 = vadd.f32 %v10360_v36, %v4866_v10  ;;  %v10704_v54 = vpop.f32.mrb[47].mxu1  ;;  %11192 = vmatprep.subr.bf16.mxu1 %v12782_v6  ;;  %v11397_v16 = vmax.f32 %v14144_v57, 0.0  ;;  %v11396_v24 = vmax.f32 %v14141_v8, 0.0  ;;  %v4295_v19 = vld [vmem:[#allocation22 + $0xe70] sm:$0xff]  ;;  %v4304_v58 = vld [vmem:[#allocation22 + $0xeb8] sm:$0xff] }
0x155b   :  { %v11403_v56 = vmax.f32 %v14142_v33, 0.0  ;;  %v14147_v31 = vadd.f32 %v10704_v54, %v4874_v53  ;;  %v11398_v22 = vmax.f32 %v14145_v0, 0.0  ;;  %v4296_v53 = vld [vmem:[#allocation22 + $0xe78] sm:$0xff]  ;;  %v12797_v60 = vcombine.low %v4284_v30, %v4288_v45  ;;  %v4307_v8 = vld [vmem:[#allocation22 + $0xed0] sm:$0xff] }
0x155c   :  { %v11405_v61 = vmax.f32 %v14146_v23, 0.0  ;;  %v11404_v15 = vmax.f32 %v14143_v52, 0.0  ;;  %10849 = vmatpush1.bf16.msra.mxu0 %v12779_v32  ;;  %v12804_v38 = vcombine.high %v4291_v17, %v4295_v19  ;;  %v12806_v6 = vcombine.high %v4292_v50, %v4296_v53  ;;  %v4308_v59 = vld [vmem:[#allocation22 + $0xed8] sm:$0xff]  ;;  %v4315_v36 = vld [vmem:[#allocation22 + $0xf10] sm:$0xff] }
0x155d   :  { %v16248_v37 = vpack.c.bf16 %v11403_v56, %v11395_v34  ;;  %v11406_v25 = vmax.f32 %v14147_v31, 0.0  ;;  %11193 = vmatpush1.bf16.msra.mxu1 %v12781_v2  ;;  %10850 = vmatprep.subr.bf16.mxu0 %v12788_v48  ;;  %v12803_v9 = vcombine.low %v4291_v17, %v4295_v19  ;;  %v12805_v13 = vcombine.low %v4292_v50, %v4296_v53  ;;  %v4312_v32 = vld [vmem:[#allocation22 + $0xef8] sm:$0xff]  ;;  %v4319_v48 = vld [vmem:[#allocation22 + $0xf30] sm:$0xff] }
0x155e   :  { %v16250_v21 = vpack.c.bf16 %v11405_v61, %v11397_v16  ;;  %v16252_v26 = vpack.c.bf16 %v11404_v15, %v11396_v24  ;;  %11194 = vmatprep.subr.bf16.mxu1 %v12790_v35  ;;  %v12814_v57 = vcombine.high %v4300_v11, %v4304_v58  ;;  %v12811_v2 = vcombine.low %v4299_v3, %v4303_v39  ;;  %v4316_v23 = vld [vmem:[#allocation22 + $0xf18] sm:$0xff]  ;;  %v4323_v1 = vld [vmem:[#allocation22 + $0xf50] sm:$0xff] }
0x155f   :  { %v16254_v10 = vpack.c.bf16 %v11406_v25, %v11398_v22  ;;  %v12813_v0 = vcombine.low %v4300_v11, %v4304_v58  ;;  %v12820_v33 = vcombine.high %v4307_v8, %v4311_v62  ;;  %v12822_v20 = vcombine.high %v4308_v59, %v4312_v32  ;;  %v4320_v52 = vld [vmem:[#allocation22 + $0xf38] sm:$0xff]  ;;  %v4327_v34 = vld [vmem:[#allocation22 + $0xf70] sm:$0xff] }
0x1560   :  { %10851 = vmatpush1.bf16.msra.mxu0 %v12787_v55  ;;  %v12819_v54 = vcombine.low %v4307_v8, %v4311_v62  ;;  %v12821_v55 = vcombine.low %v4308_v59, %v4312_v32  ;;  %v12828_v35 = vcombine.high %v4315_v36, %v4319_v48  ;;  %v12830_v29 = vcombine.high %v4316_v23, %v4320_v52  ;;  %v4324_v56 = vld [vmem:[#allocation22 + $0xf58] sm:$0xff]  ;;  %v4331_v24 = vld [vmem:[#allocation22 + $0xf90] sm:$0xff] }
0x1561   :  { %11195 = vmatpush1.bf16.msra.mxu1 %v12789_v41  ;;  %10852 = vmatprep.subr.bf16.mxu0 %v12796_v42  ;;  %v4328_v31 = vld [vmem:[#allocation22 + $0xf78] sm:$0xff]  ;;  %v12827_v41 = vcombine.low %v4315_v36, %v4319_v48  ;;  %v12829_v30 = vcombine.low %v4316_v23, %v4320_v52  ;;  %v12836_v45 = vcombine.high %v4323_v1, %v4327_v34  ;;  %v4335_v61 = vld [vmem:[#allocation22 + $0xfb0] sm:$0xff] }
0x1562   :  { %11196 = vmatprep.subr.bf16.mxu1 %v12798_v27  ;;  %v12838_v16 = vcombine.high %v4324_v56, %v4328_v31  ;;  %v4332_v15 = vld [vmem:[#allocation22 + $0xf98] sm:$0xff]  ;;  %v12835_v25 = vcombine.low %v4323_v1, %v4327_v34  ;;  %v12837_v42 = vcombine.low %v4324_v56, %v4328_v31  ;;  %v12844_v27 = vcombine.high %v4331_v24, %v4335_v61  ;;  %v4339_v19 = vld [vmem:[#allocation22 + $0xfd0] sm:$0xff] }
0x1563   :  { %v4336_v22 = vld [vmem:[#allocation22 + $0xfb8] sm:$0xff]  ;;  %v4343_v50 = vld [vmem:[#allocation22 + $0xff0] sm:$0xff] }
0x1564   :  { %10853 = vmatpush1.bf16.msra.mxu0 %v12795_v44  ;;  %v12846_v17 = vcombine.high %v4332_v15, %v4336_v22  ;;  %v4340_v53 = vld [vmem:[#allocation22 + $0xfd8] sm:$0xff]  ;;  %v4347_v39 = vld [vmem:[#allocation22 + $0x1010] sm:$0xff] }
0x1565   :  { %11197 = vmatpush1.bf16.msra.mxu1 %v12797_v60  ;;  %10854 = vmatprep.subr.bf16.mxu0 %v12804_v38  ;;  %v4344_v44 = vld [vmem:[#allocation22 + $0xff8] sm:$0xff]  ;;  %v12843_v60 = vcombine.low %v4331_v24, %v4335_v61  ;;  %v12845_v38 = vcombine.low %v4332_v15, %v4336_v22  ;;  %v4351_v11 = vld [vmem:[#allocation22 + $0x1030] sm:$0xff] }
0x1566   :  { %11198 = vmatprep.subr.bf16.mxu1 %v12806_v6  ;;  %v12852_v6 = vcombine.high %v4339_v19, %v4343_v50  ;;  %v12854_v3 = vcombine.high %v4340_v53, %v4344_v44  ;;  %v4348_v58 = vld [vmem:[#allocation22 + $0x1018] sm:$0xff]  ;;  %v4355_v62 = vld [vmem:[#allocation22 + $0x1050] sm:$0xff]  ;;  %v12859_v32 = vcombine.low %v4347_v39, %v4351_v11 }
0x1567   :  { %v4359_v59 = vld [vmem:[#allocation22 + $0x1070] sm:$0xff]  ;;  %v4364_v52 = vld [vmem:[#allocation22 + $0x1098] sm:$0xff] }
0x1568   :  { %10855 = vmatpush1.bf16.msra.mxu0 %v12803_v9  ;;  %v4352_v9 = vld [vmem:[#allocation22 + $0x1038] sm:$0xff]  ;;  %v4363_v36 = vld [vmem:[#allocation22 + $0x1090] sm:$0xff] }
0x1569   :  { %11199 = vmatpush1.bf16.msra.mxu1 %v12805_v13  ;;  %10856 = vmatprep.subr.bf16.mxu0 %v12812_v4  ;;  %v12851_v13 = vcombine.low %v4339_v19, %v4343_v50  ;;  %v12853_v4 = vcombine.low %v4340_v53, %v4344_v44  ;;  %v12862_v8 = vcombine.high %v4348_v58, %v4352_v9  ;;  %v4367_v48 = vld [vmem:[#allocation22 + $0x10b0] sm:$0xff]  ;;  %v4372_v31 = vld [vmem:[#allocation22 + $0x10d8] sm:$0xff] }
0x156a   :  { %11200 = vmatprep.subr.bf16.mxu1 %v12814_v57  ;;  %v12860_v57 = vcombine.high %v4347_v39, %v4351_v11  ;;  %v4371_v34 = vld [vmem:[#allocation22 + $0x10d0] sm:$0xff]  ;;  %v4380_v15 = vld [vmem:[#allocation22 + $0x1118] sm:$0xff] }
0x156b   :  { %v4375_v56 = vld [vmem:[#allocation22 + $0x10f0] sm:$0xff]  ;;  %v4384_v22 = vld [vmem:[#allocation22 + $0x1138] sm:$0xff] }
0x156c   :  { %10857 = vmatpush1.bf16.msra.mxu0 %v12811_v2  ;;  %v4356_v2 = vld [vmem:[#allocation22 + $0x1058] sm:$0xff]  ;;  %v4379_v24 = vld [vmem:[#allocation22 + $0x1110] sm:$0xff] }
0x156d   :  { %11201 = vmatpush1.bf16.msra.mxu1 %v12813_v0  ;;  %10858 = vmatprep.subr.bf16.mxu0 %v12820_v33  ;;  %v4360_v0 = vld [vmem:[#allocation22 + $0x1078] sm:$0xff]  ;;  %v12861_v33 = vcombine.low %v4348_v58, %v4352_v9  ;;  %v4383_v61 = vld [vmem:[#allocation22 + $0x1130] sm:$0xff] }
0x156e   :  { %11202 = vmatprep.subr.bf16.mxu1 %v12822_v20  ;;  %v12868_v20 = vcombine.high %v4355_v62, %v4359_v59  ;;  %v12870_v23 = vcombine.high %v4356_v2, %v4360_v0  ;;  %v4391_v19 = vld [vmem:[#allocation22 + $0x1170] sm:$0xff]  ;;  %v4388_v50 = vld [vmem:[#allocation22 + $0x1158] sm:$0xff]  ;;  %v12891_v44 = vcombine.low %v4379_v24, %v4383_v61 }
0x156f   :  { %v4392_v53 = vld [vmem:[#allocation22 + $0x1178] sm:$0xff]  ;;  %v4399_v39 = vld [vmem:[#allocation22 + $0x11b0] sm:$0xff] }
0x1570   :  { %10859 = vmatpush1.bf16.msra.mxu0 %v12819_v54  ;;  %v4368_v54 = vld [vmem:[#allocation22 + $0x10b8] sm:$0xff] }
0x1571   :  { %11203 = vmatpush1.bf16.msra.mxu1 %v12821_v55  ;;  %10860 = vmatprep.subr.bf16.mxu0 %v12828_v35  ;;  %v12867_v55 = vcombine.low %v4355_v62, %v4359_v59  ;;  %v12869_v35 = vcombine.low %v4356_v2, %v4360_v0  ;;  %v12878_v1 = vcombine.high %v4364_v52, %v4368_v54  ;;  %v4396_v11 = vld [vmem:[#allocation22 + $0x1198] sm:$0xff]  ;;  %v4407_v62 = vld [vmem:[#allocation22 + $0x11f0] sm:$0xff] }
0x1572   :  { %11204 = vmatprep.subr.bf16.mxu1 %v12830_v29  ;;  %v12876_v29 = vcombine.high %v4363_v36, %v4367_v48  ;;  %v4400_v58 = vld [vmem:[#allocation22 + $0x11b8] sm:$0xff] }
0x1573   :  { %v4404_v59 = vld [vmem:[#allocation22 + $0x11d8] sm:$0xff]  ;;  %v12909_v0 = vcombine.low %v4396_v11, %v4400_v58 }
0x1574   :  { %10861 = vmatpush1.bf16.msra.mxu0 %v12827_v41  ;;  %v4376_v41 = vld [vmem:[#allocation22 + $0x10f8] sm:$0xff] }
0x1575   :  { %11205 = vmatpush1.bf16.msra.mxu1 %v12829_v30  ;;  %10862 = vmatprep.subr.bf16.mxu0 %v12836_v45  ;;  %v12875_v30 = vcombine.low %v4363_v36, %v4367_v48  ;;  %v12884_v45 = vcombine.high %v4371_v34, %v4375_v56  ;;  %v4411_v36 = vld [vmem:[#allocation22 + $0x1210] sm:$0xff] }
0x1576   :  { %11206 = vmatprep.subr.bf16.mxu1 %v12838_v16  ;;  %v12886_v16 = vcombine.high %v4372_v31, %v4376_v41  ;;  %v4415_v48 = vld [vmem:[#allocation22 + $0x1230] sm:$0xff] }
0x1578   :  { %10863 = vmatpush1.bf16.msra.mxu0 %v12835_v25  ;;  %v12885_v25 = vcombine.low %v4372_v31, %v4376_v41  ;;  %v4424_v31 = vld [vmem:[#allocation22 + $0x1278] sm:$0xff]  ;;  %v12923_v41 = vcombine.low %v4411_v36, %v4415_v48 }
0x1579   :  { %11207 = vmatpush1.bf16.msra.mxu1 %v12837_v42  ;;  %10864 = vmatprep.subr.bf16.mxu0 %v12844_v27  ;;  %v12892_v42 = vcombine.high %v4379_v24, %v4383_v61  ;;  %v12894_v27 = vcombine.high %v4380_v15, %v4384_v22  ;;  %v4431_v24 = vld [vmem:[#allocation22 + $0x12b0] sm:$0xff]  ;;  %v4428_v61 = vld [vmem:[#allocation22 + $0x1298] sm:$0xff] }
0x157a   :  { %11208 = vmatprep.subr.bf16.mxu1 %v12846_v17  ;;  %v4387_v17 = vld [vmem:[#allocation22 + $0x1150] sm:$0xff] }
0x157b   :  { %v12899_v9 = vcombine.low %v4387_v17, %v4391_v19 }
0x157c   :  { %10865 = vmatpush1.bf16.msra.mxu0 %v12843_v60  ;;  %v12893_v60 = vcombine.low %v4380_v15, %v4384_v22  ;;  %v4432_v15 = vld [vmem:[#allocation22 + $0x12b8] sm:$0xff] }
0x157d   :  { %11209 = vmatpush1.bf16.msra.mxu1 %v12845_v38  ;;  %10866 = vmatprep.subr.bf16.mxu0 %v12852_v6  ;;  %v12900_v38 = vcombine.high %v4387_v17, %v4391_v19  ;;  %v12902_v6 = vcombine.high %v4388_v50, %v4392_v53  ;;  %v4439_v17 = vld [vmem:[#allocation22 + $0x12f0] sm:$0xff]  ;;  %v4436_v19 = vld [vmem:[#allocation22 + $0x12d8] sm:$0xff] }
0x157e   :  { %11210 = vmatprep.subr.bf16.mxu1 %v12854_v3  ;;  %v4395_v3 = vld [vmem:[#allocation22 + $0x1190] sm:$0xff] }
0x157f   :  { %v12907_v2 = vcombine.low %v4395_v3, %v4399_v39 }
0x1580   :  { %10867 = vmatpush1.bf16.msra.mxu0 %v12851_v13  ;;  %v12901_v13 = vcombine.low %v4388_v50, %v4392_v53  ;;  %v4440_v50 = vld [vmem:[#allocation22 + $0x12f8] sm:$0xff] }
0x1581   :  { %11211 = vmatpush1.bf16.msra.mxu1 %v12853_v4  ;;  %10879 = vmatprep.subr.bf16.mxu0 %v12860_v57  ;;  %v12908_v4 = vcombine.high %v4395_v3, %v4399_v39  ;;  %v12910_v57 = vcombine.high %v4396_v11, %v4400_v58  ;;  %v4447_v3 = vld [vmem:[#allocation22 + $0x1330] sm:$0xff]  ;;  %v4444_v39 = vld [vmem:[#allocation22 + $0x1318] sm:$0xff] }
0x1582   :  { %11223 = vmatprep.subr.bf16.mxu1 %v12862_v8  ;;  %v4403_v8 = vld [vmem:[#allocation22 + $0x11d0] sm:$0xff]  ;;  %v4448_v11 = vld [vmem:[#allocation22 + $0x1338] sm:$0xff] }
0x1583   :  { %10869 = vmatmul.mubr.bf16.vlgmr.msra.gmra.mrb[52].mxu0 %v16164_v12 }
0x1584   :  { %11213 = vmatmul.mubr.bf16.vlgmr.msra.gmra.mrb[48].mxu1 %v16164_v12  ;;  %10880 = vmatpush1.bf16.msra.mxu0 %v12859_v32  ;;  %v12877_v12 = vcombine.low %v4364_v52, %v4368_v54  ;;  %v4408_v32 = vld [vmem:[#allocation22 + $0x11f8] sm:$0xff]  ;;  %v12915_v54 = vcombine.low %v4403_v8, %v4407_v62 }
0x1585   :  { %10911 = vmatprep.mubr.bf16.mxu0 %v16184_v49  ;;  %11224 = vmatpush1.bf16.msra.mxu1 %v12861_v33  ;;  %v12916_v33 = vcombine.high %v4403_v8, %v4407_v62  ;;  %v4416_v52 = vld [vmem:[#allocation22 + $0x1238] sm:$0xff]  ;;  %v4455_v8 = vld [vmem:[#allocation22 + $0x1370] sm:$0xff] }
0x1586   :  { %11255 = vmatprep.mubr.bf16.mxu1 %v16184_v49  ;;  %10881 = vmatprep.subr.bf16.mxu0 %v12868_v20  ;;  %v12883_v49 = vcombine.low %v4371_v34, %v4375_v56  ;;  %v12918_v20 = vcombine.high %v4404_v59, %v4408_v32  ;;  %v4423_v34 = vld [vmem:[#allocation22 + $0x1270] sm:$0xff]  ;;  %v4420_v56 = vld [vmem:[#allocation22 + $0x1258] sm:$0xff] }
0x1587   :  { %11225 = vmatprep.subr.bf16.mxu1 %v12870_v23  ;;  %v4412_v23 = vld [vmem:[#allocation22 + $0x1218] sm:$0xff] }
0x1588   :  { %10882 = vmatpush1.bf16.msra.mxu0 %v12867_v55  ;;  %v12917_v55 = vcombine.low %v4404_v59, %v4408_v32  ;;  %v4452_v62 = vld [vmem:[#allocation22 + $0x1358] sm:$0xff] }
0x1589   :  { %11226 = vmatpush1.bf16.msra.mxu1 %v12869_v35  ;;  %10883 = vmatprep.subr.bf16.mxu0 %v12876_v29  ;;  %v12924_v35 = vcombine.high %v4411_v36, %v4415_v48  ;;  %v12926_v29 = vcombine.high %v4412_v23, %v4416_v52  ;;  %v4456_v59 = vld [vmem:[#allocation22 + $0x1378] sm:$0xff]  ;;  %v4463_v36 = vld [vmem:[#allocation22 + $0x13b0] sm:$0xff] }
0x158a   :  { %11227 = vmatprep.subr.bf16.mxu1 %v12878_v1  ;;  %v4419_v1 = vld [vmem:[#allocation22 + $0x1250] sm:$0xff]  ;;  %v4460_v48 = vld [vmem:[#allocation22 + $0x1398] sm:$0xff] }
0x158b   :  { %v12931_v22 = vcombine.low %v4419_v1, %v4423_v34 }
0x158c   :  { %10884 = vmatpush1.bf16.msra.mxu0 %v12875_v30  ;;  %v12925_v30 = vcombine.low %v4412_v23, %v4416_v52  ;;  %v4464_v23 = vld [vmem:[#allocation22 + $0x13b8] sm:$0xff] }
0x158d   :  { %11228 = vmatpush1.bf16.msra.mxu1 %v12877_v12  ;;  %10885 = vmatprep.subr.bf16.mxu0 %v12884_v45  ;;  %v12932_v12 = vcombine.high %v4419_v1, %v4423_v34  ;;  %v12934_v45 = vcombine.high %v4420_v56, %v4424_v31  ;;  %v4471_v1 = vld [vmem:[#allocation22 + $0x13f0] sm:$0xff]  ;;  %v4468_v34 = vld [vmem:[#allocation22 + $0x13d8] sm:$0xff] }
0x158e   :  { %11229 = vmatprep.subr.bf16.mxu1 %v12886_v16  ;;  %v4427_v16 = vld [vmem:[#allocation22 + $0x1290] sm:$0xff] }
0x158f   :  { %v12939_v53 = vcombine.low %v4427_v16, %v4431_v24 }
0x1590   :  { %10886 = vmatpush1.bf16.msra.mxu0 %v12883_v49  ;;  %v12933_v49 = vcombine.low %v4420_v56, %v4424_v31  ;;  %v4472_v56 = vld [vmem:[#allocation22 + $0x13f8] sm:$0xff] }
0x1591   :  { %11230 = vmatpush1.bf16.msra.mxu1 %v12885_v25  ;;  %10887 = vmatprep.subr.bf16.mxu0 %v12892_v42  ;;  %v12940_v25 = vcombine.high %v4427_v16, %v4431_v24  ;;  %v12942_v42 = vcombine.high %v4428_v61, %v4432_v15  ;;  %v4479_v16 = vld [vmem:[#allocation22 + $0x1430] sm:$0xff]  ;;  %v4476_v24 = vld [vmem:[#allocation22 + $0x1418] sm:$0xff] }
0x1592   :  { %11231 = vmatprep.subr.bf16.mxu1 %v12894_v27  ;;  %v4435_v27 = vld [vmem:[#allocation22 + $0x12d0] sm:$0xff] }
0x1593   :  { %v12947_v58 = vcombine.low %v4435_v27, %v4439_v17 }
0x1594   :  { %10888 = vmatpush1.bf16.msra.mxu0 %v12891_v44  ;;  %v12941_v44 = vcombine.low %v4428_v61, %v4432_v15  ;;  %v4480_v61 = vld [vmem:[#allocation22 + $0x1438] sm:$0xff] }
0x1595   :  { %11232 = vmatpush1.bf16.msra.mxu1 %v12893_v60  ;;  %10889 = vmatprep.subr.bf16.mxu0 %v12900_v38  ;;  %v12948_v60 = vcombine.high %v4435_v27, %v4439_v17  ;;  %v12950_v38 = vcombine.high %v4436_v19, %v4440_v50  ;;  %v4487_v27 = vld [vmem:[#allocation22 + $0x1470] sm:$0xff] }
0x1596   :  { %11233 = vmatprep.subr.bf16.mxu1 %v12902_v6  ;;  %v4443_v6 = vld [vmem:[#allocation22 + $0x1310] sm:$0xff] }
0x1597   :  { %v12955_v32 = vcombine.low %v4443_v6, %v4447_v3 }
0x1598   :  { %10890 = vmatpush1.bf16.msra.mxu0 %v12899_v9  ;;  %v12949_v9 = vcombine.low %v4436_v19, %v4440_v50  ;;  %v4484_v19 = vld [vmem:[#allocation22 + $0x1458] sm:$0xff] }
0x1599   :  { %11234 = vmatpush1.bf16.msra.mxu1 %v12901_v13  ;;  %10891 = vmatprep.subr.bf16.mxu0 %v12908_v4  ;;  %v12956_v13 = vcombine.high %v4443_v6, %v4447_v3  ;;  %v12958_v4 = vcombine.high %v4444_v39, %v4448_v11  ;;  %v4488_v50 = vld [vmem:[#allocation22 + $0x1478] sm:$0xff] }
0x159a   :  { %11235 = vmatprep.subr.bf16.mxu1 %v12910_v57  ;;  %v4451_v57 = vld [vmem:[#allocation22 + $0x1350] sm:$0xff]  ;;  %v12998_v6 = vcombine.high %v4484_v19, %v4488_v50  ;;  %v4492_v3 = vld [vmem:[#allocation22 + $0x1498] sm:$0xff] }
0x159b   :  { %v12963_v52 = vcombine.low %v4451_v57, %v4455_v8 }
0x159c   :  { %10892 = vmatpush1.bf16.msra.mxu0 %v12907_v2  ;;  %v12957_v2 = vcombine.low %v4444_v39, %v4448_v11  ;;  %v4496_v39 = vld [vmem:[#allocation22 + $0x14b8] sm:$0xff] }
0x159d   :  { %11236 = vmatpush1.bf16.msra.mxu1 %v12909_v0  ;;  %10893 = vmatprep.subr.bf16.mxu0 %v12916_v33  ;;  %v12964_v0 = vcombine.high %v4451_v57, %v4455_v8  ;;  %v12966_v33 = vcombine.high %v4452_v62, %v4456_v59  ;;  %v4503_v57 = vld [vmem:[#allocation22 + $0x14f0] sm:$0xff]  ;;  %v4500_v8 = vld [vmem:[#allocation22 + $0x14d8] sm:$0xff] }
0x159e   :  { %11237 = vmatprep.subr.bf16.mxu1 %v12918_v20  ;;  %v4459_v20 = vld [vmem:[#allocation22 + $0x1390] sm:$0xff] }
0x159f   :  { %v12971_v31 = vcombine.low %v4459_v20, %v4463_v36 }
0x15a0   :  { %10894 = vmatpush1.bf16.msra.mxu0 %v12915_v54  ;;  %v12965_v54 = vcombine.low %v4452_v62, %v4456_v59  ;;  %v4504_v62 = vld [vmem:[#allocation22 + $0x14f8] sm:$0xff] }
0x15a1   :  { %11238 = vmatpush1.bf16.msra.mxu1 %v12917_v55  ;;  %10895 = vmatprep.subr.bf16.mxu0 %v12924_v35  ;;  %v12972_v55 = vcombine.high %v4459_v20, %v4463_v36  ;;  %v12974_v35 = vcombine.high %v4460_v48, %v4464_v23  ;;  %v4508_v20 = vld [vmem:[#allocation22 + $0x1518] sm:$0xff] }
0x15a2   :  { %11239 = vmatprep.subr.bf16.mxu1 %v12926_v29  ;;  %v4467_v29 = vld [vmem:[#allocation22 + $0x13d0] sm:$0xff]  ;;  %v4512_v36 = vld [vmem:[#allocation22 + $0x1538] sm:$0xff] }
0x15a3   :  { %v12979_v15 = vcombine.low %v4467_v29, %v4471_v1 }
0x15a4   :  { %10896 = vmatpush1.bf16.msra.mxu0 %v12923_v41  ;;  %v12973_v41 = vcombine.low %v4460_v48, %v4464_v23  ;;  %v13013_v48 = vcombine.low %v4500_v8, %v4504_v62 }
0x15a5   :  { %11240 = vmatpush1.bf16.msra.mxu1 %v12925_v30  ;;  %10897 = vmatprep.subr.bf16.mxu0 %v12932_v12  ;;  %v12980_v30 = vcombine.high %v4467_v29, %v4471_v1  ;;  %v12982_v12 = vcombine.high %v4468_v34, %v4472_v56  ;;  %v4520_v29 = vld [vmem:[#allocation22 + $0x1578] sm:$0xff] }
0x15a6   :  { %11241 = vmatprep.subr.bf16.mxu1 %v12934_v45  ;;  %v4475_v45 = vld [vmem:[#allocation22 + $0x1410] sm:$0xff] }
0x15a7   :  { %v12987_v17 = vcombine.low %v4475_v45, %v4479_v16 }
0x15a8   :  { %10898 = vmatpush1.bf16.msra.mxu0 %v12931_v22  ;;  %v12981_v22 = vcombine.low %v4468_v34, %v4472_v56  ;;  %v13021_v34 = vcombine.low %v4508_v20, %v4512_v36 }
0x15a9   :  { %11242 = vmatpush1.bf16.msra.mxu1 %v12933_v49  ;;  %10899 = vmatprep.subr.bf16.mxu0 %v12940_v25  ;;  %v12988_v49 = vcombine.high %v4475_v45, %v4479_v16  ;;  %v12990_v25 = vcombine.high %v4476_v24, %v4480_v61  ;;  %v4528_v45 = vld [vmem:[#allocation22 + $0x15b8] sm:$0xff] }
0x15aa   :  { %11243 = vmatprep.subr.bf16.mxu1 %v12942_v42  ;;  %v4483_v42 = vld [vmem:[#allocation22 + $0x1450] sm:$0xff] }
0x15ab   :  { %v12995_v11 = vcombine.low %v4483_v42, %v4487_v27 }
0x15ac   :  { %10900 = vmatpush1.bf16.msra.mxu0 %v12939_v53  ;;  %v12989_v53 = vcombine.low %v4476_v24, %v4480_v61 }
0x15ad   :  { %11244 = vmatpush1.bf16.msra.mxu1 %v12941_v44  ;;  %10901 = vmatprep.subr.bf16.mxu0 %v12948_v60  ;;  %v12996_v44 = vcombine.high %v4483_v42, %v4487_v27  ;;  %v4491_v60 = vld [vmem:[#allocation22 + $0x1490] sm:$0xff]  ;;  %v4536_v42 = vld [vmem:[#allocation22 + $0x15f8] sm:$0xff] }
0x15ae   :  { %11245 = vmatprep.subr.bf16.mxu1 %v12950_v38  ;;  %v4495_v38 = vld [vmem:[#allocation22 + $0x14b0] sm:$0xff] }
0x15af   :  { %v13003_v59 = vcombine.low %v4491_v60, %v4495_v38 }
0x15b0   :  { %10902 = vmatpush1.bf16.msra.mxu0 %v12947_v58  ;;  %v12997_v58 = vcombine.low %v4484_v19, %v4488_v50 }
0x15b1   :  { %11246 = vmatpush1.bf16.msra.mxu1 %v12949_v9  ;;  %10903 = vmatprep.subr.bf16.mxu0 %v12956_v13  ;;  %v13004_v9 = vcombine.high %v4491_v60, %v4495_v38  ;;  %v13006_v13 = vcombine.high %v4492_v3, %v4496_v39  ;;  %v4540_v60 = vld [vmem:[#allocation22 + $0x1618] sm:$0xff] }
0x15b2   :  { %11247 = vmatprep.subr.bf16.mxu1 %v12958_v4  ;;  %v4499_v4 = vld [vmem:[#allocation22 + $0x14d0] sm:$0xff]  ;;  %v4544_v38 = vld [vmem:[#allocation22 + $0x1638] sm:$0xff] }
0x15b4   :  { %10904 = vmatpush1.bf16.msra.mxu0 %v12955_v32  ;;  %v13012_v32 = vcombine.high %v4499_v4, %v4503_v57 }
0x15b5   :  { %11248 = vmatpush1.bf16.msra.mxu1 %v12957_v2  ;;  %10905 = vmatprep.subr.bf16.mxu0 %v12964_v0  ;;  %v13014_v2 = vcombine.high %v4500_v8, %v4504_v62  ;;  %v4507_v0 = vld [vmem:[#allocation22 + $0x1510] sm:$0xff]  ;;  %v13053_v8 = vcombine.low %v4540_v60, %v4544_v38 }
0x15b6   :  { %11249 = vmatprep.subr.bf16.mxu1 %v12966_v33  ;;  %v4511_v33 = vld [vmem:[#allocation22 + $0x1530] sm:$0xff] }
0x15b7   :  { %v13020_v23 = vcombine.high %v4507_v0, %v4511_v33  ;;  %v13019_v1 = vcombine.low %v4507_v0, %v4511_v33  ;;  %v4560_v0 = vld [vmem:[#allocation22 + $0x16b8] sm:$0xff] }
0x15b8   :  { %10906 = vmatpush1.bf16.msra.mxu0 %v12963_v52  ;;  %v13022_v52 = vcombine.high %v4508_v20, %v4512_v36 }
0x15b9   :  { %11250 = vmatpush1.bf16.msra.mxu1 %v12965_v54  ;;  %10907 = vmatprep.subr.bf16.mxu0 %v12972_v55  ;;  %v4515_v54 = vld [vmem:[#allocation22 + $0x1550] sm:$0xff] }
0x15ba   :  { %11251 = vmatprep.subr.bf16.mxu1 %v12974_v35  ;;  %v4519_v55 = vld [vmem:[#allocation22 + $0x1570] sm:$0xff]  ;;  %v4516_v35 = vld [vmem:[#allocation22 + $0x1558] sm:$0xff] }
0x15bb   :  { %v13028_v56 = vcombine.high %v4515_v54, %v4519_v55  ;;  %v13027_v16 = vcombine.low %v4515_v54, %v4519_v55  ;;  %v13029_v24 = vcombine.low %v4516_v35, %v4520_v29  ;;  %v4568_v54 = vld [vmem:[#allocation22 + $0x16f8] sm:$0xff] }
0x15bc   :  { %10908 = vmatpush1.bf16.msra.mxu0 %v12971_v31  ;;  %v13030_v31 = vcombine.high %v4516_v35, %v4520_v29 }
0x15bd   :  { %11252 = vmatpush1.bf16.msra.mxu1 %v12973_v41  ;;  %10909 = vmatprep.subr.bf16.mxu0 %v12980_v30  ;;  %v4523_v41 = vld [vmem:[#allocation22 + $0x1590] sm:$0xff] }
0x15be   :  { %11253 = vmatprep.subr.bf16.mxu1 %v12982_v12  ;;  %v4527_v30 = vld [vmem:[#allocation22 + $0x15b0] sm:$0xff]  ;;  %v4524_v12 = vld [vmem:[#allocation22 + $0x1598] sm:$0xff] }
0x15bf   :  { %v13036_v61 = vcombine.high %v4523_v41, %v4527_v30  ;;  %v13035_v27 = vcombine.low %v4523_v41, %v4527_v30  ;;  %v4576_v41 = vld [vmem:[#allocation22 + $0x1738] sm:$0xff] }
0x15c0   :  { %10910 = vmatpush1.bf16.msra.mxu0 %v12979_v15  ;;  %v13038_v15 = vcombine.high %v4524_v12, %v4528_v45 }
0x15c1   :  { %11254 = vmatpush1.bf16.msra.mxu1 %v12981_v22  ;;  %10922 = vmatprep.subr.bf16.mxu0 %v12988_v49  ;;  %v4531_v22 = vld [vmem:[#allocation22 + $0x15d0] sm:$0xff] }
0x15c2   :  { %11266 = vmatprep.subr.bf16.mxu1 %v12990_v25  ;;  %v4535_v49 = vld [vmem:[#allocation22 + $0x15f0] sm:$0xff]  ;;  %v4532_v25 = vld [vmem:[#allocation22 + $0x15d8] sm:$0xff] }
0x15c3   :  { %10912 = vmatmul.mubr.bf16.vlgmr.msra.gmra.mrb[52].mxu0 %v16180_v46  ;;  %v13044_v19 = vcombine.high %v4531_v22, %v4535_v49  ;;  %v13046_v50 = vcombine.high %v4532_v25, %v4536_v42 }
0x15c4   :  { %11256 = vmatmul.mubr.bf16.vlgmr.msra.gmra.mrb[48].mxu1 %v16180_v46  ;;  %10923 = vmatpush1.bf16.msra.mxu0 %v12987_v17  ;;  %v13005_v46 = vcombine.low %v4492_v3, %v4496_v39  ;;  %v13037_v17 = vcombine.low %v4524_v12, %v4528_v45  ;;  %v13045_v3 = vcombine.low %v4532_v25, %v4536_v42 }
0x15c5   :  { %10954 = vmatprep.mubr.bf16.mxu0 %v16186_v51  ;;  %11267 = vmatpush1.bf16.msra.mxu1 %v12989_v53  ;;  %v4539_v53 = vld [vmem:[#allocation22 + $0x1610] sm:$0xff] }
0x15c6   :  { %11298 = vmatprep.mubr.bf16.mxu1 %v16186_v51  ;;  %10924 = vmatprep.subr.bf16.mxu0 %v12996_v44  ;;  %v13011_v51 = vcombine.low %v4499_v4, %v4503_v57  ;;  %v4543_v44 = vld [vmem:[#allocation22 + $0x1630] sm:$0xff]  ;;  %v4552_v4 = vld [vmem:[#allocation22 + $0x1678] sm:$0xff] }
0x15c7   :  { %11268 = vmatprep.subr.bf16.mxu1 %v12998_v6  ;;  %v13043_v6 = vcombine.low %v4531_v22, %v4535_v49  ;;  %v13052_v39 = vcombine.high %v4539_v53, %v4543_v44  ;;  %v13051_v57 = vcombine.low %v4539_v53, %v4543_v44  ;;  %v4584_v22 = vld [vmem:[#allocation22 + $0x1778] sm:$0xff] }
0x15c8   :  { %10925 = vmatpush1.bf16.msra.mxu0 %v12995_v11  ;;  %v13054_v11 = vcombine.high %v4540_v60, %v4544_v38  ;;  %v4592_v53 = vld [vmem:[#allocation22 + $0x17b8] sm:$0xff] }
0x15c9   :  { %11269 = vmatpush1.bf16.msra.mxu1 %v12997_v58  ;;  %10926 = vmatprep.subr.bf16.mxu0 %v13004_v9  ;;  %v4547_v58 = vld [vmem:[#allocation22 + $0x1650] sm:$0xff] }
0x15ca   :  { %11270 = vmatprep.subr.bf16.mxu1 %v13006_v13  ;;  %v4551_v9 = vld [vmem:[#allocation22 + $0x1670] sm:$0xff]  ;;  %v4548_v13 = vld [vmem:[#allocation22 + $0x1658] sm:$0xff] }
0x15cb   :  { %v13060_v62 = vcombine.high %v4547_v58, %v4551_v9  ;;  %v13059_v33 = vcombine.low %v4547_v58, %v4551_v9  ;;  %v13061_v20 = vcombine.low %v4548_v13, %v4552_v4  ;;  %v4600_v58 = vld [vmem:[#allocation22 + $0x17f8] sm:$0xff] }
0x15cc   :  { %10927 = vmatpush1.bf16.msra.mxu0 %v13003_v59  ;;  %v13062_v59 = vcombine.high %v4548_v13, %v4552_v4 }
0x15cd   :  { %11271 = vmatpush1.bf16.msra.mxu1 %v13005_v46  ;;  %10928 = vmatprep.subr.bf16.mxu0 %v13012_v32  ;;  %v4555_v46 = vld [vmem:[#allocation22 + $0x1690] sm:$0xff] }
0x15ce   :  { %11272 = vmatprep.subr.bf16.mxu1 %v13014_v2  ;;  %v4559_v32 = vld [vmem:[#allocation22 + $0x16b0] sm:$0xff]  ;;  %v4556_v2 = vld [vmem:[#allocation22 + $0x1698] sm:$0xff] }
0x15cf   :  { %v13068_v36 = vcombine.high %v4555_v46, %v4559_v32  ;;  %v13067_v55 = vcombine.low %v4555_v46, %v4559_v32  ;;  %v13069_v35 = vcombine.low %v4556_v2, %v4560_v0  ;;  %v4608_v46 = vld [vmem:[#allocation22 + $0x1838] sm:$0xff] }
0x15d0   :  { %10929 = vmatpush1.bf16.msra.mxu0 %v13011_v51  ;;  %v13070_v51 = vcombine.high %v4556_v2, %v4560_v0 }
0x15d1   :  { %11273 = vmatpush1.bf16.msra.mxu1 %v13013_v48  ;;  %10930 = vmatprep.subr.bf16.mxu0 %v13020_v23  ;;  %v4563_v48 = vld [vmem:[#allocation22 + $0x16d0] sm:$0xff] }
0x15d2   :  { %11274 = vmatprep.subr.bf16.mxu1 %v13022_v52  ;;  %v4567_v23 = vld [vmem:[#allocation22 + $0x16f0] sm:$0xff]  ;;  %v4564_v52 = vld [vmem:[#allocation22 + $0x16d8] sm:$0xff] }
0x15d3   :  { %v13076_v29 = vcombine.high %v4563_v48, %v4567_v23  ;;  %v13075_v30 = vcombine.low %v4563_v48, %v4567_v23  ;;  %v13077_v12 = vcombine.low %v4564_v52, %v4568_v54  ;;  %v4612_v48 = vld [vmem:[#allocation22 + $0x1858] sm:$0xff] }
0x15d4   :  { %10931 = vmatpush1.bf16.msra.mxu0 %v13019_v1  ;;  %v13078_v1 = vcombine.high %v4564_v52, %v4568_v54  ;;  %v4616_v23 = vld [vmem:[#allocation22 + $0x1878] sm:$0xff] }
0x15d5   :  { %11275 = vmatpush1.bf16.msra.mxu1 %v13021_v34  ;;  %10932 = vmatprep.subr.bf16.mxu0 %v13028_v56  ;;  %v4571_v34 = vld [vmem:[#allocation22 + $0x1710] sm:$0xff] }
0x15d6   :  { %11276 = vmatprep.subr.bf16.mxu1 %v13030_v31  ;;  %v4575_v56 = vld [vmem:[#allocation22 + $0x1730] sm:$0xff]  ;;  %v4572_v31 = vld [vmem:[#allocation22 + $0x1718] sm:$0xff] }
0x15d7   :  { %v13084_v45 = vcombine.high %v4571_v34, %v4575_v56  ;;  %v13083_v49 = vcombine.low %v4571_v34, %v4575_v56  ;;  %v13085_v25 = vcombine.low %v4572_v31, %v4576_v41  ;;  %v4624_v34 = vld [vmem:[#allocation22 + $0x18b8] sm:$0xff] }
0x15d8   :  { %10933 = vmatpush1.bf16.msra.mxu0 %v13027_v16  ;;  %v13086_v16 = vcombine.high %v4572_v31, %v4576_v41  ;;  %v13125_v31 = vcombine.low %v4612_v48, %v4616_v23 }
0x15d9   :  { %11277 = vmatpush1.bf16.msra.mxu1 %v13029_v24  ;;  %10934 = vmatprep.subr.bf16.mxu0 %v13036_v61  ;;  %v4579_v24 = vld [vmem:[#allocation22 + $0x1750] sm:$0xff] }
0x15da   :  { %11278 = vmatprep.subr.bf16.mxu1 %v13038_v15  ;;  %v4583_v61 = vld [vmem:[#allocation22 + $0x1770] sm:$0xff]  ;;  %v4580_v15 = vld [vmem:[#allocation22 + $0x1758] sm:$0xff] }
0x15db   :  { %v13092_v42 = vcombine.high %v4579_v24, %v4583_v61  ;;  %v13091_v44 = vcombine.low %v4579_v24, %v4583_v61  ;;  %v13093_v60 = vcombine.low %v4580_v15, %v4584_v22  ;;  %v4632_v24 = vld [vmem:[#allocation22 + $0x18f8] sm:$0xff] }
0x15dc   :  { %10935 = vmatpush1.bf16.msra.mxu0 %v13035_v27  ;;  %v13094_v27 = vcombine.high %v4580_v15, %v4584_v22 }
0x15dd   :  { %11279 = vmatpush1.bf16.msra.mxu1 %v13037_v17  ;;  %10936 = vmatprep.subr.bf16.mxu0 %v13044_v19  ;;  %v4587_v17 = vld [vmem:[#allocation22 + $0x1790] sm:$0xff] }
0x15de   :  { %11280 = vmatprep.subr.bf16.mxu1 %v13046_v50  ;;  %v4591_v19 = vld [vmem:[#allocation22 + $0x17b0] sm:$0xff]  ;;  %v4588_v50 = vld [vmem:[#allocation22 + $0x1798] sm:$0xff] }
0x15df   :  { %v13100_v38 = vcombine.high %v4587_v17, %v4591_v19  ;;  %v13099_v9 = vcombine.low %v4587_v17, %v4591_v19  ;;  %v13101_v13 = vcombine.low %v4588_v50, %v4592_v53 }
0x15e0   :  { %10937 = vmatpush1.bf16.msra.mxu0 %v13043_v6  ;;  %v13102_v6 = vcombine.high %v4588_v50, %v4592_v53  ;;  %v4643_v53 = vld [vmem:[#allocation22 + $0x1950] sm:$0xff] }
0x15e1   :  { %11281 = vmatpush1.bf16.msra.mxu1 %v13045_v3  ;;  %10938 = vmatprep.subr.bf16.mxu0 %v13052_v39  ;;  %v4595_v3 = vld [vmem:[#allocation22 + $0x17d0] sm:$0xff] }
0x15e2   :  { %11282 = vmatprep.subr.bf16.mxu1 %v13054_v11  ;;  %v4599_v39 = vld [vmem:[#allocation22 + $0x17f0] sm:$0xff]  ;;  %v4596_v11 = vld [vmem:[#allocation22 + $0x17d8] sm:$0xff] }
0x15e3   :  { %v13108_v4 = vcombine.high %v4595_v3, %v4599_v39  ;;  %v13107_v32 = vcombine.low %v4595_v3, %v4599_v39  ;;  %v13109_v2 = vcombine.low %v4596_v11, %v4600_v58 }
0x15e4   :  { %10939 = vmatpush1.bf16.msra.mxu0 %v13051_v57  ;;  %v13110_v57 = vcombine.high %v4596_v11, %v4600_v58  ;;  %v4651_v58 = vld [vmem:[#allocation22 + $0x1990] sm:$0xff] }
0x15e5   :  { %11283 = vmatpush1.bf16.msra.mxu1 %v13053_v8  ;;  %10940 = vmatprep.subr.bf16.mxu0 %v13060_v62  ;;  %v4603_v8 = vld [vmem:[#allocation22 + $0x1810] sm:$0xff] }
0x15e6   :  { %11284 = vmatprep.subr.bf16.mxu1 %v13062_v59  ;;  %v4607_v62 = vld [vmem:[#allocation22 + $0x1830] sm:$0xff]  ;;  %v4604_v59 = vld [vmem:[#allocation22 + $0x1818] sm:$0xff] }
0x15e7   :  { %v13116_v0 = vcombine.high %v4603_v8, %v4607_v62  ;;  %v13117_v52 = vcombine.low %v4604_v59, %v4608_v46 }
0x15e8   :  { %10941 = vmatpush1.bf16.msra.mxu0 %v13059_v33  ;;  %v13118_v33 = vcombine.high %v4604_v59, %v4608_v46  ;;  %v4659_v46 = vld [vmem:[#allocation22 + $0x19d0] sm:$0xff] }
0x15e9   :  { %11285 = vmatpush1.bf16.msra.mxu1 %v13061_v20  ;;  %10942 = vmatprep.subr.bf16.mxu0 %v13068_v36  ;;  %v4611_v20 = vld [vmem:[#allocation22 + $0x1850] sm:$0xff] }
0x15ea   :  { %11286 = vmatprep.subr.bf16.mxu1 %v13070_v51  ;;  %v4615_v36 = vld [vmem:[#allocation22 + $0x1870] sm:$0xff]  ;;  %v13115_v51 = vcombine.low %v4603_v8, %v4607_v62 }
0x15eb   :  { %v13124_v54 = vcombine.high %v4611_v20, %v4615_v36  ;;  %v13123_v56 = vcombine.low %v4611_v20, %v4615_v36 }
0x15ec   :  { %10943 = vmatpush1.bf16.msra.mxu0 %v13067_v55  ;;  %v4619_v55 = vld [vmem:[#allocation22 + $0x1890] sm:$0xff] }
0x15ed   :  { %11287 = vmatpush1.bf16.msra.mxu1 %v13069_v35  ;;  %10944 = vmatprep.subr.bf16.mxu0 %v13076_v29  ;;  %v4623_v35 = vld [vmem:[#allocation22 + $0x18b0] sm:$0xff]  ;;  %v13126_v29 = vcombine.high %v4612_v48, %v4616_v23 }
0x15ee   :  { %11288 = vmatprep.subr.bf16.mxu1 %v13078_v1  ;;  %v4620_v1 = vld [vmem:[#allocation22 + $0x1898] sm:$0xff]  ;;  %v13132_v41 = vcombine.high %v4619_v55, %v4623_v35  ;;  %v13131_v61 = vcombine.low %v4619_v55, %v4623_v35  ;;  %v4667_v48 = vld [vmem:[#allocation22 + $0x1a10] sm:$0xff] }
0x15ef   :  { %v4671_v23 = vld [vmem:[#allocation22 + $0x1a30] sm:$0xff] }
0x15f0   :  { %10945 = vmatpush1.bf16.msra.mxu0 %v13075_v30  ;;  %v13134_v30 = vcombine.high %v4620_v1, %v4624_v34 }
0x15f1   :  { %11289 = vmatpush1.bf16.msra.mxu1 %v13077_v12  ;;  %10946 = vmatprep.subr.bf16.mxu0 %v13084_v45  ;;  %v4627_v12 = vld [vmem:[#allocation22 + $0x18d0] sm:$0xff] }
0x15f2   :  { %11290 = vmatprep.subr.bf16.mxu1 %v13086_v16  ;;  %v4631_v45 = vld [vmem:[#allocation22 + $0x18f0] sm:$0xff]  ;;  %v4628_v16 = vld [vmem:[#allocation22 + $0x18d8] sm:$0xff] }
0x15f3   :  { %v13140_v15 = vcombine.high %v4627_v12, %v4631_v45  ;;  %v13142_v22 = vcombine.high %v4628_v16, %v4632_v24  ;;  %v13141_v17 = vcombine.low %v4628_v16, %v4632_v24  ;;  %v4683_v24 = vld [vmem:[#allocation22 + $0x1a90] sm:$0xff] }
0x15f4   :  { %10947 = vmatpush1.bf16.msra.mxu0 %v13083_v49  ;;  %v4635_v49 = vld [vmem:[#allocation22 + $0x1910] sm:$0xff] }
0x15f5   :  { %11291 = vmatpush1.bf16.msra.mxu1 %v13085_v25  ;;  %10948 = vmatprep.subr.bf16.mxu0 %v13092_v42  ;;  %v4639_v25 = vld [vmem:[#allocation22 + $0x1930] sm:$0xff]  ;;  %v4636_v42 = vld [vmem:[#allocation22 + $0x1918] sm:$0xff] }
0x15f6   :  { %11292 = vmatprep.subr.bf16.mxu1 %v13094_v27  ;;  %v4640_v27 = vld [vmem:[#allocation22 + $0x1938] sm:$0xff]  ;;  %v13148_v19 = vcombine.high %v4635_v49, %v4639_v25 }
0x15f7   :  { %v13150_v50 = vcombine.high %v4636_v42, %v4640_v27  ;;  %v13149_v3 = vcombine.low %v4636_v42, %v4640_v27  ;;  %v4691_v27 = vld [vmem:[#allocation22 + $0x1ad0] sm:$0xff] }
0x15f8   :  { %10949 = vmatpush1.bf16.msra.mxu0 %v13091_v44  ;;  %v4647_v44 = vld [vmem:[#allocation22 + $0x1970] sm:$0xff] }
0x15f9   :  { %11293 = vmatpush1.bf16.msra.mxu1 %v13093_v60  ;;  %10950 = vmatprep.subr.bf16.mxu0 %v13100_v38  ;;  %v4644_v60 = vld [vmem:[#allocation22 + $0x1958] sm:$0xff]  ;;  %v13156_v39 = vcombine.high %v4643_v53, %v4647_v44 }
0x15fa   :  { %11294 = vmatprep.subr.bf16.mxu1 %v13102_v6  ;;  %v4648_v38 = vld [vmem:[#allocation22 + $0x1978] sm:$0xff]  ;;  %v13147_v6 = vcombine.low %v4635_v49, %v4639_v25 }
0x15fb   :  { %v13158_v11 = vcombine.high %v4644_v60, %v4648_v38  ;;  %v13157_v8 = vcombine.low %v4644_v60, %v4648_v38  ;;  %v4699_v38 = vld [vmem:[#allocation22 + $0x1b10] sm:$0xff] }
0x15fc   :  { %10951 = vmatpush1.bf16.msra.mxu0 %v13099_v9  ;;  %v4655_v9 = vld [vmem:[#allocation22 + $0x19b0] sm:$0xff] }
0x15fd   :  { %11295 = vmatpush1.bf16.msra.mxu1 %v13101_v13  ;;  %10952 = vmatprep.subr.bf16.mxu0 %v13108_v4  ;;  %v4652_v13 = vld [vmem:[#allocation22 + $0x1998] sm:$0xff]  ;;  %v13164_v62 = vcombine.high %v4651_v58, %v4655_v9 }
0x15fe   :  { %11296 = vmatprep.subr.bf16.mxu1 %v13110_v57  ;;  %v4656_v4 = vld [vmem:[#allocation22 + $0x19b8] sm:$0xff]  ;;  %v13155_v57 = vcombine.low %v4643_v53, %v4647_v44 }
0x15ff   :  { %v13166_v59 = vcombine.high %v4652_v13, %v4656_v4  ;;  %v13165_v20 = vcombine.low %v4652_v13, %v4656_v4  ;;  %v4707_v4 = vld [vmem:[#allocation22 + $0x1b50] sm:$0xff] }
0x1600   :  { %10953 = vmatpush1.bf16.msra.mxu0 %v13107_v32  ;;  %v4663_v32 = vld [vmem:[#allocation22 + $0x19f0] sm:$0xff] }
0x1601   :  { %11297 = vmatpush1.bf16.msra.mxu1 %v13109_v2  ;;  %10965 = vmatprep.subr.bf16.mxu0 %v13116_v0  ;;  %v4660_v2 = vld [vmem:[#allocation22 + $0x19d8] sm:$0xff]  ;;  %v13172_v36 = vcombine.high %v4659_v46, %v4663_v32  ;;  %v13171_v55 = vcombine.low %v4659_v46, %v4663_v32 }
0x1602   :  { %11309 = vmatprep.subr.bf16.mxu1 %v13118_v33  ;;  %v4664_v0 = vld [vmem:[#allocation22 + $0x19f8] sm:$0xff]  ;;  %v13163_v33 = vcombine.low %v4651_v58, %v4655_v9 }
0x1603   :  { %10955 = vmatmul.mubr.bf16.vlgmr.msra.gmra.mrb[52].mxu0 %v16182_v47  ;;  %v13173_v35 = vcombine.low %v4660_v2, %v4664_v0 }
0x1604   :  { %11299 = vmatmul.mubr.bf16.vlgmr.msra.gmra.mrb[48].mxu1 %v16182_v47  ;;  %10966 = vmatpush1.bf16.msra.mxu0 %v13115_v51  ;;  %v13133_v47 = vcombine.low %v4620_v1, %v4624_v34  ;;  %v13174_v51 = vcombine.high %v4660_v2, %v4664_v0  ;;  %v4675_v34 = vld [vmem:[#allocation22 + $0x1a50] sm:$0xff] }
0x1605   :  { %10997 = vmatprep.mubr.bf16.mxu0 %v16204_v63  ;;  %11310 = vmatpush1.bf16.msra.mxu1 %v13117_v52  ;;  %v4668_v52 = vld [vmem:[#allocation22 + $0x1a18] sm:$0xff]  ;;  %v4715_v0 = vld [vmem:[#allocation22 + $0x1b90] sm:$0xff] }
0x1606   :  { %11341 = vmatprep.mubr.bf16.mxu1 %v16204_v63  ;;  %10967 = vmatprep.subr.bf16.mxu0 %v13124_v54  ;;  %v13139_v63 = vcombine.low %v4627_v12, %v4631_v45  ;;  %v4672_v54 = vld [vmem:[#allocation22 + $0x1a38] sm:$0xff] }
0x1607   :  { %11311 = vmatprep.subr.bf16.mxu1 %v13126_v29  ;;  %v13180_v29 = vcombine.high %v4667_v48, %v4671_v23  ;;  %v13182_v1 = vcombine.high %v4668_v52, %v4672_v54  ;;  %v13181_v12 = vcombine.low %v4668_v52, %v4672_v54  ;;  %v4723_v54 = vld [vmem:[#allocation22 + $0x1bd0] sm:$0xff] }
0x1608   :  { %10968 = vmatpush1.bf16.msra.mxu0 %v13123_v56  ;;  %v4679_v56 = vld [vmem:[#allocation22 + $0x1a70] sm:$0xff] }
0x1609   :  { %11312 = vmatpush1.bf16.msra.mxu1 %v13125_v31  ;;  %10969 = vmatprep.subr.bf16.mxu0 %v13132_v41  ;;  %v4676_v31 = vld [vmem:[#allocation22 + $0x1a58] sm:$0xff]  ;;  %v13188_v45 = vcombine.high %v4675_v34, %v4679_v56 }
0x160a   :  { %11313 = vmatprep.subr.bf16.mxu1 %v13134_v30  ;;  %v4680_v41 = vld [vmem:[#allocation22 + $0x1a78] sm:$0xff]  ;;  %v13179_v30 = vcombine.low %v4667_v48, %v4671_v23 }
0x160b   :  { %v13190_v16 = vcombine.high %v4676_v31, %v4680_v41  ;;  %v13189_v49 = vcombine.low %v4676_v31, %v4680_v41  ;;  %v4731_v41 = vld [vmem:[#allocation22 + $0x1c10] sm:$0xff] }
0x160c   :  { %10970 = vmatpush1.bf16.msra.mxu0 %v13131_v61  ;;  %v4687_v61 = vld [vmem:[#allocation22 + $0x1ab0] sm:$0xff] }
0x160d   :  { %11314 = vmatpush1.bf16.msra.mxu1 %v13133_v47  ;;  %10971 = vmatprep.subr.bf16.mxu0 %v13140_v15  ;;  %v4684_v47 = vld [vmem:[#allocation22 + $0x1a98] sm:$0xff]  ;;  %v13196_v25 = vcombine.high %v4683_v24, %v4687_v61 }
0x160e   :  { %11315 = vmatprep.subr.bf16.mxu1 %v13142_v22  ;;  %v4688_v15 = vld [vmem:[#allocation22 + $0x1ab8] sm:$0xff]  ;;  %v13187_v22 = vcombine.low %v4675_v34, %v4679_v56 }
0x160f   :  { %v13198_v42 = vcombine.high %v4684_v47, %v4688_v15  ;;  %v13197_v53 = vcombine.low %v4684_v47, %v4688_v15  ;;  %v4739_v15 = vld [vmem:[#allocation22 + $0x1c50] sm:$0xff] }
0x1610   :  { %10972 = vmatpush1.bf16.msra.mxu0 %v13139_v63  ;;  %v4695_v63 = vld [vmem:[#allocation22 + $0x1af0] sm:$0xff] }
0x1611   :  { %11316 = vmatpush1.bf16.msra.mxu1 %v13141_v17  ;;  %10973 = vmatprep.subr.bf16.mxu0 %v13148_v19  ;;  %v4692_v17 = vld [vmem:[#allocation22 + $0x1ad8] sm:$0xff]  ;;  %v13204_v44 = vcombine.high %v4691_v27, %v4695_v63 }
0x1612   :  { %11317 = vmatprep.subr.bf16.mxu1 %v13150_v50  ;;  %v4696_v19 = vld [vmem:[#allocation22 + $0x1af8] sm:$0xff]  ;;  %v13195_v50 = vcombine.low %v4683_v24, %v4687_v61 }
0x1613   :  { %v13206_v60 = vcombine.high %v4692_v17, %v4696_v19  ;;  %v13205_v58 = vcombine.low %v4692_v17, %v4696_v19  ;;  %v4747_v17 = vld [vmem:[#allocation22 + $0x1c90] sm:$0xff] }
0x1614   :  { %10974 = vmatpush1.bf16.msra.mxu0 %v13147_v6  ;;  %v4703_v6 = vld [vmem:[#allocation22 + $0x1b30] sm:$0xff] }
0x1615   :  { %11318 = vmatpush1.bf16.msra.mxu1 %v13149_v3  ;;  %10975 = vmatprep.subr.bf16.mxu0 %v13156_v39  ;;  %v4700_v3 = vld [vmem:[#allocation22 + $0x1b18] sm:$0xff]  ;;  %v13212_v9 = vcombine.high %v4699_v38, %v4703_v6  ;;  %v4751_v19 = vld [vmem:[#allocation22 + $0x1cb0] sm:$0xff] }
0x1616   :  { %11319 = vmatprep.subr.bf16.mxu1 %v13158_v11  ;;  %v4704_v39 = vld [vmem:[#allocation22 + $0x1b38] sm:$0xff]  ;;  %v13203_v11 = vcombine.low %v4691_v27, %v4695_v63 }
0x1617   :  { %v13214_v13 = vcombine.high %v4700_v3, %v4704_v39  ;;  %v13213_v46 = vcombine.low %v4700_v3, %v4704_v39  ;;  %v4755_v39 = vld [vmem:[#allocation22 + $0x1cd0] sm:$0xff] }
0x1618   :  { %10976 = vmatpush1.bf16.msra.mxu0 %v13155_v57  ;;  %v4711_v57 = vld [vmem:[#allocation22 + $0x1b70] sm:$0xff] }
0x1619   :  { %11320 = vmatpush1.bf16.msra.mxu1 %v13157_v8  ;;  %10977 = vmatprep.subr.bf16.mxu0 %v13164_v62  ;;  %v4708_v8 = vld [vmem:[#allocation22 + $0x1b58] sm:$0xff]  ;;  %v13220_v32 = vcombine.high %v4707_v4, %v4711_v57 }
0x161a   :  { %11321 = vmatprep.subr.bf16.mxu1 %v13166_v59  ;;  %v4712_v62 = vld [vmem:[#allocation22 + $0x1b78] sm:$0xff]  ;;  %v13211_v59 = vcombine.low %v4699_v38, %v4703_v6  ;;  %v13260_v6 = vcombine.high %v4747_v17, %v4751_v19 }
0x161b   :  { %v13222_v2 = vcombine.high %v4708_v8, %v4712_v62  ;;  %v13221_v48 = vcombine.low %v4708_v8, %v4712_v62  ;;  %v4763_v8 = vld [vmem:[#allocation22 + $0x1d10] sm:$0xff] }
0x161c   :  { %10978 = vmatpush1.bf16.msra.mxu0 %v13163_v33  ;;  %v4719_v33 = vld [vmem:[#allocation22 + $0x1bb0] sm:$0xff] }
0x161d   :  { %11322 = vmatpush1.bf16.msra.mxu1 %v13165_v20  ;;  %10979 = vmatprep.subr.bf16.mxu0 %v13172_v36  ;;  %v4716_v20 = vld [vmem:[#allocation22 + $0x1b98] sm:$0xff]  ;;  %v13228_v23 = vcombine.high %v4715_v0, %v4719_v33  ;;  %v4767_v62 = vld [vmem:[#allocation22 + $0x1d30] sm:$0xff] }
0x161e   :  { %11323 = vmatprep.subr.bf16.mxu1 %v13174_v51  ;;  %v4720_v36 = vld [vmem:[#allocation22 + $0x1bb8] sm:$0xff]  ;;  %v13219_v51 = vcombine.low %v4707_v4, %v4711_v57 }
0x161f   :  { %v13230_v52 = vcombine.high %v4716_v20, %v4720_v36  ;;  %v13229_v34 = vcombine.low %v4716_v20, %v4720_v36  ;;  %v4775_v20 = vld [vmem:[#allocation22 + $0x1d70] sm:$0xff]  ;;  %v4772_v36 = vld [vmem:[#allocation22 + $0x1d58] sm:$0xff] }
0x1620   :  { %10980 = vmatpush1.bf16.msra.mxu0 %v13171_v55  ;;  %v4727_v55 = vld [vmem:[#allocation22 + $0x1bf0] sm:$0xff] }
0x1621   :  { %11324 = vmatpush1.bf16.msra.mxu1 %v13173_v35  ;;  %10981 = vmatprep.subr.bf16.mxu0 %v13180_v29  ;;  %v4724_v35 = vld [vmem:[#allocation22 + $0x1bd8] sm:$0xff]  ;;  %v13236_v56 = vcombine.high %v4723_v54, %v4727_v55 }
0x1622   :  { %11325 = vmatprep.subr.bf16.mxu1 %v13182_v1  ;;  %v4728_v29 = vld [vmem:[#allocation22 + $0x1bf8] sm:$0xff]  ;;  %v13227_v1 = vcombine.low %v4715_v0, %v4719_v33  ;;  %v4771_v33 = vld [vmem:[#allocation22 + $0x1d50] sm:$0xff] }
0x1623   :  { %v13238_v31 = vcombine.high %v4724_v35, %v4728_v29  ;;  %v13237_v24 = vcombine.low %v4724_v35, %v4728_v29  ;;  %v4783_v35 = vld [vmem:[#allocation22 + $0x1db0] sm:$0xff]  ;;  %v4780_v29 = vld [vmem:[#allocation22 + $0x1d98] sm:$0xff] }
0x1624   :  { %10982 = vmatpush1.bf16.msra.mxu0 %v13179_v30  ;;  %v4735_v30 = vld [vmem:[#allocation22 + $0x1c30] sm:$0xff] }
0x1625   :  { %11326 = vmatpush1.bf16.msra.mxu1 %v13181_v12  ;;  %10983 = vmatprep.subr.bf16.mxu0 %v13188_v45  ;;  %v4732_v12 = vld [vmem:[#allocation22 + $0x1c18] sm:$0xff]  ;;  %v13244_v61 = vcombine.high %v4731_v41, %v4735_v30 }
0x1626   :  { %11327 = vmatprep.subr.bf16.mxu1 %v13190_v16  ;;  %v4736_v45 = vld [vmem:[#allocation22 + $0x1c38] sm:$0xff]  ;;  %v13235_v16 = vcombine.low %v4723_v54, %v4727_v55  ;;  %v4779_v55 = vld [vmem:[#allocation22 + $0x1d90] sm:$0xff] }
0x1627   :  { %v13246_v47 = vcombine.high %v4732_v12, %v4736_v45  ;;  %v13245_v27 = vcombine.low %v4732_v12, %v4736_v45  ;;  %v4791_v12 = vld [vmem:[#allocation22 + $0x1df0] sm:$0xff]  ;;  %v4788_v45 = vld [vmem:[#allocation22 + $0x1dd8] sm:$0xff] }
0x1628   :  { %10984 = vmatpush1.bf16.msra.mxu0 %v13187_v22  ;;  %v4743_v22 = vld [vmem:[#allocation22 + $0x1c70] sm:$0xff] }
0x1629   :  { %11328 = vmatpush1.bf16.msra.mxu1 %v13189_v49  ;;  %10985 = vmatprep.subr.bf16.mxu0 %v13196_v25  ;;  %v13243_v49 = vcombine.low %v4731_v41, %v4735_v30  ;;  %v4740_v25 = vld [vmem:[#allocation22 + $0x1c58] sm:$0xff]  ;;  %v13252_v63 = vcombine.high %v4739_v15, %v4743_v22  ;;  %v4787_v30 = vld [vmem:[#allocation22 + $0x1dd0] sm:$0xff] }
0x162a   :  { %11329 = vmatprep.subr.bf16.mxu1 %v13198_v42  ;;  %v4744_v42 = vld [vmem:[#allocation22 + $0x1c78] sm:$0xff] }
0x162b   :  { %v13253_v38 = vcombine.low %v4740_v25, %v4744_v42 }
0x162c   :  { %10986 = vmatpush1.bf16.msra.mxu0 %v13195_v50  ;;  %v13254_v50 = vcombine.high %v4740_v25, %v4744_v42  ;;  %v4796_v25 = vld [vmem:[#allocation22 + $0x1e18] sm:$0xff] }
0x162d   :  { %11330 = vmatpush1.bf16.msra.mxu1 %v13197_v53  ;;  %10987 = vmatprep.subr.bf16.mxu0 %v13204_v44  ;;  %v4748_v53 = vld [vmem:[#allocation22 + $0x1c98] sm:$0xff] }
0x162e   :  { %11331 = vmatprep.subr.bf16.mxu1 %v13206_v60  ;;  %v4752_v44 = vld [vmem:[#allocation22 + $0x1cb8] sm:$0xff]  ;;  %v13251_v60 = vcombine.low %v4739_v15, %v4743_v22  ;;  %v4795_v22 = vld [vmem:[#allocation22 + $0x1e10] sm:$0xff] }
0x162f   :  { %v13262_v3 = vcombine.high %v4748_v53, %v4752_v44  ;;  %v4800_v42 = vld [vmem:[#allocation22 + $0x1e38] sm:$0xff] }
0x1630   :  { %10988 = vmatpush1.bf16.msra.mxu0 %v13203_v11  ;;  %v4759_v11 = vld [vmem:[#allocation22 + $0x1cf0] sm:$0xff] }
0x1631   :  { %11332 = vmatpush1.bf16.msra.mxu1 %v13205_v58  ;;  %10989 = vmatprep.subr.bf16.mxu0 %v13212_v9  ;;  %v4756_v58 = vld [vmem:[#allocation22 + $0x1cd8] sm:$0xff]  ;;  %v13268_v4 = vcombine.high %v4755_v39, %v4759_v11 }
0x1632   :  { %11333 = vmatprep.subr.bf16.mxu1 %v13214_v13  ;;  %v4760_v9 = vld [vmem:[#allocation22 + $0x1cf8] sm:$0xff]  ;;  %v13259_v13 = vcombine.low %v4747_v17, %v4751_v19  ;;  %v13310_v19 = vcombine.high %v4796_v25, %v4800_v42 }
0x1633   :  { %v13270_v57 = vcombine.high %v4756_v58, %v4760_v9 }
0x1634   :  { %10990 = vmatpush1.bf16.msra.mxu0 %v13211_v59  ;;  %v4764_v59 = vld [vmem:[#allocation22 + $0x1d18] sm:$0xff] }
0x1635   :  { %11334 = vmatpush1.bf16.msra.mxu1 %v13213_v46  ;;  %10991 = vmatprep.subr.bf16.mxu0 %v13220_v32  ;;  %v4768_v46 = vld [vmem:[#allocation22 + $0x1d38] sm:$0xff]  ;;  %v13269_v32 = vcombine.low %v4756_v58, %v4760_v9  ;;  %v4815_v58 = vld [vmem:[#allocation22 + $0x1eb0] sm:$0xff] }
0x1636   :  { %11335 = vmatprep.subr.bf16.mxu1 %v13222_v2  ;;  %v13276_v2 = vcombine.high %v4763_v8, %v4767_v62  ;;  %v13278_v0 = vcombine.high %v4764_v59, %v4768_v46  ;;  %v4812_v9 = vld [vmem:[#allocation22 + $0x1e98] sm:$0xff] }
0x1638   :  { %10992 = vmatpush1.bf16.msra.mxu0 %v13219_v51  ;;  %v4776_v51 = vld [vmem:[#allocation22 + $0x1d78] sm:$0xff] }
0x1639   :  { %11336 = vmatpush1.bf16.msra.mxu1 %v13221_v48  ;;  %10993 = vmatprep.subr.bf16.mxu0 %v13228_v23  ;;  %v13275_v48 = vcombine.low %v4763_v8, %v4767_v62  ;;  %v13277_v23 = vcombine.low %v4764_v59, %v4768_v46  ;;  %v13286_v54 = vcombine.high %v4772_v36, %v4776_v51  ;;  %v4819_v62 = vld [vmem:[#allocation22 + $0x1ed0] sm:$0xff]  ;;  %v4820_v46 = vld [vmem:[#allocation22 + $0x1ed8] sm:$0xff] }
0x163a   :  { %11337 = vmatprep.subr.bf16.mxu1 %v13230_v52  ;;  %v13284_v52 = vcombine.high %v4771_v33, %v4775_v20  ;;  %v4823_v59 = vld [vmem:[#allocation22 + $0x1ef0] sm:$0xff] }
0x163c   :  { %10994 = vmatpush1.bf16.msra.mxu0 %v13227_v1  ;;  %v4784_v1 = vld [vmem:[#allocation22 + $0x1db8] sm:$0xff] }
0x163d   :  { %11338 = vmatpush1.bf16.msra.mxu1 %v13229_v34  ;;  %10995 = vmatprep.subr.bf16.mxu0 %v13236_v56  ;;  %v13283_v34 = vcombine.low %v4771_v33, %v4775_v20  ;;  %v13285_v56 = vcombine.low %v4772_v36, %v4776_v51  ;;  %v13294_v41 = vcombine.high %v4780_v29, %v4784_v1  ;;  %v4827_v20 = vld [vmem:[#allocation22 + $0x1f10] sm:$0xff]  ;;  %v4828_v51 = vld [vmem:[#allocation22 + $0x1f18] sm:$0xff] }
0x163e   :  { %11339 = vmatprep.subr.bf16.mxu1 %v13238_v31  ;;  %v13292_v31 = vcombine.high %v4779_v55, %v4783_v35  ;;  %v4831_v36 = vld [vmem:[#allocation22 + $0x1f30] sm:$0xff] }
0x1640   :  { %10996 = vmatpush1.bf16.msra.mxu0 %v13235_v16  ;;  %v4792_v16 = vld [vmem:[#allocation22 + $0x1df8] sm:$0xff] }
0x1641   :  { %11340 = vmatpush1.bf16.msra.mxu1 %v13237_v24  ;;  %11008 = vmatprep.subr.bf16.mxu0 %v13244_v61  ;;  %v13291_v24 = vcombine.low %v4779_v55, %v4783_v35  ;;  %v13293_v61 = vcombine.low %v4780_v29, %v4784_v1  ;;  %v13302_v15 = vcombine.high %v4788_v45, %v4792_v16  ;;  %v4835_v35 = vld [vmem:[#allocation22 + $0x1f50] sm:$0xff]  ;;  %v4836_v1 = vld [vmem:[#allocation22 + $0x1f58] sm:$0xff] }
0x1642   :  { %11352 = vmatprep.subr.bf16.mxu1 %v13246_v47  ;;  %v13300_v47 = vcombine.high %v4787_v30, %v4791_v12  ;;  %v4839_v29 = vld [vmem:[#allocation22 + $0x1f70] sm:$0xff] }
0x1643   :  { %10998 = vmatmul.mubr.bf16.vlgmr.msra.gmra.mrb[52].mxu0 %v16200_v14 }
0x1644   :  { %11342 = vmatmul.mubr.bf16.vlgmr.msra.gmra.mrb[48].mxu1 %v16200_v14  ;;  %11009 = vmatpush1.bf16.msra.mxu0 %v13243_v49  ;;  %v13261_v14 = vcombine.low %v4748_v53, %v4752_v44  ;;  %v4799_v49 = vld [vmem:[#allocation22 + $0x1e30] sm:$0xff]  ;;  %v4804_v44 = vld [vmem:[#allocation22 + $0x1e58] sm:$0xff] }
0x1645   :  { %11040 = vmatprep.mubr.bf16.mxu0 %v16206_v28  ;;  %11353 = vmatpush1.bf16.msra.mxu1 %v13245_v27  ;;  %v13299_v27 = vcombine.low %v4787_v30, %v4791_v12  ;;  %v13308_v17 = vcombine.high %v4795_v22, %v4799_v49  ;;  %v4807_v53 = vld [vmem:[#allocation22 + $0x1e70] sm:$0xff] }
0x1646   :  { %11384 = vmatprep.mubr.bf16.mxu1 %v16206_v28  ;;  %11010 = vmatprep.subr.bf16.mxu0 %v13252_v63  ;;  %v13267_v28 = vcombine.low %v4755_v39, %v4759_v11  ;;  %v13301_v63 = vcombine.low %v4788_v45, %v4792_v16  ;;  %v4811_v11 = vld [vmem:[#allocation22 + $0x1e90] sm:$0xff]  ;;  %v4844_v16 = vld [vmem:[#allocation22 + $0x1f98] sm:$0xff] }
0x1647   :  { %11354 = vmatprep.subr.bf16.mxu1 %v13254_v50  ;;  %v4803_v50 = vld [vmem:[#allocation22 + $0x1e50] sm:$0xff] }
0x1648   :  { %11011 = vmatpush1.bf16.msra.mxu0 %v13251_v60  ;;  %v4808_v60 = vld [vmem:[#allocation22 + $0x1e78] sm:$0xff]  ;;  %v4843_v12 = vld [vmem:[#allocation22 + $0x1f90] sm:$0xff] }
0x1649   :  { %11355 = vmatpush1.bf16.msra.mxu1 %v13253_v38  ;;  %11012 = vmatprep.subr.bf16.mxu0 %v13260_v6  ;;  %v13307_v38 = vcombine.low %v4795_v22, %v4799_v49  ;;  %v13309_v6 = vcombine.low %v4796_v25, %v4800_v42  ;;  %v13318_v39 = vcombine.high %v4804_v44, %v4808_v60  ;;  %v4847_v45 = vld [vmem:[#allocation22 + $0x1fb0] sm:$0xff]  ;;  %v4852_v42 = vld [vmem:[#allocation22 + $0x1fd8] sm:$0xff] }
0x164a   :  { %11356 = vmatprep.subr.bf16.mxu1 %v13262_v3  ;;  %v13316_v3 = vcombine.high %v4803_v50, %v4807_v53  ;;  %v4851_v49 = vld [vmem:[#allocation22 + $0x1fd0] sm:$0xff] }
0x164b   :  { %v4855_v25 = vld [vmem:[#allocation22 + $0x1ff0] sm:$0xff] }
0x164c   :  { %11013 = vmatpush1.bf16.msra.mxu0 %v13259_v13  ;;  %v4816_v13 = vld [vmem:[#allocation22 + $0x1eb8] sm:$0xff] }
0x164d   :  { %11357 = vmatpush1.bf16.msra.mxu1 %v13261_v14  ;;  %11014 = vmatprep.subr.bf16.mxu0 %v13268_v4  ;;  %v13315_v14 = vcombine.low %v4803_v50, %v4807_v53  ;;  %v13317_v4 = vcombine.low %v4804_v44, %v4808_v60  ;;  %v13326_v8 = vcombine.high %v4812_v9, %v4816_v13  ;;  %v14371_v60 = vld [vmem:[#allocation25 + $0x40] sm:$0xff]  }
0x164e   :  { %11358 = vmatprep.subr.bf16.mxu1 %v13270_v57  ;;  %v13324_v57 = vcombine.high %v4811_v11, %v4815_v58  ;;  %v13363_v53 = vcombine.low %v4851_v49, %v4855_v25 }
0x1650   :  { %11015 = vmatpush1.bf16.msra.mxu0 %v13267_v28  ;;  %v4824_v28 = vld [vmem:[#allocation22 + $0x1ef8] sm:$0xff] }
0x1651   :  { %11359 = vmatpush1.bf16.msra.mxu1 %v13269_v32  ;;  %11016 = vmatprep.subr.bf16.mxu0 %v13276_v2  ;;  %v13323_v32 = vcombine.low %v4811_v11, %v4815_v58  ;;  %v13325_v2 = vcombine.low %v4812_v9, %v4816_v13  ;;  %v13334_v33 = vcombine.high %v4820_v46, %v4824_v28  ;;  %v14376_v11 = vld [vmem:[#allocation25 + $0xc8] sm:$0xff]   ;;  %v14379_v13 = vld [vmem:[#allocation25 + $0x50] sm:$0xff]  }
0x1652   :  { %11360 = vmatprep.subr.bf16.mxu1 %v13278_v0  ;;  %v13332_v0 = vcombine.high %v4819_v62, %v4823_v59  ;;  %v14377_v58 = vld [vmem:[#allocation25 + $0x8] sm:$0xff]  }
0x1653   :  { %v14378_v9 = vld [vmem:[#allocation25 + $0x88] sm:$0xff]  }
0x1654   :  { %11017 = vmatpush1.bf16.msra.mxu0 %v13275_v48  ;;  %v4832_v48 = vld [vmem:[#allocation22 + $0x1f38] sm:$0xff] }
0x1655   :  { %11361 = vmatpush1.bf16.msra.mxu1 %v13277_v23  ;;  %11018 = vmatprep.subr.bf16.mxu0 %v13284_v52  ;;  %v13331_v23 = vcombine.low %v4819_v62, %v4823_v59  ;;  %v13333_v52 = vcombine.low %v4820_v46, %v4824_v28  ;;  %v13342_v55 = vcombine.high %v4828_v51, %v4832_v48  ;;  %v14385_v62 = vld [vmem:[#allocation25 + $0x18] sm:$0xff]   ;;  %v14387_v59 = vld [vmem:[#allocation25 + $0x60] sm:$0xff]  }
0x1656   :  { %11362 = vmatprep.subr.bf16.mxu1 %v13286_v54  ;;  %v13340_v54 = vcombine.high %v4827_v20, %v4831_v36  ;;  %v14388_v46 = vld [vmem:[#allocation25 + $0xe0] sm:$0xff]  }
0x1657   :  { %v14390_v28 = vld [vmem:[#allocation25 + $0xa0] sm:$0xff]  }
0x1658   :  { %11019 = vmatpush1.bf16.msra.mxu0 %v13283_v34  ;;  %v4840_v34 = vld [vmem:[#allocation22 + $0x1f78] sm:$0xff] }
0x1659   :  { %11363 = vmatpush1.bf16.msra.mxu1 %v13285_v56  ;;  %11020 = vmatprep.subr.bf16.mxu0 %v13292_v31  ;;  %v13339_v56 = vcombine.low %v4827_v20, %v4831_v36  ;;  %v13341_v31 = vcombine.low %v4828_v51, %v4832_v48  ;;  %v13350_v30 = vcombine.high %v4836_v1, %v4840_v34  ;;  %v14395_v20 = vld [vmem:[#allocation25 + $0x70] sm:$0xff]  }
0x165a   :  { %11364 = vmatprep.subr.bf16.mxu1 %v13294_v41  ;;  %v13348_v41 = vcombine.high %v4835_v35, %v4839_v29  ;;  %v14396_v36 = vld [vmem:[#allocation25 + $0xf0] sm:$0xff]  }
0x165b   :  { %v14397_v51 = vld [vmem:[#allocation25 + $0x30] sm:$0xff]  }
0x165c   :  { %11021 = vmatpush1.bf16.msra.mxu0 %v13291_v24  ;;  %v4848_v24 = vld [vmem:[#allocation22 + $0x1fb8] sm:$0xff] }
0x165d   :  { %11365 = vmatpush1.bf16.msra.mxu1 %v13293_v61  ;;  %11022 = vmatprep.subr.bf16.mxu0 %v13300_v47  ;;  %v13347_v61 = vcombine.low %v4835_v35, %v4839_v29  ;;  %v13349_v47 = vcombine.low %v4836_v1, %v4840_v34  ;;  %v13358_v22 = vcombine.high %v4844_v16, %v4848_v24  ;;  %v14398_v48 = vld [vmem:[#allocation25 + $0xb0] sm:$0xff]   ;;  %v14403_v35 = vld [vmem:[#allocation25 + $0x140] sm:$0xff]  }
0x165e   :  { %11366 = vmatprep.subr.bf16.mxu1 %v13302_v15  ;;  %v13356_v15 = vcombine.high %v4843_v12, %v4847_v45  ;;  %v14404_v29 = vld [vmem:[#allocation25 + $0x1c0] sm:$0xff]  }
0x165f   :  { %v14405_v1 = vld [vmem:[#allocation25 + $0x100] sm:$0xff]  }
0x1660   :  { %11023 = vmatpush1.bf16.msra.mxu0 %v13299_v27  ;;  %v4856_v27 = vld [vmem:[#allocation22 + $0x1ff8] sm:$0xff]  ;;  %v14406_v34 = vld [vmem:[#allocation25 + $0x180] sm:$0xff]  }
0x1661   :  { %11367 = vmatpush1.bf16.msra.mxu1 %v13301_v63  ;;  %11024 = vmatprep.subr.bf16.mxu0 %v13308_v17  ;;  %v13355_v63 = vcombine.low %v4843_v12, %v4847_v45  ;;  %v13357_v17 = vcombine.low %v4844_v16, %v4848_v24  ;;  %v13366_v50 = vcombine.high %v4852_v42, %v4856_v27  ;;  %v14411_v12 = vld [vmem:[#allocation25 + $0x150] sm:$0xff]  }
0x1662   :  { %11368 = vmatprep.subr.bf16.mxu1 %v13310_v19  ;;  %v13364_v19 = vcombine.high %v4851_v49, %v4855_v25  ;;  %v13365_v44 = vcombine.low %v4852_v42, %v4856_v27  ;;  %v14412_v45 = vld [vmem:[#allocation25 + $0x1d0] sm:$0xff]   ;;  %v14421_v49 = vld [vmem:[#allocation25 + $0x120] sm:$0xff]   ;;  %v14423_v42 = vld [vmem:[#allocation25 + $0x168] sm:$0xff]  }
0x1663   :  { %v14413_v16 = vld [vmem:[#allocation25 + $0x110] sm:$0xff]   ;;  %v14422_v25 = vld [vmem:[#allocation25 + $0x1a0] sm:$0xff]   ;;  %v14424_v27 = vld [vmem:[#allocation25 + $0x1e8] sm:$0xff]  }
0x1664   :  { %11025 = vmatpush1.bf16.msra.mxu0 %v13307_v38  ;;  %v14372_v38 = vld [vmem:[#allocation25 + $0xc0] sm:$0xff]   ;;  %v14414_v24 = vld [vmem:[#allocation25 + $0x190] sm:$0xff]  }
0x1665   :  { %11369 = vmatpush1.bf16.msra.mxu1 %v13309_v6  ;;  %11026 = vmatprep.subr.bf16.mxu0 %v13316_v3  ;;  %v14373_v6 = vld [vmem:[#allocation25] sm:$0xff]  }
0x1666   :  { %11370 = vmatprep.subr.bf16.mxu1 %v13318_v39  ;;  %v14374_v3 = vld [vmem:[#allocation25 + $0x80] sm:$0xff]   ;;  %v14375_v39 = vld [vmem:[#allocation25 + $0x48] sm:$0xff]  }
0x1668   :  { %11027 = vmatpush1.bf16.msra.mxu0 %v13315_v14  ;;  %v14380_v14 = vld [vmem:[#allocation25 + $0xd0] sm:$0xff]  }
0x1669   :  { %11371 = vmatpush1.bf16.msra.mxu1 %v13317_v4  ;;  %11028 = vmatprep.subr.bf16.mxu0 %v13324_v57  ;;  %v14381_v4 = vld [vmem:[#allocation25 + $0x10] sm:$0xff]  }
0x166a   :  { %11372 = vmatprep.subr.bf16.mxu1 %v13326_v8  ;;  %v14382_v57 = vld [vmem:[#allocation25 + $0x90] sm:$0xff]   ;;  %v14383_v8 = vld [vmem:[#allocation25 + $0x58] sm:$0xff]  }
0x166c   :  { %11029 = vmatpush1.bf16.msra.mxu0 %v13323_v32  ;;  %v14391_v32 = vld [vmem:[#allocation25 + $0x68] sm:$0xff]  }
0x166d   :  { %11373 = vmatpush1.bf16.msra.mxu1 %v13325_v2  ;;  %11030 = vmatprep.subr.bf16.mxu0 %v13332_v0  ;;  %v14392_v2 = vld [vmem:[#allocation25 + $0xe8] sm:$0xff]  }
0x166e   :  { %11374 = vmatprep.subr.bf16.mxu1 %v13334_v33  ;;  %v14393_v0 = vld [vmem:[#allocation25 + $0x28] sm:$0xff]  }
0x166f   :  { %v14394_v33 = vld [vmem:[#allocation25 + $0xa8] sm:$0xff]  }
0x1670   :  { %11031 = vmatpush1.bf16.msra.mxu0 %v13331_v23  ;;  %v14399_v23 = vld [vmem:[#allocation25 + $0x78] sm:$0xff]  }
0x1671   :  { %11375 = vmatpush1.bf16.msra.mxu1 %v13333_v52  ;;  %11032 = vmatprep.subr.bf16.mxu0 %v13340_v54  ;;  %v14400_v52 = vld [vmem:[#allocation25 + $0xf8] sm:$0xff]  }
0x1672   :  { %11376 = vmatprep.subr.bf16.mxu1 %v13342_v55  ;;  %v14401_v54 = vld [vmem:[#allocation25 + $0x38] sm:$0xff]  }
0x1673   :  { %v14402_v55 = vld [vmem:[#allocation25 + $0xb8] sm:$0xff]  }
0x1674   :  { %11033 = vmatpush1.bf16.msra.mxu0 %v13339_v56  ;;  %v14407_v56 = vld [vmem:[#allocation25 + $0x148] sm:$0xff]  }
0x1675   :  { %11377 = vmatpush1.bf16.msra.mxu1 %v13341_v31  ;;  %11034 = vmatprep.subr.bf16.mxu0 %v13348_v41  ;;  %v14408_v31 = vld [vmem:[#allocation25 + $0x1c8] sm:$0xff]  }
0x1676   :  { %11378 = vmatprep.subr.bf16.mxu1 %v13350_v30  ;;  %v14409_v41 = vld [vmem:[#allocation25 + $0x108] sm:$0xff]  }
0x1677   :  { %v14410_v30 = vld [vmem:[#allocation25 + $0x188] sm:$0xff]  }
0x1678   :  { %11035 = vmatpush1.bf16.msra.mxu0 %v13347_v61  ;;  %v14415_v61 = vld [vmem:[#allocation25 + $0x158] sm:$0xff]  }
0x1679   :  { %11379 = vmatpush1.bf16.msra.mxu1 %v13349_v47  ;;  %11036 = vmatprep.subr.bf16.mxu0 %v13356_v15  ;;  %v14416_v47 = vld [vmem:[#allocation25 + $0x1d8] sm:$0xff]   ;;  %v14419_v15 = vld [vmem:[#allocation25 + $0x160] sm:$0xff]  }
0x167a   :  { %11380 = vmatprep.subr.bf16.mxu1 %v13358_v22  ;;  %v14420_v22 = vld [vmem:[#allocation25 + $0x1e0] sm:$0xff]  }
0x167c   :  { %11037 = vmatpush1.bf16.msra.mxu0 %v13355_v63  ;;  %v14425_v63 = vld [vmem:[#allocation25 + $0x128] sm:$0xff]  }
0x167d   :  { %11381 = vmatpush1.bf16.msra.mxu1 %v13357_v17  ;;  %11038 = vmatprep.subr.bf16.mxu0 %v13364_v19  ;;  %v14426_v17 = vld [vmem:[#allocation25 + $0x1a8] sm:$0xff]   ;;  %v14427_v19 = vld [vmem:[#allocation25 + $0x170] sm:$0xff]  }
0x167e   :  { %11382 = vmatprep.subr.bf16.mxu1 %v13366_v50  ;;  %v14428_v50 = vld [vmem:[#allocation25 + $0x1f0] sm:$0xff]  }
0x1680   :  { %11039 = vmatpush1.bf16.msra.mxu0 %v13363_v53  ;;  %v14429_v53 = vld [vmem:[#allocation25 + $0x130] sm:$0xff]  }
0x1681   :  { %11383 = vmatpush1.bf16.msra.mxu1 %v13365_v44  ;;  %13711 = vmatprep.subr.bf16.mxu0 %v14371_v60  ;;  %v14430_v44 = vld [vmem:[#allocation25 + $0x1b0] sm:$0xff]   ;;  %v14431_v60 = vld [vmem:[#allocation25 + $0x178] sm:$0xff]  }
0x1682   :  { %13733 = vmatprep.subr.bf16.mxu1 %v14372_v38  ;;  %v14432_v38 = vld [vmem:[#allocation25 + $0x1f8] sm:$0xff]  }
0x1683   :  { %11041 = vmatmul.mubr.bf16.vlgmr.msra.gmra.mrb[52].mxu0 %v16202_v18 }
0x1684   :  { %11385 = vmatmul.mubr.bf16.vlgmr.msra.gmra.mrb[48].mxu1 %v16202_v18  ;;  %13712 = vmatpush3.bf16.msra.mxu0 %v14373_v6  ;;  %v14384_v18 = vld [vmem:[#allocation25 + $0xd8] sm:$0xff]  }
0x1685   :  { %11970 = vmatprep.mubr.bf16.mxu0 %v16252_v26  ;;  %13734 = vmatpush3.bf16.msra.mxu1 %v14374_v3  ;;  %v14386_v26 = vld [vmem:[#allocation25 + $0x98] sm:$0xff]  }
0x1686   :  { %12011 = vmatprep.mubr.bf16.mxu1 %v16254_v10  ;;  %13713 = vmatprep.subr.bf16.mxu0 %v14375_v39  ;;  %v14389_v10 = vld [vmem:[#allocation25 + $0x20] sm:$0xff]   ;;  %v14433_v6 = vld [vmem:[#allocation25 + $0x138] sm:$0xff]  }
0x1687   :  { %13735 = vmatprep.subr.bf16.mxu1 %v14376_v11  ;;  %v14434_v3 = vld [vmem:[#allocation25 + $0x1b8] sm:$0xff]  }
0x1688   :  { %13714 = vmatpush3.bf16.msra.mxu0 %v14377_v58  ;;  %v14483_v39 = vld [vmem:[#allocation23] sm:$0xff] }
0x1689   :  { %13736 = vmatpush3.bf16.msra.mxu1 %v14378_v9  ;;  %13715 = vmatprep.subr.bf16.mxu0 %v14379_v13  ;;  %v4878_v11 = vrot.slane %v14483_v39, %v16143_v7  ;;  %v4886_v58 = vrot.slane %v14483_v39, %v16146_v43  ;;  %v4882_v9 = vrot.slane %v14483_v39, %v16149_v5 }
0x168a   :  { %13737 = vmatprep.subr.bf16.mxu1 %v14380_v14  ;;  %v4890_v13 = vrot.slane %v14483_v39, %v16152_v40 }
0x168c   :  { %13716 = vmatpush3.bf16.msra.mxu0 %v14381_v4 }
0x168d   :  { %13738 = vmatpush3.bf16.msra.mxu1 %v14382_v57  ;;  %13717 = vmatprep.subr.bf16.mxu0 %v14383_v8 }
0x168e   :  { %13739 = vmatprep.subr.bf16.mxu1 %v14384_v18 }
0x1690   :  { %13718 = vmatpush3.bf16.msra.mxu0 %v14385_v62 }
0x1691   :  { %13740 = vmatpush3.bf16.msra.mxu1 %v14386_v26  ;;  %13719 = vmatprep.subr.bf16.mxu0 %v14387_v59 }
0x1692   :  { %13741 = vmatprep.subr.bf16.mxu1 %v14388_v46 }
0x1694   :  { %13720 = vmatpush3.bf16.msra.mxu0 %v14389_v10 }
0x1695   :  { %13742 = vmatpush3.bf16.msra.mxu1 %v14390_v28  ;;  %13721 = vmatprep.subr.bf16.mxu0 %v14391_v32 }
0x1696   :  { %13743 = vmatprep.subr.bf16.mxu1 %v14392_v2 }
0x1698   :  { %13722 = vmatpush3.bf16.msra.mxu0 %v14393_v0 }
0x1699   :  { %13744 = vmatpush3.bf16.msra.mxu1 %v14394_v33  ;;  %13723 = vmatprep.subr.bf16.mxu0 %v14395_v20 }
0x169a   :  { %13745 = vmatprep.subr.bf16.mxu1 %v14396_v36 }
0x169c   :  { %13724 = vmatpush3.bf16.msra.mxu0 %v14397_v51 }
0x169d   :  { %13746 = vmatpush3.bf16.msra.mxu1 %v14398_v48  ;;  %13725 = vmatprep.subr.bf16.mxu0 %v14399_v23 }
0x169e   :  { %13747 = vmatprep.subr.bf16.mxu1 %v14400_v52 }
0x16a0   :  { %13726 = vmatpush3.bf16.msra.mxu0 %v14401_v54 }
0x16a1   :  { %13748 = vmatpush3.bf16.msra.mxu1 %v14402_v55  ;;  %13755 = vmatprep.subr.bf16.mxu0 %v14403_v35 }
0x16a2   :  { %13777 = vmatprep.subr.bf16.mxu1 %v14404_v29 }
0x16a3   :  { %11971 = vmatmul.mubr.bf16.vlgmr.msra.gmra.mrb[56].mxu0 %v16248_v37  ;;  %v14417_v37 = vld [vmem:[#allocation25 + $0x118] sm:$0xff]  }
0x16a4   :  { %12012 = vmatmul.mubr.bf16.vlgmr.msra.gmra.mrb[52].mxu1 %v16250_v21  ;;  %13756 = vmatpush3.bf16.msra.mxu0 %v14405_v1  ;;  %v14418_v21 = vld [vmem:[#allocation25 + $0x198] sm:$0xff]  }
0x16a5   :  { %13778 = vmatpush3.bf16.msra.mxu1 %v14406_v34  ;;  %13757 = vmatprep.subr.bf16.mxu0 %v14407_v56  ;;  %v13367_v34 = vld [vmem:[#allocation26] ss:$0 sm:$0xff] }
0x16a6   :  { %13779 = vmatprep.subr.bf16.mxu1 %v14408_v31 }
0x16a8   :  { %13758 = vmatpush3.bf16.msra.mxu0 %v14409_v41 }
0x16a9   :  { %13780 = vmatpush3.bf16.msra.mxu1 %v14410_v30  ;;  %13759 = vmatprep.subr.bf16.mxu0 %v14411_v12 }
0x16aa   :  { %13781 = vmatprep.subr.bf16.mxu1 %v14412_v45 }
0x16ac   :  { %13760 = vmatpush3.bf16.msra.mxu0 %v14413_v16 }
0x16ad   :  { %13782 = vmatpush3.bf16.msra.mxu1 %v14414_v24  ;;  %13761 = vmatprep.subr.bf16.mxu0 %v14415_v61 }
0x16ae   :  { %13783 = vmatprep.subr.bf16.mxu1 %v14416_v47 }
0x16b0   :  { %13762 = vmatpush3.bf16.msra.mxu0 %v14417_v37 }
0x16b1   :  { %13784 = vmatpush3.bf16.msra.mxu1 %v14418_v21  ;;  %13763 = vmatprep.subr.bf16.mxu0 %v14419_v15 }
0x16b2   :  { %13785 = vmatprep.subr.bf16.mxu1 %v14420_v22 }
0x16b4   :  { %13764 = vmatpush3.bf16.msra.mxu0 %v14421_v49 }
0x16b5   :  { %13786 = vmatpush3.bf16.msra.mxu1 %v14422_v25  ;;  %13765 = vmatprep.subr.bf16.mxu0 %v14423_v42 }
0x16b6   :  { %13787 = vmatprep.subr.bf16.mxu1 %v14424_v27 }
0x16b8   :  { %13766 = vmatpush3.bf16.msra.mxu0 %v14425_v63 }
0x16b9   :  { %13788 = vmatpush3.bf16.msra.mxu1 %v14426_v17  ;;  %13767 = vmatprep.subr.bf16.mxu0 %v14427_v19 }
0x16ba   :  { %13789 = vmatprep.subr.bf16.mxu1 %v14428_v50 }
0x16bc   :  { %13768 = vmatpush3.bf16.msra.mxu0 %v14429_v53 }
0x16bd   :  { %13790 = vmatpush3.bf16.msra.mxu1 %v14430_v44  ;;  %13769 = vmatprep.subr.bf16.mxu0 %v14431_v60 }
0x16be   :  { %13791 = vmatprep.subr.bf16.mxu1 %v14432_v38 }
0x16c0   :  { %13770 = vmatpush3.bf16.msra.mxu0 %v14433_v6 }
0x16c1   :  { %13792 = vmatpush3.bf16.msra.mxu1 %v14434_v3 }
0x1756   :  { %v11042_v14 = vpop.f32.mrb[52].mxu0 }
0x1757   :  { %v14148_v4 = vadd.f32 %v11042_v14, %v4878_v11  ;;  %v11386_v57 = vpop.f32.mrb[48].mxu1  ;;  %v11044_v8 = vpop.f32.mrb[53].mxu0 }
0x1758   :  { %v14152_v18 = vadd.f32 %v11386_v57, %v4886_v58  ;;  %v14149_v62 = vadd.f32 %v11044_v8, %v4882_v9  ;;  %v11388_v26 = vpop.f32.mrb[49].mxu1  ;;  %v11046_v59 = vpop.f32.mrb[54].mxu0 }
0x1759   :  { %v14153_v46 = vadd.f32 %v11388_v26, %v4890_v13  ;;  %v14150_v10 = vadd.f32 %v11046_v59, %v4878_v11  ;;  %v11390_v28 = vpop.f32.mrb[50].mxu1  ;;  %v11048_v32 = vpop.f32.mrb[55].mxu0  ;;  %v11399_v43 = vmax.f32 %v14148_v4, 0.0 }
0x175a   :  { %v14154_v2 = vadd.f32 %v11390_v28, %v4886_v58  ;;  %v14151_v7 = vadd.f32 %v11048_v32, %v4882_v9  ;;  %v11392_v0 = vpop.f32.mrb[51].mxu1  ;;  %v11401_v20 = vmax.f32 %v14152_v18, 0.0  ;;  %v11400_v40 = vmax.f32 %v14149_v62, 0.0 }
0x175b   :  { %v11407_v33 = vmax.f32 %v14150_v10, 0.0  ;;  %v14155_v5 = vadd.f32 %v11392_v0, %v4890_v13  ;;  %v11402_v48 = vmax.f32 %v14153_v46, 0.0 }
0x175c   :  { %v11409_v36 = vmax.f32 %v14154_v2, 0.0  ;;  %v11408_v51 = vmax.f32 %v14151_v7, 0.0 }
0x175d   :  { %v11415_v23 = vpack.c.bf16 %v11407_v33, %v11399_v43  ;;  %v11410_v52 = vmax.f32 %v14155_v5, 0.0 }
0x175e   :  { %v11417_v54 = vpack.c.bf16 %v11409_v36, %v11401_v20  ;;  %v11416_v55 = vpack.c.bf16 %v11408_v51, %v11400_v40 }
0x175f   :  { %v11418_v35 = vpack.c.bf16 %v11410_v52, %v11402_v48 }
0x1760   :  { %12052 = vmatprep.mubr.bf16.mxu0 %v11416_v55 }
0x1761   :  { %12093 = vmatprep.mubr.bf16.mxu1 %v11418_v35  ;;  %12053 = vmatmul.mubr.bf16.vlgmr.msra.gmra.mrb[60].mxu0 %v11415_v23 }
0x1762   :  { %12094 = vmatmul.mubr.bf16.vlgmr.msra.gmra.mrb[56].mxu1 %v11417_v54 }
0x1776   :  { %v13727_v29 = vpop.f32.mrb[56].mxu0 }
0x1777   :  { %v13749_v1 = vpop.f32.mrb[52].mxu1  ;;  %v13728_v56 = vpop.f32.mrb[57].mxu0 }
0x1778   :  { %v13729_v31 = vadd.f32 %v13728_v56, %v13727_v29  ;;  %v13750_v41 = vpop.f32.mrb[53].mxu1  ;;  %v13730_v30 = vpop.f32.mrb[58].mxu0 }
0x1779   :  { %v13751_v12 = vadd.f32 %v13750_v41, %v13749_v1  ;;  %v13752_v45 = vpop.f32.mrb[54].mxu1  ;;  %v13731_v16 = vpop.f32.mrb[59].mxu0 }
0x177a   :  { %v11973_v24 = vadd.f32 %v13729_v31, %v13367_v34  ;;  %v13732_v61 = vadd.f32 %v13731_v16, %v13730_v30  ;;  %v13753_v47 = vpop.f32.mrb[55].mxu1 }
0x177b   :  { %v13754_v37 = vadd.f32 %v13753_v47, %v13752_v45 }
0x177c   :  { %v12014_v21 = vadd.f32 %v13751_v12, %v11973_v24  ;;  %v11976_v15 = vadd.f32 %v13732_v61, %v13367_v34 }
0x177e   :  { %v12017_v22 = vadd.f32 %v13754_v37, %v11976_v15 }
0x1834   :  { %v13771_v49 = vpop.f32.mrb[60].mxu0 }
0x1835   :  { %v13793_v25 = vpop.f32.mrb[56].mxu1  ;;  %v13772_v42 = vpop.f32.mrb[61].mxu0 }
0x1836   :  { %v13773_v27 = vadd.f32 %v13772_v42, %v13771_v49  ;;  %v13794_v63 = vpop.f32.mrb[57].mxu1  ;;  %v13774_v17 = vpop.f32.mrb[62].mxu0 }
0x1837   :  { %v13795_v19 = vadd.f32 %v13794_v63, %v13793_v25  ;;  %v13796_v50 = vpop.f32.mrb[58].mxu1  ;;  %v13775_v53 = vpop.f32.mrb[63].mxu0 }
0x1838   :  { %v12055_v44 = vadd.f32 %v13773_v27, %v12014_v21  ;;  %v13776_v60 = vadd.f32 %v13775_v53, %v13774_v17  ;;  %v13797_v38 = vpop.f32.mrb[59].mxu1 }
0x1839   :  { %v13798_v6 = vadd.f32 %v13797_v38, %v13796_v50 }
0x183a   :  { %v12096_v3 = vadd.f32 %v13795_v19, %v12055_v44  ;;  %v12058_v39 = vadd.f32 %v13776_v60, %v12017_v22 }
0x183c   :  { %12102 = vst [vmem:[#allocation28] sm:$0xff] %v12096_v3  ;;  %v12099_v11 = vadd.f32 %v13798_v6, %v12058_v39 }
0x183e   :  { %12103 = vst [vmem:[#allocation28 + $0x8] sm:$0xff] %v12099_v11 }
0x183f   :  { %14847 = shalt.err (!%p14844_p6)
}
0x1840   :  { %s16343_s4 = sld [smem:[#allocation47_spill]] }
0x1846   :  { %s14848_s14 = scalar_lea.hbm %s16343_s4, 256 }
0x1847   :  { %p14849_p7 = scmp.ne.s32.totalorder %s16343_s4, %s14848_s14  ;;  %p14852_p8 = scmp.lt.u32.totalorder %s14848_s14, %s16343_s4 }
0x1849   :  { %p14854_p9 = pnand %p14852_p8, %p14849_p7 }
0x184b   :  { %14857 = shalt.err (!%p14854_p9)
}
0x184c   :  { %12115 = dma.vmem_to_hbm [thread:$0]  %s12110_s22, 256, %s16343_s4, [#allocation4], %s14884_s20, %s14884_s20, %s14885_s1  }
0x184d   :  { %14876 = dma.done.wait [#allocation4], 256  }
0x184e   :  { %14877 = vsyncadd [#allocation4], 4294967040 }
0x184f   :  { %12119 = vsyncpa [#allocation3], 1 }
0x1850   :  { %12120 = vsyncpa [#allocation6], 1 }
0x1851   :  { %12121 = vsyncpa [#allocation9], 1 }
0x1852   :  { %12122 = vsyncpa [#allocation12], 1 }
0x1853   :  { %12123 = vsyncpa [#allocation15], 1 }
0x1854   :  { %12124 = vsyncpa [#allocation18], 1 }
0x1855   :  { %12125 = vsyncpa [#allocation21], 1 }
0x1856   :  { %12126 = vsyncpa [#allocation24], 1 }
0x1857   :  { %12127 = vsyncpa [#allocation27], 1 }
0x1858   :  { %12128 = vsyncpa [#allocation4], 1 }

</bundles_post_ra>
